<compile_context>
chip_gen: v5e
topology: v5e:2x2
jax: 0.10.0
libtpu: 0.0.40
codegen_flags: <defaults>
</compile_context>

<pallas_src>
import jax
import jax.numpy as jnp
from jax.experimental import pallas as pl
from jax.experimental.pallas import tpu as pltpu

# ----------------------------- model dims -----------------------------------
L_IN = 2400          # input sequence length implied by 29900 = 50 * 598
C1, C2 = 25, 50      # conv1 / conv2 output channels
C1P = 32             # conv1 channels zero-padded to a multiple of 8 (sublanes)
L_POOL1 = 1199       # floor((2400 - 2) / 2)      (h1 length, kept in-kernel)
L_POOL2 = 598        # floor((1199 - 2) / 2)
FLAT = C2 * L_POOL2  # 29900
H1, H2, H3 = 120, 84, 6

NQ = 600             # phase length: P[t, q] = x[4q + t], q in [0, 600)
NPHASE = 10          # taps t in [0, 10) cover conv1(3) o pool(2) o conv2(3) o pool(2)

TK = 7680            # MLP K tile: 4 tiles of 3.7 MB cover the padded 30720 K dim


# ------------------------------- kernels ------------------------------------

def _conv_fused_kernel(p_ref, wband_ref, b1_ref, w2s_ref, b2_ref, o_ref):
    """Fused conv1+relu+pool+conv2+relu+pool for a tile of `bt` samples.

    p_ref    : (bt, 10, 600)  phase matrix  P[b, t, q] = x[b, 4q + t]
    wband_ref: (256, 10)      banded conv1 weights (2 pool phases x 4 offsets x 32 ch)
    b1_ref   : (128, 1)       conv1 bias tiled over the 4 pooled offsets
    w2s_ref  : (50, 96)       conv2 weights stacked over (tap, padded channel)
    b2_ref   : (50, 1)        conv2 bias
    o_ref    : (bt, 50, 598)  channel-major pooled conv2 output (== torch flatten order)
    """
    wband = wband_ref[...]                                     # (256, 10)
    w2s = w2s_ref[...]                                         # (50, 96)
    # hoist bias broadcasts out of the per-sample loop
    b1 = jnp.broadcast_to(b1_ref[...], (4 * C1P, NQ))          # (128, 600)
    b2 = jnp.broadcast_to(b2_ref[...], (C2, NQ))               # (50, 600)

    bt = o_ref.shape[0]
    for b in range(bt):                                        # static unroll over batch tile
        pmat = p_ref[b]                                        # (10, 600)
        # conv1 at all 8 interleaved sub-positions in one MXU dot:
        #   c1[half*128 + m*32 + c, q] = sum_k w1[c,k] * x[4q + (2m+half) + k]
        c1 = jnp.dot(wband, pmat, preferred_element_type=jnp.float32)     # (256, 600)
        # fused bias + relu + maxpool(2) of conv1 (monotone ops commute with max):
        #   a[m*32 + c, q] = h1[c, 2q + m]
        a = jnp.maximum(jnp.maximum(c1[:128, :], c1[128:, :]) + b1, 0.0)  # (128, 600)
        # conv2 at even / odd positions as two K=96 dots over stacked taps,
        # then fused bias + relu + maxpool(2).  All slices are 32-row aligned.
        c2e = jnp.dot(w2s, a[0:96, :], preferred_element_type=jnp.float32)    # (50, 600)
        c2o = jnp.dot(w2s, a[32:128, :], preferred_element_type=jnp.float32)  # (50, 600)
        h2 = jnp.maximum(jnp.maximum(c2e, c2o) + b2, 0.0)                      # (50, 600)
        o_ref[b] = h2[:, :L_POOL2]                                             # (50, 598)


def _mlp_kernel(x_ref, w1_ref, b1_ref, w2_ref, b2_ref, w3_ref, b3_ref,
                o_ref, acc_ref):
    # grid = (batch_tiles, k_tiles); K is the inner ("arbitrary") reduction axis.
    k = pl.program_id(1)

    @pl.when(k == 0)
    def _():
        acc_ref[...] = jnp.zeros_like(acc_ref)

    acc_ref[...] += jnp.dot(x_ref[...], w1_ref[...],
                            preferred_element_type=jnp.float32)

    @pl.when(k == pl.num_programs(1) - 1)
    def _():
        z1 = jnp.maximum(acc_ref[...] + b1_ref[...], 0.0)
        z2 = jnp.maximum(
            jnp.dot(z1, w2_ref[...], preferred_element_type=jnp.float32)
            + b2_ref[...], 0.0)
        o_ref[...] = (jnp.dot(z2, w3_ref[...], preferred_element_type=jnp.float32)
                      + b3_ref[...])


# -------------------------- weight preparation -------------------------------

def prepare_kernel_params(p):
    """One-time re-layout of the PyTorch-style weights into kernel form."""
    # conv1: banded weight so conv1 over all 8 interleaved sub-positions is one dot.
    w1 = p["conv1_w"][:, 0, :]                            # (25, 3)
    w1p = jnp.pad(w1, ((0, C1P - C1), (0, 0)))            # (32, 3)
    wband = jnp.zeros((2, 4, C1P, NPHASE), jnp.float32)   # (half, m, c, t)
    for half in range(2):
        for m in range(4):
            s = 2 * m + half
            wband = wband.at[half, m, :, s:s + 3].set(w1p)
    wband = wband.reshape(2 * 4 * C1P, NPHASE)            # (256, 10)
    b1t = jnp.tile(jnp.pad(p["conv1_b"], (0, C1P - C1)), 4)[:, None]   # (128, 1)

    # conv2: stack the 3 taps along K (columns ordered k*32 + c), pad channels to 32.
    w2p = jnp.pad(p["conv2_w"], ((0, 0), (0, C1P - C1), (0, 0)))       # (50, 32, 3)
    w2s = jnp.transpose(w2p, (0, 2, 1)).reshape(C2, 3 * C1P)           # (50, 96)
    b2c = p["conv2_b"][:, None]                                        # (50, 1)

    # MLP: torch Linear weights are (out, in) -> transpose; pad l1's K to the tile grid.
    kpad = pl.cdiv(FLAT, TK) * TK
    l1_wt = jnp.pad(jnp.transpose(p["l1_w"]), ((0, kpad - FLAT), (0, 0)))  # (30720, 120)

    return {
        "wband": wband, "b1t": b1t, "w2s": w2s, "b2": b2c,
        "l1_wt": l1_wt, "l1_b": p["l1_b"][None, :],
        "l2_wt": jnp.transpose(p["l2_w"]), "l2_b": p["l2_b"][None, :],
        "l3_wt": jnp.transpose(p["l3_w"]), "l3_b": p["l3_b"][None, :],
    }


# ------------------------------- wrappers ------------------------------------

def conv_stage(x_ncl, kp):
    # x_ncl: (N, 1, 2400) -> fused conv pipeline -> (N, 50, 598) channel-major.
    n = x_ncl.shape[0]
    bt = n if n < 8 else 8                     # samples per grid step
    n_pad = pl.cdiv(n, bt) * bt
    xs = x_ncl.reshape(n, L_IN)
    xs = jnp.pad(xs, ((0, n_pad - n), (0, 8)))            # batch pad + 8-tap tail zeros
    # phase matrix P[b, t, q] = x[b, 4q + t]  (tiny wrapper prep: ~24 KB / sample)
    phases = jnp.stack([xs[:, t:t + 4 * NQ:4] for t in range(NPHASE)],
                       axis=1)                            # (n_pad, 10, 600)
    h2 = pl.pallas_call(
        _conv_fused_kernel,
        out_shape=jax.ShapeDtypeStruct((n_pad, C2, L_POOL2), jnp.float32),
        grid=(n_pad // bt,),
        in_specs=[
            pl.BlockSpec((bt, NPHASE, NQ), lambda i: (i, 0, 0)),
            pl.BlockSpec((2 * 4 * C1P, NPHASE), lambda i: (0, 0)),
            pl.BlockSpec((4 * C1P, 1), lambda i: (0, 0)),
            pl.BlockSpec((C2, 3 * C1P), lambda i: (0, 0)),
            pl.BlockSpec((C2, 1), lambda i: (0, 0)),
        ],
        out_specs=pl.BlockSpec((bt, C2, L_POOL2), lambda i: (i, 0, 0)),
        compiler_params=pltpu.CompilerParams(
            dimension_semantics=("parallel",),
            vmem_limit_bytes=32 * 1024 * 1024),
    )(phases, kp["wband"], kp["b1t"], kp["w2s"], kp["b2"])
    return h2[:n]


def mlp_stage(flat, kp):
    # flat: (N, 29900)  ->  (N, 6)
    n = flat.shape[0]
    kt = pl.cdiv(FLAT, TK)                     # 4 K tiles
    kpad = kt * TK                             # 30720
    bn = n if n < 128 else 128                 # batch tile (gives a parallel axis for N>bn)
    nb = pl.cdiv(n, bn)
    n_pad = nb * bn
    xp = jnp.pad(flat, ((0, n_pad - n), (0, kpad - FLAT)))
    out = pl.pallas_call(
        _mlp_kernel,
        out_shape=jax.ShapeDtypeStruct((n_pad, H3), jnp.float32),
        grid=(nb, kt),
        in_specs=[
            pl.BlockSpec((bn, TK), lambda i, k: (i, k)),
            pl.BlockSpec((TK, H1), lambda i, k: (k, 0)),
            pl.BlockSpec((1, H1), lambda i, k: (0, 0)),
            pl.BlockSpec((H1, H2), lambda i, k: (0, 0)),
            pl.BlockSpec((1, H2), lambda i, k: (0, 0)),
            pl.BlockSpec((H2, H3), lambda i, k: (0, 0)),
            pl.BlockSpec((1, H3), lambda i, k: (0, 0)),
        ],
        out_specs=pl.BlockSpec((bn, H3), lambda i, k: (i, 0)),
        scratch_shapes=[pltpu.VMEM((bn, H1), jnp.float32)],
        compiler_params=pltpu.CompilerParams(
            dimension_semantics=("parallel", "arbitrary"),
            vmem_limit_bytes=32 * 1024 * 1024),
    )(xp, kp["l1_wt"], kp["l1_b"], kp["l2_wt"], kp["l2_b"], kp["l3_wt"], kp["l3_b"])
    return out[:n]


@jax.jit
def forward(x, kp):
    h2 = conv_stage(x, kp)                     # (N, 50, 598) channel-major
    flat = h2.reshape(h2.shape[0], FLAT)       # free reshape == torch.flatten(x, 1)
    return mlp_stage(flat, kp)


# ------------------------ params & pure-JAX reference ------------------------

def init_params(key):
    ks = jax.random.split(key, 10)
    u = lambda k, shape, s: jax.random.uniform(k, shape, jnp.float32, -s, s)
    return {
        "conv1_w": u(ks[0], (C1, 1, 3), 0.2),
        "conv1_b": u(ks[1], (C1,), 0.2),
        "conv2_w": u(ks[2], (C2, C1, 3), 0.1),
        "conv2_b": u(ks[3], (C2,), 0.1),
        "l1_w": u(ks[4], (H1, FLAT), 0.01),
        "l1_b": u(ks[5], (H1,), 0.01),
        "l2_w": u(ks[6], (H2, H1), 0.05),
        "l2_b": u(ks[7], (H2,), 0.05),
        "l3_w": u(ks[8], (H3, H2), 0.05),
        "l3_b": u(ks[9], (H3,), 0.05),
    }


def reference_forward(x, p):
    xs = x[:, 0, :]                                                   # (N, 2400)
    c1 = sum(xs[:, None, k:k + L_IN - 2] * p["conv1_w"][None, :, 0, k, None]
             for k in range(3))
    c1 = jax.nn.relu(c1 + p["conv1_b"][None, :, None])                # (N, 25, 2398)
    h1 = c1.reshape(c1.shape[0], C1, L_POOL1, 2).max(axis=-1)         # (N, 25, 1199)
    c2 = sum(jnp.einsum("ncl,oc->nol", h1[:, :, k:k + 1197], p["conv2_w"][:, :, k])
             for k in range(3))
    c2 = jax.nn.relu(c2 + p["conv2_b"][None, :, None])                # (N, 50, 1197)
    h2 = c2[:, :, :2 * L_POOL2].reshape(c2.shape[0], C2, L_POOL2, 2).max(axis=-1)
    flat = h2.reshape(h2.shape[0], FLAT)
    z1 = jax.nn.relu(flat @ p["l1_w"].T + p["l1_b"])
    z2 = jax.nn.relu(z1 @ p["l2_w"].T + p["l2_b"])
    return z2 @ p["l3_w"].T + p["l3_b"]


if __name__ == "__main__":
    key = jax.random.PRNGKey(0)
    pkey, xkey = jax.random.split(key)
    params = init_params(pkey)
    kparams = prepare_kernel_params(params)    # one-time weight re-layout (not per call)

    N = 2
    x = jax.random.normal(xkey, (N, 1, L_IN), jnp.float32)   # NCL input like PyTorch

    out = jax.block_until_ready(forward(x, kparams))
    assert out.shape == (N, H3) and out.dtype == jnp.float32

    ref = reference_forward(x, params)
    err = float(jnp.max(jnp.abs(out - ref)))
    # f32 MXU accumulation-order differences vs. the XLA reference stay well
    # below this; any layout/ordering bug would show up as O(0.1+) errors.
    if not bool(jnp.allclose(out, ref, rtol=1e-2, atol=1e-2)):
        raise SystemExit(f"mismatch vs reference, max abs err={err}")

    print("KERNEL_OK")
</pallas_src>

<mosaic_0001>
module attributes {stable_mosaic.version = 11 : i64} {
  func.func @_conv_fused_kernel(%arg0: i32, %arg1: memref<2x10x600xf32, #tpu.memory_space<vmem>>, %arg2: memref<256x10xf32, #tpu.memory_space<vmem>>, %arg3: memref<128x1xf32, #tpu.memory_space<vmem>>, %arg4: memref<50x96xf32, #tpu.memory_space<vmem>>, %arg5: memref<50x1xf32, #tpu.memory_space<vmem>>, %arg6: memref<2x50x598xf32, #tpu.memory_space<vmem>>) attributes {dimension_semantics = [#tpu.dimension_semantics<parallel>], iteration_bounds = array<i64: 1>, scalar_prefetch = 0 : i64, scratch_operands = 0 : i64, tpu.core_type = #tpu.core_type<tc>, window_params = [{transform_indices = @transform_0, window_bounds = array<i64: 2, 10, 600>}, {pipeline_mode = #tpu.pipeline_mode<synchronous>, transform_indices = @transform_1, window_bounds = array<i64: 256, 10>}, {pipeline_mode = #tpu.pipeline_mode<synchronous>, transform_indices = @transform_2, window_bounds = array<i64: 128, 1>}, {pipeline_mode = #tpu.pipeline_mode<synchronous>, transform_indices = @transform_3, window_bounds = array<i64: 50, 96>}, {pipeline_mode = #tpu.pipeline_mode<synchronous>, transform_indices = @transform_4, window_bounds = array<i64: 50, 1>}, {transform_indices = @transform_5, window_bounds = array<i64: 2, 50, 598>}]} {
    %c0 = arith.constant 0 : index
    %c0_0 = arith.constant 0 : index
    %0 = vector.load %arg2[%c0, %c0_0] : memref<256x10xf32, #tpu.memory_space<vmem>>, vector<256x10xf32>
    %c0_1 = arith.constant 0 : index
    %c0_2 = arith.constant 0 : index
    %1 = vector.load %arg4[%c0_1, %c0_2] : memref<50x96xf32, #tpu.memory_space<vmem>>, vector<50x96xf32>
    %c0_3 = arith.constant 0 : index
    %c0_4 = arith.constant 0 : index
    %2 = vector.load %arg3[%c0_3, %c0_4] : memref<128x1xf32, #tpu.memory_space<vmem>>, vector<128x1xf32>
    %3 = vector.shape_cast %2 : vector<128x1xf32> to vector<128x1xf32>
    %4 = vector.broadcast %3 : vector<128x1xf32> to vector<128x600xf32>
    %c0_5 = arith.constant 0 : index
    %c0_6 = arith.constant 0 : index
    %5 = vector.load %arg5[%c0_5, %c0_6] : memref<50x1xf32, #tpu.memory_space<vmem>>, vector<50x1xf32>
    %6 = vector.shape_cast %5 : vector<50x1xf32> to vector<50x1xf32>
    %7 = vector.broadcast %6 : vector<50x1xf32> to vector<50x600xf32>
    %c0_7 = arith.constant 0 : index
    %c0_8 = arith.constant 0 : index
    %c0_9 = arith.constant 0 : index
    %8 = vector.load %arg1[%c0_7, %c0_8, %c0_9] : memref<2x10x600xf32, #tpu.memory_space<vmem>>, vector<1x10x600xf32>
    %9 = vector.shape_cast %8 : vector<1x10x600xf32> to vector<10x600xf32>
    %cst = arith.constant dense<0.000000e+00> : vector<256x600xf32>
    %10 = tpu.matmul %0, %9, %cst {dimension_numbers = #tpu.dot_dimension_numbers<[1], [0], [0], [1], [0, 0, 1, 1], [], []>} : vector<256x10xf32>, vector<10x600xf32>, vector<256x600xf32> -> vector<256x600xf32>
    %11 = vector.extract_strided_slice %10 {offsets = [0, 0], sizes = [128, 600], strides = [1, 1]} : vector<256x600xf32> to vector<128x600xf32>
    %12 = vector.extract_strided_slice %10 {offsets = [128, 0], sizes = [128, 600], strides = [1, 1]} : vector<256x600xf32> to vector<128x600xf32>
    %13 = arith.maximumf %11, %12 : vector<128x600xf32>
    %14 = arith.addf %13, %4 : vector<128x600xf32>
    %cst_10 = arith.constant 0.000000e+00 : f32
    %15 = vector.broadcast %cst_10 : f32 to vector<128x600xf32>
    %16 = arith.maximumf %14, %15 : vector<128x600xf32>
    %17 = vector.extract_strided_slice %16 {offsets = [0, 0], sizes = [96, 600], strides = [1, 1]} : vector<128x600xf32> to vector<96x600xf32>
    %cst_11 = arith.constant dense<0.000000e+00> : vector<50x600xf32>
    %18 = tpu.matmul %1, %17, %cst_11 {dimension_numbers = #tpu.dot_dimension_numbers<[1], [0], [0], [1], [0, 0, 1, 1], [], []>} : vector<50x96xf32>, vector<96x600xf32>, vector<50x600xf32> -> vector<50x600xf32>
    %19 = vector.extract_strided_slice %16 {offsets = [32, 0], sizes = [96, 600], strides = [1, 1]} : vector<128x600xf32> to vector<96x600xf32>
    %cst_12 = arith.constant dense<0.000000e+00> : vector<50x600xf32>
    %20 = tpu.matmul %1, %19, %cst_12 {dimension_numbers = #tpu.dot_dimension_numbers<[1], [0], [0], [1], [0, 0, 1, 1], [], []>} : vector<50x96xf32>, vector<96x600xf32>, vector<50x600xf32> -> vector<50x600xf32>
    %21 = arith.maximumf %18, %20 : vector<50x600xf32>
    %22 = arith.addf %21, %7 : vector<50x600xf32>
    %cst_13 = arith.constant 0.000000e+00 : f32
    %23 = vector.broadcast %cst_13 : f32 to vector<50x600xf32>
    %24 = arith.maximumf %22, %23 : vector<50x600xf32>
    %25 = vector.extract_strided_slice %24 {offsets = [0, 0], sizes = [50, 598], strides = [1, 1]} : vector<50x600xf32> to vector<50x598xf32>
    %c0_14 = arith.constant 0 : index
    %c0_15 = arith.constant 0 : index
    %c0_16 = arith.constant 0 : index
    %26 = vector.load %arg6[%c0_14, %c0_15, %c0_16] : memref<2x50x598xf32, #tpu.memory_space<vmem>>, vector<1x50x598xf32>
    %27 = vector.shape_cast %26 : vector<1x50x598xf32> to vector<50x598xf32>
    %28 = vector.shape_cast %25 : vector<50x598xf32> to vector<1x50x598xf32>
    tpu.vector_store %arg6[%c0_14, %c0_15, %c0_16], %28 {strides = array<i32>} : memref<2x50x598xf32, #tpu.memory_space<vmem>>, vector<1x50x598xf32>,
    %c1 = arith.constant 1 : index
    %c0_17 = arith.constant 0 : index
    %c0_18 = arith.constant 0 : index
    %29 = vector.load %arg1[%c1, %c0_17, %c0_18] : memref<2x10x600xf32, #tpu.memory_space<vmem>>, vector<1x10x600xf32>
    %30 = vector.shape_cast %29 : vector<1x10x600xf32> to vector<10x600xf32>
    %cst_19 = arith.constant dense<0.000000e+00> : vector<256x600xf32>
    %31 = tpu.matmul %0, %30, %cst_19 {dimension_numbers = #tpu.dot_dimension_numbers<[1], [0], [0], [1], [0, 0, 1, 1], [], []>} : vector<256x10xf32>, vector<10x600xf32>, vector<256x600xf32> -> vector<256x600xf32>
    %32 = vector.extract_strided_slice %31 {offsets = [0, 0], sizes = [128, 600], strides = [1, 1]} : vector<256x600xf32> to vector<128x600xf32>
    %33 = vector.extract_strided_slice %31 {offsets = [128, 0], sizes = [128, 600], strides = [1, 1]} : vector<256x600xf32> to vector<128x600xf32>
    %34 = arith.maximumf %32, %33 : vector<128x600xf32>
    %35 = arith.addf %34, %4 : vector<128x600xf32>
    %cst_20 = arith.constant 0.000000e+00 : f32
    %36 = vector.broadcast %cst_20 : f32 to vector<128x600xf32>
    %37 = arith.maximumf %35, %36 : vector<128x600xf32>
    %38 = vector.extract_strided_slice %37 {offsets = [0, 0], sizes = [96, 600], strides = [1, 1]} : vector<128x600xf32> to vector<96x600xf32>
    %cst_21 = arith.constant dense<0.000000e+00> : vector<50x600xf32>
    %39 = tpu.matmul %1, %38, %cst_21 {dimension_numbers = #tpu.dot_dimension_numbers<[1], [0], [0], [1], [0, 0, 1, 1], [], []>} : vector<50x96xf32>, vector<96x600xf32>, vector<50x600xf32> -> vector<50x600xf32>
    %40 = vector.extract_strided_slice %37 {offsets = [32, 0], sizes = [96, 600], strides = [1, 1]} : vector<128x600xf32> to vector<96x600xf32>
    %cst_22 = arith.constant dense<0.000000e+00> : vector<50x600xf32>
    %41 = tpu.matmul %1, %40, %cst_22 {dimension_numbers = #tpu.dot_dimension_numbers<[1], [0], [0], [1], [0, 0, 1, 1], [], []>} : vector<50x96xf32>, vector<96x600xf32>, vector<50x600xf32> -> vector<50x600xf32>
    %42 = arith.maximumf %39, %41 : vector<50x600xf32>
    %43 = arith.addf %42, %7 : vector<50x600xf32>
    %cst_23 = arith.constant 0.000000e+00 : f32
    %44 = vector.broadcast %cst_23 : f32 to vector<50x600xf32>
    %45 = arith.maximumf %43, %44 : vector<50x600xf32>
    %46 = vector.extract_strided_slice %45 {offsets = [0, 0], sizes = [50, 598], strides = [1, 1]} : vector<50x600xf32> to vector<50x598xf32>
    %c1_24 = arith.constant 1 : index
    %c0_25 = arith.constant 0 : index
    %c0_26 = arith.constant 0 : index
    %47 = vector.load %arg6[%c1_24, %c0_25, %c0_26] : memref<2x50x598xf32, #tpu.memory_space<vmem>>, vector<1x50x598xf32>
    %48 = vector.shape_cast %47 : vector<1x50x598xf32> to vector<50x598xf32>
    %49 = vector.shape_cast %46 : vector<50x598xf32> to vector<1x50x598xf32>
    tpu.vector_store %arg6[%c1_24, %c0_25, %c0_26], %49 {strides = array<i32>} : memref<2x50x598xf32, #tpu.memory_space<vmem>>, vector<1x50x598xf32>,
    return
  }
  func.func @transform_0(%arg0: i32) -> (i32, i32, i32) {
    %c0_i32 = arith.constant 0 : i32
    %c0_i32_0 = arith.constant 0 : i32
    %c0_i32_1 = arith.constant 0 : i32
    return %arg0, %c0_i32, %c0_i32_0 : i32, i32, i32
  }
  func.func @transform_1(%arg0: i32) -> (i32, i32) {
    %c0_i32 = arith.constant 0 : i32
    %c0_i32_0 = arith.constant 0 : i32
    %c0_i32_1 = arith.constant 0 : i32
    return %c0_i32, %c0_i32_0 : i32, i32
  }
  func.func @transform_2(%arg0: i32) -> (i32, i32) {
    %c0_i32 = arith.constant 0 : i32
    %c0_i32_0 = arith.constant 0 : i32
    %c0_i32_1 = arith.constant 0 : i32
    return %c0_i32, %c0_i32_0 : i32, i32
  }
  func.func @transform_3(%arg0: i32) -> (i32, i32) {
    %c0_i32 = arith.constant 0 : i32
    %c0_i32_0 = arith.constant 0 : i32
    %c0_i32_1 = arith.constant 0 : i32
    return %c0_i32, %c0_i32_0 : i32, i32
  }
  func.func @transform_4(%arg0: i32) -> (i32, i32) {
    %c0_i32 = arith.constant 0 : i32
    %c0_i32_0 = arith.constant 0 : i32
    %c0_i32_1 = arith.constant 0 : i32
    return %c0_i32, %c0_i32_0 : i32, i32
  }
  func.func @transform_5(%arg0: i32) -> (i32, i32, i32) {
    %c0_i32 = arith.constant 0 : i32
    %c0_i32_0 = arith.constant 0 : i32
    %c0_i32_1 = arith.constant 0 : i32
    return %arg0, %c0_i32, %c0_i32_0 : i32, i32, i32
  }
}

module attributes {stable_mosaic.version = 11 : i64} {
  func.func @_mlp_kernel(%arg0: i32, %arg1: i32, %arg2: memref<2x7680xf32, #tpu.memory_space<vmem>>, %arg3: memref<7680x120xf32, #tpu.memory_space<vmem>>, %arg4: memref<1x120xf32, #tpu.memory_space<vmem>>, %arg5: memref<120x84xf32, #tpu.memory_space<vmem>>, %arg6: memref<1x84xf32, #tpu.memory_space<vmem>>, %arg7: memref<84x6xf32, #tpu.memory_space<vmem>>, %arg8: memref<1x6xf32, #tpu.memory_space<vmem>>, %arg9: memref<2x6xf32, #tpu.memory_space<vmem>>, %arg10: memref<2x120xf32, #tpu.memory_space<vmem>>) attributes {dimension_semantics = [#tpu.dimension_semantics<parallel>, #tpu.dimension_semantics<arbitrary>], iteration_bounds = array<i64: 1, 4>, scalar_prefetch = 0 : i64, scratch_operands = 1 : i64, tpu.core_type = #tpu.core_type<tc>, window_params = [{transform_indices = @transform_0, window_bounds = array<i64: 2, 7680>}, {transform_indices = @transform_1, window_bounds = array<i64: 7680, 120>}, {pipeline_mode = #tpu.pipeline_mode<synchronous>, transform_indices = @transform_2, window_bounds = array<i64: 1, 120>}, {pipeline_mode = #tpu.pipeline_mode<synchronous>, transform_indices = @transform_3, window_bounds = array<i64: 120, 84>}, {pipeline_mode = #tpu.pipeline_mode<synchronous>, transform_indices = @transform_4, window_bounds = array<i64: 1, 84>}, {pipeline_mode = #tpu.pipeline_mode<synchronous>, transform_indices = @transform_5, window_bounds = array<i64: 84, 6>}, {pipeline_mode = #tpu.pipeline_mode<synchronous>, transform_indices = @transform_6, window_bounds = array<i64: 1, 6>}, {transform_indices = @transform_7, window_bounds = array<i64: 2, 6>}]} {
    %c0_i32 = arith.constant 0 : i32
    %0 = arith.cmpi eq, %arg1, %c0_i32 : i32
    %1 = arith.extui %0 : i1 to i32
    %c0_i32_0 = arith.constant 0 : i32
    %2 = arith.cmpi ne, %1, %c0_i32_0 : i32
    scf.if %2 {
      %cst_9 = arith.constant 0.000000e+00 : f32
      %12 = vector.broadcast %cst_9 : f32 to vector<2x120xf32>
      %c0_10 = arith.constant 0 : index
      %c0_11 = arith.constant 0 : index
      %13 = vector.load %arg10[%c0_10, %c0_11] : memref<2x120xf32, #tpu.memory_space<vmem>>, vector<2x120xf32>
      tpu.vector_store %arg10[%c0_10, %c0_11], %12 {strides = array<i32>} : memref<2x120xf32, #tpu.memory_space<vmem>>, vector<2x120xf32>,
    } else {
    }
    %c0 = arith.constant 0 : index
    %c0_1 = arith.constant 0 : index
    %3 = vector.load %arg10[%c0, %c0_1] : memref<2x120xf32, #tpu.memory_space<vmem>>, vector<2x120xf32>
    %c0_2 = arith.constant 0 : index
    %c0_3 = arith.constant 0 : index
    %4 = vector.load %arg2[%c0_2, %c0_3] : memref<2x7680xf32, #tpu.memory_space<vmem>>, vector<2x7680xf32>
    %c0_4 = arith.constant 0 : index
    %c0_5 = arith.constant 0 : index
    %5 = vector.load %arg3[%c0_4, %c0_5] : memref<7680x120xf32, #tpu.memory_space<vmem>>, vector<7680x120xf32>
    %cst = arith.constant dense<0.000000e+00> : vector<2x120xf32>
    %6 = tpu.matmul %4, %5, %cst {dimension_numbers = #tpu.dot_dimension_numbers<[1], [0], [0], [1], [0, 0, 1, 1], [], []>} : vector<2x7680xf32>, vector<7680x120xf32>, vector<2x120xf32> -> vector<2x120xf32>
    %7 = arith.addf %3, %6 : vector<2x120xf32>
    %c0_6 = arith.constant 0 : index
    %c0_7 = arith.constant 0 : index
    %8 = vector.load %arg10[%c0_6, %c0_7] : memref<2x120xf32, #tpu.memory_space<vmem>>, vector<2x120xf32>
    tpu.vector_store %arg10[%c0_6, %c0_7], %7 {strides = array<i32>} : memref<2x120xf32, #tpu.memory_space<vmem>>, vector<2x120xf32>,
    %c3_i32 = arith.constant 3 : i32
    %9 = arith.cmpi eq, %arg1, %c3_i32 : i32
    %10 = arith.extui %9 : i1 to i32
    %c0_i32_8 = arith.constant 0 : i32
    %11 = arith.cmpi ne, %10, %c0_i32_8 : i32
    scf.if %11 {
      %c0_9 = arith.constant 0 : index
      %c0_10 = arith.constant 0 : index
      %12 = vector.load %arg10[%c0_9, %c0_10] : memref<2x120xf32, #tpu.memory_space<vmem>>, vector<2x120xf32>
      %c0_11 = arith.constant 0 : index
      %c0_12 = arith.constant 0 : index
      %13 = vector.load %arg4[%c0_11, %c0_12] : memref<1x120xf32, #tpu.memory_space<vmem>>, vector<1x120xf32>
      %14 = vector.broadcast %13 : vector<1x120xf32> to vector<2x120xf32>
      %15 = arith.addf %12, %14 : vector<2x120xf32>
      %cst_13 = arith.constant 0.000000e+00 : f32
      %16 = vector.broadcast %cst_13 : f32 to vector<2x120xf32>
      %17 = arith.maximumf %15, %16 : vector<2x120xf32>
      %c0_14 = arith.constant 0 : index
      %c0_15 = arith.constant 0 : index
      %18 = vector.load %arg5[%c0_14, %c0_15] : memref<120x84xf32, #tpu.memory_space<vmem>>, vector<120x84xf32>
      %cst_16 = arith.constant dense<0.000000e+00> : vector<2x84xf32>
      %19 = tpu.matmul %17, %18, %cst_16 {dimension_numbers = #tpu.dot_dimension_numbers<[1], [0], [0], [1], [0, 0, 1, 1], [], []>} : vector<2x120xf32>, vector<120x84xf32>, vector<2x84xf32> -> vector<2x84xf32>
      %c0_17 = arith.constant 0 : index
      %c0_18 = arith.constant 0 : index
      %20 = vector.load %arg6[%c0_17, %c0_18] : memref<1x84xf32, #tpu.memory_space<vmem>>, vector<1x84xf32>
      %21 = vector.broadcast %20 : vector<1x84xf32> to vector<2x84xf32>
      %22 = arith.addf %19, %21 : vector<2x84xf32>
      %cst_19 = arith.constant 0.000000e+00 : f32
      %23 = vector.broadcast %cst_19 : f32 to vector<2x84xf32>
      %24 = arith.maximumf %22, %23 : vector<2x84xf32>
      %c0_20 = arith.constant 0 : index
      %c0_21 = arith.constant 0 : index
      %25 = vector.load %arg7[%c0_20, %c0_21] : memref<84x6xf32, #tpu.memory_space<vmem>>, vector<84x6xf32>
      %cst_22 = arith.constant dense<0.000000e+00> : vector<2x6xf32>
      %26 = tpu.matmul %24, %25, %cst_22 {dimension_numbers = #tpu.dot_dimension_numbers<[1], [0], [0], [1], [0, 0, 1, 1], [], []>} : vector<2x84xf32>, vector<84x6xf32>, vector<2x6xf32> -> vector<2x6xf32>
      %c0_23 = arith.constant 0 : index
      %c0_24 = arith.constant 0 : index
      %27 = vector.load %arg8[%c0_23, %c0_24] : memref<1x6xf32, #tpu.memory_space<vmem>>, vector<1x6xf32>
      %28 = vector.broadcast %27 : vector<1x6xf32> to vector<2x6xf32>
      %29 = arith.addf %26, %28 : vector<2x6xf32>
      %c0_25 = arith.constant 0 : index
      %c0_26 = arith.constant 0 : index
      %30 = vector.load %arg9[%c0_25, %c0_26] : memref<2x6xf32, #tpu.memory_space<vmem>>, vector<2x6xf32>
      tpu.vector_store %arg9[%c0_25, %c0_26], %29 {strides = array<i32>} : memref<2x6xf32, #tpu.memory_space<vmem>>, vector<2x6xf32>,
    } else {
    }
    return
  }
  func.func @transform_0(%arg0: i32, %arg1: i32) -> (i32, i32) {
    %c0_i32 = arith.constant 0 : i32
    return %arg0, %arg1 : i32, i32
  }
  func.func @transform_1(%arg0: i32, %arg1: i32) -> (i32, i32) {
    %c0_i32 = arith.constant 0 : i32
    %c0_i32_0 = arith.constant 0 : i32
    return %arg1, %c0_i32 : i32, i32
  }
  func.func @transform_2(%arg0: i32, %arg1: i32) -> (i32, i32) {
    %c0_i32 = arith.constant 0 : i32
    %c0_i32_0 = arith.constant 0 : i32
    %c0_i32_1 = arith.constant 0 : i32
    return %c0_i32, %c0_i32_0 : i32, i32
  }
  func.func @transform_3(%arg0: i32, %arg1: i32) -> (i32, i32) {
    %c0_i32 = arith.constant 0 : i32
    %c0_i32_0 = arith.constant 0 : i32
    %c0_i32_1 = arith.constant 0 : i32
    return %c0_i32, %c0_i32_0 : i32, i32
  }
  func.func @transform_4(%arg0: i32, %arg1: i32) -> (i32, i32) {
    %c0_i32 = arith.constant 0 : i32
    %c0_i32_0 = arith.constant 0 : i32
    %c0_i32_1 = arith.constant 0 : i32
    return %c0_i32, %c0_i32_0 : i32, i32
  }
  func.func @transform_5(%arg0: i32, %arg1: i32) -> (i32, i32) {
    %c0_i32 = arith.constant 0 : i32
    %c0_i32_0 = arith.constant 0 : i32
    %c0_i32_1 = arith.constant 0 : i32
    return %c0_i32, %c0_i32_0 : i32, i32
  }
  func.func @transform_6(%arg0: i32, %arg1: i32) -> (i32, i32) {
    %c0_i32 = arith.constant 0 : i32
    %c0_i32_0 = arith.constant 0 : i32
    %c0_i32_1 = arith.constant 0 : i32
    return %c0_i32, %c0_i32_0 : i32, i32
  }
  func.func @transform_7(%arg0: i32, %arg1: i32) -> (i32, i32) {
    %c0_i32 = arith.constant 0 : i32
    %c0_i32_0 = arith.constant 0 : i32
    return %arg0, %c0_i32 : i32, i32
  }
}

</mosaic_0001>

<bundles_post_ra>
// kernel: forward.2
= control target key start
LH: loop header
LB: loop body
LE: loop exit
PB: predicated region body
PF: predicated region fallthrough
CT: control target
= control target key end

     0   :  { %10 = vsyncpa [#allocation3], 0  ;;  %s3672_s21 = smov [#allocation2]   ;;  %s3673_s23 = smov 128   ;;  %s7171_s0 = inlined_call_operand.vmem [shape: f32[2,10,600], index: 0, kind: input, shape index: {}]   ;;  %s7172_s1 = inlined_call_operand.vmem [shape: f32[256,10], index: 1, kind: input, shape index: {}]   ;;  %s7173_s2 = inlined_call_operand.vmem [shape: f32[128,1], index: 2, kind: input, shape index: {}]   ;;  %s7174_s3 = inlined_call_operand.hbm [shape: f32[50,96], index: 3, kind: input, shape index: {}]   ;;  %s7175_s4 = inlined_call_operand.vmem [shape: f32[50,1], index: 4, kind: input, shape index: {}]   ;;  %s7176_s5 = inlined_call_operand.vmem [shape: f32[2,50,598], index: 5, kind: output, shape index: {}]  }
   0x1   :  { %s21_s20 = sshll.u32 %s7174_s3, 4  ;;  %s23_s22 = sshll.u32 %s3672_s21, 4  ;;  %s22_s20 = int_to_ptr.hbm [resolvable:$true] %s21_s20  ;;  %s24_s22 = int_to_ptr.vmem [resolvable:$true] %s23_s22 }
   0x2   :  { %s3674_s24 = smov 8  }
   0x3   :  { %29 = dma.hbm_to_vmem [thread:$0]  %s22_s20, 896, %s24_s22, [#allocation3], %s3673_s23, %s3673_s23, %s3674_s24  }
   0x4   :  { %3670 = dma.done.wait [#allocation3], 896  }
   0x5   :  { %3671 = vsyncadd [#allocation3], 4294966400  ;;  %vm320_vm0 = vcmask 1041408   ;;  %v218_v0 = vld [vmem:[%s7171_s0 + $0x28] sm:$0x3]  ;;  %v213_v2 = vld [vmem:[%s7171_s0] sm:$0xff] }
   0x6   :  { %v220_v1 = vld [vmem:[%s7171_s0 + $0x38] sm:$0x3]  ;;  %3042 = vmatpush.msk.msra.mxu0 %vm320_vm0, %v218_v0  ;;  %3557 = vmatpush.msk.msra.mxu1 %vm320_vm0, %v218_v0  ;;  %v215_v3 = vld [vmem:[%s7171_s0 + $0x10] sm:$0xff]  ;;  %v3728_v4 = vld [vmem:[%s7172_s1] sm:$0xff]  ;;  %vm223_vm1 = vcmask 80896   ;;  %v3675_v20 = vmov 0  }
   0x7   :  { %3108 = vmatpush.msk.msra.mxu2 %vm320_vm0, %v220_v1  ;;  %3559 = vmatpush.msk.msra.mxu3 %vm320_vm0, %v220_v1  ;;  %v3733_v5 = vld [vmem:[%s7172_s1 + $0xf0] sm:$0xff]  ;;  %v221_v7 = vld [vmem:[%s7171_s0 + $0x40] sm:$0x3]  ;;  %v214_v8 = vld [vmem:[%s7171_s0 + $0x8] sm:$0xff]  ;;  %vm1141_vm2 = vcmask 785408   ;;  %vm1652_vm3 = vcmask 703488  }
   0x8   :  { %351 = vmatpush.msra.mxu0 %v213_v2  ;;  %3558 = vmatpush.msra.mxu1 %v213_v2  ;;  %v219_v6 = vld [vmem:[%s7171_s0 + $0x30] sm:$0x3]  ;;  %v216_v9 = vld [vmem:[%s7171_s0 + $0x18] sm:$0xff]  ;;  %v3760_v10 = vld [vmem:[%s7172_s1 + $0x8] sm:$0xff]  ;;  %vm1683_vm4 = vcmask 697344  }
   0x9   :  { %577 = vmatpush.msra.mxu2 %v215_v3  ;;  %3560 = vmatpush.msra.mxu3 %v215_v3  ;;  %v3765_v11 = vld [vmem:[%s7172_s1 + $0xf8] sm:$0xff]  ;;  %v3778_v12 = vld [vmem:[%s7172_s1 + $0x10] sm:$0xff]  ;;  %v3804_v14 = vld [vmem:[%s7172_s1 + $0x20] sm:$0xff] }
   0xa   :  { %3043 = vmatmul.msk.f32.vlgmr.msra.gmra.mxu0 %vm223_vm1, %v3728_v4  ;;  %3073 = vmatmul.msk.f32.vlgmr.msra.gmra.mxu1 %vm223_vm1, %v3733_v5  ;;  %v3791_v13 = vld [vmem:[%s7172_s1 + $0x18] sm:$0xff]  ;;  %v3817_v15 = vld [vmem:[%s7172_s1 + $0x28] sm:$0xff]  ;;  %v3830_v16 = vld [vmem:[%s7172_s1 + $0x30] sm:$0xff] }
   0xb   :  { %3109 = vmatmul.msk.f32.vlgmr.msra.gmra.mxu2 %vm223_vm1, %v3728_v4  ;;  %3139 = vmatmul.msk.f32.vlgmr.msra.gmra.mxu3 %vm223_vm1, %v3733_v5  ;;  %v3843_v17 = vld [vmem:[%s7172_s1 + $0x38] sm:$0xff]  ;;  %v84_v18 = vld [vmem:[%s7173_s2 + $0x48] sm:$0xff]  ;;  %v3863_v21 = vld [vmem:[%s7172_s1 + $0x40] sm:$0xff] }
   0xc   :  { %3075 = vmatpush.msk.msrb.mxu1 %vm320_vm0, %v219_v6  ;;  %3141 = vmatpush.msk.msrb.mxu3 %vm320_vm0, %v221_v7  ;;  %v222_v19 = vld [vmem:[%s7171_s0 + $0x48] sm:$0x3]  ;;  %v86_v22 = vld [vmem:[%s7173_s2 + $0x58] sm:$0xff]  ;;  %v83_v23 = vld [vmem:[%s7173_s2 + $0x40] sm:$0xff] }
   0xd   :  { %3566 = vset.pattern.permute.xlu1 %v3675_v20  ;;  %3174 = vmatpush.msk.msrb.mxu0 %vm320_vm0, %v222_v19  ;;  %v3882_v24 = vld [vmem:[%s7172_s1 + $0x48] sm:$0xff]  ;;  %v85_v25 = vld [vmem:[%s7173_s2 + $0x50] sm:$0xff]  ;;  %v79_v26 = vld [vmem:[%s7173_s2 + $0x20] sm:$0xff] }
   0xe   :  { %464 = vmatpush.msrb.mxu1 %v214_v8  ;;  %690 = vmatpush.msrb.mxu3 %v216_v9  ;;  %v3901_v27 = vld [vmem:[%s7172_s1 + $0x50] sm:$0xff]  ;;  %v80_v28 = vld [vmem:[%s7173_s2 + $0x28] sm:$0xff]  ;;  %v3920_v30 = vld [vmem:[%s7172_s1 + $0x58] sm:$0xff] }
   0xf   :  { %138 = vperm.xlu1 %3566, %v84_v18   ;;  %3565 = vset.pattern.permute.xlu0 %v3675_v20  ;;  %v76_v29 = vld [vmem:[%s7173_s2 + $0x8] sm:$0xff]  ;;  %v77_v31 = vld [vmem:[%s7173_s2 + $0x10] sm:$0xff]  ;;  %v3939_v33 = vld [vmem:[%s7172_s1 + $0x60] sm:$0xff] }
  0x10   :  { %3567 = vset.pattern.permute.xlu2 %v3675_v20  ;;  %148 = vperm.xlu0 %3565, %v86_v22   ;;  %v89_v32 = vld [vmem:[%s7173_s2 + $0x70] sm:$0xff]  ;;  %v90_v34 = vld [vmem:[%s7173_s2 + $0x78] sm:$0xff]  ;;  %v3955_v35 = vld [vmem:[%s7172_s1 + $0x68] sm:$0xff] }
  0x11   :  { %v82_v36 = vld [vmem:[%s7173_s2 + $0x38] sm:$0xff]  ;;  %v3971_v37 = vld [vmem:[%s7172_s1 + $0x70] sm:$0xff]  ;;  %v4007_v43 = vld [vmem:[%s7172_s1 + $0x80] sm:$0xff] }
  0x12   :  { %3044 = vmatmul.msk.f32.gmra.mxu0 %vm223_vm1, %v3760_v10  ;;  %3074 = vmatmul.msk.f32.gmra.mxu1 %vm223_vm1, %v3765_v11  ;;  %v81_v38 = vld [vmem:[%s7173_s2 + $0x30] sm:$0xff]  ;;  %v3987_v39 = vld [vmem:[%s7172_s1 + $0x78] sm:$0xff]  ;;  %7355 = vst [vmem:[#allocation7_spill] sm:$0xff] %v4007_v43  ;;  %v75_v46 = vld [vmem:[%s7173_s2] sm:$0xff] }
  0x13   :  { %3110 = vmatmul.msk.f32.gmra.mxu2 %vm223_vm1, %v3760_v10  ;;  %3140 = vmatmul.msk.f32.gmra.mxu3 %vm223_vm1, %v3765_v11  ;;  %7353 = vst [vmem:[#allocation5_spill] sm:$0xff] %v3987_v39  ;;  %v78_v40 = vld [vmem:[%s7173_s2 + $0x18] sm:$0xff]  ;;  %v4031_v49 = vld [vmem:[%s7172_s1 + $0x88] sm:$0xff]  ;;  %v4052_v54 = vld [vmem:[%s7172_s1 + $0x90] sm:$0xff] }
  0x14   :  { %128 = vperm.xlu2 %3567, %v82_v36   ;;  %7357 = vst [vmem:[#allocation9_spill] sm:$0xff] %v4031_v49  ;;  %v4073_v59 = vld [vmem:[%s7172_s1 + $0x98] sm:$0xff]  ;;  %v4094_v0 = vld [vmem:[%s7172_s1 + $0xa0] sm:$0xff]  ;;  %v4115_v7 = vld [vmem:[%s7172_s1 + $0xa8] sm:$0xff] }
  0x15   :  { %7361 = vst [vmem:[#allocation13_spill] sm:$0xff] %v4052_v54  ;;  %v4136_v20 = vld [vmem:[%s7172_s1 + $0xb0] sm:$0xff] }
  0x16   :  { %7365 = vst [vmem:[#allocation17_spill] sm:$0xff] %v4073_v59 }
  0x17   :  { %133 = vperm.xlu1 %3566, %v83_v23   ;;  %7368 = vst [vmem:[#allocation20_spill] sm:$0xff] %v4094_v0 }
  0x18   :  { %143 = vperm.xlu0 %3565, %v85_v25   ;;  %7371 = vst [vmem:[#allocation23_spill] sm:$0xff] %v4115_v7 }
  0x19   :  { %7374 = vst [vmem:[#allocation26_spill] sm:$0xff] %v4136_v20 }
  0x1a   :  { %3045 = vmatmul.msk.f32.gmra.mxu0 %vm223_vm1, %v3778_v12  ;;  %3076 = vmatmul.msk.f32.vlgmr.msrb.gmra.mxu1 %vm223_vm1, %v3728_v4 }
  0x1b   :  { %3111 = vmatmul.msk.f32.gmra.mxu2 %vm223_vm1, %v3778_v12  ;;  %3142 = vmatmul.msk.f32.vlgmr.msrb.gmra.mxu3 %vm223_vm1, %v3728_v4 }
  0x1c   :  { %123 = vperm.xlu2 %3567, %v81_v38   ;;  %v4181_v38 = vld [vmem:[%s7172_s1 + $0xc0] sm:$0xff] }
  0x1d   :  { %7380 = vst [vmem:[#allocation32_spill] sm:$0xff] %v4181_v38 }
  0x1f   :  { %113 = vperm.xlu1 %3566, %v79_v26  }
  0x20   :  { %118 = vperm.xlu0 %3565, %v80_v28   ;;  %v4157_v28 = vld [vmem:[%s7172_s1 + $0xb8] sm:$0xff] }
  0x21   :  { %7377 = vst [vmem:[#allocation29_spill] sm:$0xff] %v4157_v28 }
  0x22   :  { %3046 = vmatmul.msk.f32.gmra.mxu0 %vm223_vm1, %v3791_v13  ;;  %3077 = vmatmul.msk.f32.gmra.mxu1 %vm223_vm1, %v3760_v10 }
  0x23   :  { %3112 = vmatmul.msk.f32.gmra.mxu2 %vm223_vm1, %v3791_v13  ;;  %3143 = vmatmul.msk.f32.gmra.mxu3 %vm223_vm1, %v3760_v10 }
  0x24   :  { %108 = vperm.xlu2 %3567, %v78_v40  }
  0x27   :  { %98 = vperm.xlu1 %3566, %v76_v29   ;;  %v217_v29 = vld [vmem:[%s7171_s0 + $0x20] sm:$0xff] }
  0x28   :  { %103 = vperm.xlu0 %3565, %v77_v31   ;;  %803 = vmatpush.msrb.mxu0 %v217_v29 }
  0x2a   :  { %3047 = vmatmul.msk.f32.gmra.mxu0 %vm223_vm1, %v3804_v14  ;;  %3078 = vmatmul.msk.f32.gmra.mxu1 %vm223_vm1, %v3778_v12 }
  0x2b   :  { %3113 = vmatmul.msk.f32.gmra.mxu2 %vm223_vm1, %v3804_v14  ;;  %3144 = vmatmul.msk.f32.gmra.mxu3 %vm223_vm1, %v3778_v12 }
  0x2c   :  { %93 = vperm.xlu2 %3567, %v75_v46  }
  0x2f   :  { %163 = vperm.xlu1 %3566, %v89_v32  }
  0x30   :  { %168 = vperm.xlu0 %3565, %v90_v34  }
  0x32   :  { %3048 = vmatmul.msk.f32.gmra.mxu0 %vm223_vm1, %v3817_v15  ;;  %3079 = vmatmul.msk.f32.gmra.mxu1 %vm223_vm1, %v3791_v13 }
  0x33   :  { %3114 = vmatmul.msk.f32.gmra.mxu2 %vm223_vm1, %v3817_v15  ;;  %3145 = vmatmul.msk.f32.gmra.mxu3 %vm223_vm1, %v3791_v13 }
  0x3a   :  { %3049 = vmatmul.msk.f32.gmra.mxu0 %vm223_vm1, %v3830_v16  ;;  %3080 = vmatmul.msk.f32.gmra.mxu1 %vm223_vm1, %v3804_v14 }
  0x3b   :  { %3115 = vmatmul.msk.f32.gmra.mxu2 %vm223_vm1, %v3830_v16  ;;  %3146 = vmatmul.msk.f32.gmra.mxu3 %vm223_vm1, %v3804_v14 }
  0x42   :  { %3050 = vmatmul.msk.f32.gmra.mxu0 %vm223_vm1, %v3843_v17  ;;  %3081 = vmatmul.msk.f32.gmra.mxu1 %vm223_vm1, %v3817_v15 }
  0x43   :  { %3116 = vmatmul.msk.f32.gmra.mxu2 %vm223_vm1, %v3843_v17  ;;  %3147 = vmatmul.msk.f32.gmra.mxu3 %vm223_vm1, %v3817_v15 }
  0x4a   :  { %3051 = vmatmul.msk.f32.gmra.mxu0 %vm223_vm1, %v3863_v21  ;;  %3082 = vmatmul.msk.f32.gmra.mxu1 %vm223_vm1, %v3830_v16 }
  0x4b   :  { %3117 = vmatmul.msk.f32.gmra.mxu2 %vm223_vm1, %v3863_v21  ;;  %3148 = vmatmul.msk.f32.gmra.mxu3 %vm223_vm1, %v3830_v16 }
  0x52   :  { %3052 = vmatmul.msk.f32.gmra.mxu0 %vm223_vm1, %v3882_v24  ;;  %3083 = vmatmul.msk.f32.gmra.mxu1 %vm223_vm1, %v3843_v17 }
  0x53   :  { %3118 = vmatmul.msk.f32.gmra.mxu2 %vm223_vm1, %v3882_v24  ;;  %3149 = vmatmul.msk.f32.gmra.mxu3 %vm223_vm1, %v3843_v17 }
  0x5a   :  { %3053 = vmatmul.msk.f32.gmra.mxu0 %vm223_vm1, %v3901_v27  ;;  %3084 = vmatmul.msk.f32.gmra.mxu1 %vm223_vm1, %v3863_v21 }
  0x5b   :  { %3119 = vmatmul.msk.f32.gmra.mxu2 %vm223_vm1, %v3901_v27  ;;  %3150 = vmatmul.msk.f32.gmra.mxu3 %vm223_vm1, %v3863_v21 }
  0x62   :  { %3054 = vmatmul.msk.f32.gmra.mxu0 %vm223_vm1, %v3920_v30  ;;  %3085 = vmatmul.msk.f32.gmra.mxu1 %vm223_vm1, %v3882_v24 }
  0x63   :  { %3120 = vmatmul.msk.f32.gmra.mxu2 %vm223_vm1, %v3920_v30  ;;  %3151 = vmatmul.msk.f32.gmra.mxu3 %vm223_vm1, %v3882_v24 }
  0x6a   :  { %3055 = vmatmul.msk.f32.gmra.mxu0 %vm223_vm1, %v3939_v33  ;;  %3086 = vmatmul.msk.f32.gmra.mxu1 %vm223_vm1, %v3901_v27 }
  0x6b   :  { %3121 = vmatmul.msk.f32.gmra.mxu2 %vm223_vm1, %v3939_v33  ;;  %3152 = vmatmul.msk.f32.gmra.mxu3 %vm223_vm1, %v3901_v27 }
  0x72   :  { %3056 = vmatmul.msk.f32.gmra.mxu0 %vm223_vm1, %v3955_v35  ;;  %3087 = vmatmul.msk.f32.gmra.mxu1 %vm223_vm1, %v3920_v30 }
  0x73   :  { %3122 = vmatmul.msk.f32.gmra.mxu2 %vm223_vm1, %v3955_v35  ;;  %3153 = vmatmul.msk.f32.gmra.mxu3 %vm223_vm1, %v3920_v30 }
  0x7a   :  { %3057 = vmatmul.msk.f32.gmra.mxu0 %vm223_vm1, %v3971_v37  ;;  %3088 = vmatmul.msk.f32.gmra.mxu1 %vm223_vm1, %v3939_v33 }
  0x7b   :  { %3123 = vmatmul.msk.f32.gmra.mxu2 %vm223_vm1, %v3971_v37  ;;  %3154 = vmatmul.msk.f32.gmra.mxu3 %vm223_vm1, %v3939_v33 }
  0x82   :  { %3058 = vmatmul.msk.f32.gmra.mxu0 %vm223_vm1, %v3987_v39  ;;  %3089 = vmatmul.msk.f32.gmra.mxu1 %vm223_vm1, %v3955_v35 }
  0x83   :  { %3124 = vmatmul.msk.f32.gmra.mxu2 %vm223_vm1, %v3987_v39  ;;  %3155 = vmatmul.msk.f32.gmra.mxu3 %vm223_vm1, %v3955_v35 }
  0x87   :  { %v4000_v41 = vpop.f32.mrf.mxu0  ;;  %v4002_v42 = vpop.f32.mrf.mxu1 }
  0x88   :  { %7354 = vst [vmem:[#allocation6_spill] sm:$0xff] %v4002_v42 }
  0x8a   :  { %3059 = vmatmul.msk.f32.gmra.mxu0 %vm223_vm1, %v4007_v43  ;;  %3090 = vmatmul.msk.f32.gmra.mxu1 %vm223_vm1, %v3971_v37 }
  0x8b   :  { %3125 = vmatmul.msk.f32.gmra.mxu2 %vm223_vm1, %v4007_v43  ;;  %3156 = vmatmul.msk.f32.gmra.mxu3 %vm223_vm1, %v3971_v37 }
  0x8e   :  { %v4017_v44 = vpop.f32.mrf.mxu2  ;;  %v4019_v45 = vpop.f32.mrf.mxu3 }
  0x8f   :  { %7356 = vst [vmem:[#allocation8_spill] sm:$0xff] %v4019_v45  ;;  %v4024_v47 = vpop.f32.mrf.mxu0  ;;  %v4026_v48 = vpop.f32.mrf.mxu1 }
  0x92   :  { %3060 = vmatmul.msk.f32.gmra.mxu0 %vm223_vm1, %v4031_v49  ;;  %3091 = vmatmul.msk.f32.gmra.mxu1 %vm223_vm1, %v3987_v39 }
  0x93   :  { %3126 = vmatmul.msk.f32.gmra.mxu2 %vm223_vm1, %v4031_v49  ;;  %3157 = vmatmul.msk.f32.gmra.mxu3 %vm223_vm1, %v3987_v39 }
  0x96   :  { %v4041_v50 = vpop.f32.mrf.mxu2  ;;  %v4043_v51 = vpop.f32.mrf.mxu3 }
  0x97   :  { %7358 = vst [vmem:[#allocation10_spill] sm:$0xff] %v4041_v50  ;;  %v4045_v52 = vpop.f32.mrf.mxu0  ;;  %v4047_v53 = vpop.f32.mrf.mxu1 }
  0x98   :  { %7359 = vst [vmem:[#allocation11_spill] sm:$0xff] %v4043_v51  ;;  %v4202_v51 = vld [vmem:[%s7172_s1 + $0xc8] sm:$0xff] }
  0x99   :  { %7360 = vst [vmem:[#allocation12_spill] sm:$0xff] %v4047_v53 }
  0x9a   :  { %3061 = vmatmul.msk.f32.gmra.mxu0 %vm223_vm1, %v4052_v54  ;;  %3092 = vmatmul.msk.f32.gmra.mxu1 %vm223_vm1, %v4007_v43  ;;  %7383 = vst [vmem:[#allocation35_spill] sm:$0xff] %v4202_v51 }
  0x9b   :  { %3127 = vmatmul.msk.f32.gmra.mxu2 %vm223_vm1, %v4052_v54  ;;  %3158 = vmatmul.msk.f32.gmra.mxu3 %vm223_vm1, %v4007_v43 }
  0x9e   :  { %v4062_v55 = vpop.f32.mrf.mxu2  ;;  %v4064_v56 = vpop.f32.mrf.mxu3 }
  0x9f   :  { %7362 = vst [vmem:[#allocation14_spill] sm:$0xff] %v4062_v55  ;;  %v4066_v57 = vpop.f32.mrf.mxu0  ;;  %v4068_v58 = vpop.f32.mrf.mxu1 }
  0xa0   :  { %7363 = vst [vmem:[#allocation15_spill] sm:$0xff] %v4064_v56 }
  0xa1   :  { %7364 = vst [vmem:[#allocation16_spill] sm:$0xff] %v4068_v58  ;;  %v4268_v58 = vld [vmem:[%s7172_s1 + $0xe0] sm:$0xff] }
  0xa2   :  { %3062 = vmatmul.msk.f32.gmra.mxu0 %vm223_vm1, %v4073_v59  ;;  %3093 = vmatmul.msk.f32.gmra.mxu1 %vm223_vm1, %v4031_v49  ;;  %7391 = vst [vmem:[#allocation43_spill] sm:$0xff] %v4268_v58 }
  0xa3   :  { %3128 = vmatmul.msk.f32.gmra.mxu2 %vm223_vm1, %v4073_v59  ;;  %3159 = vmatmul.msk.f32.gmra.mxu3 %vm223_vm1, %v4031_v49 }
  0xa6   :  { %v4083_v60 = vpop.f32.mrf.mxu2  ;;  %v4085_v61 = vpop.f32.mrf.mxu3 }
  0xa7   :  { %7366 = vst [vmem:[#allocation18_spill] sm:$0xff] %v4085_v61  ;;  %v4087_v62 = vpop.f32.mrf.mxu0  ;;  %v4089_v63 = vpop.f32.mrf.mxu1 }
  0xa8   :  { %7367 = vst [vmem:[#allocation19_spill] sm:$0xff] %v4089_v63 }
  0xaa   :  { %3063 = vmatmul.msk.f32.gmra.mxu0 %vm223_vm1, %v4094_v0  ;;  %3094 = vmatmul.msk.f32.gmra.mxu1 %vm223_vm1, %v4052_v54 }
  0xab   :  { %3129 = vmatmul.msk.f32.gmra.mxu2 %vm223_vm1, %v4094_v0  ;;  %3160 = vmatmul.msk.f32.gmra.mxu3 %vm223_vm1, %v4052_v54  ;;  %v4226_v54 = vld [vmem:[%s7172_s1 + $0xd0] sm:$0xff] }
  0xac   :  { %7386 = vst [vmem:[#allocation38_spill] sm:$0xff] %v4226_v54 }
  0xae   :  { %v4104_v1 = vpop.f32.mrf.mxu2  ;;  %v4106_v2 = vpop.f32.mrf.mxu3 }
  0xaf   :  { %7369 = vst [vmem:[#allocation21_spill] sm:$0xff] %v4106_v2  ;;  %v4108_v3 = vpop.f32.mrf.mxu0  ;;  %v4110_v6 = vpop.f32.mrf.mxu1 }
  0xb0   :  { %7370 = vst [vmem:[#allocation22_spill] sm:$0xff] %v4110_v6 }
  0xb2   :  { %3064 = vmatmul.msk.f32.gmra.mxu0 %vm223_vm1, %v4115_v7  ;;  %3095 = vmatmul.msk.f32.gmra.mxu1 %vm223_vm1, %v4073_v59 }
  0xb3   :  { %3130 = vmatmul.msk.f32.gmra.mxu2 %vm223_vm1, %v4115_v7  ;;  %3161 = vmatmul.msk.f32.gmra.mxu3 %vm223_vm1, %v4073_v59 }
  0xb6   :  { %v4125_v8 = vpop.f32.mrf.mxu2  ;;  %v4127_v9 = vpop.f32.mrf.mxu3 }
  0xb7   :  { %7372 = vst [vmem:[#allocation24_spill] sm:$0xff] %v4127_v9  ;;  %v4129_v18 = vpop.f32.mrf.mxu0  ;;  %v4131_v19 = vpop.f32.mrf.mxu1 }
  0xb8   :  { %7373 = vst [vmem:[#allocation25_spill] sm:$0xff] %v4131_v19 }
  0xba   :  { %3065 = vmatmul.msk.f32.gmra.mxu0 %vm223_vm1, %v4136_v20  ;;  %3096 = vmatmul.msk.f32.gmra.mxu1 %vm223_vm1, %v4094_v0 }
  0xbb   :  { %3131 = vmatmul.msk.f32.gmra.mxu2 %vm223_vm1, %v4136_v20  ;;  %3162 = vmatmul.msk.f32.gmra.mxu3 %vm223_vm1, %v4094_v0  ;;  %v87_v0 = vld [vmem:[%s7173_s2 + $0x60] sm:$0xff] }
  0xbc   :  { %153 = vperm.xlu0 %3565, %v87_v0   ;;  %v4247_v0 = vld [vmem:[%s7172_s1 + $0xd8] sm:$0xff] }
  0xbd   :  { %7388 = vst [vmem:[#allocation40_spill] sm:$0xff] %v4247_v0 }
  0xbe   :  { %v4146_v22 = vpop.f32.mrf.mxu2  ;;  %v4148_v23 = vpop.f32.mrf.mxu3 }
  0xbf   :  { %7375 = vst [vmem:[#allocation27_spill] sm:$0xff] %v4148_v23  ;;  %v4150_v25 = vpop.f32.mrf.mxu0  ;;  %v4152_v26 = vpop.f32.mrf.mxu1 }
  0xc0   :  { %7376 = vst [vmem:[#allocation28_spill] sm:$0xff] %v4152_v26 }
  0xc2   :  { %3066 = vmatmul.msk.f32.gmra.mxu0 %vm223_vm1, %v4157_v28  ;;  %3097 = vmatmul.msk.f32.gmra.mxu1 %vm223_vm1, %v4115_v7 }
  0xc3   :  { %3132 = vmatmul.msk.f32.gmra.mxu2 %vm223_vm1, %v4157_v28  ;;  %3163 = vmatmul.msk.f32.gmra.mxu3 %vm223_vm1, %v4115_v7 }
  0xc6   :  { %v4170_v31 = vpop.f32.mrf.mxu2  ;;  %v4172_v32 = vpop.f32.mrf.mxu3 }
  0xc7   :  { %7378 = vst [vmem:[#allocation30_spill] sm:$0xff] %v4172_v32  ;;  %v4174_v34 = vpop.f32.mrf.mxu0  ;;  %v4176_v36 = vpop.f32.mrf.mxu1 }
  0xc8   :  { %7379 = vst [vmem:[#allocation31_spill] sm:$0xff] %v4176_v36 }
  0xca   :  { %3067 = vmatmul.msk.f32.gmra.mxu0 %vm223_vm1, %v4181_v38  ;;  %3098 = vmatmul.msk.f32.gmra.mxu1 %vm223_vm1, %v4136_v20 }
  0xcb   :  { %3133 = vmatmul.msk.f32.gmra.mxu2 %vm223_vm1, %v4181_v38  ;;  %3164 = vmatmul.msk.f32.gmra.mxu3 %vm223_vm1, %v4136_v20 }
  0xce   :  { %v4191_v40 = vpop.f32.mrf.mxu2  ;;  %v4193_v46 = vpop.f32.mrf.mxu3 }
  0xcf   :  { %7381 = vst [vmem:[#allocation33_spill] sm:$0xff] %v4193_v46  ;;  %v4195_v29 = vpop.f32.mrf.mxu0  ;;  %v4197_v45 = vpop.f32.mrf.mxu1  ;;  %v4289_v46 = vld [vmem:[%s7172_s1 + $0xe8] sm:$0xff] }
  0xd0   :  { %7382 = vst [vmem:[#allocation34_spill] sm:$0xff] %v4197_v45 }
  0xd1   :  { %7395 = vst [vmem:[#allocation47_spill] sm:$0xff] %v4289_v46 }
  0xd2   :  { %3068 = vmatmul.msk.f32.gmra.mxu0 %vm223_vm1, %v4202_v51  ;;  %3099 = vmatmul.msk.f32.gmra.mxu1 %vm223_vm1, %v4157_v28 }
  0xd3   :  { %3134 = vmatmul.msk.f32.gmra.mxu2 %vm223_vm1, %v4202_v51  ;;  %3165 = vmatmul.msk.f32.gmra.mxu3 %vm223_vm1, %v4157_v28 }
  0xd6   :  { %v4212_v20 = vpop.f32.mrf.mxu2  ;;  %v4214_v7 = vpop.f32.mrf.mxu3 }
  0xd7   :  { %7384 = vst [vmem:[#allocation36_spill] sm:$0xff] %v4214_v7  ;;  %v4219_v59 = vpop.f32.mrf.mxu0  ;;  %v4221_v56 = vpop.f32.mrf.mxu1  ;;  %v88_v7 = vld [vmem:[%s7173_s2 + $0x68] sm:$0xff] }
  0xd8   :  { %7385 = vst [vmem:[#allocation37_spill] sm:$0xff] %v4221_v56  ;;  %158 = vperm.xlu2 %3567, %v88_v7  }
  0xda   :  { %3069 = vmatmul.msk.f32.gmra.mxu0 %vm223_vm1, %v4226_v54  ;;  %3100 = vmatmul.msk.f32.gmra.mxu1 %vm223_vm1, %v4181_v38 }
  0xdb   :  { %3135 = vmatmul.msk.f32.gmra.mxu2 %vm223_vm1, %v4226_v54  ;;  %3166 = vmatmul.msk.f32.gmra.mxu3 %vm223_vm1, %v4181_v38 }
  0xde   :  { %v4236_v28 = vpop.f32.mrf.mxu2  ;;  %v4238_v61 = vpop.f32.mrf.mxu3 }
  0xdf   :  { %7387 = vst [vmem:[#allocation39_spill] sm:$0xff] %v4238_v61  ;;  %v4240_v2 = vpop.f32.mrf.mxu0  ;;  %v4242_v9 = vpop.f32.mrf.mxu1 }
  0xe2   :  { %3070 = vmatmul.msk.f32.gmra.mxu0 %vm223_vm1, %v4247_v0  ;;  %3101 = vmatmul.msk.f32.gmra.mxu1 %vm223_vm1, %v4202_v51 }
  0xe3   :  { %3136 = vmatmul.msk.f32.gmra.mxu2 %vm223_vm1, %v4247_v0  ;;  %3167 = vmatmul.msk.f32.gmra.mxu3 %vm223_vm1, %v4202_v51 }
  0xe6   :  { %v4257_v38 = vpop.f32.mrf.mxu2  ;;  %v4259_v53 = vpop.f32.mrf.mxu3 }
  0xe7   :  { %7389 = vst [vmem:[#allocation41_spill] sm:$0xff] %v4259_v53  ;;  %v4261_v49 = vpop.f32.mrf.mxu0  ;;  %v4263_v23 = vpop.f32.mrf.mxu1 }
  0xe8   :  { %7390 = vst [vmem:[#allocation42_spill] sm:$0xff] %v4261_v49 }
  0xea   :  { %3071 = vmatmul.msk.f32.gmra.mxu0 %vm223_vm1, %v4268_v58  ;;  %3102 = vmatmul.msk.f32.gmra.mxu1 %vm223_vm1, %v4226_v54 }
  0xeb   :  { %3168 = vmatmul.msk.f32.gmra.mxu3 %vm223_vm1, %v4226_v54  ;;  %3137 = vmatmul.msk.f32.gmra.mxu2 %vm223_vm1, %v4268_v58 }
  0xee   :  { %v4278_v51 = vpop.f32.mrf.mxu2  ;;  %v4280_v49 = vpop.f32.mrf.mxu3 }
  0xef   :  { %7392 = vst [vmem:[#allocation44_spill] sm:$0xff] %v4278_v51  ;;  %v4282_v32 = vpop.f32.mrf.mxu0  ;;  %v4284_v63 = vpop.f32.mrf.mxu1 }
  0xf0   :  { %7393 = vst [vmem:[#allocation45_spill] sm:$0xff] %v4280_v49  ;;  %v4445_v49 = vpop.permute.xlu0 %148 }
  0xf1   :  { %7394 = vst [vmem:[#allocation46_spill] sm:$0xff] %v4282_v32 }
  0xf2   :  { %3072 = vmatmul.msk.f32.gmra.mxu0 %vm223_vm1, %v4289_v46  ;;  %3103 = vmatmul.msk.f32.gmra.mxu1 %vm223_vm1, %v4247_v0 }
  0xf3   :  { %3169 = vmatmul.msk.f32.gmra.mxu3 %vm223_vm1, %v4247_v0  ;;  %3138 = vmatmul.msk.f32.gmra.mxu2 %vm223_vm1, %v4289_v46 }
  0xf6   :  { %v4299_v51 = vpop.f32.mrf.mxu2  ;;  %v4301_v54 = vpop.f32.mrf.mxu3 }
  0xf7   :  { %7396 = vst [vmem:[#allocation48_spill] sm:$0xff] %v4299_v51  ;;  %v4303_v32 = vpop.f32.mrf.mxu0  ;;  %v4305_v6 = vpop.f32.mrf.mxu1 }
  0xf8   :  { %7397 = vst [vmem:[#allocation49_spill] sm:$0xff] %v4301_v54 }
  0xf9   :  { %7398 = vst [vmem:[#allocation50_spill] sm:$0xff] %v4303_v32 }
  0xfa   :  { %7399 = vst [vmem:[#allocation51_spill] sm:$0xff] %v4305_v6  ;;  %3104 = vmatmul.msk.f32.gmra.mxu1 %vm223_vm1, %v4268_v58  ;;  %3175 = vmatmul.msk.f32.vlgmr.msrb.gmra.mxu0 %vm223_vm1, %v3728_v4  ;;  %v173_v4 = vld [vmem:[%s7175_s4 + $0x10] sm:$0xff] }
  0xfb   :  { %3170 = vmatmul.msk.f32.gmra.mxu3 %vm223_vm1, %v4268_v58  ;;  %190 = vperm.xlu0 %3565, %v173_v4  }
  0xfe   :  { %v4316_v51 = vpop.f32.mrf.mxu2  ;;  %v4318_v0 = vpop.f32.mrf.mxu3 }
  0xff   :  { %7400 = vst [vmem:[#allocation52_spill] sm:$0xff] %v4316_v51  ;;  %v4320_v32 = vpop.f32.mrf.mxu0  ;;  %v4322_v6 = vpop.f32.mrf.mxu1 }
 0x100   :  { %7401 = vst [vmem:[#allocation53_spill] sm:$0xff] %v4318_v0 }
 0x101   :  { %7402 = vst [vmem:[#allocation54_spill] sm:$0xff] %v4322_v6 }
 0x102   :  { %3105 = vmatmul.msk.f32.gmra.mxu1 %vm223_vm1, %v4289_v46  ;;  %3176 = vmatmul.msk.f32.gmra.mxu0 %vm223_vm1, %v3760_v10  ;;  %v176_v10 = vld [vmem:[%s7175_s4 + $0x28] sm:$0xff] }
 0x103   :  { %3171 = vmatmul.msk.f32.gmra.mxu3 %vm223_vm1, %v4289_v46  ;;  %205 = vperm.xlu0 %3565, %v176_v10  }
 0x106   :  { %v4333_v7 = vpop.f32.mrf.mxu2  ;;  %v4335_v51 = vpop.f32.mrf.mxu3 }
 0x107   :  { %7403 = vst [vmem:[#allocation55_spill] sm:$0xff] %v4333_v7  ;;  %v4337_v58 = vpop.f32.mrf.mxu0  ;;  %v4339_v0 = vpop.f32.mrf.mxu1 }
 0x108   :  { %7404 = vst [vmem:[#allocation56_spill] sm:$0xff] %v4335_v51 }
 0x109   :  { %7405 = vst [vmem:[#allocation57_spill] sm:$0xff] %v4339_v0 }
 0x10a   :  { %3106 = vmatmul.msk.f32.gmra.mxu1 %vm223_vm1, %v3733_v5  ;;  %3177 = vmatmul.msk.f32.gmra.mxu0 %vm223_vm1, %v3778_v12 }
 0x10b   :  { %3172 = vmatmul.msk.f32.gmra.mxu3 %vm223_vm1, %v3733_v5 }
 0x10e   :  { %v4350_v4 = vpop.f32.mrf.mxu2  ;;  %v4352_v7 = vpop.f32.mrf.mxu3 }
 0x10f   :  { %7406 = vst [vmem:[#allocation58_spill] sm:$0xff] %v4352_v7  ;;  %v4354_v46 = vpop.f32.mrf.mxu0  ;;  %v4356_v51 = vpop.f32.mrf.mxu1 }
 0x110   :  { %7407 = vst [vmem:[#allocation59_spill] sm:$0xff] %v4356_v51 }
 0x112   :  { %3107 = vmatmul.msk.f32.gmra.mxu1 %vm223_vm1, %v3765_v11  ;;  %3178 = vmatmul.msk.f32.gmra.mxu0 %vm223_vm1, %v3791_v13 }
 0x113   :  { %3173 = vmatmul.msk.f32.gmra.mxu3 %vm223_vm1, %v3765_v11  ;;  %v171_v11 = vld [vmem:[%s7175_s4] sm:$0xff] }
 0x114   :  { %180 = vperm.xlu1 %3566, %v171_v11  }
 0x116   :  { %v4364_v12 = vpop.f32.mrf.mxu2  ;;  %v4366_v5 = vpop.f32.mrf.mxu3 }
 0x117   :  { %7408 = vst [vmem:[#allocation60_spill] sm:$0xff] %v4364_v12  ;;  %v4368_v10 = vpop.f32.mrf.mxu0  ;;  %v4370_v7 = vpop.f32.mrf.mxu1 }
 0x118   :  { %7409 = vst [vmem:[#allocation61_spill] sm:$0xff] %v4366_v5 }
 0x119   :  { %7410 = vst [vmem:[#allocation62_spill] sm:$0xff] %v4370_v7 }
 0x11a   :  { %3179 = vmatmul.msk.f32.gmra.mxu0 %vm223_vm1, %v3804_v14 }
 0x11e   :  { %v4374_v51 = vpop.f32.mrf.mxu2  ;;  %v4376_v6 = vpop.f32.mrf.mxu3 }
 0x11f   :  { %7411 = vst [vmem:[#allocation63_spill] sm:$0xff] %v4374_v51  ;;  %v4378_v0 = vpop.f32.mrf.mxu0  ;;  %v4380_v13 = vpop.f32.mrf.mxu1 }
 0x120   :  { %7412 = vst [vmem:[#allocation64_spill] sm:$0xff] %v4376_v6 }
 0x121   :  { %7413 = vst [vmem:[#allocation65_spill] sm:$0xff] %v4380_v13 }
 0x122   :  { %3180 = vmatmul.msk.f32.gmra.mxu0 %vm223_vm1, %v3817_v15  ;;  %v174_v15 = vld [vmem:[%s7175_s4 + $0x18] sm:$0xff] }
 0x123   :  { %195 = vperm.xlu1 %3566, %v174_v15  }
 0x126   :  { %v4387_v5 = vpop.f32.mrf.mxu2  ;;  %v4389_v7 = vpop.f32.mrf.mxu3 }
 0x127   :  { %7414 = vst [vmem:[#allocation66_spill] sm:$0xff] %v4389_v7  ;;  %v4391_v14 = vpop.f32.mrf.mxu0  ;;  %v4393_v42 = vpop.f32.mrf.mxu1 }
 0x128   :  { %7415 = vst [vmem:[#allocation67_spill] sm:$0xff] %v4393_v42 }
 0x12a   :  { %3181 = vmatmul.msk.f32.gmra.mxu0 %vm223_vm1, %v3830_v16  ;;  %v177_v16 = vld [vmem:[%s7175_s4 + $0x30] sm:$0x3] }
 0x12b   :  { %210 = vperm.xlu1 %3566, %v177_v16  }
 0x12e   :  { %v4400_v6 = vpop.f32.mrf.mxu2  ;;  %v4402_v13 = vpop.f32.mrf.mxu3 }
 0x12f   :  { %7416 = vst [vmem:[#allocation68_spill] sm:$0xff] %v4402_v13  ;;  %v4404_v11 = vpop.f32.mrf.mxu0  ;;  %v4406_v61 = vpop.f32.mrf.mxu1 }
 0x130   :  { %7417 = vst [vmem:[#allocation69_spill] sm:$0xff] %v4406_v61 }
 0x132   :  { %3182 = vmatmul.msk.f32.gmra.mxu0 %vm223_vm1, %v3843_v17 }
 0x136   :  { %v4413_v7 = vpop.f32.mrf.mxu2  ;;  %v4415_v42 = vpop.f32.mrf.mxu3 }
 0x137   :  { %7418 = vst [vmem:[#allocation70_spill] sm:$0xff] %v4415_v42  ;;  %v4417_v15 = vpop.f32.mrf.mxu0  ;;  %v4419_v43 = vpop.f32.mrf.mxu1 }
 0x138   :  { %7419 = vst [vmem:[#allocation71_spill] sm:$0xff] %v4419_v43 }
 0x13a   :  { %3183 = vmatmul.msk.f32.gmra.mxu0 %vm223_vm1, %v3863_v21  ;;  %v4439_v21 = vpop.permute.xlu1 %138 }
 0x13e   :  { %v4423_v13 = vpop.f32.mrf.mxu2  ;;  %v4425_v61 = vpop.f32.mrf.mxu3 }
 0x13f   :  { %7420 = vst [vmem:[#allocation72_spill] sm:$0xff] %v4425_v61  ;;  %v422_v17 = vpop.f32.mrf.mxu0  ;;  %v4427_v19 = vpop.f32.mrf.mxu1 }
 0x140   :  { %7421 = vst [vmem:[#allocation73_spill] sm:$0xff] %v4427_v19 }
 0x142   :  { %3184 = vmatmul.msk.f32.gmra.mxu0 %vm223_vm1, %v3882_v24  ;;  %v4449_v24 = vpop.permute.xlu2 %128  ;;  %v4455_v50 = vpop.permute.xlu1 %133 }
 0x143   :  { %7426 = vst [vmem:[#allocation78_spill] sm:$0xff] %v4449_v24 }
 0x144   :  { %7429 = vst [vmem:[#allocation81_spill] sm:$0xff] %v4455_v50 }
 0x146   :  { %v4431_v16 = vpop.f32.mrf.mxu2  ;;  %v4433_v42 = vpop.f32.mrf.mxu3 }
 0x147   :  { %7422 = vst [vmem:[#allocation74_spill] sm:$0xff] %v4433_v42  ;;  %v425_v26 = vpop.f32.mrf.mxu0  ;;  %v4435_v53 = vpop.f32.mrf.mxu1 }
 0x148   :  { %7423 = vst [vmem:[#allocation75_spill] sm:$0xff] %v4435_v53  ;;  %v941_v56 = vmax.f32 %v4174_v34, %v425_v26 }
 0x14a   :  { %3185 = vmatmul.msk.f32.gmra.mxu0 %vm223_vm1, %v3901_v27  ;;  %v4461_v12 = vpop.permute.xlu2 %123 }
 0x14b   :  { %7430 = vst [vmem:[#allocation82_spill] sm:$0xff] %v4461_v12 }
 0x14e   :  { %v651_v43 = vpop.f32.mrf.mxu2  ;;  %v4441_v61 = vpop.f32.mrf.mxu3 }
 0x14f   :  { %7424 = vst [vmem:[#allocation76_spill] sm:$0xff] %v4441_v61  ;;  %v428_v54 = vpop.f32.mrf.mxu0  ;;  %v4443_v19 = vpop.f32.mrf.mxu1 }
 0x150   :  { %7425 = vst [vmem:[#allocation77_spill] sm:$0xff] %v4443_v19  ;;  %v4459_v61 = vpop.permute.xlu0 %143 }
 0x152   :  { %3186 = vmatmul.msk.f32.gmra.mxu0 %vm223_vm1, %v3920_v30 }
 0x156   :  { %v654_v42 = vpop.f32.mrf.mxu2  ;;  %v4451_v36 = vpop.f32.mrf.mxu3 }
 0x157   :  { %7427 = vst [vmem:[#allocation79_spill] sm:$0xff] %v4451_v36  ;;  %v431_v53 = vpop.f32.mrf.mxu0  ;;  %v4453_v27 = vpop.f32.mrf.mxu1  ;;  %v946_v36 = vmax.f32 %v4195_v29, %v428_v54 }
 0x158   :  { %7428 = vst [vmem:[#allocation80_spill] sm:$0xff] %v4453_v27  ;;  %v951_v45 = vmax.f32 %v4219_v59, %v431_v53  ;;  %v4479_v53 = vpop.permute.xlu1 %113  ;;  %v4509_v29 = vpop.permute.xlu2 %108 }
 0x159   :  { %7432 = vst [vmem:[#allocation84_spill] sm:$0xff] %v4479_v53  ;;  %v4484_v54 = vadd.f32 %v946_v36, %v4439_v21 }
 0x15a   :  { %3187 = vmatmul.msk.f32.gmra.mxu0 %vm223_vm1, %v3939_v33  ;;  %v4472_v33 = vadd.f32 %v951_v45, %v4459_v61  ;;  %v948_v45 = vmax.f32 %v4212_v20, %v654_v42  ;;  %7435 = vst [vmem:[#allocation87_spill] sm:$0xff] %v4509_v29 }
 0x15e   :  { %v657_v30 = vpop.f32.mrf.mxu2  ;;  %v4464_v19 = vpop.f32.mrf.mxu3 }
 0x15f   :  { %7431 = vst [vmem:[#allocation83_spill] sm:$0xff] %v4464_v19  ;;  %v434_v39 = vpop.f32.mrf.mxu0  ;;  %v4466_v55 = vpop.f32.mrf.mxu1  ;;  %v953_v59 = vmax.f32 %v4236_v28, %v657_v30  ;;  %v936_v19 = vmax.f32 %v4150_v25, %v422_v17  ;;  %v7198_v25 = vmax.f32 %v4472_v33, 0.0  ;;  %v943_v28 = vmax.f32 %v4191_v40, %v651_v43 }
 0x160   :  { %v956_v51 = vmax.f32 %v4240_v2, %v434_v39  ;;  %v4487_v2 = vpop.permute.xlu0 %118  ;;  %v7197_v43 = vmax.f32 %v4484_v54, 0.0  ;;  %v938_v40 = vmax.f32 %v4170_v31, %v4431_v16  ;;  %v4524_v30 = vadd.f32 %v948_v45, %v4439_v21 }
 0x161   :  { %7433 = vst [vmem:[#allocation85_spill] sm:$0xff] %v4487_v2  ;;  %v4502_v36 = vadd.f32 %v953_v59, %v4459_v61  ;;  %v4514_v17 = vadd.f32 %v936_v19, %v4449_v24  ;;  %v921_v19 = vmax.f32 %v4087_v62, %v4391_v14  ;;  %v933_v16 = vmax.f32 %v4146_v22, %v4423_v13  ;;  %v4557_v13 = vpop.permute.xlu1 %98 }
 0x162   :  { %v4475_v27 = vadd.f32 %v956_v51, %v4445_v49  ;;  %3188 = vmatmul.msk.f32.gmra.mxu0 %vm223_vm1, %v3955_v35  ;;  %v931_v51 = vmax.f32 %v4129_v18, %v4417_v15  ;;  %v4493_v35 = vadd.f32 %v941_v56, %v4455_v50  ;;  %v926_v15 = vmax.f32 %v4108_v3, %v4404_v11 }
 0x163   :  { %7434 = vst [vmem:[#allocation86_spill] sm:$0xff] %v4502_v36  ;;  %v906_v3 = vmax.f32 %v4024_v47, %v4354_v46  ;;  %v4544_v45 = vadd.f32 %v943_v28, %v4455_v50  ;;  %v7194_v62 = vmax.f32 %v4502_v36, 0.0  ;;  %v916_v46 = vmax.f32 %v4066_v57, %v4378_v0  ;;  %v7492_v36 = vld [vmem:[#allocation16_spill] sm:$0xff] }
 0x164   :  { %v7201_v39 = vmax.f32 %v4475_v27, 0.0  ;;  %7436 = vst [vmem:[#allocation88_spill] sm:$0xff] %v4524_v30  ;;  %v4534_v11 = vadd.f32 %v931_v51, %v4461_v12  ;;  %v7195_v31 = vmax.f32 %v4493_v35, 0.0  ;;  %v7193_v22 = vmax.f32 %v4514_v17, 0.0 }
 0x165   :  { %7438 = vst [vmem:[#allocation90_spill] sm:$0xff] %v4544_v45  ;;  %v903_v51 = vmax.f32 %v4017_v44, %v4350_v4  ;;  %v4564_v57 = vadd.f32 %v938_v40, %v4449_v24  ;;  %v4570_v0 = vadd.f32 %v906_v3, %v4557_v13  ;;  %v911_v28 = vmax.f32 %v4045_v52, %v4368_v10 }
 0x166   :  { %v660_v26 = vpop.f32.mrf.mxu2  ;;  %v4495_v34 = vpop.f32.mrf.mxu3  ;;  %1167 = vmatpush.msra.mxu1 %v7201_v39  ;;  %7439 = vst [vmem:[#allocation91_spill] sm:$0xff] %v4557_v13  ;;  %v4588_v40 = vadd.f32 %v933_v16, %v4461_v12  ;;  %v947_v52 = vmax.f32 %v4242_v9, %v4466_v55  ;;  %v918_v9 = vmax.f32 %v4083_v60, %v4387_v5 }
 0x167   :  { %v958_v42 = vmax.f32 %v4257_v38, %v660_v26  ;;  %v4505_v20 = vpop.f32.mrf.mxu0  ;;  %v544_v18 = vpop.f32.mrf.mxu1  ;;  %v901_v38 = vmax.f32 %v4000_v41, %v4337_v58  ;;  %v928_v26 = vmax.f32 %v4125_v8, %v4413_v7  ;;  %7440 = vst [vmem:[#allocation92_spill] sm:$0xff] %v4564_v57  ;;  %v7196_v8 = vmax.f32 %v4534_v11, 0.0  ;;  %v172_v7 = vld [vmem:[%s7175_s4 + $0x8] sm:$0xff] }
 0x168   :  { %1168 = vmatpush.msra.mxu1 %v7198_v25  ;;  %v952_v14 = vmax.f32 %v4263_v23, %v544_v18  ;;  %v7199_v23 = vmax.f32 %v4524_v30, 0.0  ;;  %7441 = vst [vmem:[#allocation93_spill] sm:$0xff] %v4588_v40  ;;  %185 = vperm.xlu2 %3567, %v172_v7   ;;  %v7444_v7 = vld [vmem:[#allocation80_spill] sm:$0xff]  ;;  %v7448_v25 = vld [vmem:[#allocation5_spill] sm:$0xff] }
 0x169   :  { %v4527_v59 = vadd.f32 %v958_v42, %v4445_v49  ;;  %v4575_v42 = vadd.f32 %v921_v19, %v4479_v53  ;;  %v7202_v19 = vmax.f32 %v4544_v45, 0.0  ;;  %v4610_v16 = vadd.f32 %v928_v26, %v4487_v2  ;;  %v7450_v26 = vld [vmem:[#allocation77_spill] sm:$0xff] }
 0x16a   :  { %3189 = vmatmul.msk.f32.gmra.mxu0 %vm223_vm1, %v3971_v37  ;;  %1169 = vmatpush.msra.mxu1 %v7197_v43  ;;  %v4551_v37 = vadd.f32 %v926_v15, %v4487_v2  ;;  %v923_v15 = vmax.f32 %v4104_v1, %v4400_v6  ;;  %v4605_v6 = vadd.f32 %v952_v14, %v4459_v61  ;;  %v7446_v14 = vld [vmem:[#allocation63_spill] sm:$0xff]  ;;  %v7457_v58 = vld [vmem:[#allocation49_spill] sm:$0xff] }
 0x16b   :  { %7437 = vst [vmem:[#allocation89_spill] sm:$0xff] %v4527_v59  ;;  %v7192_v47 = vmax.f32 %v4527_v59, 0.0  ;;  %v7203_v60 = vmax.f32 %v4575_v42, 0.0  ;;  %v7462_v44 = vmax.f32 %v4610_v16, 0.0  ;;  %v7493_v59 = vld [vmem:[#allocation72_spill] sm:$0xff] }
 0x16c   :  { %1170 = vmatpush.msra.mxu1 %v7195_v31  ;;  %v7200_v55 = vmax.f32 %v4551_v37, 0.0  ;;  %7443 = vst [vmem:[#allocation95_spill] sm:$0xff] %v4610_v16  ;;  %v7207_v39 = vmax.f32 %v4605_v6, 0.0  ;;  %v7478_v16 = vld [vmem:[#allocation76_spill] sm:$0xff] }
 0x16d   :  { %1243 = vmatpush.msra.mxu3 %v7192_v47  ;;  %v4597_v47 = vpop.permute.xlu0 %103 }
 0x16e   :  { %v4577_v18 = vpop.f32.mrf.mxu3  ;;  %1171 = vmatpush.msra.mxu1 %v7193_v22  ;;  %7442 = vst [vmem:[#allocation94_spill] sm:$0xff] %v4597_v47  ;;  %v996_v22 = vadd.f32 %v916_v46, %v4509_v29  ;;  %v4617_v46 = vpop.permute.xlu2 %93 }
 0x16f   :  { %1244 = vmatpush.msra.mxu3 %v7194_v62  ;;  %v4594_v10 = vpop.f32.mrf.mxu0  ;;  %v547_v3 = vpop.f32.mrf.mxu1  ;;  %v7445_v62 = vld [vmem:[#allocation37_spill] sm:$0xff] }
 0x170   :  { %v957_v1 = vmax.f32 %v4284_v63, %v547_v3  ;;  %1172 = vmatpush.msra.mxu1 %v7196_v8  ;;  %v942_v31 = vmax.f32 %v7445_v62, %v7444_v7  ;;  %v7204_v63 = vmax.f32 %v4564_v57, 0.0  ;;  %v991_v3 = vadd.f32 %v911_v28, %v4597_v47  ;;  %v7447_v8 = vld [vmem:[#allocation14_spill] sm:$0xff] }
 0x171   :  { %1245 = vmatpush.msra.mxu3 %v7199_v23  ;;  %v913_v43 = vmax.f32 %v7447_v8, %v7446_v14  ;;  %v4631_v62 = vadd.f32 %v923_v15, %v4479_v53  ;;  %v7451_v7 = vld [vmem:[#allocation34_spill] sm:$0xff]  ;;  %v7205_v8 = vmax.f32 %v4588_v40, 0.0  ;;  %v7452_v14 = vld [vmem:[#allocation60_spill] sm:$0xff]  ;;  %v7479_v40 = vld [vmem:[#allocation33_spill] sm:$0xff] }
 0x172   :  { %3190 = vmatmul.msk.f32.gmra.mxu0 %vm223_vm1, %v7448_v25  ;;  %1173 = vmatpush.msra.mxu1 %v7200_v55  ;;  %v4628_v5 = vadd.f32 %v957_v1, %v4445_v49  ;;  %v937_v28 = vmax.f32 %v7451_v7, %v7450_v26  ;;  %v4639_v25 = vadd.f32 %v947_v52, %v4439_v21  ;;  %v7453_v23 = vld [vmem:[#allocation10_spill] sm:$0xff]  ;;  %v1076_v1 = vmax.f32 %v996_v22, 0.0  ;;  %v175_v22 = vld [vmem:[%s7175_s4 + $0x20] sm:$0xff] }
 0x173   :  { %7449 = vst [vmem:[#allocation80_spill] sm:$0xff] %v4631_v62  ;;  %1246 = vmatpush.msra.mxu3 %v7202_v19  ;;  %v908_v55 = vmax.f32 %v7453_v23, %v7452_v14  ;;  %v998_v26 = vadd.f32 %v918_v9, %v4509_v29  ;;  %v981_v23 = vadd.f32 %v901_v38, %v4617_v46  ;;  %v7454_v9 = vld [vmem:[#allocation75_spill] sm:$0xff]  ;;  %v1071_v41 = vmax.f32 %v991_v3, 0.0 }
 0x174   :  { %1174 = vmatpush.msra.mxu1 %v7203_v60  ;;  %v7206_v15 = vmax.f32 %v4628_v5, 0.0  ;;  %v4656_v52 = vadd.f32 %v942_v31, %v4455_v50  ;;  %v993_v14 = vadd.f32 %v913_v43, %v4597_v47  ;;  %v7455_v19 = vld [vmem:[#allocation31_spill] sm:$0xff]  ;;  %200 = vperm.xlu2 %3567, %v175_v22   ;;  %v934_v57 = vmax.f32 %v7479_v40, %v7478_v16 }
 0x175   :  { %1247 = vmatpush.msra.mxu3 %v7204_v63  ;;  %v932_v60 = vmax.f32 %v7455_v19, %v7454_v9  ;;  %v7456_v63 = vld [vmem:[#allocation45_spill] sm:$0xff]  ;;  %v7208_v19 = vmax.f32 %v4639_v25, 0.0  ;;  %v7209_v9 = vmax.f32 %v4631_v62, 0.0  ;;  %v988_v3 = vadd.f32 %v908_v55, %v4557_v13  ;;  %v4700_v55 = vpop.permute.xlu0 %168 }
 0x176   :  { %v954_v56 = vmax.f32 %v7456_v63, %v4577_v18  ;;  %v773_v7 = vpop.f32.mrf.mxu3  ;;  %1175 = vmatpush.msra.mxu1 %v1076_v1  ;;  %1205 = vmatpush.msrb.mxu2 %v7206_v15  ;;  %v4678_v18 = vadd.f32 %v937_v28, %v4449_v24  ;;  %v4684_v63 = vadd.f32 %v903_v51, %v4617_v46  ;;  %v7459_v1 = vld [vmem:[#allocation41_spill] sm:$0xff]  ;;  %v1078_v51 = vmax.f32 %v998_v26, 0.0  ;;  %v4718_v26 = vld [vmem:[#allocation2] sm:$0xff] }
 0x177   :  { %v959_v38 = vmax.f32 %v7457_v58, %v773_v7  ;;  %1248 = vmatpush.msra.mxu3 %v7205_v8  ;;  %v4671_v31 = vpop.f32.mrf.mxu1  ;;  %v4673_v43 = vpop.f32.mrf.mxu0  ;;  %v949_v7 = vmax.f32 %v7459_v1, %v4495_v34  ;;  %v1066_v58 = vmax.f32 %v4570_v0, 0.0  ;;  %v7460_v28 = vld [vmem:[#allocation73_spill] sm:$0xff]  ;;  %v7461_v8 = vld [vmem:[#allocation28_spill] sm:$0xff]  ;;  %7463 = vst [vmem:[#allocation63_spill] sm:$0xff] %v4700_v55  ;;  %v7464_v34 = vld [vmem:[#allocation71_spill] sm:$0xff]  ;;  %v7474_v62 = vmax.f32 %v4656_v52, 0.0 }
 0x178   :  { %7458 = vst [vmem:[#allocation37_spill] sm:$0xff] %v4673_v43  ;;  %1176 = vmatpush.msra.mxu1 %v1071_v41  ;;  %1206 = vmatpush.msrb.mxu2 %v7207_v39  ;;  %v927_v22 = vmax.f32 %v7461_v8, %v7460_v28  ;;  %v7465_v41 = vld [vmem:[#allocation25_spill] sm:$0xff]  ;;  %v4705_v39 = vadd.f32 %v954_v56, %v4459_v61  ;;  %v7466_v0 = vld [vmem:[#allocation7_spill] sm:$0xff]  ;;  %v1061_v8 = vmax.f32 %v981_v23, 0.0  ;;  %v7470_v23 = vld [vmem:[#allocation50_spill] sm:$0xff]  ;;  %v1068_v56 = vmax.f32 %v988_v3, 0.0 }
 0x179   :  { %v4695_v15 = vadd.f32 %v959_v38, %v4445_v49  ;;  %1249 = vmatpush.msra.mxu3 %v7462_v44  ;;  %v922_v1 = vmax.f32 %v7465_v41, %v7464_v34  ;;  %v4710_v38 = vadd.f32 %v932_v60, %v4461_v12  ;;  %v7467_v28 = vld [vmem:[#allocation83_spill] sm:$0xff]  ;;  %v1073_v34 = vmax.f32 %v993_v14, 0.0 }
 0x17a   :  { %3191 = vmatmul.msk.f32.gmra.mxu0 %vm223_vm1, %v7466_v0  ;;  %1177 = vmatpush.msra.mxu1 %v1066_v58  ;;  %v7468_v44 = vld [vmem:[#allocation39_spill] sm:$0xff]  ;;  %v7469_v58 = vld [vmem:[#allocation6_spill] sm:$0xff]  ;;  %v4724_v60 = vadd.f32 %v949_v7, %v4439_v21  ;;  %v4734_v14 = vadd.f32 %v927_v22, %v4487_v2  ;;  %v7475_v7 = vmax.f32 %v4320_v32, %v4026_v48 }
 0x17b   :  { %v944_v4 = vmax.f32 %v7468_v44, %v7467_v28  ;;  %1207 = vmatpush.msrb.mxu2 %v7208_v19  ;;  %1250 = vmatpush.msra.mxu3 %v7209_v9  ;;  %v971_v41 = vmax.f32 %v7470_v23, %v7469_v58  ;;  %v4727_v28 = vpop.permute.xlu1 %163  ;;  %v7472_v44 = vld [vmem:[#allocation79_spill] sm:$0xff]  ;;  %v7473_v19 = vld [vmem:[#allocation36_spill] sm:$0xff]  ;;  %v7476_v23 = vld [vmem:[#allocation69_spill] sm:$0xff]  ;;  %v4750_v3 = vadd.f32 %v922_v1, %v4479_v53 }
 0x17c   :  { %1178 = vmatpush.msra.mxu1 %v1061_v8  ;;  %7471 = vst [vmem:[#allocation14_spill] sm:$0xff] %v4727_v28  ;;  %v939_v9 = vmax.f32 %v7473_v19, %v7472_v44  ;;  %v1056_v58 = vadd.f32 %v7475_v7, %v4700_v55  ;;  %v7477_v8 = vld [vmem:[#allocation22_spill] sm:$0xff]  ;;  %v1063_v7 = vmax.f32 %v4684_v63, 0.0  ;;  %v7483_v1 = vld [vmem:[#allocation67_spill] sm:$0xff] }
 0x17d   :  { %1208 = vmatpush.msrb.mxu2 %v7474_v62  ;;  %1251 = vmatpush.msra.mxu3 %v1078_v51  ;;  %v917_v0 = vmax.f32 %v7477_v8, %v7476_v23  ;;  %v4753_v22 = vadd.f32 %v944_v4, %v4455_v50  ;;  %v7480_v48 = vld [vmem:[#allocation46_spill] sm:$0xff]  ;;  %v7481_v51 = vmax.f32 %v4678_v18, 0.0  ;;  %v7484_v23 = vld [vmem:[#allocation19_spill] sm:$0xff]  ;;  %v4767_v4 = vpop.permute.xlu2 %158  ;;  %v7486_v62 = vmax.f32 %v4695_v15, 0.0 }
 0x17e   :  { %v4744_v19 = vpop.f32.mrf.mxu3  ;;  %3207 = vmatmul.msk.f32.vlgmr.msra.gmra.mxu1 %vm1141_vm2, %v4718_v26  ;;  %v966_v32 = vmax.f32 %v7480_v48, %v4594_v10  ;;  %v912_v8 = vmax.f32 %v7484_v23, %v7483_v1  ;;  %7485 = vst [vmem:[#allocation77_spill] sm:$0xff] %v4767_v4  ;;  %v7487_v48 = vld [vmem:[#allocation74_spill] sm:$0xff]  ;;  %v4776_v30 = vadd.f32 %v939_v9, %v4449_v24  ;;  %v7490_v1 = vmax.f32 %v4710_v38, 0.0 }
 0x17f   :  { %1209 = vmatpush.msrb.mxu2 %v7481_v51  ;;  %1252 = vmatpush.msra.mxu3 %v1073_v34  ;;  %v4759_v40 = vpop.f32.mrf.mxu1  ;;  %v4761_v16 = vpop.f32.mrf.mxu0  ;;  %v1051_v34 = vadd.f32 %v971_v41, %v4727_v28  ;;  %v7488_v51 = vld [vmem:[#allocation30_spill] sm:$0xff]  ;;  %v7218_v23 = vmax.f32 %v4734_v14, 0.0  ;;  %v7494_v41 = vld [vmem:[#allocation27_spill] sm:$0xff]  ;;  %v7496_v9 = vmax.f32 %v4705_v39, 0.0 }
 0x180   :  { %7482 = vst [vmem:[#allocation5_spill] sm:$0xff] %v4761_v16  ;;  %1281 = vmatpush.msrb.mxu1 %v7486_v62  ;;  %v929_v45 = vmax.f32 %v7488_v51, %v7487_v48  ;;  %v7489_v63 = vld [vmem:[#allocation42_spill] sm:$0xff]  ;;  %v7491_v62 = vld [vmem:[#allocation65_spill] sm:$0xff]  ;;  %v924_v43 = vmax.f32 %v7494_v41, %v7493_v59  ;;  %v4787_v16 = vpop.permute.xlu0 %153  ;;  %v997_v51 = vadd.f32 %v917_v0, %v4509_v29  ;;  %v4800_v59 = vld [vmem:[#allocation2 + $0x8] sm:$0xff] }
 0x181   :  { %v961_v44 = vmax.f32 %v7489_v63, %v4505_v20  ;;  %1210 = vmatpush.msrb.mxu2 %v7490_v1  ;;  %1253 = vmatpush.msra.mxu3 %v1068_v56  ;;  %v907_v10 = vmax.f32 %v7492_v36, %v7491_v62  ;;  %7495 = vst [vmem:[#allocation34_spill] sm:$0xff] %v4787_v16  ;;  %v7497_v48 = vld [vmem:[#allocation9_spill] sm:$0xff]  ;;  %v1136_v20 = vmax.f32 %v1056_v58, 0.0  ;;  %v7498_v62 = vld [vmem:[#allocation62_spill] sm:$0xff]  ;;  %v7499_v41 = vld [vmem:[#allocation12_spill] sm:$0xff]  ;;  %v1131_v0 = vmax.f32 %v1051_v34, 0.0 }
 0x182   :  { %1282 = vmatpush.msrb.mxu1 %v7496_v9  ;;  %3192 = vmatmul.msk.f32.gmra.mxu0 %vm223_vm1, %v7497_v48  ;;  %v4795_v56 = vadd.f32 %v934_v57, %v4461_v12  ;;  %v1046_v1 = vadd.f32 %v966_v32, %v4767_v4  ;;  %v902_v58 = vmax.f32 %v7499_v41, %v7498_v62  ;;  %v7500_v57 = vmax.f32 %v4724_v60, 0.0  ;;  %v7501_v9 = vld [vmem:[#allocation70_spill] sm:$0xff]  ;;  %v7502_v48 = vld [vmem:[#allocation24_spill] sm:$0xff] }
 0x183   :  { %1211 = vmatpush.msrb.mxu2 %v7218_v23  ;;  %1254 = vmatpush.msra.mxu3 %v1063_v7  ;;  %v992_v7 = vadd.f32 %v912_v8, %v4597_v47  ;;  %v919_v23 = vmax.f32 %v7502_v48, %v7501_v9  ;;  %v4814_v36 = vadd.f32 %v929_v45, %v4487_v2  ;;  %v7503_v32 = vmax.f32 %v4750_v3, 0.0  ;;  %v7505_v9 = vld [vmem:[#allocation21_spill] sm:$0xff]  ;;  %v7507_v12 = vld [vmem:[#allocation66_spill] sm:$0xff]  ;;  %v7512_v2 = vld [vmem:[#allocation15_spill] sm:$0xff] }
 0x184   :  { %3221 = vmatmul.msk.f32.vlgmr.msra.gmra.mxu3 %vm1141_vm2, %v4718_v26  ;;  %1283 = vmatpush.msrb.mxu1 %v7500_v57  ;;  %v1041_v41 = vadd.f32 %v961_v44, %v4787_v16  ;;  %v1077_v8 = vmax.f32 %v997_v51, 0.0  ;;  %v987_v34 = vadd.f32 %v907_v10, %v4557_v13  ;;  %v7504_v57 = vld [vmem:[#allocation68_spill] sm:$0xff]  ;;  %v7506_v48 = vmax.f32 %v4753_v22, 0.0  ;;  %v7508_v24 = vld [vmem:[#allocation18_spill] sm:$0xff] }
 0x185   :  { %1357 = vmatpush.msrb.mxu3 %v1136_v20  ;;  %1212 = vmatpush.msrb.mxu2 %v7503_v32  ;;  %v914_v45 = vmax.f32 %v7505_v9, %v7504_v57  ;;  %v4828_v20 = vadd.f32 %v924_v43, %v4479_v53  ;;  %v1126_v62 = vmax.f32 %v1046_v1, 0.0  ;;  %v1072_v51 = vmax.f32 %v992_v7, 0.0  ;;  %v7510_v1 = vld [vmem:[#allocation13_spill] sm:$0xff]  ;;  %v7511_v7 = vld [vmem:[#allocation64_spill] sm:$0xff] }
 0x186   :  { %v4820_v63 = vpop.f32.mrf.mxu3  ;;  %3208 = vmatmul.msk.f32.gmra.mxu1 %vm1141_vm2, %v4800_v59  ;;  %v982_v10 = vadd.f32 %v902_v58, %v4617_v46  ;;  %v909_v57 = vmax.f32 %v7508_v24, %v7507_v12  ;;  %v999_v43 = vadd.f32 %v919_v23, %v4509_v29  ;;  %v7509_v9 = vmax.f32 %v4776_v30, 0.0  ;;  %v4849_v24 = vld [vmem:[#allocation2 + $0x10] sm:$0xff] }
 0x187   :  { %1284 = vmatpush.msrb.mxu1 %v7506_v48  ;;  %1358 = vmatpush.msrb.mxu3 %v1131_v0  ;;  %v556_v32 = vpop.f32.mrf.mxu1  ;;  %v4832_v44 = vpop.f32.mrf.mxu0  ;;  %v1121_v0 = vmax.f32 %v1041_v41, 0.0  ;;  %v1089_v48 = vmax.f32 %v4814_v36, 0.0  ;;  %v904_v58 = vmax.f32 %v7512_v2, %v7511_v7  ;;  %v994_v53 = vadd.f32 %v914_v45, %v4597_v47  ;;  %7514 = vst [vmem:[#allocation60_spill] sm:$0xff] %v4849_v24  ;;  %v7516_v45 = vld [vmem:[#allocation57_spill] sm:$0xff]  ;;  %v7555_v36 = vld [vmem:[#allocation35_spill] sm:$0xff] }
 0x188   :  { %1213 = vmatpush.msrb.mxu2 %v1077_v8  ;;  %v1067_v8 = vmax.f32 %v987_v34, 0.0  ;;  %v7513_v12 = vmax.f32 %v4795_v56, 0.0  ;;  %v1084_v23 = vmax.f32 %v4828_v20, 0.0  ;;  %v989_v41 = vadd.f32 %v909_v57, %v4557_v13 }
 0x189   :  { %1285 = vmatpush.msrb.mxu1 %v7509_v9  ;;  %1359 = vmatpush.msrb.mxu3 %v1126_v62  ;;  %v1062_v62 = vmax.f32 %v982_v10, 0.0  ;;  %v7515_v2 = vmax.f32 %v4475_v27, 0.0  ;;  %v1079_v34 = vmax.f32 %v999_v43, 0.0  ;;  %v7517_v10 = vmax.f32 %v4472_v33, 0.0  ;;  %v7518_v43 = vld [vmem:[#allocation54_spill] sm:$0xff]  ;;  %v7521_v33 = vld [vmem:[#allocation51_spill] sm:$0xff] }
 0x18a   :  { %1214 = vmatpush.msrb.mxu2 %v1072_v51  ;;  %3193 = vmatmul.msk.f32.gmra.mxu0 %vm223_vm1, %v7510_v1  ;;  %v972_v51 = vmax.f32 %v7516_v45, %v556_v32  ;;  %v1074_v27 = vmax.f32 %v994_v53, 0.0  ;;  %v967_v32 = vmax.f32 %v7518_v43, %v4759_v40  ;;  %v7522_v45 = vld [vmem:[#allocation17_spill] sm:$0xff]  ;;  %v7523_v40 = vld [vmem:[#allocation58_spill] sm:$0xff] }
 0x18b   :  { %1286 = vmatpush.msrb.mxu1 %v7513_v12  ;;  %1360 = vmatpush.msrb.mxu3 %v1121_v0  ;;  %v984_v0 = vadd.f32 %v904_v58, %v4617_v46  ;;  %v7520_v58 = vmax.f32 %v4484_v54, 0.0  ;;  %v1069_v12 = vmax.f32 %v989_v41, 0.0 }
 0x18c   :  { %1215 = vmatpush.msrb.mxu2 %v1067_v8  ;;  %3222 = vmatmul.msk.f32.gmra.mxu3 %vm1141_vm2, %v4800_v59  ;;  %v7519_v8 = vld [vmem:[#allocation59_spill] sm:$0xff]  ;;  %v1047_v41 = vadd.f32 %v967_v32, %v4767_v4 }
 0x18d   :  { %1287 = vmatpush.msrb.mxu1 %v1089_v48  ;;  %1361 = vmatpush.msrb.mxu3 %v7515_v2  ;;  %v1052_v2 = vadd.f32 %v972_v51, %v4727_v28  ;;  %v1064_v54 = vmax.f32 %v984_v0, 0.0 }
 0x18e   :  { %1216 = vmatpush.msrb.mxu2 %v1062_v62  ;;  %v782_v9 = vpop.f32.mrf.mxu3  ;;  %3209 = vmatmul.msk.f32.gmra.mxu1 %vm1141_vm2, %v4849_v24  ;;  %v962_v62 = vmax.f32 %v7521_v33, %v4671_v31  ;;  %v7526_v31 = vld [vmem:[#allocation56_spill] sm:$0xff] }
 0x18f   :  { %1288 = vmatpush.msrb.mxu1 %v1084_v23  ;;  %1362 = vmatpush.msrb.mxu3 %v7517_v10  ;;  %v559_v57 = vpop.f32.mrf.mxu1  ;;  %v4867_v1 = vpop.f32.mrf.mxu0  ;;  %v974_v10 = vmax.f32 %v7523_v40, %v782_v9  ;;  %v969_v51 = vmax.f32 %v7526_v31, %v4820_v63  ;;  %v1132_v0 = vmax.f32 %v1052_v2, 0.0  ;;  %v7530_v63 = vmax.f32 %v4534_v11, 0.0 }
 0x190   :  { %v977_v7 = vmax.f32 %v7519_v8, %v559_v57  ;;  %3214 = vmatmul.msk.f32.vlgmr.msrb.gmra.mxu2 %vm1141_vm2, %v4718_v26  ;;  %v7524_v57 = vmax.f32 %v4493_v35, 0.0  ;;  %v7527_v8 = vmax.f32 %v4514_v17, 0.0  ;;  %v1042_v9 = vadd.f32 %v962_v62, %v4787_v16 }
 0x191   :  { %1289 = vmatpush.msrb.mxu1 %v1079_v34  ;;  %1363 = vmatpush.msrb.mxu3 %v7520_v58  ;;  %v4885_v34 = vld [vmem:[#allocation2 + $0x18] sm:$0xff]  ;;  %v1049_v62 = vadd.f32 %v969_v51, %v4767_v4  ;;  %v7536_v31 = vmax.f32 %v4605_v6, 0.0  ;;  %v7537_v51 = vld [vmem:[#allocation23_spill] sm:$0xff]  ;;  %v7542_v6 = vmax.f32 %v4705_v39, 0.0  ;;  %v7547_v39 = vmax.f32 %v4753_v22, 0.0 }
 0x192   :  { %v1057_v53 = vadd.f32 %v977_v7, %v4700_v55  ;;  %3194 = vmatmul.msk.f32.gmra.mxu0 %vm223_vm1, %v7522_v45  ;;  %7525 = vst [vmem:[#allocation10_spill] sm:$0xff] %v4885_v34  ;;  %v1054_v7 = vadd.f32 %v974_v10, %v4727_v28  ;;  %v7529_v58 = vld [vmem:[#allocation61_spill] sm:$0xff]  ;;  %v1122_v11 = vmax.f32 %v1042_v9, 0.0  ;;  %v7533_v10 = vmax.f32 %v4575_v42, 0.0  ;;  %v4936_v9 = vld [vmem:[#allocation2 + $0x28] sm:$0xff] }
 0x193   :  { %1290 = vmatpush.msrb.mxu1 %v1074_v27  ;;  %1364 = vmatpush.msrb.mxu3 %v7524_v57  ;;  %v7528_v27 = vld [vmem:[#allocation53_spill] sm:$0xff]  ;;  %v7535_v42 = vmax.f32 %v4628_v5, 0.0  ;;  %7539 = vst [vmem:[#allocation31_spill] sm:$0xff] %v4936_v9  ;;  %v7540_v5 = vmax.f32 %v4695_v15, 0.0  ;;  %v7544_v15 = vmax.f32 %v4724_v60, 0.0  ;;  %v7550_v60 = vmax.f32 %v4776_v30, 0.0 }
 0x194   :  { %v1137_v43 = vmax.f32 %v1057_v53, 0.0  ;;  %3223 = vmatmul.msk.f32.gmra.mxu3 %vm1141_vm2, %v4849_v24  ;;  %v964_v32 = vmax.f32 %v7528_v27, %v4744_v19  ;;  %v7531_v19 = vmax.f32 %v4551_v37, 0.0  ;;  %v7532_v53 = vld [vmem:[#allocation20_spill] sm:$0xff]  ;;  %v1134_v57 = vmax.f32 %v1054_v7, 0.0  ;;  %v7546_v27 = vld [vmem:[#allocation26_spill] sm:$0xff] }
 0x195   :  { %1291 = vmatpush.msrb.mxu1 %v1069_v12  ;;  %1365 = vmatpush.msrb.mxu3 %v7527_v8  ;;  %v1127_v12 = vmax.f32 %v1047_v41, 0.0  ;;  %v1129_v37 = vmax.f32 %v1049_v62, 0.0  ;;  %v7538_v8 = vmax.f32 %v4639_v25, 0.0  ;;  %v7543_v25 = vmax.f32 %v4678_v18, 0.0  ;;  %v4964_v18 = vld [vmem:[#allocation2 + $0x30] sm:$0x3] }
 0x196   :  { %v785_v35 = vpop.f32.mrf.mxu3  ;;  %3210 = vmatmul.msk.f32.gmra.mxu1 %vm1141_vm2, %v4885_v34  ;;  %v1044_v45 = vadd.f32 %v964_v32, %v4787_v16  ;;  %v7548_v32 = vmax.f32 %v4734_v14, 0.0  ;;  %7549 = vst [vmem:[#allocation45_spill] sm:$0xff] %v4964_v18  ;;  %v7552_v22 = vmax.f32 %v4795_v56, 0.0  ;;  %v7553_v14 = vld [vmem:[#allocation29_spill] sm:$0xff] }
 0x197   :  { %v979_v33 = vmax.f32 %v7529_v58, %v785_v35  ;;  %1292 = vmatpush.msrb.mxu1 %v1064_v54  ;;  %1366 = vmatpush.msrb.mxu3 %v7530_v63  ;;  %v4903_v17 = vpop.f32.mrf.mxu0  ;;  %v4918_v54 = vld [vmem:[#allocation2 + $0x20] sm:$0xff]  ;;  %v7541_v35 = vmax.f32 %v4656_v52, 0.0  ;;  %v7545_v52 = vmax.f32 %v4710_v38, 0.0  ;;  %v7551_v38 = vmax.f32 %v4750_v3, 0.0  ;;  %v7554_v3 = vld [vmem:[#allocation32_spill] sm:$0xff]  ;;  %v3280_v62 = vld [vmem:[%s7171_s0 + $0x68] sm:$0xff] }
 0x198   :  { %3215 = vmatmul.msk.f32.gmra.mxu2 %vm1141_vm2, %v4800_v59  ;;  %7534 = vst [vmem:[#allocation75_spill] sm:$0xff] %v4918_v54  ;;  %v7557_v58 = vld [vmem:[#allocation40_spill] sm:$0xff]  ;;  %v3285_v63 = vld [vmem:[%s7171_s0 + $0x90] sm:$0x3] }
 0x199   :  { %1395 = vmatpush.msra.mxu1 %v1137_v43  ;;  %v1059_v2 = vadd.f32 %v979_v33, %v4700_v55  ;;  %1367 = vmatpush.msrb.mxu3 %v7531_v19  ;;  %v1124_v43 = vmax.f32 %v1044_v45, 0.0  ;;  %v7559_v19 = vld [vmem:[#allocation47_spill] sm:$0xff] }
 0x19a   :  { %3195 = vmatmul.msk.f32.gmra.mxu0 %vm223_vm1, %v7532_v53 }
 0x19b   :  { %1396 = vmatpush.msra.mxu1 %v1132_v0  ;;  %v1139_v40 = vmax.f32 %v1059_v2, 0.0  ;;  %1368 = vmatpush.msrb.mxu3 %v7533_v10 }
 0x19c   :  { %3224 = vmatmul.msk.f32.gmra.mxu3 %vm1141_vm2, %v4885_v34  ;;  %3386 = vmatpush.msk.msra.mxu0 %vm320_vm0, %v3285_v63 }
 0x19d   :  { %1397 = vmatpush.msra.mxu1 %v1127_v12  ;;  %1471 = vmatpush.msra.mxu3 %v1139_v40  ;;  %v7558_v12 = vld [vmem:[#allocation43_spill] sm:$0xff] }
 0x19e   :  { %3211 = vmatmul.msk.f32.gmra.mxu1 %vm1141_vm2, %v4918_v54  ;;  %2065 = vmatpush.msra.mxu0 %v3280_v62  ;;  %v5065_v40 = vld [vmem:[%s7172_s1 + $0xf8] sm:$0xff] }
 0x19f   :  { %1398 = vmatpush.msra.mxu1 %v1122_v11  ;;  %1472 = vmatpush.msra.mxu3 %v1134_v57  ;;  %v4922_v41 = vpop.f32.mrf.mxu0  ;;  %v5052_v11 = vld [vmem:[%s7172_s1 + $0xf0] sm:$0xff]  ;;  %7561 = vst [vmem:[#allocation41_spill] sm:$0xff] %v5065_v40  ;;  %v5078_v57 = vld [vmem:[%s7172_s1] sm:$0xff] }
 0x1a0   :  { %3216 = vmatmul.msk.f32.gmra.mxu2 %vm1141_vm2, %v4849_v24  ;;  %7560 = vst [vmem:[#allocation49_spill] sm:$0xff] %v5052_v11 }
 0x1a1   :  { %1399 = vmatpush.msra.mxu1 %v7535_v42  ;;  %1473 = vmatpush.msra.mxu3 %v1129_v37  ;;  %7562 = vst [vmem:[#allocation73_spill] sm:$0xff] %v5078_v57  ;;  %v5093_v42 = vld [vmem:[%s7172_s1 + $0x8] sm:$0xff] }
 0x1a2   :  { %3196 = vmatmul.msk.f32.gmra.mxu0 %vm223_vm1, %v7537_v51  ;;  %7563 = vst [vmem:[#allocation28_spill] sm:$0xff] %v5093_v42 }
 0x1a3   :  { %1400 = vmatpush.msra.mxu1 %v7536_v31  ;;  %1474 = vmatpush.msra.mxu3 %v1124_v43 }
 0x1a4   :  { %3225 = vmatmul.msk.f32.gmra.mxu3 %vm1141_vm2, %v4918_v54 }
 0x1a5   :  { %1401 = vmatpush.msra.mxu1 %v7538_v8  ;;  %1475 = vmatpush.msra.mxu3 %v7540_v5  ;;  %v3283_v5 = vld [vmem:[%s7171_s0 + $0x80] sm:$0x3] }
 0x1a6   :  { %3212 = vmatmul.msk.f32.gmra.mxu1 %vm1141_vm2, %v4936_v9 }
 0x1a7   :  { %1402 = vmatpush.msra.mxu1 %v7541_v35  ;;  %1476 = vmatpush.msra.mxu3 %v7542_v6  ;;  %v4946_v0 = vpop.f32.mrf.mxu0  ;;  %v5113_v35 = vld [vmem:[%s7172_s1 + $0x10] sm:$0xff] }
 0x1a8   :  { %3217 = vmatmul.msk.f32.gmra.mxu2 %vm1141_vm2, %v4885_v34  ;;  %7565 = vst [vmem:[#allocation25_spill] sm:$0xff] %v5113_v35 }
 0x1a9   :  { %1403 = vmatpush.msra.mxu1 %v7543_v25  ;;  %1477 = vmatpush.msra.mxu3 %v7544_v15  ;;  %v3278_v25 = vld [vmem:[%s7171_s0 + $0x58] sm:$0xff] }
 0x1aa   :  { %3197 = vmatmul.msk.f32.gmra.mxu0 %vm223_vm1, %v7546_v27  ;;  %v5134_v27 = vld [vmem:[%s7172_s1 + $0x18] sm:$0xff] }
 0x1ab   :  { %1404 = vmatpush.msra.mxu1 %v7545_v52  ;;  %1478 = vmatpush.msra.mxu3 %v7547_v39  ;;  %7567 = vst [vmem:[#allocation83_spill] sm:$0xff] %v5134_v27 }
 0x1ac   :  { %3226 = vmatmul.msk.f32.gmra.mxu3 %vm1141_vm2, %v4936_v9 }
 0x1ad   :  { %1405 = vmatpush.msra.mxu1 %v7548_v32  ;;  %1479 = vmatpush.msra.mxu3 %v7550_v60 }
 0x1ae   :  { %3213 = vmatmul.msk.f32.gmra.mxu1 %vm1141_vm2, %v4964_v18 }
 0x1af   :  { %1406 = vmatpush.msra.mxu1 %v7551_v38  ;;  %1480 = vmatpush.msra.mxu3 %v7552_v22  ;;  %v4974_v7 = vpop.f32.mrf.mxu0  ;;  %v5151_v38 = vld [vmem:[%s7172_s1 + $0x20] sm:$0xff] }
 0x1b0   :  { %3218 = vmatmul.msk.f32.gmra.mxu2 %vm1141_vm2, %v4918_v54  ;;  %7569 = vst [vmem:[#allocation6_spill] sm:$0xff] %v5151_v38 }
 0x1b1   :  { %1481 = vmatpush.msra.mxu3 %v1089_v48  ;;  %v7556_v48 = vld [vmem:[#allocation38_spill] sm:$0xff] }
 0x1b2   :  { %3198 = vmatmul.msk.f32.gmra.mxu0 %vm223_vm1, %v7553_v14 }
 0x1b3   :  { %1482 = vmatpush.msra.mxu3 %v1084_v23 }
 0x1b4   :  { %3227 = vmatmul.msk.f32.gmra.mxu3 %vm1141_vm2, %v4964_v18 }
 0x1b6   :  { %3228 = vmatmul.msk.f32.vlgmr.msrb.gmra.mxu1 %vm1141_vm2, %v4718_v26 }
 0x1b7   :  { %v4988_v30 = vpop.f32.mrf.mxu0 }
 0x1b8   :  { %3219 = vmatmul.msk.f32.gmra.mxu2 %vm1141_vm2, %v4936_v9 }
 0x1ba   :  { %3199 = vmatmul.msk.f32.gmra.mxu0 %vm223_vm1, %v7554_v3 }
 0x1bc   :  { %3242 = vmatmul.msk.f32.vlgmr.msrb.gmra.mxu3 %vm1141_vm2, %v4718_v26 }
 0x1bd   :  { %3320 = vmatpush.msk.msrb.mxu3 %vm320_vm0, %v3283_v5 }
 0x1be   :  { %3229 = vmatmul.msk.f32.gmra.mxu1 %vm1141_vm2, %v4800_v59 }
 0x1bf   :  { %v4998_v56 = vpop.f32.mrf.mxu0  ;;  %1839 = vmatpush.msrb.mxu3 %v3278_v25  ;;  %v5198_v25 = vld [vmem:[%s7172_s1 + $0x38] sm:$0xff] }
 0x1c0   :  { %3220 = vmatmul.msk.f32.gmra.mxu2 %vm1141_vm2, %v4964_v18 }
 0x1c2   :  { %3200 = vmatmul.msk.f32.gmra.mxu0 %vm223_vm1, %v7555_v36  ;;  %v5168_v36 = vld [vmem:[%s7172_s1 + $0x28] sm:$0xff] }
 0x1c4   :  { %3243 = vmatmul.msk.f32.gmra.mxu3 %vm1141_vm2, %v4800_v59 }
 0x1c6   :  { %3230 = vmatmul.msk.f32.gmra.mxu1 %vm1141_vm2, %v4849_v24 }
 0x1c7   :  { %v5008_v20 = vpop.f32.mrf.mxu0 }
 0x1ca   :  { %3201 = vmatmul.msk.f32.gmra.mxu0 %vm223_vm1, %v7556_v48 }
 0x1cc   :  { %3244 = vmatmul.msk.f32.gmra.mxu3 %vm1141_vm2, %v4849_v24 }
 0x1ce   :  { %3231 = vmatmul.msk.f32.gmra.mxu1 %vm1141_vm2, %v4885_v34 }
 0x1cf   :  { %v5016_v23 = vpop.f32.mrf.mxu0 }
 0x1d2   :  { %3202 = vmatmul.msk.f32.gmra.mxu0 %vm223_vm1, %v7557_v58 }
 0x1d4   :  { %3245 = vmatmul.msk.f32.gmra.mxu3 %vm1141_vm2, %v4885_v34 }
 0x1d6   :  { %3232 = vmatmul.msk.f32.gmra.mxu1 %vm1141_vm2, %v4918_v54 }
 0x1d7   :  { %v5024_v33 = vpop.f32.mrf.mxu0 }
 0x1da   :  { %3203 = vmatmul.msk.f32.gmra.mxu0 %vm223_vm1, %v7558_v12  ;;  %v5183_v12 = vld [vmem:[%s7172_s1 + $0x30] sm:$0xff] }
 0x1dc   :  { %3246 = vmatmul.msk.f32.gmra.mxu3 %vm1141_vm2, %v4918_v54 }
 0x1de   :  { %3233 = vmatmul.msk.f32.gmra.mxu1 %vm1141_vm2, %v4936_v9 }
 0x1df   :  { %v5039_v2 = vpop.f32.mrf.mxu0 }
 0x1e2   :  { %3204 = vmatmul.msk.f32.gmra.mxu0 %vm223_vm1, %v7559_v19 }
 0x1e4   :  { %3247 = vmatmul.msk.f32.gmra.mxu3 %vm1141_vm2, %v4936_v9 }
 0x1e6   :  { %3234 = vmatmul.msk.f32.gmra.mxu1 %vm1141_vm2, %v4964_v18 }
 0x1e7   :  { %v5047_v53 = vpop.f32.mrf.mxu0 }
 0x1ea   :  { %3205 = vmatmul.msk.f32.gmra.mxu0 %vm223_vm1, %v5052_v11 }
 0x1ec   :  { %3248 = vmatmul.msk.f32.gmra.mxu3 %vm1141_vm2, %v4964_v18 }
 0x1ee   :  { %3249 = vmatmul.msk.f32.vlgmr.msra.gmra.mxu1 %vm1141_vm2, %v4718_v26 }
 0x1ef   :  { %v5060_v45 = vpop.f32.mrf.mxu0 }
 0x1f2   :  { %3206 = vmatmul.msk.f32.gmra.mxu0 %vm223_vm1, %v5065_v40 }
 0x1f4   :  { %3263 = vmatmul.msk.f32.vlgmr.msra.gmra.mxu3 %vm1141_vm2, %v4718_v26 }
 0x1f6   :  { %3250 = vmatmul.msk.f32.gmra.mxu1 %vm1141_vm2, %v4800_v59 }
 0x1f7   :  { %v5073_v10 = vpop.f32.mrf.mxu0 }
 0x1fa   :  { %3387 = vmatmul.msk.f32.vlgmr.msra.gmra.mxu0 %vm223_vm1, %v5078_v57 }
 0x1fb   :  { %v5082_v37 = vpop.f32.mrf.mxu1 }
 0x1fc   :  { %3264 = vmatmul.msk.f32.gmra.mxu3 %vm1141_vm2, %v4800_v59 }
 0x1fe   :  { %3251 = vmatmul.msk.f32.gmra.mxu1 %vm1141_vm2, %v4849_v24 }
 0x1ff   :  { %v5088_v43 = vpop.f32.mrf.mxu0 }
 0x202   :  { %3388 = vmatmul.msk.f32.gmra.mxu0 %vm223_vm1, %v5093_v42 }
 0x203   :  { %v5097_v31 = vpop.f32.mrf.mxu1 }
 0x204   :  { %3265 = vmatmul.msk.f32.gmra.mxu3 %vm1141_vm2, %v4849_v24 }
 0x206   :  { %3252 = vmatmul.msk.f32.gmra.mxu1 %vm1141_vm2, %v4885_v34 }
 0x207   :  { %v5103_v51 = vpop.f32.mrf.mxu3  ;;  %v5105_v8 = vpop.f32.mrf.mxu0 }
 0x208   :  { %7564 = vst [vmem:[#allocation71_spill] sm:$0xff] %v5103_v51 }
 0x20a   :  { %3389 = vmatmul.msk.f32.gmra.mxu0 %vm223_vm1, %v5113_v35 }
 0x20b   :  { %v5118_v6 = vpop.f32.mrf.mxu1 }
 0x20c   :  { %3266 = vmatmul.msk.f32.gmra.mxu3 %vm1141_vm2, %v4885_v34 }
 0x20e   :  { %3253 = vmatmul.msk.f32.gmra.mxu1 %vm1141_vm2, %v4918_v54 }
 0x20f   :  { %v5127_v15 = vpop.f32.mrf.mxu3  ;;  %v5129_v52 = vpop.f32.mrf.mxu0 }
 0x210   :  { %7566 = vst [vmem:[#allocation7_spill] sm:$0xff] %v5127_v15 }
 0x212   :  { %3390 = vmatmul.msk.f32.gmra.mxu0 %vm223_vm1, %v5134_v27 }
 0x213   :  { %v5138_v39 = vpop.f32.mrf.mxu1 }
 0x214   :  { %3267 = vmatmul.msk.f32.gmra.mxu3 %vm1141_vm2, %v4918_v54 }
 0x216   :  { %3254 = vmatmul.msk.f32.gmra.mxu1 %vm1141_vm2, %v4936_v9 }
 0x217   :  { %v5144_v32 = vpop.f32.mrf.mxu3  ;;  %v5146_v60 = vpop.f32.mrf.mxu0 }
 0x218   :  { %7568 = vst [vmem:[#allocation39_spill] sm:$0xff] %v5144_v32 }
 0x21a   :  { %3391 = vmatmul.msk.f32.gmra.mxu0 %vm223_vm1, %v5151_v38 }
 0x21b   :  { %v5155_v22 = vpop.f32.mrf.mxu1 }
 0x21c   :  { %3268 = vmatmul.msk.f32.gmra.mxu3 %vm1141_vm2, %v4936_v9 }
 0x21e   :  { %3255 = vmatmul.msk.f32.gmra.mxu1 %vm1141_vm2, %v4964_v18 }
 0x21f   :  { %v5161_v14 = vpop.f32.mrf.mxu3  ;;  %v5163_v3 = vpop.f32.mrf.mxu0 }
 0x220   :  { %7570 = vst [vmem:[#allocation50_spill] sm:$0xff] %v5161_v14 }
 0x222   :  { %3392 = vmatmul.msk.f32.gmra.mxu0 %vm223_vm1, %v5168_v36 }
 0x223   :  { %v5172_v48 = vpop.f32.mrf.mxu1 }
 0x224   :  { %3269 = vmatmul.msk.f32.gmra.mxu3 %vm1141_vm2, %v4964_v18 }
 0x227   :  { %v5176_v58 = vpop.f32.mrf.mxu3  ;;  %v5178_v63 = vpop.f32.mrf.mxu0 }
 0x228   :  { %7571 = vst [vmem:[#allocation79_spill] sm:$0xff] %v5176_v58 }
 0x22a   :  { %3393 = vmatmul.msk.f32.gmra.mxu0 %vm223_vm1, %v5183_v12 }
 0x22b   :  { %v5187_v62 = vpop.f32.mrf.mxu1 }
 0x22c   :  { %3321 = vmatmul.msk.f32.vlgmr.msrb.gmra.mxu3 %vm223_vm1, %v5078_v57  ;;  %v5226_v57 = vld [vmem:[%s7172_s1 + $0x48] sm:$0xff] }
 0x22f   :  { %v5191_v19 = vpop.f32.mrf.mxu3  ;;  %v5193_v5 = vpop.f32.mrf.mxu0 }
 0x230   :  { %7572 = vst [vmem:[#allocation36_spill] sm:$0xff] %v5191_v19  ;;  %v5211_v19 = vld [vmem:[%s7172_s1 + $0x40] sm:$0xff] }
 0x232   :  { %3394 = vmatmul.msk.f32.gmra.mxu0 %vm223_vm1, %v5198_v25 }
 0x233   :  { %v5202_v58 = vpop.f32.mrf.mxu1 }
 0x234   :  { %3322 = vmatmul.msk.f32.gmra.mxu3 %vm223_vm1, %v5093_v42  ;;  %v5220_v42 = vpop.permute.xlu1 %180 }
 0x237   :  { %v5206_v14 = vpop.f32.mrf.mxu3  ;;  %v877_v32 = vpop.f32.mrf.mxu0 }
 0x238   :  { %7573 = vst [vmem:[#allocation69_spill] sm:$0xff] %v5206_v14 }
 0x23a   :  { %3395 = vmatmul.msk.f32.gmra.mxu0 %vm223_vm1, %v5211_v19 }
 0x23b   :  { %v5215_v15 = vpop.f32.mrf.mxu1 }
 0x23c   :  { %7574 = vst [vmem:[#allocation22_spill] sm:$0xff] %v5215_v15  ;;  %3323 = vmatmul.msk.f32.gmra.mxu3 %vm223_vm1, %v5113_v35  ;;  %v5238_v35 = vpop.permute.xlu2 %185 }
 0x23f   :  { %v1370_v51 = vpop.f32.mrf.mxu3  ;;  %v880_v40 = vpop.f32.mrf.mxu0 }
 0x240   :  { %v1543_v11 = vmax.f32 %v5082_v37, %v1370_v51  ;;  %v950_v34 = vmax.f32 %v4998_v56, %v880_v40  ;;  %v5274_v56 = vld [vmem:[%s7172_s1 + $0x58] sm:$0xff] }
 0x242   :  { %v1578_v14 = vadd.f32 %v1543_v11, %v5220_v42  ;;  %3396 = vmatmul.msk.f32.gmra.mxu0 %vm223_vm1, %v5226_v57 }
 0x243   :  { %v5230_v9 = vpop.f32.mrf.mxu1 }
 0x244   :  { %v1613_v18 = vmax.f32 %v1578_v14, 0.0  ;;  %7575 = vst [vmem:[#allocation76_spill] sm:$0xff] %v5230_v9  ;;  %3324 = vmatmul.msk.f32.gmra.mxu3 %vm223_vm1, %v5134_v27  ;;  %v5244_v14 = vld [vmem:[%s7172_s1 + $0x50] sm:$0xff]  ;;  %v5248_v27 = vpop.f32.mrf.mxu2 }
 0x245   :  { %7576 = vst [vmem:[#allocation33_spill] sm:$0xff] %v5244_v14 }
 0x246   :  { %1648 = vst [vmem:[%s7176_s5] sm:$0xff] %v1613_v18 }
 0x247   :  { %v1373_v37 = vpop.f32.mrf.mxu3  ;;  %v883_v11 = vpop.f32.mrf.mxu0 }
 0x248   :  { %v1548_v51 = vmax.f32 %v5097_v31, %v1373_v37  ;;  %v955_v31 = vmax.f32 %v5008_v20, %v883_v11  ;;  %v940_v20 = vmax.f32 %v4974_v7, %v5193_v5  ;;  %v930_v11 = vmax.f32 %v4922_v41, %v5163_v3 }
 0x24a   :  { %v1583_v54 = vadd.f32 %v1548_v51, %v5238_v35  ;;  %3397 = vmatmul.msk.f32.gmra.mxu0 %vm223_vm1, %v5244_v14 }
 0x24b   :  { %v5250_v18 = vpop.f32.mrf.mxu1 }
 0x24c   :  { %v1618_v9 = vmax.f32 %v1583_v54, 0.0  ;;  %7577 = vst [vmem:[#allocation46_spill] sm:$0xff] %v5250_v18  ;;  %3325 = vmatmul.msk.f32.gmra.mxu3 %vm223_vm1, %v5151_v38  ;;  %v5261_v54 = vpop.permute.xlu0 %190  ;;  %v945_v18 = vmax.f32 %v4988_v30, %v877_v32  ;;  %v5265_v38 = vadd.f32 %v955_v31, %v4459_v61  ;;  %v5281_v30 = vadd.f32 %v950_v34, %v4439_v21  ;;  %v5312_v31 = vpop.permute.xlu1 %195 }
 0x24d   :  { %7578 = vst [vmem:[#allocation67_spill] sm:$0xff] %v5261_v54 }
 0x24e   :  { %1654 = vst [vmem:[%s7176_s5 + $0x28] sm:$0xff] %v1618_v9  ;;  %v5293_v32 = vadd.f32 %v945_v18, %v4455_v50  ;;  %v7254_v34 = vmax.f32 %v5265_v38, 0.0  ;;  %v7253_v18 = vmax.f32 %v5281_v30, 0.0 }
 0x24f   :  { %v1376_v37 = vpop.f32.mrf.mxu3  ;;  %v886_v51 = vpop.f32.mrf.mxu0  ;;  %7580 = vst [vmem:[#allocation19_spill] sm:$0xff] %v5312_v31 }
 0x250   :  { %v1553_v15 = vmax.f32 %v5118_v6, %v1376_v37  ;;  %v960_v24 = vmax.f32 %v5016_v23, %v886_v51  ;;  %v925_v37 = vmax.f32 %v4903_v17, %v5146_v60  ;;  %v7581_v51 = vld [vmem:[#allocation82_spill] sm:$0xff]  ;;  %v7256_v3 = vmax.f32 %v5293_v32, 0.0  ;;  %v7582_v60 = vld [vmem:[#allocation85_spill] sm:$0xff] }
 0x251   :  { %v920_v17 = vmax.f32 %v4867_v1, %v5129_v52 }
 0x252   :  { %v1588_v14 = vadd.f32 %v1553_v15, %v5261_v54  ;;  %v5269_v9 = vadd.f32 %v960_v24, %v4445_v49  ;;  %3398 = vmatmul.msk.f32.gmra.mxu0 %vm223_vm1, %v5274_v56  ;;  %v5288_v24 = vpop.f32.mrf.mxu2  ;;  %v935_v15 = vmax.f32 %v4946_v0, %v5178_v63 }
 0x253   :  { %v5284_v6 = vpop.f32.mrf.mxu1 }
 0x254   :  { %v1623_v23 = vmax.f32 %v1588_v14, 0.0  ;;  %v7255_v40 = vmax.f32 %v5269_v9, 0.0  ;;  %3326 = vmatmul.msk.f32.gmra.mxu3 %vm223_vm1, %v5168_v36  ;;  %v7579_v14 = vld [vmem:[#allocation78_spill] sm:$0xff] }
 0x255   :  { %v5306_v0 = vadd.f32 %v940_v20, %v7579_v14  ;;  %v5333_v20 = vadd.f32 %v930_v11, %v7582_v60 }
 0x256   :  { %1659 = vst [vmem:[%s7176_s5 + $0x50] sm:$0xff] %v1623_v23  ;;  %1319 = vmatpush.msra.mxu2 %v7255_v40  ;;  %v5317_v23 = vadd.f32 %v935_v15, %v7581_v51 }
 0x257   :  { %v1379_v7 = vpop.f32.mrf.mxu3  ;;  %v5301_v5 = vpop.f32.mrf.mxu0 }
 0x258   :  { %v1558_v63 = vmax.f32 %v5138_v39, %v1379_v7  ;;  %1320 = vmatpush.msra.mxu2 %v7254_v34  ;;  %v5325_v39 = vld [vmem:[%s7172_s1 + $0x60] sm:$0xff]  ;;  %v7259_v1 = vmax.f32 %v5317_v23, 0.0 }
 0x259   :  { %v7583_v34 = vld [vmem:[#allocation84_spill] sm:$0xff] }
 0x25a   :  { %v1593_v41 = vadd.f32 %v1558_v63, %v5312_v31  ;;  %1321 = vmatpush.msra.mxu2 %v7253_v18  ;;  %3399 = vmatmul.msk.f32.gmra.mxu0 %vm223_vm1, %v5325_v39  ;;  %v7257_v63 = vmax.f32 %v5306_v0, 0.0  ;;  %v915_v18 = vmax.f32 %v4832_v44, %v5105_v8  ;;  %v5345_v40 = vadd.f32 %v925_v37, %v7583_v34  ;;  %v1218_v52 = vpop.f32.mrf.mxu2 }
 0x25b   :  { %v5335_v7 = vpop.f32.mrf.mxu1  ;;  %v1000_v44 = vadd.f32 %v920_v17, %v4509_v29  ;;  %v7258_v37 = vmax.f32 %v5333_v20, 0.0  ;;  %v7588_v17 = vld [vmem:[#allocation55_spill] sm:$0xff] }
 0x25c   :  { %v1628_v15 = vmax.f32 %v1593_v41, 0.0  ;;  %3327 = vmatmul.msk.f32.gmra.mxu3 %vm223_vm1, %v5183_v12  ;;  %1322 = vmatpush.msra.mxu2 %v7256_v3  ;;  %v7584_v3 = vld [vmem:[#allocation5_spill] sm:$0xff]  ;;  %v995_v51 = vadd.f32 %v915_v18, %v4597_v47 }
 0x25d   :  { %v910_v60 = vmax.f32 %v7584_v3, %v5088_v43  ;;  %v5373_v43 = vld [vmem:[%s7172_s1 + $0x68] sm:$0xff]  ;;  %v7587_v3 = vld [vmem:[#allocation11_spill] sm:$0xff] }
 0x25e   :  { %1664 = vst [vmem:[%s7176_s5 + $0x78] sm:$0xff] %v1628_v15  ;;  %1323 = vmatpush.msra.mxu2 %v7257_v63  ;;  %v5362_v15 = vpop.permute.xlu2 %200  ;;  %v7586_v63 = vld [vmem:[#allocation37_spill] sm:$0xff] }
 0x25f   :  { %v1382_v11 = vpop.f32.mrf.mxu3  ;;  %v5353_v41 = vpop.f32.mrf.mxu0  ;;  %7585 = vst [vmem:[#allocation74_spill] sm:$0xff] %v5362_v15  ;;  %v905_v34 = vmax.f32 %v7586_v63, %v5073_v10  ;;  %v978_v10 = vmax.f32 %v7588_v17, %v7587_v3  ;;  %v990_v18 = vadd.f32 %v910_v60, %v4557_v13  ;;  %v7591_v13 = vld [vmem:[#allocation48_spill] sm:$0xff] }
 0x260   :  { %v1563_v8 = vmax.f32 %v5155_v22, %v1382_v11  ;;  %1324 = vmatpush.msra.mxu2 %v7259_v1  ;;  %v7268_v22 = vmax.f32 %v5345_v40, 0.0  ;;  %v7590_v1 = vld [vmem:[#allocation52_spill] sm:$0xff]  ;;  %v968_v50 = vmax.f32 %v7591_v13, %v5288_v24 }
 0x261   :  { %v985_v29 = vadd.f32 %v905_v34, %v4617_v46  ;;  %v1058_v17 = vadd.f32 %v978_v10, %v4700_v55  ;;  %v5406_v10 = vld [vmem:[%s7172_s1 + $0x70] sm:$0xff] }
 0x262   :  { %v1598_v14 = vadd.f32 %v1563_v8, %v5362_v15  ;;  %1325 = vmatpush.msra.mxu2 %v7258_v37  ;;  %3400 = vmatmul.msk.f32.gmra.mxu0 %vm223_vm1, %v5373_v43  ;;  %v1080_v8 = vmax.f32 %v1000_v44, 0.0  ;;  %v7589_v37 = vld [vmem:[#allocation8_spill] sm:$0xff]  ;;  %v1048_v24 = vadd.f32 %v968_v50, %v4767_v4 }
 0x263   :  { %v5381_v11 = vpop.f32.mrf.mxu1  ;;  %v973_v47 = vmax.f32 %v7590_v1, %v7589_v37  ;;  %v1221_v1 = vpop.f32.mrf.mxu2  ;;  %v1065_v13 = vmax.f32 %v985_v29, 0.0 }
 0x264   :  { %v1633_v63 = vmax.f32 %v1598_v14, 0.0  ;;  %3328 = vmatmul.msk.f32.gmra.mxu3 %vm223_vm1, %v5198_v25  ;;  %1326 = vmatpush.msra.mxu2 %v7268_v22  ;;  %v1075_v14 = vmax.f32 %v995_v51, 0.0  ;;  %v1070_v22 = vmax.f32 %v990_v18, 0.0  ;;  %v5397_v37 = vpop.permute.xlu0 %205 }
 0x265   :  { %7592 = vst [vmem:[#allocation30_spill] sm:$0xff] %v5397_v37  ;;  %v1053_v34 = vadd.f32 %v973_v47, %v4727_v28 }
 0x266   :  { %1669 = vst [vmem:[%s7176_s5 + $0xa0] sm:$0xff] %v1633_v63  ;;  %1327 = vmatpush.msra.mxu2 %v1080_v8  ;;  %v7593_v63 = vld [vmem:[#allocation44_spill] sm:$0xff] }
 0x267   :  { %v1385_v60 = vpop.f32.mrf.mxu3  ;;  %v895_v3 = vpop.f32.mrf.mxu0  ;;  %v963_v8 = vmax.f32 %v7593_v63, %v5248_v27  ;;  %v1133_v50 = vmax.f32 %v1053_v34, 0.0  ;;  %v1128_v63 = vmax.f32 %v1048_v24, 0.0 }
 0x268   :  { %v1568_v44 = vmax.f32 %v5172_v48, %v1385_v60  ;;  %1328 = vmatpush.msra.mxu2 %v1075_v14  ;;  %v1138_v48 = vmax.f32 %v1058_v17, 0.0  ;;  %v975_v29 = vmax.f32 %v5047_v53, %v895_v3 }
 0x26a   :  { %v1603_v51 = vadd.f32 %v1568_v44, %v5397_v37  ;;  %1329 = vmatpush.msra.mxu2 %v1070_v22  ;;  %3401 = vmatmul.msk.f32.gmra.mxu0 %vm223_vm1, %v5406_v10  ;;  %v1043_v22 = vadd.f32 %v963_v8, %v4787_v16  ;;  %v5425_v8 = vpop.permute.xlu1 %210  ;;  %v1055_v53 = vadd.f32 %v975_v29, %v4727_v28  ;;  %v7649_v28 = vld [vmem:[#allocation49_spill] sm:$0xff] }
 0x26b   :  { %v1408_v47 = vpop.f32.mrf.mxu1  ;;  %7594 = vst [vmem:[#allocation42_spill] sm:$0xff] %v5425_v8 }
 0x26c   :  { %v1638_v18 = vmax.f32 %v1603_v51, 0.0  ;;  %3329 = vmatmul.msk.f32.gmra.mxu3 %vm223_vm1, %v5211_v19  ;;  %1330 = vmatpush.msra.mxu2 %v1065_v13  ;;  %v1544_v27 = vmax.f32 %v1218_v52, %v1408_v47  ;;  %v970_v52 = vmax.f32 %v5039_v2, %v5353_v41  ;;  %v5433_v2 = vld [vmem:[%s7172_s1 + $0x78] sm:$0xff]  ;;  %v965_v41 = vmax.f32 %v5024_v33, %v5301_v5  ;;  %v7595_v33 = vld [vmem:[#allocation89_spill] sm:$0xff] }
 0x26d   :  { %3235 = vmatmul.msk.f32.vlgmr.msra.gmra.mxu2 %vm1141_vm2, %v4718_v26  ;;  %v7596_v5 = vmax.f32 %v7595_v33, 0.0 }
 0x26e   :  { %1674 = vst [vmem:[%s7176_s5 + $0xc8] sm:$0xff] %v1638_v18  ;;  %1433 = vmatpush.msrb.mxu2 %v1138_v48  ;;  %v1579_v14 = vadd.f32 %v1544_v27, %v5220_v42  ;;  %v1050_v13 = vadd.f32 %v970_v52, %v4767_v4  ;;  %v1135_v27 = vmax.f32 %v1055_v53, 0.0  ;;  %v5770_v4 = vld [vmem:[%s7172_s1 + $0xe8] sm:$0xff] }
 0x26f   :  { %v1388_v60 = vpop.f32.mrf.mxu3  ;;  %v898_v17 = vpop.f32.mrf.mxu0  ;;  %7645 = vst [vmem:[#allocation13_spill] sm:$0xff] %v5770_v4 }
 0x270   :  { %v1573_v44 = vmax.f32 %v5187_v62, %v1388_v60  ;;  %v980_v26 = vmax.f32 %v5060_v45, %v898_v17  ;;  %1434 = vmatpush.msrb.mxu2 %v1133_v50  ;;  %v1614_v51 = vmax.f32 %v1579_v14, 0.0  ;;  %v1123_v45 = vmax.f32 %v1043_v22, 0.0  ;;  %v1224_v62 = vpop.f32.mrf.mxu2  ;;  %v7597_v60 = vld [vmem:[#allocation86_spill] sm:$0xff] }
 0x271   :  { %v1045_v22 = vadd.f32 %v965_v41, %v4787_v16  ;;  %v7598_v17 = vmax.f32 %v7597_v60, 0.0  ;;  %v1130_v52 = vmax.f32 %v1050_v13, 0.0  ;;  %v7603_v13 = vld [vmem:[#allocation33_spill] sm:$0xff] }
 0x272   :  { %v1608_v3 = vadd.f32 %v1573_v44, %v5425_v8  ;;  %v1060_v34 = vadd.f32 %v980_v26, %v4700_v55  ;;  %1435 = vmatpush.msrb.mxu2 %v1128_v63  ;;  %3402 = vmatmul.msk.f32.gmra.mxu0 %vm223_vm1, %v5433_v2  ;;  %1649 = vst [vmem:[%s7176_s5 + $0x8] sm:$0xff] %v1614_v51  ;;  %v7599_v63 = vld [vmem:[#allocation88_spill] sm:$0xff] }
 0x273   :  { %v1411_v18 = vpop.f32.mrf.mxu1  ;;  %v7600_v51 = vmax.f32 %v7599_v63, 0.0  ;;  %v1125_v53 = vmax.f32 %v1045_v22, 0.0  ;;  %v7607_v22 = vmax.f32 %v5269_v9, 0.0  ;;  %v7614_v9 = vmax.f32 %v5281_v30, 0.0 }
 0x274   :  { %v1643_v48 = vmax.f32 %v1608_v3, 0.0  ;;  %v1140_v24 = vmax.f32 %v1060_v34, 0.0  ;;  %1436 = vmatpush.msrb.mxu2 %v1123_v45  ;;  %3330 = vmatmul.msk.f32.gmra.mxu3 %vm223_vm1, %v5226_v57  ;;  %v1549_v47 = vmax.f32 %v1221_v1, %v1411_v18  ;;  %v7601_v45 = vld [vmem:[#allocation90_spill] sm:$0xff]  ;;  %v7604_v18 = vld [vmem:[#allocation60_spill] sm:$0xff]  ;;  %v7617_v30 = vmax.f32 %v5293_v32, 0.0 }
 0x275   :  { %3236 = vmatmul.msk.f32.gmra.mxu2 %vm1141_vm2, %v4800_v59  ;;  %v7602_v41 = vmax.f32 %v7601_v45, 0.0 }
 0x276   :  { %1679 = vst [vmem:[%s7176_s5 + $0xf0] sm:$0x3] %v1643_v48  ;;  %1437 = vmatpush.msrb.mxu2 %v7596_v5  ;;  %1509 = vmatpush.msrb.mxu1 %v1140_v24  ;;  %v1584_v29 = vadd.f32 %v1549_v47, %v5238_v35  ;;  %v7605_v47 = vld [vmem:[#allocation92_spill] sm:$0xff] }
 0x277   :  { %v1484_v50 = vpop.f32.mrf.mxu3  ;;  %v5454_v14 = vpop.f32.mrf.mxu0  ;;  %v7606_v33 = vmax.f32 %v7605_v47, 0.0 }
 0x278   :  { %v1546_v1 = vmax.f32 %v5202_v58, %v1484_v50  ;;  %1438 = vmatpush.msrb.mxu2 %v7598_v17  ;;  %1510 = vmatpush.msrb.mxu1 %v1135_v27  ;;  %v1619_v44 = vmax.f32 %v1584_v29, 0.0  ;;  %v5468_v58 = vld [vmem:[%s7172_s1 + $0x80] sm:$0xff]  ;;  %v1227_v48 = vpop.f32.mrf.mxu2 }
 0x27a   :  { %v1581_v26 = vadd.f32 %v1546_v1, %v5220_v42  ;;  %1439 = vmatpush.msrb.mxu2 %v7600_v51  ;;  %1511 = vmatpush.msrb.mxu1 %v1130_v52  ;;  %1655 = vst [vmem:[%s7176_s5 + $0x30] sm:$0xff] %v1619_v44  ;;  %v7609_v1 = vld [vmem:[#allocation93_spill] sm:$0xff]  ;;  %v7611_v52 = vmax.f32 %v5265_v38, 0.0 }
 0x27b   :  { %3403 = vmatmul.msk.f32.gmra.mxu0 %vm223_vm1, %v5468_v58  ;;  %v1414_v34 = vpop.f32.mrf.mxu1  ;;  %v7610_v60 = vmax.f32 %v7609_v1, 0.0  ;;  %v5504_v51 = vld [vmem:[%s7172_s1 + $0x88] sm:$0xff]  ;;  %v7622_v1 = vmax.f32 %v5333_v20, 0.0  ;;  %v5549_v20 = vld [vmem:[#allocation2] sm:$0xff] }
 0x27c   :  { %v1616_v3 = vmax.f32 %v1581_v26, 0.0  ;;  %1440 = vmatpush.msrb.mxu2 %v7602_v41  ;;  %3331 = vmatmul.msk.f32.gmra.mxu3 %vm223_vm1, %v7603_v13  ;;  %v1554_v24 = vmax.f32 %v1224_v62, %v1414_v34  ;;  %v7608_v62 = vld [vmem:[#allocation22_spill] sm:$0xff]  ;;  %v7612_v26 = vld [vmem:[#allocation95_spill] sm:$0xff] }
 0x27d   :  { %1512 = vmatpush.msrb.mxu1 %v1125_v53  ;;  %3237 = vmatmul.msk.f32.gmra.mxu2 %vm1141_vm2, %v7604_v18  ;;  %v7613_v63 = vmax.f32 %v7612_v26, 0.0  ;;  %v7618_v41 = vld [vmem:[#allocation10_spill] sm:$0xff] }
 0x27e   :  { %1651 = vst [vmem:[%s7176_s5 + $0x18] sm:$0xff] %v1616_v3  ;;  %1441 = vmatpush.msrb.mxu2 %v7606_v33  ;;  %v1589_v5 = vadd.f32 %v1554_v24, %v5261_v54  ;;  %v7615_v3 = vld [vmem:[#allocation80_spill] sm:$0xff] }
 0x27f   :  { %v1487_v27 = vpop.f32.mrf.mxu3  ;;  %1513 = vmatpush.msrb.mxu1 %v7607_v22  ;;  %v5486_v29 = vpop.f32.mrf.mxu0  ;;  %v7616_v34 = vmax.f32 %v7615_v3, 0.0 }
 0x280   :  { %v1551_v50 = vmax.f32 %v7608_v62, %v1487_v27  ;;  %1442 = vmatpush.msrb.mxu2 %v7610_v60  ;;  %v1624_v17 = vmax.f32 %v1589_v5, 0.0  ;;  %v1230_v24 = vpop.f32.mrf.mxu2  ;;  %v7619_v5 = vmax.f32 %v5306_v0, 0.0  ;;  %v7621_v62 = vmax.f32 %v5317_v23, 0.0  ;;  %v5536_v0 = vld [vmem:[%s7172_s1 + $0x90] sm:$0xff] }
 0x281   :  { %1514 = vmatpush.msrb.mxu1 %v7611_v52  ;;  %v7623_v52 = vmax.f32 %v5345_v40, 0.0 }
 0x282   :  { %v1586_v44 = vadd.f32 %v1551_v50, %v5238_v35  ;;  %1443 = vmatpush.msrb.mxu2 %v7613_v63  ;;  %1660 = vst [vmem:[%s7176_s5 + $0x58] sm:$0xff] %v1624_v17 }
 0x283   :  { %1515 = vmatpush.msrb.mxu1 %v7614_v9  ;;  %3404 = vmatmul.msk.f32.gmra.mxu0 %vm223_vm1, %v5504_v51  ;;  %v1417_v53 = vpop.f32.mrf.mxu1 }
 0x284   :  { %v1621_v38 = vmax.f32 %v1586_v44, 0.0  ;;  %1444 = vmatpush.msrb.mxu2 %v7616_v34  ;;  %3332 = vmatmul.msk.f32.gmra.mxu3 %vm223_vm1, %v5274_v56  ;;  %v1559_v45 = vmax.f32 %v1227_v48, %v1417_v53  ;;  %v7620_v48 = vld [vmem:[#allocation76_spill] sm:$0xff]  ;;  %v7624_v44 = vld [vmem:[#allocation75_spill] sm:$0xff] }
 0x285   :  { %1516 = vmatpush.msrb.mxu1 %v7617_v30  ;;  %3238 = vmatmul.msk.f32.gmra.mxu2 %vm1141_vm2, %v7618_v41 }
 0x286   :  { %1657 = vst [vmem:[%s7176_s5 + $0x40] sm:$0xff] %v1621_v38  ;;  %v1594_v47 = vadd.f32 %v1559_v45, %v5312_v31  ;;  %v7625_v38 = vld [vmem:[#allocation46_spill] sm:$0xff]  ;;  %v5564_v45 = vld [vmem:[%s7172_s1 + $0x98] sm:$0xff] }
 0x287   :  { %v1490_v33 = vpop.f32.mrf.mxu3  ;;  %1517 = vmatpush.msrb.mxu1 %v7619_v5  ;;  %v5522_v27 = vpop.f32.mrf.mxu0 }
 0x288   :  { %v1556_v22 = vmax.f32 %v7620_v48, %v1490_v33  ;;  %v1629_v32 = vmax.f32 %v1594_v47, 0.0  ;;  %v1233_v53 = vpop.f32.mrf.mxu2  ;;  %v7626_v33 = vld [vmem:[#allocation31_spill] sm:$0xff] }
 0x289   :  { %1518 = vmatpush.msrb.mxu1 %v7621_v62 }
 0x28a   :  { %v1591_v50 = vadd.f32 %v1556_v22, %v5261_v54  ;;  %1665 = vst [vmem:[%s7176_s5 + $0x80] sm:$0xff] %v1629_v32 }
 0x28b   :  { %1519 = vmatpush.msrb.mxu1 %v7622_v1  ;;  %3405 = vmatmul.msk.f32.gmra.mxu0 %vm223_vm1, %v5536_v0  ;;  %v1420_v23 = vpop.f32.mrf.mxu1 }
 0x28c   :  { %v1626_v60 = vmax.f32 %v1591_v50, 0.0  ;;  %3333 = vmatmul.msk.f32.gmra.mxu3 %vm223_vm1, %v5325_v39  ;;  %v1564_v17 = vmax.f32 %v1230_v24, %v1420_v23 }
 0x28d   :  { %1520 = vmatpush.msrb.mxu1 %v7623_v52  ;;  %3239 = vmatmul.msk.f32.gmra.mxu2 %vm1141_vm2, %v7624_v44 }
 0x28e   :  { %1662 = vst [vmem:[%s7176_s5 + $0x68] sm:$0xff] %v1626_v60  ;;  %3270 = vmatmul.msk.f32.vlgmr.msrb.gmra.mxu1 %vm1141_vm2, %v5549_v20  ;;  %v1599_v26 = vadd.f32 %v1564_v17, %v5362_v15  ;;  %v5588_v60 = vld [vmem:[%s7172_s1 + $0xa0] sm:$0xff]  ;;  %v7627_v17 = vld [vmem:[#allocation45_spill] sm:$0xff] }
 0x28f   :  { %v1493_v63 = vpop.f32.mrf.mxu3  ;;  %v5554_v9 = vpop.f32.mrf.mxu0 }
 0x290   :  { %v1561_v40 = vmax.f32 %v7625_v38, %v1493_v63  ;;  %v1634_v3 = vmax.f32 %v1599_v26, 0.0  ;;  %v1236_v1 = vpop.f32.mrf.mxu2  ;;  %v3284_v38 = vld [vmem:[%s7171_s0 + $0x88] sm:$0x3] }
 0x291   :  { %3353 = vmatpush.msk.msra.mxu1 %vm320_vm0, %v3284_v38 }
 0x292   :  { %v1596_v34 = vadd.f32 %v1561_v40, %v5312_v31  ;;  %1670 = vst [vmem:[%s7176_s5 + $0xa8] sm:$0xff] %v1634_v3 }
 0x293   :  { %3406 = vmatmul.msk.f32.gmra.mxu0 %vm223_vm1, %v5564_v45  ;;  %v1423_v24 = vpop.f32.mrf.mxu1 }
 0x294   :  { %v1631_v30 = vmax.f32 %v1596_v34, 0.0  ;;  %3334 = vmatmul.msk.f32.gmra.mxu3 %vm223_vm1, %v5373_v43  ;;  %v1569_v47 = vmax.f32 %v1233_v53, %v1423_v24  ;;  %v5616_v34 = vld [vmem:[%s7172_s1 + $0xa8] sm:$0xff] }
 0x295   :  { %3240 = vmatmul.msk.f32.gmra.mxu2 %vm1141_vm2, %v7626_v33 }
 0x296   :  { %1667 = vst [vmem:[%s7176_s5 + $0x90] sm:$0xff] %v1631_v30  ;;  %3271 = vmatmul.msk.f32.gmra.mxu1 %vm1141_vm2, %v4800_v59  ;;  %v1604_v5 = vadd.f32 %v1569_v47, %v5397_v37 }
 0x297   :  { %v1496_v48 = vpop.f32.mrf.mxu3  ;;  %v5578_v22 = vpop.f32.mrf.mxu0 }
 0x298   :  { %v1566_v32 = vmax.f32 %v5284_v6, %v1496_v48  ;;  %v1639_v62 = vmax.f32 %v1604_v5, 0.0 }
 0x29a   :  { %v1601_v50 = vadd.f32 %v1566_v32, %v5362_v15  ;;  %1675 = vst [vmem:[%s7176_s5 + $0xd0] sm:$0xff] %v1639_v62  ;;  %v5639_v32 = vld [vmem:[%s7172_s1 + $0xb0] sm:$0xff] }
 0x29b   :  { %3407 = vmatmul.msk.f32.gmra.mxu0 %vm223_vm1, %v5588_v60  ;;  %v1426_v23 = vpop.f32.mrf.mxu1 }
 0x29c   :  { %v1636_v59 = vmax.f32 %v1601_v50, 0.0  ;;  %3335 = vmatmul.msk.f32.gmra.mxu3 %vm223_vm1, %v5406_v10  ;;  %v1574_v6 = vmax.f32 %v1236_v1, %v1426_v23  ;;  %v5645_v50 = vld [vmem:[#allocation2 + $0x8] sm:$0xff] }
 0x29d   :  { %3241 = vmatmul.msk.f32.gmra.mxu2 %vm1141_vm2, %v7627_v17 }
 0x29e   :  { %1672 = vst [vmem:[%s7176_s5 + $0xb8] sm:$0xff] %v1636_v59  ;;  %3272 = vmatmul.msk.f32.gmra.mxu1 %vm1141_vm2, %v7604_v18  ;;  %v1609_v52 = vadd.f32 %v1574_v6, %v5425_v8  ;;  %v5661_v59 = vld [vmem:[%s7172_s1 + $0xb8] sm:$0xff] }
 0x29f   :  { %v1499_v26 = vpop.f32.mrf.mxu3  ;;  %v5602_v63 = vpop.f32.mrf.mxu0 }
 0x2a0   :  { %v1571_v40 = vmax.f32 %v5335_v7, %v1499_v26  ;;  %v1644_v53 = vmax.f32 %v1609_v52, 0.0  ;;  %v3279_v7 = vld [vmem:[%s7171_s0 + $0x60] sm:$0xff]  ;;  %v3282_v52 = vld [vmem:[%s7171_s0 + $0x78] sm:$0x3] }
 0x2a1   :  { %1952 = vmatpush.msra.mxu1 %v3279_v7  ;;  %3287 = vmatpush.msk.msra.mxu2 %vm320_vm0, %v3282_v52  ;;  %v5682_v26 = vld [vmem:[%s7172_s1 + $0xc0] sm:$0xff]  ;;  %v5719_v7 = vld [vmem:[%s7172_s1 + $0xd0] sm:$0xff] }
 0x2a2   :  { %v1606_v3 = vadd.f32 %v1571_v40, %v5397_v37  ;;  %1680 = vst [vmem:[%s7176_s5 + $0xf8] sm:$0x3] %v1644_v53  ;;  %v5702_v53 = vld [vmem:[%s7172_s1 + $0xc8] sm:$0xff] }
 0x2a3   :  { %3408 = vmatmul.msk.f32.gmra.mxu0 %vm223_vm1, %v5616_v34  ;;  %7631 = vst [vmem:[#allocation27_spill] sm:$0xff] %v5702_v53 }
 0x2a4   :  { %v1641_v30 = vmax.f32 %v1606_v3, 0.0  ;;  %3336 = vmatmul.msk.f32.gmra.mxu3 %vm223_vm1, %v5433_v2  ;;  %7634 = vst [vmem:[#allocation62_spill] sm:$0xff] %v5719_v7 }
 0x2a5   :  { %3256 = vmatmul.msk.f32.vlgmr.msrb.gmra.mxu2 %vm1141_vm2, %v5549_v20 }
 0x2a6   :  { %1677 = vst [vmem:[%s7176_s5 + $0xe0] sm:$0xff] %v1641_v30  ;;  %3273 = vmatmul.msk.f32.gmra.mxu1 %vm1141_vm2, %v7618_v41 }
 0x2a7   :  { %v1502_v24 = vpop.f32.mrf.mxu3  ;;  %v5632_v47 = vpop.f32.mrf.mxu0 }
 0x2a8   :  { %v1576_v5 = vmax.f32 %v5381_v11, %v1502_v24 }
 0x2aa   :  { %v1611_v48 = vadd.f32 %v1576_v5, %v5425_v8 }
 0x2ab   :  { %3409 = vmatmul.msk.f32.gmra.mxu0 %vm223_vm1, %v5639_v32 }
 0x2ac   :  { %v1646_v62 = vmax.f32 %v1611_v48, 0.0  ;;  %3337 = vmatmul.msk.f32.gmra.mxu3 %vm223_vm1, %v5468_v58  ;;  %v5736_v48 = vld [vmem:[%s7172_s1 + $0xd8] sm:$0xff] }
 0x2ad   :  { %3257 = vmatmul.msk.f32.gmra.mxu2 %vm1141_vm2, %v5645_v50  ;;  %7637 = vst [vmem:[#allocation70_spill] sm:$0xff] %v5736_v48 }
 0x2ae   :  { %1682 = vst [vmem:[%s7176_s5 + $0x108] sm:$0x3] %v1646_v62  ;;  %3274 = vmatmul.msk.f32.gmra.mxu1 %vm1141_vm2, %v7624_v44 }
 0x2af   :  { %v5654_v11 = vpop.f32.mrf.mxu3  ;;  %v5656_v1 = vpop.f32.mrf.mxu0 }
 0x2b0   :  { %7628 = vst [vmem:[#allocation65_spill] sm:$0xff] %v5654_v11 }
 0x2b3   :  { %3410 = vmatmul.msk.f32.gmra.mxu0 %vm223_vm1, %v5661_v59 }
 0x2b4   :  { %3338 = vmatmul.msk.f32.gmra.mxu3 %vm223_vm1, %v5504_v51 }
 0x2b5   :  { %3258 = vmatmul.msk.f32.gmra.mxu2 %vm1141_vm2, %v7604_v18  ;;  %v3277_v18 = vld [vmem:[%s7171_s0 + $0x50] sm:$0xff] }
 0x2b6   :  { %3275 = vmatmul.msk.f32.gmra.mxu1 %vm1141_vm2, %v7626_v33  ;;  %1726 = vmatpush.msra.mxu2 %v3277_v18  ;;  %v5753_v18 = vld [vmem:[%s7172_s1 + $0xe0] sm:$0xff] }
 0x2b7   :  { %v5671_v23 = vpop.f32.mrf.mxu3  ;;  %v5673_v6 = vpop.f32.mrf.mxu0  ;;  %7641 = vst [vmem:[#allocation21_spill] sm:$0xff] %v5753_v18 }
 0x2b8   :  { %7629 = vst [vmem:[#allocation16_spill] sm:$0xff] %v5671_v23 }
 0x2bb   :  { %3411 = vmatmul.msk.f32.gmra.mxu0 %vm223_vm1, %v5682_v26 }
 0x2bc   :  { %3339 = vmatmul.msk.f32.gmra.mxu3 %vm223_vm1, %v5536_v0 }
 0x2bd   :  { %3259 = vmatmul.msk.f32.gmra.mxu2 %vm1141_vm2, %v7618_v41  ;;  %v7632_v41 = vld [vmem:[#allocation73_spill] sm:$0xff] }
 0x2be   :  { %3276 = vmatmul.msk.f32.gmra.mxu1 %vm1141_vm2, %v7627_v17 }
 0x2bf   :  { %v5695_v38 = vpop.f32.mrf.mxu3  ;;  %v5697_v40 = vpop.f32.mrf.mxu0 }
 0x2c0   :  { %7630 = vst [vmem:[#allocation72_spill] sm:$0xff] %v5695_v38  ;;  %v7652_v38 = vld [vmem:[#allocation41_spill] sm:$0xff] }
 0x2c3   :  { %3412 = vmatmul.msk.f32.gmra.mxu0 %vm223_vm1, %v5702_v53 }
 0x2c4   :  { %3340 = vmatmul.msk.f32.gmra.mxu3 %vm223_vm1, %v5564_v45 }
 0x2c5   :  { %3260 = vmatmul.msk.f32.gmra.mxu2 %vm1141_vm2, %v7624_v44  ;;  %v7635_v44 = vld [vmem:[#allocation28_spill] sm:$0xff] }
 0x2c6   :  { %3354 = vmatmul.msk.f32.vlgmr.msra.gmra.mxu1 %vm223_vm1, %v7632_v41 }
 0x2c7   :  { %v5712_v3 = vpop.f32.mrf.mxu3  ;;  %v5714_v30 = vpop.f32.mrf.mxu0 }
 0x2c8   :  { %7633 = vst [vmem:[#allocation9_spill] sm:$0xff] %v5712_v3 }
 0x2cb   :  { %3413 = vmatmul.msk.f32.gmra.mxu0 %vm223_vm1, %v5719_v7 }
 0x2cc   :  { %3341 = vmatmul.msk.f32.gmra.mxu3 %vm223_vm1, %v5588_v60 }
 0x2cd   :  { %3261 = vmatmul.msk.f32.gmra.mxu2 %vm1141_vm2, %v7626_v33  ;;  %v7638_v33 = vld [vmem:[#allocation25_spill] sm:$0xff] }
 0x2ce   :  { %3355 = vmatmul.msk.f32.gmra.mxu1 %vm223_vm1, %v7635_v44 }
 0x2cf   :  { %v5729_v24 = vpop.f32.mrf.mxu3  ;;  %v5731_v5 = vpop.f32.mrf.mxu0 }
 0x2d0   :  { %7636 = vst [vmem:[#allocation12_spill] sm:$0xff] %v5729_v24 }
 0x2d3   :  { %3414 = vmatmul.msk.f32.gmra.mxu0 %vm223_vm1, %v5736_v48 }
 0x2d4   :  { %3342 = vmatmul.msk.f32.gmra.mxu3 %vm223_vm1, %v5616_v34 }
 0x2d5   :  { %3262 = vmatmul.msk.f32.gmra.mxu2 %vm1141_vm2, %v7627_v17  ;;  %v7642_v17 = vld [vmem:[#allocation83_spill] sm:$0xff] }
 0x2d6   :  { %3356 = vmatmul.msk.f32.gmra.mxu1 %vm223_vm1, %v7638_v33 }
 0x2d7   :  { %v5746_v62 = vpop.f32.mrf.mxu3  ;;  %v5748_v52 = vpop.f32.mrf.mxu0 }
 0x2d8   :  { %7639 = vst [vmem:[#allocation24_spill] sm:$0xff] %v5746_v62 }
 0x2d9   :  { %7640 = vst [vmem:[#allocation68_spill] sm:$0xff] %v5748_v52 }
 0x2db   :  { %3415 = vmatmul.msk.f32.gmra.mxu0 %vm223_vm1, %v5753_v18 }
 0x2dc   :  { %3343 = vmatmul.msk.f32.gmra.mxu3 %vm223_vm1, %v5639_v32 }
 0x2dd   :  { %3288 = vmatmul.msk.f32.vlgmr.msra.gmra.mxu2 %vm223_vm1, %v7632_v41  ;;  %v7646_v41 = vld [vmem:[#allocation6_spill] sm:$0xff] }
 0x2de   :  { %3357 = vmatmul.msk.f32.gmra.mxu1 %vm223_vm1, %v7642_v17 }
 0x2df   :  { %v5763_v16 = vpop.f32.mrf.mxu3  ;;  %v5765_v52 = vpop.f32.mrf.mxu0 }
 0x2e0   :  { %7643 = vst [vmem:[#allocation66_spill] sm:$0xff] %v5763_v16 }
 0x2e1   :  { %7644 = vst [vmem:[#allocation18_spill] sm:$0xff] %v5765_v52 }
 0x2e3   :  { %3416 = vmatmul.msk.f32.gmra.mxu0 %vm223_vm1, %v5770_v4 }
 0x2e4   :  { %3344 = vmatmul.msk.f32.gmra.mxu3 %vm223_vm1, %v5661_v59 }
 0x2e5   :  { %3289 = vmatmul.msk.f32.gmra.mxu2 %vm223_vm1, %v7635_v44 }
 0x2e6   :  { %3358 = vmatmul.msk.f32.gmra.mxu1 %vm223_vm1, %v7646_v41 }
 0x2e7   :  { %v5780_v55 = vpop.f32.mrf.mxu3  ;;  %v5782_v52 = vpop.f32.mrf.mxu0 }
 0x2e8   :  { %7647 = vst [vmem:[#allocation64_spill] sm:$0xff] %v5780_v55 }
 0x2e9   :  { %7648 = vst [vmem:[#allocation15_spill] sm:$0xff] %v5782_v52 }
 0x2eb   :  { %3417 = vmatmul.msk.f32.gmra.mxu0 %vm223_vm1, %v7649_v28 }
 0x2ec   :  { %3345 = vmatmul.msk.f32.gmra.mxu3 %vm223_vm1, %v5682_v26 }
 0x2ed   :  { %3290 = vmatmul.msk.f32.gmra.mxu2 %vm223_vm1, %v7638_v33 }
 0x2ee   :  { %3359 = vmatmul.msk.f32.gmra.mxu1 %vm223_vm1, %v5168_v36 }
 0x2ef   :  { %v5792_v44 = vpop.f32.mrf.mxu3  ;;  %v5794_v11 = vpop.f32.mrf.mxu0 }
 0x2f0   :  { %7650 = vst [vmem:[#allocation57_spill] sm:$0xff] %v5792_v44  ;;  %v1332_v23 = vpop.f32.mrf.mxu2 }
 0x2f1   :  { %7651 = vst [vmem:[#allocation54_spill] sm:$0xff] %v5794_v11 }
 0x2f3   :  { %3418 = vmatmul.msk.f32.gmra.mxu0 %vm223_vm1, %v7652_v38 }
 0x2f4   :  { %3346 = vmatmul.msk.f32.gmra.mxu3 %vm223_vm1, %v5702_v53 }
 0x2f5   :  { %3291 = vmatmul.msk.f32.gmra.mxu2 %vm223_vm1, %v7642_v17 }
 0x2f6   :  { %3360 = vmatmul.msk.f32.gmra.mxu1 %vm223_vm1, %v5183_v12 }
 0x2f7   :  { %v5804_v33 = vpop.f32.mrf.mxu3 }
 0x2f8   :  { %7653 = vst [vmem:[#allocation59_spill] sm:$0xff] %v5804_v33  ;;  %v5806_v52 = vpop.f32.mrf.mxu0  ;;  %v1335_v3 = vpop.f32.mrf.mxu2 }
 0x2fc   :  { %3347 = vmatmul.msk.f32.gmra.mxu3 %vm223_vm1, %v5719_v7 }
 0x2fd   :  { %3292 = vmatmul.msk.f32.gmra.mxu2 %vm223_vm1, %v7646_v41 }
 0x2fe   :  { %3361 = vmatmul.msk.f32.gmra.mxu1 %vm223_vm1, %v5198_v25 }
 0x2ff   :  { %v5814_v11 = vpop.f32.mrf.mxu3 }
 0x300   :  { %v5816_v17 = vpop.f32.mrf.mxu0  ;;  %v1338_v24 = vpop.f32.mrf.mxu2 }
 0x304   :  { %3348 = vmatmul.msk.f32.gmra.mxu3 %vm223_vm1, %v5736_v48 }
 0x305   :  { %3293 = vmatmul.msk.f32.gmra.mxu2 %vm223_vm1, %v5168_v36 }
 0x306   :  { %3362 = vmatmul.msk.f32.gmra.mxu1 %vm223_vm1, %v5211_v19 }
 0x307   :  { %v5824_v7 = vpop.f32.mrf.mxu3 }
 0x308   :  { %v5826_v41 = vpop.f32.mrf.mxu0  ;;  %v1341_v62 = vpop.f32.mrf.mxu2 }
 0x30b   :  { %v1522_v16 = vpop.f32.mrf.mxu1 }
 0x30c   :  { %v1547_v53 = vmax.f32 %v1332_v23, %v1522_v16  ;;  %3349 = vmatmul.msk.f32.gmra.mxu3 %vm223_vm1, %v5753_v18 }
 0x30d   :  { %3294 = vmatmul.msk.f32.gmra.mxu2 %vm223_vm1, %v5183_v12 }
 0x30e   :  { %v1582_v48 = vadd.f32 %v1547_v53, %v5220_v42  ;;  %3363 = vmatmul.msk.f32.gmra.mxu1 %vm223_vm1, %v5226_v57 }
 0x30f   :  { %v5835_v36 = vpop.f32.mrf.mxu3 }
 0x310   :  { %7654 = vst [vmem:[#allocation51_spill] sm:$0xff] %v5835_v36  ;;  %v1617_v55 = vmax.f32 %v1582_v48, 0.0  ;;  %v5837_v44 = vpop.f32.mrf.mxu0  ;;  %v1344_v33 = vpop.f32.mrf.mxu2 }
 0x312   :  { %1653 = vst.msk [vmem:[%s7176_s5 + $0x20] sm:$0xff] %vm1652_vm3, %v1617_v55 }
 0x313   :  { %v1525_v16 = vpop.f32.mrf.mxu1 }
 0x314   :  { %v1552_v23 = vmax.f32 %v1335_v3, %v1525_v16  ;;  %3350 = vmatmul.msk.f32.gmra.mxu3 %vm223_vm1, %v5770_v4 }
 0x315   :  { %3295 = vmatmul.msk.f32.gmra.mxu2 %vm223_vm1, %v5198_v25 }
 0x316   :  { %v1587_v12 = vadd.f32 %v1552_v23, %v5238_v35  ;;  %3364 = vmatmul.msk.f32.gmra.mxu1 %vm223_vm1, %v7603_v13 }
 0x317   :  { %v5850_v53 = vpop.f32.mrf.mxu3 }
 0x318   :  { %7655 = vst [vmem:[#allocation17_spill] sm:$0xff] %v5850_v53  ;;  %v1622_v48 = vmax.f32 %v1587_v12, 0.0  ;;  %v5852_v36 = vpop.f32.mrf.mxu0  ;;  %v1347_v18 = vpop.f32.mrf.mxu2  ;;  %v7656_v53 = vld [vmem:[#allocation71_spill] sm:$0xff] }
 0x31a   :  { %1658 = vst.msk [vmem:[%s7176_s5 + $0x48] sm:$0xff] %vm1652_vm3, %v1622_v48 }
 0x31b   :  { %v1528_v55 = vpop.f32.mrf.mxu1 }
 0x31c   :  { %v1557_v3 = vmax.f32 %v1338_v24, %v1528_v55  ;;  %3351 = vmatmul.msk.f32.gmra.mxu3 %vm223_vm1, %v7649_v28  ;;  %v3286_v28 = vld [vmem:[%s7171_s0 + $0x98] sm:$0x3] }
 0x31d   :  { %3296 = vmatmul.msk.f32.gmra.mxu2 %vm223_vm1, %v5211_v19 }
 0x31e   :  { %v1592_v25 = vadd.f32 %v1557_v3, %v5261_v54  ;;  %3365 = vmatmul.msk.f32.gmra.mxu1 %vm223_vm1, %v5274_v56  ;;  %3419 = vmatpush.msk.msrb.mxu2 %vm320_vm0, %v3286_v28 }
 0x31f   :  { %v5865_v16 = vpop.f32.mrf.mxu3 }
 0x320   :  { %v1627_v23 = vmax.f32 %v1592_v25, 0.0  ;;  %v5867_v12 = vpop.f32.mrf.mxu0  ;;  %v1350_v4 = vpop.f32.mrf.mxu2 }
 0x322   :  { %1663 = vst.msk [vmem:[%s7176_s5 + $0x70] sm:$0xff] %vm1652_vm3, %v1627_v23 }
 0x323   :  { %v1531_v19 = vpop.f32.mrf.mxu1 }
 0x324   :  { %v1562_v24 = vmax.f32 %v1341_v62, %v1531_v19  ;;  %3352 = vmatmul.msk.f32.gmra.mxu3 %vm223_vm1, %v7652_v38 }
 0x325   :  { %3297 = vmatmul.msk.f32.gmra.mxu2 %vm223_vm1, %v5226_v57 }
 0x326   :  { %v1597_v48 = vadd.f32 %v1562_v24, %v5312_v31  ;;  %3366 = vmatmul.msk.f32.gmra.mxu1 %vm223_vm1, %v5325_v39 }
 0x327   :  { %v5884_v55 = vpop.f32.mrf.mxu3 }
 0x328   :  { %v1632_v3 = vmax.f32 %v1597_v48, 0.0  ;;  %v5886_v25 = vpop.f32.mrf.mxu0  ;;  %v1446_v23 = vpop.f32.mrf.mxu2 }
 0x329   :  { %v1545_v28 = vmax.f32 %v7656_v53, %v1446_v23 }
 0x32a   :  { %1668 = vst.msk [vmem:[%s7176_s5 + $0x98] sm:$0xff] %vm1652_vm3, %v1632_v3 }
 0x32b   :  { %v1580_v57 = vadd.f32 %v1545_v28, %v5220_v42  ;;  %v1534_v38 = vpop.f32.mrf.mxu1 }
 0x32c   :  { %v1567_v62 = vmax.f32 %v1344_v33, %v1534_v38  ;;  %v7657_v33 = vld [vmem:[#allocation7_spill] sm:$0xff] }
 0x32d   :  { %v1615_v19 = vmax.f32 %v1580_v57, 0.0  ;;  %3298 = vmatmul.msk.f32.gmra.mxu2 %vm223_vm1, %v7603_v13 }
 0x32e   :  { %v1602_v24 = vadd.f32 %v1567_v62, %v5362_v15  ;;  %3367 = vmatmul.msk.f32.gmra.mxu1 %vm223_vm1, %v5373_v43 }
 0x32f   :  { %1650 = vst [vmem:[%s7176_s5 + $0x10] sm:$0xff] %v1615_v19  ;;  %v5902_v53 = vpop.f32.mrf.mxu3 }
 0x330   :  { %v1637_v48 = vmax.f32 %v1602_v24, 0.0  ;;  %v5904_v3 = vpop.f32.mrf.mxu0  ;;  %v1449_v23 = vpop.f32.mrf.mxu2 }
 0x331   :  { %v1550_v28 = vmax.f32 %v7657_v33, %v1449_v23 }
 0x332   :  { %1673 = vst.msk [vmem:[%s7176_s5 + $0xc0] sm:$0xff] %vm1652_vm3, %v1637_v48 }
 0x333   :  { %v1585_v13 = vadd.f32 %v1550_v28, %v5238_v35  ;;  %v1537_v57 = vpop.f32.mrf.mxu1  ;;  %v7658_v28 = vld [vmem:[#allocation39_spill] sm:$0xff] }
 0x334   :  { %v1572_v38 = vmax.f32 %v1347_v18, %v1537_v57 }
 0x335   :  { %v1620_v62 = vmax.f32 %v1585_v13, 0.0  ;;  %3299 = vmatmul.msk.f32.gmra.mxu2 %vm223_vm1, %v5274_v56 }
 0x336   :  { %v1607_v19 = vadd.f32 %v1572_v38, %v5397_v37  ;;  %3368 = vmatmul.msk.f32.gmra.mxu1 %vm223_vm1, %v5406_v10 }
 0x337   :  { %1656 = vst [vmem:[%s7176_s5 + $0x38] sm:$0xff] %v1620_v62  ;;  %v5920_v24 = vpop.f32.mrf.mxu3 }
 0x338   :  { %v1642_v48 = vmax.f32 %v1607_v19, 0.0  ;;  %v2139_v23 = vpop.f32.mrf.mxu0  ;;  %v1452_v33 = vpop.f32.mrf.mxu2 }
 0x339   :  { %v1555_v18 = vmax.f32 %v7658_v28, %v1452_v33 }
 0x33a   :  { %1678 = vst.msk [vmem:[%s7176_s5 + $0xe8] sm:$0xff] %vm1652_vm3, %v1642_v48 }
 0x33b   :  { %v1590_v56 = vadd.f32 %v1555_v18, %v5261_v54  ;;  %v1540_v13 = vpop.f32.mrf.mxu1 }
 0x33c   :  { %v1577_v57 = vmax.f32 %v1350_v4, %v1540_v13  ;;  %v7659_v4 = vld [vmem:[#allocation50_spill] sm:$0xff] }
 0x33d   :  { %v1625_v38 = vmax.f32 %v1590_v56, 0.0  ;;  %3300 = vmatmul.msk.f32.gmra.mxu2 %vm223_vm1, %v5325_v39 }
 0x33e   :  { %v1612_v62 = vadd.f32 %v1577_v57, %v5425_v8  ;;  %3369 = vmatmul.msk.f32.gmra.mxu1 %vm223_vm1, %v5433_v2 }
 0x33f   :  { %1661 = vst [vmem:[%s7176_s5 + $0x60] sm:$0xff] %v1625_v38  ;;  %v5936_v19 = vpop.f32.mrf.mxu3 }
 0x340   :  { %v1647_v48 = vmax.f32 %v1612_v62, 0.0  ;;  %v2142_v33 = vpop.f32.mrf.mxu0  ;;  %v1455_v28 = vpop.f32.mrf.mxu2 }
 0x341   :  { %v1560_v18 = vmax.f32 %v7659_v4, %v1455_v28 }
 0x342   :  { %1684 = vst.msk [vmem:[%s7176_s5 + $0x110] sm:$0x3] %vm1683_vm4, %v1647_v48  ;;  %v7661_v48 = vld [vmem:[#allocation79_spill] sm:$0xff] }
 0x343   :  { %v1595_v39 = vadd.f32 %v1560_v18, %v5312_v31  ;;  %v5944_v56 = vpop.f32.mrf.mxu1  ;;  %v2314_v31 = vmax.f32 %v5656_v1, %v5904_v3 }
 0x344   :  { %7660 = vst [vmem:[#allocation58_spill] sm:$0xff] %v5944_v56 }
 0x345   :  { %v1630_v13 = vmax.f32 %v1595_v39, 0.0  ;;  %3301 = vmatmul.msk.f32.gmra.mxu2 %vm223_vm1, %v5373_v43 }
 0x346   :  { %3370 = vmatmul.msk.f32.gmra.mxu1 %vm223_vm1, %v5468_v58 }
 0x347   :  { %1666 = vst [vmem:[%s7176_s5 + $0x88] sm:$0xff] %v1630_v13  ;;  %v5953_v57 = vpop.f32.mrf.mxu3 }
 0x348   :  { %v2145_v38 = vpop.f32.mrf.mxu0  ;;  %v1458_v62 = vpop.f32.mrf.mxu2 }
 0x349   :  { %v1565_v28 = vmax.f32 %v7661_v48, %v1458_v62  ;;  %v2329_v43 = vmax.f32 %v5714_v30, %v2145_v38 }
 0x34b   :  { %v1600_v4 = vadd.f32 %v1565_v28, %v5362_v15  ;;  %v5957_v18 = vpop.f32.mrf.mxu1  ;;  %v2324_v28 = vmax.f32 %v5697_v40, %v2142_v33  ;;  %v7663_v15 = vld [vmem:[#allocation36_spill] sm:$0xff] }
 0x34c   :  { %7662 = vst [vmem:[#allocation56_spill] sm:$0xff] %v5957_v18  ;;  %v5974_v18 = vadd.f32 %v2329_v43, %v4459_v61  ;;  %v7670_v43 = vld [vmem:[#allocation78_spill] sm:$0xff] }
 0x34d   :  { %v1635_v39 = vmax.f32 %v1600_v4, 0.0  ;;  %3302 = vmatmul.msk.f32.gmra.mxu2 %vm223_vm1, %v5406_v10  ;;  %v2319_v10 = vmax.f32 %v5673_v6, %v2139_v23  ;;  %v5985_v40 = vadd.f32 %v2324_v28, %v4439_v21  ;;  %v2309_v6 = vmax.f32 %v5632_v47, %v5886_v25  ;;  %v7668_v23 = vld [vmem:[#allocation81_spill] sm:$0xff] }
 0x34e   :  { %3371 = vmatmul.msk.f32.gmra.mxu1 %vm223_vm1, %v5504_v51  ;;  %7664 = vst [vmem:[#allocation53_spill] sm:$0xff] %v5974_v18  ;;  %v6008_v47 = vadd.f32 %v2314_v31, %v7670_v43  ;;  %v7672_v25 = vld [vmem:[#allocation69_spill] sm:$0xff]  ;;  %v2299_v28 = vmax.f32 %v5578_v22, %v5852_v36  ;;  %v2289_v36 = vmax.f32 %v5522_v27, %v5826_v41  ;;  %v7680_v27 = vld [vmem:[#allocation87_spill] sm:$0xff] }
 0x34f   :  { %1671 = vst [vmem:[%s7176_s5 + $0xb0] sm:$0xff] %v1635_v39  ;;  %v5967_v13 = vpop.f32.mrf.mxu3  ;;  %v5995_v33 = vadd.f32 %v2319_v10, %v7668_v23 }
 0x350   :  { %v2148_v62 = vpop.f32.mrf.mxu0  ;;  %v1461_v48 = vpop.f32.mrf.mxu2  ;;  %7667 = vst [vmem:[#allocation23_spill] sm:$0xff] %v5985_v40  ;;  %v7292_v22 = vmax.f32 %v6008_v47, 0.0 }
 0x351   :  { %v2334_v4 = vmax.f32 %v5731_v5, %v2148_v62  ;;  %v1570_v56 = vmax.f32 %v7663_v15, %v1461_v48  ;;  %7669 = vst [vmem:[#allocation26_spill] sm:$0xff] %v5995_v33  ;;  %v7293_v48 = vmax.f32 %v5985_v40, 0.0  ;;  %v7291_v31 = vmax.f32 %v5995_v33, 0.0 }
 0x352   :  { %7671 = vst [vmem:[#allocation29_spill] sm:$0xff] %v6008_v47 }
 0x353   :  { %v5977_v30 = vadd.f32 %v2334_v4, %v4445_v49  ;;  %v1605_v38 = vadd.f32 %v1570_v56, %v5397_v37  ;;  %v5980_v39 = vpop.f32.mrf.mxu1  ;;  %v2304_v56 = vmax.f32 %v5602_v63, %v5867_v12  ;;  %v7673_v4 = vld [vmem:[#allocation82_spill] sm:$0xff]  ;;  %v2294_v63 = vmax.f32 %v5554_v9, %v5837_v44  ;;  %v7676_v12 = vld [vmem:[#allocation85_spill] sm:$0xff] }
 0x354   :  { %7666 = vst [vmem:[#allocation20_spill] sm:$0xff] %v5980_v39  ;;  %v6017_v10 = vadd.f32 %v2309_v6, %v7673_v4  ;;  %v7678_v6 = vld [vmem:[#allocation84_spill] sm:$0xff] }
 0x355   :  { %7665 = vst [vmem:[#allocation61_spill] sm:$0xff] %v5977_v30  ;;  %v7298_v15 = vmax.f32 %v5977_v30, 0.0  ;;  %v1640_v5 = vmax.f32 %v1605_v38, 0.0  ;;  %3303 = vmatmul.msk.f32.gmra.mxu2 %vm223_vm1, %v5433_v2  ;;  %v7297_v2 = vmax.f32 %v5974_v18, 0.0  ;;  %v6040_v9 = vadd.f32 %v2299_v28, %v7678_v6 }
 0x356   :  { %3372 = vmatmul.msk.f32.gmra.mxu1 %vm223_vm1, %v5536_v0  ;;  %7674 = vst [vmem:[#allocation32_spill] sm:$0xff] %v6017_v10  ;;  %v2374_v41 = vadd.f32 %v2294_v63, %v7680_v27 }
 0x357   :  { %1676 = vst [vmem:[%s7176_s5 + $0xd8] sm:$0xff] %v1640_v5  ;;  %v6000_v1 = vpop.f32.mrf.mxu3  ;;  %2634 = vmatpush.msrb.mxu0 %v7298_v15 }
 0x358   :  { %v1464_v3 = vpop.f32.mrf.mxu2  ;;  %7679 = vst [vmem:[#allocation40_spill] sm:$0xff] %v6040_v9  ;;  %v2454_v63 = vmax.f32 %v2374_v41, 0.0 }
 0x359   :  { %v1575_v62 = vmax.f32 %v7672_v25, %v1464_v3  ;;  %2635 = vmatpush.msrb.mxu0 %v7297_v2  ;;  %v6028_v3 = vadd.f32 %v2304_v56, %v7676_v12 }
 0x35b   :  { %v1610_v38 = vadd.f32 %v1575_v62, %v5425_v8  ;;  %v6020_v5 = vpop.f32.mrf.mxu1  ;;  %2636 = vmatpush.msrb.mxu0 %v7293_v48  ;;  %7677 = vst [vmem:[#allocation38_spill] sm:$0xff] %v6028_v3  ;;  %v2284_v62 = vmax.f32 %v5486_v29, %v5816_v17  ;;  %v7294_v28 = vmax.f32 %v6028_v3, 0.0  ;;  %v7296_v48 = vmax.f32 %v6040_v9, 0.0  ;;  %v7683_v29 = vld [vmem:[#allocation91_spill] sm:$0xff]  ;;  %v7701_v8 = vld [vmem:[#allocation16_spill] sm:$0xff] }
 0x35c   :  { %7675 = vst [vmem:[#allocation35_spill] sm:$0xff] %v6020_v5  ;;  %v7689_v9 = vld [vmem:[#allocation59_spill] sm:$0xff]  ;;  %v2282_v37 = vmax.f32 %v7701_v8, %v5920_v24  ;;  %v3281_v8 = vld [vmem:[%s7171_s0 + $0x70] sm:$0xff] }
 0x35d   :  { %v1645_v25 = vmax.f32 %v1610_v38, 0.0  ;;  %2637 = vmatpush.msrb.mxu0 %v7291_v31  ;;  %3304 = vmatmul.msk.f32.gmra.mxu2 %vm223_vm1, %v5468_v58  ;;  %v7295_v58 = vmax.f32 %v6017_v10, 0.0  ;;  %v2279_v38 = vmax.f32 %v5454_v14, %v5806_v52  ;;  %v2364_v17 = vadd.f32 %v2284_v62, %v7683_v29 }
 0x35e   :  { %3373 = vmatmul.msk.f32.gmra.mxu1 %vm223_vm1, %v5564_v45  ;;  %v2362_v24 = vadd.f32 %v2282_v37, %v7683_v29  ;;  %2178 = vmatpush.msrb.mxu2 %v3281_v8 }
 0x35f   :  { %1681 = vst [vmem:[%s7176_s5 + $0x100] sm:$0x3] %v1645_v25  ;;  %v6045_v44 = vpop.f32.mrf.mxu3  ;;  %2638 = vmatpush.msrb.mxu0 %v7292_v22  ;;  %v7681_v25 = vld [vmem:[#allocation94_spill] sm:$0xff]  ;;  %v2359_v14 = vadd.f32 %v2279_v38, %v4617_v46  ;;  %v6102_v38 = vld [vmem:[#allocation2 + $0x10] sm:$0xff] }
 0x360   :  { %v6050_v56 = vpop.f32.mrf.mxu2  ;;  %v2369_v31 = vadd.f32 %v2289_v36, %v7681_v25  ;;  %7687 = vst [vmem:[#allocation11_spill] sm:$0xff] %v6102_v38 }
 0x361   :  { %2639 = vmatpush.msrb.mxu0 %v7295_v58  ;;  %v2444_v58 = vmax.f32 %v2364_v17, 0.0 }
 0x362   :  { %v2449_v36 = vmax.f32 %v2369_v31, 0.0 }
 0x363   :  { %v6061_v22 = vpop.f32.mrf.mxu1  ;;  %2640 = vmatpush.msrb.mxu0 %v7294_v28 }
 0x364   :  { %7682 = vst [vmem:[#allocation43_spill] sm:$0xff] %v6061_v22 }
 0x365   :  { %2641 = vmatpush.msrb.mxu0 %v7296_v48  ;;  %3305 = vmatmul.msk.f32.gmra.mxu2 %vm223_vm1, %v5504_v51  ;;  %v2439_v48 = vmax.f32 %v2359_v14, 0.0 }
 0x366   :  { %3374 = vmatmul.msk.f32.gmra.mxu1 %vm223_vm1, %v5588_v60 }
 0x367   :  { %v1910_v52 = vpop.f32.mrf.mxu3  ;;  %2642 = vmatpush.msrb.mxu0 %v2454_v63 }
 0x368   :  { %v6074_v28 = vpop.f32.mrf.mxu2 }
 0x369   :  { %2643 = vmatpush.msrb.mxu0 %v2449_v36 }
 0x36b   :  { %v6076_v62 = vpop.f32.mrf.mxu1  ;;  %2644 = vmatpush.msrb.mxu0 %v2444_v58 }
 0x36c   :  { %7684 = vst [vmem:[#allocation47_spill] sm:$0xff] %v6076_v62 }
 0x36d   :  { %2645 = vmatpush.msrb.mxu0 %v2439_v48  ;;  %3306 = vmatmul.msk.f32.gmra.mxu2 %vm223_vm1, %v5536_v0 }
 0x36e   :  { %3375 = vmatmul.msk.f32.gmra.mxu1 %vm223_vm1, %v5616_v34  ;;  %3473 = vmatmul.msk.f32.vlgmr.msrb.gmra.mxu0 %vm1141_vm2, %v5549_v20 }
 0x36f   :  { %v1913_v51 = vpop.f32.mrf.mxu3 }
 0x370   :  { %v6084_v31 = vpop.f32.mrf.mxu2 }
 0x373   :  { %v6086_v41 = vpop.f32.mrf.mxu1 }
 0x374   :  { %7685 = vst [vmem:[#allocation5_spill] sm:$0xff] %v6086_v41 }
 0x375   :  { %3307 = vmatmul.msk.f32.gmra.mxu2 %vm223_vm1, %v5564_v45 }
 0x376   :  { %3376 = vmatmul.msk.f32.gmra.mxu1 %vm223_vm1, %v5639_v32  ;;  %3474 = vmatmul.msk.f32.gmra.mxu0 %vm1141_vm2, %v5645_v50 }
 0x377   :  { %v1916_v0 = vpop.f32.mrf.mxu3 }
 0x378   :  { %v6094_v48 = vpop.f32.mrf.mxu2  ;;  %v2322_v3 = vmax.f32 %v7689_v9, %v1916_v0  ;;  %v7692_v9 = vld [vmem:[#allocation27_spill] sm:$0xff] }
 0x37b   :  { %v6096_v58 = vpop.f32.mrf.mxu1 }
 0x37c   :  { %7686 = vst [vmem:[#allocation37_spill] sm:$0xff] %v6096_v58 }
 0x37d   :  { %3308 = vmatmul.msk.f32.gmra.mxu2 %vm223_vm1, %v5588_v60  ;;  %v6114_v60 = vld [vmem:[#allocation2 + $0x18] sm:$0xff] }
 0x37e   :  { %3377 = vmatmul.msk.f32.gmra.mxu1 %vm223_vm1, %v5661_v59  ;;  %3475 = vmatmul.msk.f32.gmra.mxu0 %vm1141_vm2, %v6102_v38  ;;  %7688 = vst [vmem:[#allocation55_spill] sm:$0xff] %v6114_v60 }
 0x37f   :  { %v1919_v45 = vpop.f32.mrf.mxu3 }
 0x380   :  { %v6106_v17 = vpop.f32.mrf.mxu2  ;;  %v2327_v14 = vmax.f32 %v5814_v11, %v1919_v45  ;;  %v7691_v11 = vld [vmem:[#allocation64_spill] sm:$0xff] }
 0x381   :  { %v2312_v45 = vmax.f32 %v7691_v11, %v1910_v52 }
 0x382   :  { %v6128_v33 = vadd.f32 %v2327_v14, %v4459_v61 }
 0x383   :  { %v6108_v63 = vpop.f32.mrf.mxu1  ;;  %v6160_v11 = vadd.f32 %v2312_v45, %v7670_v43  ;;  %v7697_v45 = vld [vmem:[#allocation9_spill] sm:$0xff] }
 0x385   :  { %3309 = vmatmul.msk.f32.gmra.mxu2 %vm223_vm1, %v5616_v34  ;;  %v7690_v34 = vld [vmem:[#allocation57_spill] sm:$0xff] }
 0x386   :  { %3378 = vmatmul.msk.f32.gmra.mxu1 %vm223_vm1, %v5682_v26  ;;  %3476 = vmatmul.msk.f32.gmra.mxu0 %vm1141_vm2, %v6114_v60  ;;  %v2317_v47 = vmax.f32 %v7690_v34, %v1913_v51  ;;  %v7694_v51 = vld [vmem:[#allocation66_spill] sm:$0xff] }
 0x387   :  { %v1922_v36 = vpop.f32.mrf.mxu3  ;;  %v2307_v0 = vmax.f32 %v7694_v51, %v6045_v44  ;;  %v7696_v44 = vld [vmem:[#allocation12_spill] sm:$0xff] }
 0x388   :  { %v2332_v2 = vmax.f32 %v5824_v7, %v1922_v36  ;;  %v6120_v15 = vpop.f32.mrf.mxu2  ;;  %v6135_v7 = vadd.f32 %v2322_v3, %v4439_v21  ;;  %v6148_v14 = vadd.f32 %v2317_v47, %v7668_v23  ;;  %v7695_v36 = vld [vmem:[#allocation24_spill] sm:$0xff]  ;;  %v2297_v51 = vmax.f32 %v7696_v44, %v5967_v13  ;;  %v6187_v44 = vld [vmem:[#allocation2 + $0x28] sm:$0xff] }
 0x389   :  { %v2302_v34 = vmax.f32 %v7695_v36, %v6000_v1  ;;  %v2292_v36 = vmax.f32 %v7697_v45, %v5953_v57  ;;  %v7315_v13 = vmax.f32 %v6160_v11, 0.0  ;;  %7699 = vst [vmem:[#allocation52_spill] sm:$0xff] %v6187_v44  ;;  %v7700_v57 = vld [vmem:[#allocation72_spill] sm:$0xff] }
 0x38a   :  { %v6124_v10 = vadd.f32 %v2332_v2, %v4445_v49  ;;  %v6141_v2 = vld [vmem:[#allocation2 + $0x20] sm:$0xff]  ;;  %v7310_v47 = vmax.f32 %v6135_v7, 0.0  ;;  %v7309_v1 = vmax.f32 %v6148_v14, 0.0  ;;  %v6194_v45 = vadd.f32 %v2297_v51, %v7678_v6  ;;  %v7702_v51 = vld [vmem:[#allocation65_spill] sm:$0xff] }
 0x38b   :  { %v6130_v40 = vpop.f32.mrf.mxu1  ;;  %7693 = vst [vmem:[#allocation8_spill] sm:$0xff] %v6141_v2  ;;  %v2372_v39 = vadd.f32 %v2292_v36, %v7680_v27  ;;  %v7703_v36 = vld [vmem:[#allocation70_spill] sm:$0xff] }
 0x38c   :  { %v7306_v18 = vmax.f32 %v6124_v10, 0.0  ;;  %v2457_v22 = vmax.f32 %v6194_v45, 0.0 }
 0x38d   :  { %3310 = vmatmul.msk.f32.gmra.mxu2 %vm223_vm1, %v5639_v32  ;;  %v7308_v32 = vmax.f32 %v6128_v33, 0.0 }
 0x38e   :  { %3379 = vmatmul.msk.f32.gmra.mxu1 %vm223_vm1, %v7692_v9  ;;  %3477 = vmatmul.msk.f32.gmra.mxu0 %vm1141_vm2, %v6141_v2 }
 0x38f   :  { %2558 = vmatpush.msrb.mxu1 %v7306_v18  ;;  %v6152_v3 = vpop.f32.mrf.mxu3  ;;  %v6168_v18 = vadd.f32 %v2307_v0, %v7673_v4  ;;  %v7698_v0 = vld [vmem:[#allocation62_spill] sm:$0xff] }
 0x390   :  { %v6155_v52 = vpop.f32.mrf.mxu2 }
 0x391   :  { %2559 = vmatpush.msrb.mxu1 %v7308_v32  ;;  %v6178_v32 = vadd.f32 %v2302_v34, %v7676_v12  ;;  %v2287_v34 = vmax.f32 %v7700_v57, %v5936_v19  ;;  %v2277_v57 = vmax.f32 %v7702_v51, %v5902_v53  ;;  %v2452_v53 = vmax.f32 %v2372_v39, 0.0 }
 0x393   :  { %2560 = vmatpush.msrb.mxu1 %v7310_v47  ;;  %v6172_v30 = vpop.f32.mrf.mxu1  ;;  %v7316_v19 = vmax.f32 %v6178_v32, 0.0 }
 0x395   :  { %2561 = vmatpush.msrb.mxu1 %v7309_v1  ;;  %3311 = vmatmul.msk.f32.gmra.mxu2 %vm223_vm1, %v5661_v59  ;;  %v7317_v1 = vmax.f32 %v6168_v18, 0.0 }
 0x396   :  { %3380 = vmatmul.msk.f32.gmra.mxu1 %vm223_vm1, %v7698_v0  ;;  %3478 = vmatmul.msk.f32.gmra.mxu0 %vm1141_vm2, %v6187_v44 }
 0x397   :  { %2562 = vmatpush.msrb.mxu1 %v7315_v13  ;;  %v1928_v59 = vpop.f32.mrf.mxu3  ;;  %v2367_v13 = vadd.f32 %v2287_v34, %v7681_v25  ;;  %v2357_v34 = vadd.f32 %v2277_v57, %v4617_v46 }
 0x398   :  { %v6199_v47 = vpop.f32.mrf.mxu2 }
 0x399   :  { %2563 = vmatpush.msrb.mxu1 %v7317_v1  ;;  %v2447_v45 = vmax.f32 %v2367_v13, 0.0  ;;  %v2442_v1 = vmax.f32 %v2362_v24, 0.0  ;;  %v2437_v39 = vmax.f32 %v2357_v34, 0.0  ;;  %v7706_v13 = vld [vmem:[#allocation21_spill] sm:$0xff]  ;;  %v7709_v34 = vld [vmem:[#allocation14_spill] sm:$0xff] }
 0x39b   :  { %2564 = vmatpush.msrb.mxu1 %v7316_v19  ;;  %v6212_v5 = vpop.f32.mrf.mxu1  ;;  %v6224_v19 = vld [vmem:[#allocation2 + $0x30] sm:$0x3] }
 0x39c   :  { %7704 = vst [vmem:[#allocation48_spill] sm:$0xff] %v6224_v19 }
 0x39d   :  { %2565 = vmatpush.msrb.mxu1 %v2457_v22  ;;  %3312 = vmatmul.msk.f32.gmra.mxu2 %vm223_vm1, %v5682_v26 }
 0x39e   :  { %3381 = vmatmul.msk.f32.gmra.mxu1 %vm223_vm1, %v7703_v36  ;;  %3479 = vmatmul.msk.f32.gmra.mxu0 %vm1141_vm2, %v6224_v19 }
 0x39f   :  { %2566 = vmatpush.msrb.mxu1 %v2452_v53  ;;  %v1931_v51 = vpop.f32.mrf.mxu3  ;;  %v7707_v53 = vld [vmem:[#allocation17_spill] sm:$0xff] }
 0x3a0   :  { %v6228_v37 = vpop.f32.mrf.mxu2  ;;  %v2347_v57 = vmax.f32 %v5865_v16, %v1931_v51  ;;  %v2342_v62 = vmax.f32 %v7707_v53, %v1928_v59  ;;  %v7712_v16 = vld [vmem:[#allocation77_spill] sm:$0xff]  ;;  %v7713_v59 = vld [vmem:[#allocation34_spill] sm:$0xff] }
 0x3a1   :  { %2567 = vmatpush.msrb.mxu1 %v2447_v45 }
 0x3a2   :  { %v2422_v51 = vadd.f32 %v2342_v62, %v7712_v16  ;;  %v7717_v62 = vmax.f32 %v6124_v10, 0.0  ;;  %v6283_v10 = vld [vmem:[%s7172_s1 + $0xf8] sm:$0xff] }
 0x3a3   :  { %2568 = vmatpush.msrb.mxu1 %v2442_v1  ;;  %v6230_v26 = vpop.f32.mrf.mxu1  ;;  %v7708_v1 = vld [vmem:[#allocation51_spill] sm:$0xff]  ;;  %7722 = vst [vmem:[#allocation33_spill] sm:$0xff] %v6283_v10 }
 0x3a4   :  { %7705 = vst [vmem:[#allocation44_spill] sm:$0xff] %v6230_v26  ;;  %v2337_v24 = vmax.f32 %v7708_v1, %v6152_v3  ;;  %v7710_v26 = vld [vmem:[#allocation63_spill] sm:$0xff] }
 0x3a5   :  { %2569 = vmatpush.msrb.mxu1 %v2437_v39  ;;  %3313 = vmatmul.msk.f32.gmra.mxu2 %vm223_vm1, %v7692_v9  ;;  %v2427_v39 = vadd.f32 %v2347_v57, %v7709_v34  ;;  %v2502_v57 = vmax.f32 %v2422_v51, 0.0  ;;  %v3619_v34 = vld [vmem:[%s7172_s1 + $0x50] sm:$0xff] }
 0x3a6   :  { %3382 = vmatmul.msk.f32.gmra.mxu1 %vm223_vm1, %v7706_v13  ;;  %v2417_v53 = vadd.f32 %v2337_v24, %v7713_v59  ;;  %v7719_v24 = vmax.f32 %v6135_v7, 0.0  ;;  %v7724_v7 = vmax.f32 %v6168_v18, 0.0 }
 0x3a7   :  { %v1934_v8 = vpop.f32.mrf.mxu3 }
 0x3a8   :  { %v2352_v41 = vmax.f32 %v5884_v55, %v1934_v8  ;;  %v6239_v45 = vpop.f32.mrf.mxu2  ;;  %v7714_v55 = vld [vmem:[#allocation13_spill] sm:$0xff]  ;;  %v2507_v8 = vmax.f32 %v2427_v39, 0.0  ;;  %v7721_v39 = vmax.f32 %v6148_v14, 0.0  ;;  %v7726_v14 = vmax.f32 %v6178_v32, 0.0 }
 0x3aa   :  { %v2432_v54 = vadd.f32 %v2352_v41, %v7710_v26  ;;  %v2497_v41 = vmax.f32 %v2417_v53, 0.0 }
 0x3ab   :  { %v6245_v9 = vpop.f32.mrf.mxu1 }
 0x3ac   :  { %7711 = vst [vmem:[#allocation89_spill] sm:$0xff] %v6245_v9  ;;  %v2512_v58 = vmax.f32 %v2432_v54, 0.0  ;;  %v6262_v54 = vld [vmem:[%s7172_s1 + $0xf0] sm:$0xff] }
 0x3ad   :  { %3314 = vmatmul.msk.f32.gmra.mxu2 %vm223_vm1, %v7698_v0  ;;  %7716 = vst [vmem:[#allocation88_spill] sm:$0xff] %v6262_v54 }
 0x3ae   :  { %3383 = vmatmul.msk.f32.gmra.mxu1 %vm223_vm1, %v7714_v55  ;;  %2748 = vmatpush.msra.mxu0 %v2512_v58  ;;  %v7718_v58 = vmax.f32 %v6128_v33, 0.0  ;;  %v7723_v33 = vmax.f32 %v6160_v11, 0.0 }
 0x3b0   :  { %2749 = vmatpush.msra.mxu0 %v2507_v8  ;;  %v6253_v3 = vpop.f32.mrf.mxu2 }
 0x3b2   :  { %2750 = vmatpush.msra.mxu0 %v2502_v57 }
 0x3b3   :  { %v6255_v1 = vpop.f32.mrf.mxu1 }
 0x3b4   :  { %7715 = vst [vmem:[#allocation86_spill] sm:$0xff] %v6255_v1  ;;  %2751 = vmatpush.msra.mxu0 %v2497_v41 }
 0x3b5   :  { %3315 = vmatmul.msk.f32.gmra.mxu2 %vm223_vm1, %v7703_v36 }
 0x3b6   :  { %3384 = vmatmul.msk.f32.gmra.mxu1 %vm223_vm1, %v6262_v54  ;;  %2752 = vmatpush.msra.mxu0 %v7717_v62  ;;  %v3610_v62 = vld [vmem:[%s7172_s1 + $0x8] sm:$0xff] }
 0x3b8   :  { %2753 = vmatpush.msra.mxu0 %v7718_v58  ;;  %v6270_v0 = vpop.f32.mrf.mxu2 }
 0x3ba   :  { %2754 = vmatpush.msra.mxu0 %v7719_v24 }
 0x3bb   :  { %v6274_v36 = vpop.f32.mrf.mxu1 }
 0x3bc   :  { %7720 = vst [vmem:[#allocation90_spill] sm:$0xff] %v6274_v36  ;;  %2755 = vmatpush.msra.mxu0 %v7721_v39  ;;  %v3613_v36 = vld [vmem:[%s7172_s1 + $0x20] sm:$0xff] }
 0x3bd   :  { %3316 = vmatmul.msk.f32.gmra.mxu2 %vm223_vm1, %v7706_v13 }
 0x3be   :  { %3385 = vmatmul.msk.f32.gmra.mxu1 %vm223_vm1, %v6283_v10  ;;  %2756 = vmatpush.msra.mxu0 %v7723_v33  ;;  %v3611_v33 = vld [vmem:[%s7172_s1 + $0x10] sm:$0xff] }
 0x3c0   :  { %2757 = vmatpush.msra.mxu0 %v7724_v7  ;;  %v6291_v51 = vpop.f32.mrf.mxu2 }
 0x3c1   :  { %7725 = vst [vmem:[#allocation60_spill] sm:$0xff] %v6291_v51 }
 0x3c2   :  { %2758 = vmatpush.msra.mxu0 %v7726_v14 }
 0x3c3   :  { %v6295_v13 = vpop.f32.mrf.mxu1 }
 0x3c4   :  { %2759 = vmatpush.msra.mxu0 %v2457_v22 }
 0x3c5   :  { %3317 = vmatmul.msk.f32.gmra.mxu2 %vm223_vm1, %v7714_v55  ;;  %3494 = vmatmul.msk.f32.vlgmr.msra.gmra.mxu0 %vm1141_vm2, %v5549_v20 }
 0x3c6   :  { %3459 = vmatmul.msk.f32.vlgmr.msrb.gmra.mxu1 %vm1141_vm2, %v5549_v20  ;;  %v6321_v20 = vpop.f32.mrf.mxu0 }
 0x3c7   :  { %7729 = vst [vmem:[#allocation93_spill] sm:$0xff] %v6321_v20 }
 0x3c8   :  { %v6303_v11 = vpop.f32.mrf.mxu2 }
 0x3c9   :  { %7727 = vst [vmem:[#allocation92_spill] sm:$0xff] %v6303_v11 }
 0x3cb   :  { %v6305_v18 = vpop.f32.mrf.mxu1 }
 0x3cd   :  { %3318 = vmatmul.msk.f32.gmra.mxu2 %vm223_vm1, %v6262_v54  ;;  %3495 = vmatmul.msk.f32.gmra.mxu0 %vm1141_vm2, %v5645_v50  ;;  %v3614_v54 = vld [vmem:[%s7172_s1 + $0x28] sm:$0xff] }
 0x3ce   :  { %3460 = vmatmul.msk.f32.gmra.mxu1 %vm1141_vm2, %v5645_v50  ;;  %v3609_v50 = vld [vmem:[%s7172_s1] sm:$0xff]  ;;  %v6337_v8 = vpop.f32.mrf.mxu0 }
 0x3cf   :  { %7730 = vst [vmem:[#allocation95_spill] sm:$0xff] %v6337_v8 }
 0x3d0   :  { %v6313_v22 = vpop.f32.mrf.mxu2 }
 0x3d1   :  { %7728 = vst [vmem:[#allocation22_spill] sm:$0xff] %v6313_v22 }
 0x3d3   :  { %v6315_v32 = vpop.f32.mrf.mxu1 }
 0x3d5   :  { %3319 = vmatmul.msk.f32.gmra.mxu2 %vm223_vm1, %v6283_v10  ;;  %3496 = vmatmul.msk.f32.gmra.mxu0 %vm1141_vm2, %v6102_v38 }
 0x3d6   :  { %3461 = vmatmul.msk.f32.gmra.mxu1 %vm1141_vm2, %v6102_v38  ;;  %v6353_v24 = vpop.f32.mrf.mxu0 }
 0x3d7   :  { %7731 = vst [vmem:[#allocation80_spill] sm:$0xff] %v6353_v24  ;;  %v3615_v24 = vld [vmem:[%s7172_s1 + $0x30] sm:$0xff] }
 0x3d8   :  { %v6325_v53 = vpop.f32.mrf.mxu2 }
 0x3db   :  { %v6327_v55 = vpop.f32.mrf.mxu1 }
 0x3dd   :  { %3420 = vmatmul.msk.f32.vlgmr.msrb.gmra.mxu2 %vm223_vm1, %v3609_v50  ;;  %3497 = vmatmul.msk.f32.gmra.mxu0 %vm1141_vm2, %v6114_v60 }
 0x3de   :  { %3462 = vmatmul.msk.f32.gmra.mxu1 %vm1141_vm2, %v6114_v60  ;;  %v6369_v50 = vpop.f32.mrf.mxu0 }
 0x3df   :  { %7732 = vst [vmem:[#allocation10_spill] sm:$0xff] %v6369_v50 }
 0x3e0   :  { %v6339_v57 = vpop.f32.mrf.mxu2 }
 0x3e3   :  { %v6341_v41 = vpop.f32.mrf.mxu1 }
 0x3e5   :  { %3421 = vmatmul.msk.f32.gmra.mxu2 %vm223_vm1, %v3610_v62  ;;  %3498 = vmatmul.msk.f32.gmra.mxu0 %vm1141_vm2, %v6141_v2  ;;  %v3612_v62 = vld [vmem:[%s7172_s1 + $0x18] sm:$0xff] }
 0x3e6   :  { %3463 = vmatmul.msk.f32.gmra.mxu1 %vm1141_vm2, %v6141_v2 }
 0x3e8   :  { %v6351_v58 = vpop.f32.mrf.mxu2 }
 0x3eb   :  { %v6355_v39 = vpop.f32.mrf.mxu1  ;;  %v6383_v1 = vpop.f32.mrf.mxu0 }
 0x3ec   :  { %7733 = vst [vmem:[#allocation76_spill] sm:$0xff] %v6383_v1 }
 0x3ed   :  { %3422 = vmatmul.msk.f32.gmra.mxu2 %vm223_vm1, %v3611_v33  ;;  %3499 = vmatmul.msk.f32.gmra.mxu0 %vm1141_vm2, %v6187_v44 }
 0x3ee   :  { %3464 = vmatmul.msk.f32.gmra.mxu1 %vm1141_vm2, %v6187_v44 }
 0x3f0   :  { %v6365_v7 = vpop.f32.mrf.mxu2 }
 0x3f3   :  { %v6367_v14 = vpop.f32.mrf.mxu1  ;;  %v6397_v20 = vpop.f32.mrf.mxu0 }
 0x3f4   :  { %7734 = vst [vmem:[#allocation75_spill] sm:$0xff] %v6397_v20 }
 0x3f5   :  { %3423 = vmatmul.msk.f32.gmra.mxu2 %vm223_vm1, %v3612_v62  ;;  %3500 = vmatmul.msk.f32.gmra.mxu0 %vm1141_vm2, %v6224_v19 }
 0x3f6   :  { %3465 = vmatmul.msk.f32.gmra.mxu1 %vm1141_vm2, %v6224_v19 }
 0x3f8   :  { %v6379_v33 = vpop.f32.mrf.mxu2 }
 0x3fb   :  { %v6381_v9 = vpop.f32.mrf.mxu1  ;;  %v6405_v19 = vpop.f32.mrf.mxu0 }
 0x3fc   :  { %7735 = vst [vmem:[#allocation46_spill] sm:$0xff] %v6405_v19 }
 0x3fd   :  { %3424 = vmatmul.msk.f32.gmra.mxu2 %vm223_vm1, %v3613_v36 }
 0x400   :  { %v6389_v10 = vpop.f32.mrf.mxu2 }
 0x403   :  { %v6391_v62 = vpop.f32.mrf.mxu1  ;;  %v6413_v44 = vpop.f32.mrf.mxu0 }
 0x404   :  { %7736 = vst [vmem:[#allocation31_spill] sm:$0xff] %v6413_v44 }
 0x405   :  { %3425 = vmatmul.msk.f32.gmra.mxu2 %vm223_vm1, %v3614_v54  ;;  %v3616_v54 = vld [vmem:[%s7172_s1 + $0x38] sm:$0xff] }
 0x408   :  { %v1791_v8 = vpop.f32.mrf.mxu2 }
 0x40b   :  { %v6399_v1 = vpop.f32.mrf.mxu1  ;;  %v6423_v59 = vpop.f32.mrf.mxu0 }
 0x40c   :  { %7738 = vst [vmem:[#allocation73_spill] sm:$0xff] %v6423_v59  ;;  %v3620_v59 = vld [vmem:[%s7172_s1 + $0x58] sm:$0xff] }
 0x40d   :  { %3426 = vmatmul.msk.f32.gmra.mxu2 %vm223_vm1, %v3615_v24  ;;  %v3617_v24 = vld [vmem:[%s7172_s1 + $0x40] sm:$0xff] }
 0x410   :  { %v1794_v36 = vpop.f32.mrf.mxu2 }
 0x413   :  { %v6407_v50 = vpop.f32.mrf.mxu1 }
 0x415   :  { %3427 = vmatmul.msk.f32.gmra.mxu2 %vm223_vm1, %v3616_v54  ;;  %v3618_v54 = vld [vmem:[%s7172_s1 + $0x48] sm:$0xff] }
 0x418   :  { %v1797_v20 = vpop.f32.mrf.mxu2 }
 0x41b   :  { %v6415_v2 = vpop.f32.mrf.mxu1 }
 0x41d   :  { %3428 = vmatmul.msk.f32.gmra.mxu2 %vm223_vm1, %v3617_v24  ;;  %v6435_v24 = vpop.f32.mrf.mxu0 }
 0x41e   :  { %7740 = vst [vmem:[#allocation25_spill] sm:$0xff] %v6435_v24 }
 0x420   :  { %v1800_v19 = vpop.f32.mrf.mxu2 }
 0x421   :  { %v2316_v24 = vmax.f32 %v6228_v37, %v1800_v19  ;;  %v2306_v19 = vmax.f32 %v6155_v52, %v1794_v36 }
 0x423   :  { %v6421_v60 = vpop.f32.mrf.mxu1  ;;  %v6468_v37 = vadd.f32 %v2316_v24, %v7668_v23  ;;  %v6485_v36 = vadd.f32 %v2306_v19, %v7673_v4 }
 0x424   :  { %7737 = vst [vmem:[#allocation45_spill] sm:$0xff] %v6421_v60 }
 0x425   :  { %3429 = vmatmul.msk.f32.gmra.mxu2 %vm223_vm1, %v3618_v54  ;;  %v6444_v26 = vpop.f32.mrf.mxu0 }
 0x426   :  { %7742 = vst [vmem:[#allocation6_spill] sm:$0xff] %v6444_v26 }
 0x428   :  { %v1803_v44 = vpop.f32.mrf.mxu2 }
 0x429   :  { %v2321_v11 = vmax.f32 %v6239_v45, %v1803_v44  ;;  %v3621_v44 = vld [vmem:[%s7172_s1 + $0x60] sm:$0xff] }
 0x42b   :  { %v6429_v16 = vpop.f32.mrf.mxu1 }
 0x42c   :  { %7739 = vst [vmem:[#allocation28_spill] sm:$0xff] %v6429_v16 }
 0x42d   :  { %3430 = vmatmul.msk.f32.gmra.mxu2 %vm223_vm1, %v3619_v34 }
 0x430   :  { %v1806_v60 = vpop.f32.mrf.mxu2 }
 0x431   :  { %v2326_v54 = vmax.f32 %v6253_v3, %v1806_v60  ;;  %v6459_v60 = vadd.f32 %v2321_v11, %v4439_v21 }
 0x433   :  { %v6437_v51 = vpop.f32.mrf.mxu1  ;;  %v6450_v38 = vadd.f32 %v2326_v54, %v4459_v61  ;;  %v7345_v52 = vmax.f32 %v6459_v60, 0.0  ;;  %v2291_v54 = vmax.f32 %v6094_v48, %v6379_v33  ;;  %v7341_v33 = vmax.f32 %v6485_v36, 0.0 }
 0x434   :  { %7741 = vst [vmem:[#allocation83_spill] sm:$0xff] %v6437_v51 }
 0x435   :  { %3431 = vmatmul.msk.f32.gmra.mxu2 %vm223_vm1, %v3620_v59  ;;  %v2311_v59 = vmax.f32 %v6199_v47, %v1797_v20  ;;  %v2486_v47 = vmax.f32 %v6450_v38, 0.0  ;;  %v2296_v20 = vmax.f32 %v6106_v17, %v6389_v10  ;;  %v3622_v17 = vld [vmem:[%s7172_s1 + $0x68] sm:$0xff] }
 0x437   :  { %v6506_v48 = vadd.f32 %v2296_v20, %v7678_v6  ;;  %v2276_v20 = vmax.f32 %v6050_v56, %v6339_v57 }
 0x438   :  { %v1809_v16 = vpop.f32.mrf.mxu2 }
 0x439   :  { %v2331_v34 = vmax.f32 %v6270_v0, %v1809_v16  ;;  %v2301_v16 = vmax.f32 %v6120_v15, %v1791_v8  ;;  %v6477_v0 = vadd.f32 %v2311_v59, %v7670_v43  ;;  %v7344_v15 = vmax.f32 %v6468_v37, 0.0 }
 0x43b   :  { %v6453_v51 = vadd.f32 %v2331_v34, %v4445_v49  ;;  %v6455_v22 = vpop.f32.mrf.mxu1  ;;  %v6493_v34 = vadd.f32 %v2301_v16, %v7676_v12  ;;  %v7343_v10 = vmax.f32 %v6477_v0, 0.0  ;;  %v7775_v38 = vmax.f32 %v6477_v0, 0.0  ;;  %v7780_v0 = vld [vmem:[#allocation10_spill] sm:$0xff] }
 0x43d   :  { %v2491_v3 = vmax.f32 %v6453_v51, 0.0  ;;  %3432 = vmatmul.msk.f32.gmra.mxu2 %vm223_vm1, %v3621_v44  ;;  %v2286_v44 = vmax.f32 %v6084_v31, %v6365_v7  ;;  %v7340_v31 = vmax.f32 %v6493_v34, 0.0  ;;  %v3631_v51 = vld [vmem:[%s7172_s1 + $0xa0] sm:$0xff] }
 0x43f   :  { %2520 = vmatpush.msra.mxu3 %v2491_v3 }
 0x440   :  { %v6473_v45 = vpop.f32.mrf.mxu2 }
 0x441   :  { %2521 = vmatpush.msra.mxu3 %v2486_v47 }
 0x442   :  { %v2761_v11 = vpop.f32.mrf.mxu0 }
 0x443   :  { %v2571_v24 = vpop.f32.mrf.mxu1  ;;  %2522 = vmatpush.msra.mxu3 %v7345_v52  ;;  %v7770_v52 = vld [vmem:[#allocation55_spill] sm:$0xff] }
 0x444   :  { %v2897_v8 = vmax.f32 %v2571_v24, %v2761_v11  ;;  %v2281_v11 = vmax.f32 %v6074_v28, %v6351_v58  ;;  %v2371_v24 = vadd.f32 %v2291_v54, %v7680_v27  ;;  %v7337_v28 = vmax.f32 %v6506_v48, 0.0 }
 0x445   :  { %3433 = vmatmul.msk.f32.gmra.mxu2 %vm223_vm1, %v3622_v17  ;;  %2523 = vmatpush.msra.mxu3 %v7344_v15 }
 0x446   :  { %v2932_v59 = vadd.f32 %v2897_v8, %v5220_v42  ;;  %v2366_v8 = vadd.f32 %v2286_v44, %v7681_v25  ;;  %v2361_v54 = vadd.f32 %v2281_v11, %v7683_v29  ;;  %v2451_v56 = vmax.f32 %v2371_v24, 0.0 }
 0x447   :  { %2524 = vmatpush.msra.mxu3 %v7343_v10  ;;  %v2356_v44 = vadd.f32 %v2276_v20, %v4617_v46  ;;  %v2328_v11 = vmax.f32 %v6172_v30, %v6407_v50  ;;  %v2318_v30 = vmax.f32 %v6108_v63, %v6391_v62  ;;  %v7746_v63 = vld [vmem:[#allocation67_spill] sm:$0xff] }
 0x448   :  { %v2967_v19 = vmax.f32 %v2932_v59, 0.0  ;;  %v6511_v16 = vpop.f32.mrf.mxu2  ;;  %v2333_v59 = vmax.f32 %v6212_v5, %v6415_v2  ;;  %v2441_v24 = vmax.f32 %v2361_v54, 0.0 }
 0x449   :  { %2525 = vmatpush.msra.mxu3 %v7341_v33  ;;  %v6554_v50 = vadd.f32 %v2328_v11, %v4459_v61  ;;  %v6567_v11 = vld [vmem:[#allocation2] sm:$0xff]  ;;  %v7762_v33 = vld [vmem:[#allocation11_spill] sm:$0xff] }
 0x44a   :  { %3523 = vst [vmem:[%s7176_s5 + $0x120] sm:$0xff] %v2967_v19  ;;  %v2764_v7 = vpop.f32.mrf.mxu0  ;;  %v3623_v19 = vld [vmem:[%s7172_s1 + $0x70] sm:$0xff] }
 0x44b   :  { %v2574_v17 = vpop.f32.mrf.mxu1  ;;  %2526 = vmatpush.msra.mxu3 %v7340_v31  ;;  %7743 = vst [vmem:[#allocation49_spill] sm:$0xff] %v6554_v50 }
 0x44c   :  { %v2902_v58 = vmax.f32 %v2574_v17, %v2764_v7  ;;  %v2446_v7 = vmax.f32 %v2366_v8, 0.0  ;;  %v2323_v17 = vmax.f32 %v6130_v40, %v6399_v1  ;;  %v7744_v1 = vld [vmem:[#allocation37_spill] sm:$0xff] }
 0x44d   :  { %3434 = vmatmul.msk.f32.gmra.mxu2 %vm223_vm1, %v3623_v19  ;;  %2527 = vmatpush.msra.mxu3 %v7337_v28  ;;  %v6546_v19 = vadd.f32 %v2333_v59, %v4445_v49  ;;  %v2313_v59 = vmax.f32 %v7744_v1, %v6381_v9  ;;  %v7747_v9 = vld [vmem:[#allocation5_spill] sm:$0xff] }
 0x44e   :  { %v2937_v57 = vadd.f32 %v2902_v58, %v5238_v35  ;;  %v2436_v58 = vmax.f32 %v2356_v44, 0.0  ;;  %v6559_v54 = vadd.f32 %v2323_v17, %v4439_v21  ;;  %v2308_v44 = vmax.f32 %v7747_v9, %v6367_v14  ;;  %v7753_v9 = vld [vmem:[#allocation35_spill] sm:$0xff] }
 0x44f   :  { %2528 = vmatpush.msra.mxu3 %v2451_v56  ;;  %v7335_v56 = vmax.f32 %v6546_v19, 0.0 }
 0x450   :  { %v2972_v5 = vmax.f32 %v2937_v57, 0.0  ;;  %v6541_v2 = vpop.f32.mrf.mxu2  ;;  %7745 = vst [vmem:[#allocation41_spill] sm:$0xff] %v6559_v54  ;;  %v3624_v57 = vld [vmem:[%s7172_s1 + $0x78] sm:$0xff]  ;;  %v7334_v14 = vmax.f32 %v6559_v54, 0.0 }
 0x451   :  { %2529 = vmatpush.msra.mxu3 %v2446_v7  ;;  %v6574_v7 = vadd.f32 %v2318_v30, %v7668_v23 }
 0x452   :  { %3528 = vst [vmem:[%s7176_s5 + $0x148] sm:$0xff] %v2972_v5  ;;  %v2767_v20 = vpop.f32.mrf.mxu0  ;;  %v7332_v5 = vmax.f32 %v6554_v50, 0.0 }
 0x453   :  { %v2577_v8 = vpop.f32.mrf.mxu1  ;;  %2530 = vmatpush.msra.mxu3 %v2441_v24  ;;  %7748 = vst [vmem:[#allocation71_spill] sm:$0xff] %v6574_v7 }
 0x454   :  { %v2907_v40 = vmax.f32 %v2577_v8, %v2767_v20  ;;  %v7749_v20 = vld [vmem:[#allocation47_spill] sm:$0xff] }
 0x455   :  { %3435 = vmatmul.msk.f32.gmra.mxu2 %vm223_vm1, %v3624_v57  ;;  %2531 = vmatpush.msra.mxu3 %v2436_v58  ;;  %v2303_v8 = vmax.f32 %v7749_v20, %v6355_v39  ;;  %v6582_v58 = vadd.f32 %v2313_v59, %v7670_v43  ;;  %v6593_v57 = vadd.f32 %v2308_v44, %v7673_v4  ;;  %v7333_v59 = vmax.f32 %v6574_v7, 0.0 }
 0x456   :  { %v2942_v62 = vadd.f32 %v2907_v40, %v7746_v63  ;;  %3452 = vmatmul.msk.f32.vlgmr.msra.gmra.mxu3 %vm1141_vm2, %v6567_v11  ;;  %v7751_v40 = vld [vmem:[#allocation43_spill] sm:$0xff]  ;;  %v2293_v20 = vmax.f32 %v7753_v9, %v6327_v55  ;;  %v7756_v55 = vld [vmem:[#allocation20_spill] sm:$0xff] }
 0x457   :  { %2596 = vmatpush.msrb.mxu3 %v7335_v56  ;;  %7750 = vst [vmem:[#allocation7_spill] sm:$0xff] %v6582_v58  ;;  %v2298_v1 = vmax.f32 %v7751_v40, %v6341_v41  ;;  %v3626_v41 = vld [vmem:[%s7172_s1 + $0x80] sm:$0xff]  ;;  %v7336_v44 = vmax.f32 %v6582_v58, 0.0  ;;  %v7338_v9 = vmax.f32 %v6593_v57, 0.0 }
 0x458   :  { %v2977_v17 = vmax.f32 %v2942_v62, 0.0  ;;  %v1821_v24 = vpop.f32.mrf.mxu2  ;;  %7752 = vst [vmem:[#allocation39_spill] sm:$0xff] %v6593_v57  ;;  %v2373_v56 = vadd.f32 %v2293_v20, %v7680_v27 }
 0x459   :  { %2597 = vmatpush.msrb.mxu3 %v7332_v5  ;;  %v6601_v5 = vadd.f32 %v2303_v8, %v7676_v12  ;;  %v2288_v8 = vmax.f32 %v7756_v55, %v6315_v32  ;;  %v7759_v55 = vld [vmem:[#allocation58_spill] sm:$0xff]  ;;  %v2351_v20 = vmax.f32 %v6325_v53, %v1821_v24  ;;  %v7763_v24 = vld [vmem:[#allocation92_spill] sm:$0xff] }
 0x45a   :  { %3533 = vst [vmem:[%s7176_s5 + $0x170] sm:$0xff] %v2977_v17  ;;  %v2770_v30 = vpop.f32.mrf.mxu0  ;;  %v7755_v17 = vld [vmem:[#allocation19_spill] sm:$0xff] }
 0x45b   :  { %v2580_v39 = vpop.f32.mrf.mxu1  ;;  %2598 = vmatpush.msrb.mxu3 %v7334_v14  ;;  %7754 = vst [vmem:[#allocation50_spill] sm:$0xff] %v6601_v5  ;;  %v7339_v32 = vmax.f32 %v6601_v5, 0.0 }
 0x45c   :  { %v2912_v62 = vmax.f32 %v2580_v39, %v2770_v30  ;;  %v6611_v30 = vld [vmem:[#allocation2 + $0x8] sm:$0xff]  ;;  %v6618_v39 = vadd.f32 %v2298_v1, %v7678_v6 }
 0x45d   :  { %2599 = vmatpush.msrb.mxu3 %v7333_v59  ;;  %3436 = vmatmul.msk.f32.gmra.mxu2 %vm223_vm1, %v3626_v41 }
 0x45e   :  { %v2947_v40 = vadd.f32 %v2912_v62, %v7755_v17  ;;  %3453 = vmatmul.msk.f32.gmra.mxu3 %vm1141_vm2, %v6611_v30  ;;  %7757 = vst [vmem:[#allocation79_spill] sm:$0xff] %v6618_v39  ;;  %v7758_v62 = vld [vmem:[#allocation56_spill] sm:$0xff] }
 0x45f   :  { %2600 = vmatpush.msrb.mxu3 %v7336_v44  ;;  %v2283_v14 = vmax.f32 %v7758_v62, %v6305_v18  ;;  %v2368_v44 = vadd.f32 %v2288_v8, %v7681_v25  ;;  %v7342_v18 = vmax.f32 %v6618_v39, 0.0  ;;  %v2453_v8 = vmax.f32 %v2373_v56, 0.0 }
 0x460   :  { %v2982_v41 = vmax.f32 %v2947_v40, 0.0  ;;  %v6623_v59 = vpop.f32.mrf.mxu2  ;;  %v2278_v40 = vmax.f32 %v7759_v55, %v6295_v13  ;;  %v3628_v13 = vld [vmem:[%s7172_s1 + $0x88] sm:$0xff] }
 0x461   :  { %2601 = vmatpush.msrb.mxu3 %v7338_v9  ;;  %v2363_v9 = vadd.f32 %v2283_v14, %v7683_v29  ;;  %v2341_v14 = vmax.f32 %v7763_v24, %v6511_v16 }
 0x462   :  { %3538 = vst [vmem:[%s7176_s5 + $0x198] sm:$0xff] %v2982_v41  ;;  %v2773_v1 = vpop.f32.mrf.mxu0  ;;  %v7760_v41 = vld [vmem:[#allocation22_spill] sm:$0xff]  ;;  %v2358_v53 = vadd.f32 %v2278_v40, %v4617_v46 }
 0x463   :  { %v2583_v28 = vpop.f32.mrf.mxu1  ;;  %2602 = vmatpush.msrb.mxu3 %v7339_v32  ;;  %v2346_v55 = vmax.f32 %v7760_v41, %v6541_v2  ;;  %v7761_v32 = vld [vmem:[#allocation74_spill] sm:$0xff]  ;;  %v2443_v56 = vmax.f32 %v2363_v9, 0.0  ;;  %v7765_v2 = vld [vmem:[#allocation60_spill] sm:$0xff] }
 0x464   :  { %v2917_v62 = vmax.f32 %v2583_v28, %v2773_v1  ;;  %v2448_v28 = vmax.f32 %v2368_v44, 0.0  ;;  %v7764_v1 = vld [vmem:[#allocation63_spill] sm:$0xff]  ;;  %v7766_v41 = vld [vmem:[#allocation14_spill] sm:$0xff]  ;;  %v2438_v16 = vmax.f32 %v2358_v53, 0.0 }
 0x465   :  { %2603 = vmatpush.msrb.mxu3 %v7342_v18  ;;  %3437 = vmatmul.msk.f32.gmra.mxu2 %vm223_vm1, %v3628_v13  ;;  %v2431_v18 = vadd.f32 %v2351_v20, %v7764_v1  ;;  %v2426_v15 = vadd.f32 %v2346_v55, %v7766_v41  ;;  %v3629_v9 = vld [vmem:[%s7172_s1 + $0x90] sm:$0xff] }
 0x466   :  { %v2952_v31 = vadd.f32 %v2917_v62, %v7761_v32  ;;  %3454 = vmatmul.msk.f32.gmra.mxu3 %vm1141_vm2, %v7762_v33  ;;  %v2336_v62 = vmax.f32 %v7765_v2, %v6473_v45  ;;  %v7768_v45 = vld [vmem:[#allocation34_spill] sm:$0xff] }
 0x467   :  { %2604 = vmatpush.msrb.mxu3 %v2453_v8  ;;  %v7767_v8 = vld [vmem:[#allocation77_spill] sm:$0xff] }
 0x468   :  { %v2987_v10 = vmax.f32 %v2952_v31, 0.0  ;;  %v6657_v13 = vpop.f32.mrf.mxu2  ;;  %v2421_v20 = vadd.f32 %v2341_v14, %v7767_v8  ;;  %v2511_v31 = vmax.f32 %v2431_v18, 0.0  ;;  %v2416_v55 = vadd.f32 %v2336_v62, %v7768_v45 }
 0x469   :  { %2605 = vmatpush.msrb.mxu3 %v2448_v28  ;;  %v7769_v28 = vld [vmem:[#allocation30_spill] sm:$0xff] }
 0x46a   :  { %3543 = vst [vmem:[%s7176_s5 + $0x1c0] sm:$0xff] %v2987_v10  ;;  %v2776_v44 = vpop.f32.mrf.mxu0  ;;  %v2506_v10 = vmax.f32 %v2426_v15, 0.0  ;;  %v2501_v14 = vmax.f32 %v2421_v20, 0.0  ;;  %v3630_v15 = vld [vmem:[%s7172_s1 + $0x98] sm:$0xff]  ;;  %v7772_v20 = vld [vmem:[#allocation8_spill] sm:$0xff] }
 0x46b   :  { %v2586_v40 = vpop.f32.mrf.mxu1  ;;  %2606 = vmatpush.msrb.mxu3 %v2443_v56 }
 0x46c   :  { %v2922_v24 = vmax.f32 %v2586_v40, %v2776_v44  ;;  %v2496_v44 = vmax.f32 %v2416_v55, 0.0  ;;  %v7773_v55 = vmax.f32 %v6459_v60, 0.0 }
 0x46d   :  { %2607 = vmatpush.msrb.mxu3 %v2438_v16  ;;  %3438 = vmatmul.msk.f32.gmra.mxu2 %vm223_vm1, %v3629_v9  ;;  %v7771_v16 = vld [vmem:[#allocation42_spill] sm:$0xff] }
 0x46e   :  { %v2957_v2 = vadd.f32 %v2922_v24, %v7769_v28  ;;  %3455 = vmatmul.msk.f32.gmra.mxu3 %vm1141_vm2, %v7770_v52 }
 0x46f   :  { %2710 = vmatpush.msra.mxu3 %v2511_v31 }
 0x470   :  { %v2992_v53 = vmax.f32 %v2957_v2, 0.0  ;;  %v6674_v18 = vpop.f32.mrf.mxu2  ;;  %v7774_v2 = vmax.f32 %v6468_v37, 0.0  ;;  %v7778_v37 = vmax.f32 %v6493_v34, 0.0 }
 0x471   :  { %2711 = vmatpush.msra.mxu3 %v2506_v10  ;;  %v7779_v10 = vmax.f32 %v6506_v48, 0.0  ;;  %v7786_v48 = vld [vmem:[#allocation18_spill] sm:$0xff] }
 0x472   :  { %3548 = vst [vmem:[%s7176_s5 + $0x1e8] sm:$0xff] %v2992_v53  ;;  %v2779_v56 = vpop.f32.mrf.mxu0  ;;  %v3632_v53 = vld [vmem:[%s7172_s1 + $0xa8] sm:$0xff] }
 0x473   :  { %2712 = vmatpush.msra.mxu3 %v2501_v14  ;;  %v2589_v62 = vpop.f32.mrf.mxu1  ;;  %v7781_v14 = vld [vmem:[#allocation54_spill] sm:$0xff] }
 0x474   :  { %v2927_v40 = vmax.f32 %v2589_v62, %v2779_v56  ;;  %v2354_v56 = vmax.f32 %v7781_v14, %v7780_v0  ;;  %v7784_v62 = vld [vmem:[#allocation15_spill] sm:$0xff] }
 0x475   :  { %2713 = vmatpush.msra.mxu3 %v2496_v44  ;;  %3439 = vmatmul.msk.f32.gmra.mxu2 %vm223_vm1, %v3630_v15  ;;  %v7782_v44 = vld [vmem:[#allocation48_spill] sm:$0xff]  ;;  %v7785_v15 = vld [vmem:[#allocation95_spill] sm:$0xff] }
 0x476   :  { %v2962_v31 = vadd.f32 %v2927_v40, %v7771_v16  ;;  %3456 = vmatmul.msk.f32.gmra.mxu3 %vm1141_vm2, %v7772_v20 }
 0x477   :  { %2714 = vmatpush.msra.mxu3 %v2491_v3  ;;  %v7776_v3 = vld [vmem:[#allocation52_spill] sm:$0xff] }
 0x478   :  { %v2997_v24 = vmax.f32 %v2962_v31, 0.0  ;;  %v6690_v9 = vpop.f32.mrf.mxu2  ;;  %v2344_v31 = vmax.f32 %v7786_v48, %v7785_v15 }
 0x479   :  { %2715 = vmatpush.msra.mxu3 %v2486_v47  ;;  %v7777_v47 = vmax.f32 %v6485_v36, 0.0  ;;  %v7783_v36 = vld [vmem:[#allocation80_spill] sm:$0xff] }
 0x47a   :  { %3553 = vst [vmem:[%s7176_s5 + $0x210] sm:$0x3] %v2997_v24  ;;  %v2349_v40 = vmax.f32 %v7784_v62, %v7783_v36  ;;  %v2434_v24 = vadd.f32 %v2354_v56, %v7764_v1  ;;  %v3634_v62 = vld [vmem:[%s7172_s1 + $0xb8] sm:$0xff] }
 0x47b   :  { %2716 = vmatpush.msra.mxu3 %v7773_v55  ;;  %v7787_v55 = vld [vmem:[#allocation93_spill] sm:$0xff] }
 0x47d   :  { %2717 = vmatpush.msra.mxu3 %v7774_v2  ;;  %3440 = vmatmul.msk.f32.gmra.mxu2 %vm223_vm1, %v3631_v51  ;;  %v7788_v2 = vld [vmem:[#allocation68_spill] sm:$0xff] }
 0x47e   :  { %3457 = vmatmul.msk.f32.gmra.mxu3 %vm1141_vm2, %v7776_v3  ;;  %v2339_v51 = vmax.f32 %v7788_v2, %v7787_v55  ;;  %v7793_v55 = vld [vmem:[#allocation23_spill] sm:$0xff] }
 0x47f   :  { %2718 = vmatpush.msra.mxu3 %v7775_v38  ;;  %v2429_v38 = vadd.f32 %v2349_v40, %v7766_v41  ;;  %v7789_v40 = vld [vmem:[#allocation61_spill] sm:$0xff]  ;;  %v7794_v2 = vmax.f32 %v7793_v55, 0.0  ;;  %v3637_v55 = vld [vmem:[%s7172_s1 + $0xd0] sm:$0xff] }
 0x480   :  { %v6709_v60 = vpop.f32.mrf.mxu2  ;;  %v7790_v15 = vmax.f32 %v7789_v40, 0.0  ;;  %v3636_v40 = vld [vmem:[%s7172_s1 + $0xc8] sm:$0xff] }
 0x481   :  { %2719 = vmatpush.msra.mxu3 %v7777_v47  ;;  %v3633_v47 = vld [vmem:[%s7172_s1 + $0xb0] sm:$0xff]  ;;  %v2509_v0 = vmax.f32 %v2429_v38, 0.0 }
 0x482   :  { %v7795_v38 = vld [vmem:[#allocation26_spill] sm:$0xff] }
 0x483   :  { %2720 = vmatpush.msra.mxu3 %v7778_v37  ;;  %v2424_v37 = vadd.f32 %v2344_v31, %v7767_v8  ;;  %v7791_v31 = vld [vmem:[#allocation53_spill] sm:$0xff] }
 0x485   :  { %2721 = vmatpush.msra.mxu3 %v7779_v10  ;;  %3441 = vmatmul.msk.f32.gmra.mxu2 %vm223_vm1, %v3632_v53  ;;  %v2514_v10 = vmax.f32 %v2434_v24, 0.0  ;;  %v2419_v53 = vadd.f32 %v2339_v51, %v7768_v45  ;;  %v2504_v56 = vmax.f32 %v2424_v37, 0.0  ;;  %v7792_v24 = vmax.f32 %v7791_v31, 0.0  ;;  %v3635_v51 = vld [vmem:[%s7172_s1 + $0xc0] sm:$0xff]  ;;  %v7797_v37 = vld [vmem:[#allocation29_spill] sm:$0xff] }
 0x486   :  { %3458 = vmatmul.msk.f32.gmra.mxu3 %vm1141_vm2, %v7782_v44 }
 0x487   :  { %v2499_v36 = vmax.f32 %v2419_v53, 0.0 }
 0x488   :  { %v6725_v34 = vpop.f32.mrf.mxu2 }
 0x48d   :  { %3442 = vmatmul.msk.f32.gmra.mxu2 %vm223_vm1, %v3633_v47  ;;  %v7796_v47 = vmax.f32 %v7795_v38, 0.0 }
 0x48e   :  { %3466 = vmatmul.msk.f32.vlgmr.msrb.gmra.mxu3 %vm1141_vm2, %v6567_v11 }
 0x48f   :  { %2824 = vmatpush.msrb.mxu3 %v2514_v10  ;;  %v7798_v10 = vmax.f32 %v7797_v37, 0.0 }
 0x490   :  { %v6741_v14 = vpop.f32.mrf.mxu2 }
 0x491   :  { %2825 = vmatpush.msrb.mxu3 %v2509_v0  ;;  %v7799_v0 = vld [vmem:[#allocation32_spill] sm:$0xff] }
 0x493   :  { %2826 = vmatpush.msrb.mxu3 %v2504_v56  ;;  %v7800_v56 = vmax.f32 %v7799_v0, 0.0 }
 0x495   :  { %3443 = vmatmul.msk.f32.gmra.mxu2 %vm223_vm1, %v3634_v62  ;;  %2827 = vmatpush.msrb.mxu3 %v2499_v36  ;;  %v7801_v36 = vld [vmem:[#allocation38_spill] sm:$0xff] }
 0x496   :  { %3467 = vmatmul.msk.f32.gmra.mxu3 %vm1141_vm2, %v6611_v30  ;;  %v7802_v62 = vmax.f32 %v7801_v36, 0.0 }
 0x497   :  { %2828 = vmatpush.msrb.mxu3 %v7790_v15  ;;  %v7803_v15 = vld [vmem:[#allocation40_spill] sm:$0xff] }
 0x498   :  { %v6751_v48 = vpop.f32.mrf.mxu2  ;;  %v7804_v31 = vmax.f32 %v7803_v15, 0.0 }
 0x499   :  { %2829 = vmatpush.msrb.mxu3 %v7792_v24 }
 0x49b   :  { %2830 = vmatpush.msrb.mxu3 %v7794_v2 }
 0x49d   :  { %3444 = vmatmul.msk.f32.gmra.mxu2 %vm223_vm1, %v3635_v51  ;;  %2831 = vmatpush.msrb.mxu3 %v7796_v47  ;;  %v3638_v51 = vld [vmem:[%s7172_s1 + $0xd8] sm:$0xff]  ;;  %v3639_v47 = vld [vmem:[%s7172_s1 + $0xe0] sm:$0xff] }
 0x49e   :  { %3468 = vmatmul.msk.f32.gmra.mxu3 %vm1141_vm2, %v7762_v33 }
 0x49f   :  { %2832 = vmatpush.msrb.mxu3 %v7798_v10  ;;  %v3640_v10 = vld [vmem:[%s7172_s1 + $0xe8] sm:$0xff] }
 0x4a0   :  { %v6767_v53 = vpop.f32.mrf.mxu2 }
 0x4a1   :  { %2833 = vmatpush.msrb.mxu3 %v7800_v56  ;;  %v7805_v56 = vld [vmem:[#allocation88_spill] sm:$0xff] }
 0x4a3   :  { %2834 = vmatpush.msrb.mxu3 %v7802_v62  ;;  %v7806_v62 = vld [vmem:[#allocation33_spill] sm:$0xff] }
 0x4a5   :  { %3445 = vmatmul.msk.f32.gmra.mxu2 %vm223_vm1, %v3636_v40  ;;  %2835 = vmatpush.msrb.mxu3 %v7804_v31 }
 0x4a6   :  { %3469 = vmatmul.msk.f32.gmra.mxu3 %vm1141_vm2, %v7770_v52 }
 0x4a8   :  { %v6781_v24 = vpop.f32.mrf.mxu2 }
 0x4ad   :  { %3446 = vmatmul.msk.f32.gmra.mxu2 %vm223_vm1, %v3637_v55 }
 0x4ae   :  { %3470 = vmatmul.msk.f32.gmra.mxu3 %vm1141_vm2, %v7772_v20 }
 0x4b0   :  { %v2210_v2 = vpop.f32.mrf.mxu2 }
 0x4b5   :  { %3447 = vmatmul.msk.f32.gmra.mxu2 %vm223_vm1, %v3638_v51 }
 0x4b6   :  { %3471 = vmatmul.msk.f32.gmra.mxu3 %vm1141_vm2, %v7776_v3 }
 0x4b8   :  { %v2213_v38 = vpop.f32.mrf.mxu2 }
 0x4bd   :  { %3448 = vmatmul.msk.f32.gmra.mxu2 %vm223_vm1, %v3639_v47 }
 0x4be   :  { %3472 = vmatmul.msk.f32.gmra.mxu3 %vm1141_vm2, %v7782_v44 }
 0x4c0   :  { %v6801_v37 = vpop.f32.mrf.mxu2 }
 0x4c5   :  { %3449 = vmatmul.msk.f32.gmra.mxu2 %vm223_vm1, %v3640_v10 }
 0x4c6   :  { %3487 = vmatmul.msk.f32.vlgmr.msra.gmra.mxu3 %vm1141_vm2, %v6567_v11 }
 0x4c8   :  { %v6809_v0 = vpop.f32.mrf.mxu2 }
 0x4cd   :  { %3450 = vmatmul.msk.f32.gmra.mxu2 %vm223_vm1, %v7805_v56 }
 0x4ce   :  { %3488 = vmatmul.msk.f32.gmra.mxu3 %vm1141_vm2, %v6611_v30 }
 0x4d0   :  { %v6815_v36 = vpop.f32.mrf.mxu2 }
 0x4d5   :  { %3451 = vmatmul.msk.f32.gmra.mxu2 %vm223_vm1, %v7806_v62 }
 0x4d6   :  { %3489 = vmatmul.msk.f32.gmra.mxu3 %vm1141_vm2, %v7762_v33 }
 0x4d8   :  { %v6821_v40 = vpop.f32.mrf.mxu2 }
 0x4d9   :  { %v6823_v15 = vpop.f32.mrf.mxu3 }
 0x4de   :  { %3490 = vmatmul.msk.f32.gmra.mxu3 %vm1141_vm2, %v7770_v52 }
 0x4e0   :  { %v6827_v31 = vpop.f32.mrf.mxu2 }
 0x4e1   :  { %v6829_v55 = vpop.f32.mrf.mxu3 }
 0x4e6   :  { %3491 = vmatmul.msk.f32.gmra.mxu3 %vm1141_vm2, %v7772_v20 }
 0x4e8   :  { %v6833_v51 = vpop.f32.mrf.mxu2 }
 0x4e9   :  { %v6835_v47 = vpop.f32.mrf.mxu3 }
 0x4ee   :  { %3492 = vmatmul.msk.f32.gmra.mxu3 %vm1141_vm2, %v7776_v3 }
 0x4f0   :  { %v6839_v10 = vpop.f32.mrf.mxu2 }
 0x4f1   :  { %v6841_v56 = vpop.f32.mrf.mxu3 }
 0x4f2   :  { %7807 = vst [vmem:[#allocation36_spill] sm:$0xff] %v6841_v56 }
 0x4f6   :  { %3493 = vmatmul.msk.f32.gmra.mxu3 %vm1141_vm2, %v7782_v44 }
 0x4f8   :  { %v2237_v62 = vpop.f32.mrf.mxu2 }
 0x4f9   :  { %v6845_v26 = vpop.f32.mrf.mxu3 }
 0x4fa   :  { %7808 = vst [vmem:[#allocation81_spill] sm:$0xff] %v6845_v26 }
 0x4fe   :  { %3508 = vmatmul.msk.f32.vlgmr.msrb.gmra.mxu3 %vm1141_vm2, %v6567_v11 }
 0x500   :  { %v2240_v16 = vpop.f32.mrf.mxu2 }
 0x501   :  { %v6849_v28 = vpop.f32.mrf.mxu3 }
 0x502   :  { %7809 = vst [vmem:[#allocation78_spill] sm:$0xff] %v6849_v28 }
 0x506   :  { %3509 = vmatmul.msk.f32.gmra.mxu3 %vm1141_vm2, %v6611_v30 }
 0x508   :  { %v2243_v39 = vpop.f32.mrf.mxu2 }
 0x509   :  { %v6853_v32 = vpop.f32.mrf.mxu3 }
 0x50a   :  { %7810 = vst [vmem:[#allocation69_spill] sm:$0xff] %v6853_v32 }
 0x50e   :  { %3510 = vmatmul.msk.f32.gmra.mxu3 %vm1141_vm2, %v7762_v33 }
 0x510   :  { %v2246_v5 = vpop.f32.mrf.mxu2 }
 0x511   :  { %v6857_v57 = vpop.f32.mrf.mxu3 }
 0x512   :  { %7811 = vst [vmem:[#allocation82_spill] sm:$0xff] %v6857_v57 }
 0x516   :  { %3511 = vmatmul.msk.f32.gmra.mxu3 %vm1141_vm2, %v7770_v52 }
 0x518   :  { %v2249_v26 = vpop.f32.mrf.mxu2 }
 0x519   :  { %v6861_v58 = vpop.f32.mrf.mxu3 }
 0x51a   :  { %7812 = vst [vmem:[#allocation85_spill] sm:$0xff] %v6861_v58 }
 0x51e   :  { %3512 = vmatmul.msk.f32.gmra.mxu3 %vm1141_vm2, %v7772_v20 }
 0x520   :  { %v2252_v28 = vpop.f32.mrf.mxu2 }
 0x521   :  { %v6865_v7 = vpop.f32.mrf.mxu3 }
 0x522   :  { %7813 = vst [vmem:[#allocation84_spill] sm:$0xff] %v6865_v7  ;;  %v2320_v7 = vmax.f32 %v6767_v53, %v2252_v28 }
 0x526   :  { %3513 = vmatmul.msk.f32.gmra.mxu3 %vm1141_vm2, %v7776_v3 }
 0x528   :  { %v2255_v32 = vpop.f32.mrf.mxu2 }
 0x529   :  { %v6869_v33 = vpop.f32.mrf.mxu3  ;;  %v2325_v54 = vmax.f32 %v6781_v24, %v2255_v32  ;;  %v2310_v32 = vmax.f32 %v6741_v14, %v2246_v5 }
 0x52a   :  { %7814 = vst [vmem:[#allocation87_spill] sm:$0xff] %v6869_v33 }
 0x52b   :  { %v6887_v50 = vadd.f32 %v2325_v54, %v4439_v21 }
 0x52d   :  { %v2485_v21 = vmax.f32 %v6887_v50, 0.0 }
 0x52e   :  { %3514 = vmatmul.msk.f32.gmra.mxu3 %vm1141_vm2, %v7782_v44  ;;  %v2315_v44 = vmax.f32 %v6751_v48, %v2249_v26 }
 0x530   :  { %v2258_v57 = vpop.f32.mrf.mxu2  ;;  %v6901_v26 = vadd.f32 %v2315_v44, %v7670_v43  ;;  %v2295_v43 = vmax.f32 %v6690_v9, %v2237_v62  ;;  %v7818_v44 = vld [vmem:[#allocation28_spill] sm:$0xff] }
 0x531   :  { %v6873_v52 = vpop.f32.mrf.mxu3  ;;  %v2330_v17 = vmax.f32 %v2210_v2, %v2258_v57 }
 0x533   :  { %v6880_v3 = vadd.f32 %v2330_v17, %v4459_v61 }
 0x535   :  { %v2490_v28 = vmax.f32 %v6880_v3, 0.0 }
 0x538   :  { %v2261_v58 = vpop.f32.mrf.mxu2 }
 0x539   :  { %v2335_v20 = vmax.f32 %v2213_v38, %v2261_v58  ;;  %v6876_v56 = vpop.f32.mrf.mxu3  ;;  %v6892_v58 = vadd.f32 %v2320_v7, %v7668_v23  ;;  %v2300_v23 = vmax.f32 %v6709_v60, %v2240_v16  ;;  %v6910_v7 = vadd.f32 %v2310_v32, %v7673_v4  ;;  %v7819_v32 = vld [vmem:[#allocation89_spill] sm:$0xff] }
 0x53a   :  { %v2290_v16 = vmax.f32 %v6674_v18, %v6839_v10 }
 0x53b   :  { %v6883_v33 = vadd.f32 %v2335_v20, %v4445_v49  ;;  %v2305_v49 = vmax.f32 %v6725_v34, %v2243_v39  ;;  %v2480_v5 = vmax.f32 %v6892_v58, 0.0  ;;  %v2475_v39 = vmax.f32 %v6901_v26, 0.0  ;;  %v7842_v58 = vld [vmem:[#allocation30_spill] sm:$0xff] }
 0x53c   :  { %v6925_v4 = vadd.f32 %v2300_v23, %v7678_v6  ;;  %v2470_v60 = vmax.f32 %v6910_v7, 0.0  ;;  %v2375_v34 = vadd.f32 %v2295_v43, %v7680_v27  ;;  %v2280_v6 = vmax.f32 %v6623_v59, %v6827_v31  ;;  %v7815_v27 = vld [vmem:[#allocation90_spill] sm:$0xff]  ;;  %v7816_v59 = vld [vmem:[#allocation83_spill] sm:$0xff]  ;;  %v7820_v23 = vld [vmem:[#allocation45_spill] sm:$0xff] }
 0x53d   :  { %v2495_v57 = vmax.f32 %v6883_v33, 0.0  ;;  %v6917_v17 = vadd.f32 %v2305_v49, %v7676_v12  ;;  %v2285_v12 = vmax.f32 %v6657_v13, %v6833_v51  ;;  %v2370_v48 = vadd.f32 %v2290_v16, %v7681_v25  ;;  %v7817_v25 = vld [vmem:[#allocation86_spill] sm:$0xff]  ;;  %v7821_v43 = vld [vmem:[#allocation44_spill] sm:$0xff] }
 0x53e   :  { %v2460_v53 = vmax.f32 %v6925_v4, 0.0  ;;  %v2353_v13 = vmax.f32 %v7815_v27, %v6455_v22  ;;  %v2455_v38 = vmax.f32 %v2375_v34, 0.0  ;;  %v2348_v31 = vmax.f32 %v7817_v25, %v7816_v59  ;;  %v7838_v33 = vld [vmem:[#allocation74_spill] sm:$0xff] }
 0x53f   :  { %2672 = vmatpush.msra.mxu1 %v2495_v57  ;;  %v2465_v14 = vmax.f32 %v6917_v17, 0.0  ;;  %v2365_v2 = vadd.f32 %v2285_v12, %v7683_v29  ;;  %v2360_v10 = vadd.f32 %v2280_v6, %v4617_v46  ;;  %v2343_v22 = vmax.f32 %v7819_v32, %v7818_v44  ;;  %v3643_v26 = vld [vmem:[#allocation2 + $0x20] sm:$0xff] }
 0x540   :  { %v6897_v61 = vpop.f32.mrf.mxu2  ;;  %v2433_v29 = vadd.f32 %v2353_v13, %v7764_v1  ;;  %v2338_v16 = vmax.f32 %v7821_v43, %v7820_v23  ;;  %v2428_v46 = vadd.f32 %v2348_v31, %v7766_v41 }
 0x541   :  { %2673 = vmatpush.msra.mxu1 %v2490_v28  ;;  %v6906_v54 = vpop.f32.mrf.mxu3  ;;  %v2445_v49 = vmax.f32 %v2365_v2, 0.0  ;;  %v2440_v34 = vmax.f32 %v2360_v10, 0.0  ;;  %v2423_v6 = vadd.f32 %v2343_v22, %v7767_v8 }
 0x542   :  { %v2418_v27 = vadd.f32 %v2338_v16, %v7768_v45  ;;  %v2508_v13 = vmax.f32 %v2428_v46, 0.0  ;;  %v7829_v16 = vld [vmem:[#allocation71_spill] sm:$0xff]  ;;  %v6996_v46 = vld [vmem:[#allocation2 + $0x10] sm:$0xff] }
 0x543   :  { %2674 = vmatpush.msra.mxu1 %v2485_v21  ;;  %v2503_v59 = vmax.f32 %v2423_v6, 0.0 }
 0x544   :  { %v2498_v10 = vmax.f32 %v2418_v27, 0.0 }
 0x545   :  { %2675 = vmatpush.msra.mxu1 %v2480_v5 }
 0x547   :  { %2676 = vmatpush.msra.mxu1 %v2475_v39 }
 0x548   :  { %v2267_v9 = vpop.f32.mrf.mxu2 }
 0x549   :  { %2677 = vmatpush.msra.mxu1 %v2470_v60  ;;  %v2723_v18 = vpop.f32.mrf.mxu3 }
 0x54a   :  { %v2896_v24 = vmax.f32 %v6823_v15, %v2723_v18  ;;  %v2450_v15 = vmax.f32 %v2370_v48, 0.0  ;;  %v2513_v48 = vmax.f32 %v2433_v29, 0.0  ;;  %v7825_v29 = vld [vmem:[#allocation36_spill] sm:$0xff] }
 0x54b   :  { %2678 = vmatpush.msra.mxu1 %v2465_v14 }
 0x54c   :  { %v2931_v51 = vadd.f32 %v2896_v24, %v5220_v42 }
 0x54d   :  { %2679 = vmatpush.msra.mxu1 %v2460_v53 }
 0x54e   :  { %v2966_v62 = vmax.f32 %v2931_v51, 0.0 }
 0x54f   :  { %2680 = vmatpush.msra.mxu1 %v2455_v38 }
 0x550   :  { %v2270_v20 = vpop.f32.mrf.mxu2  ;;  %3522 = vst [vmem:[%s7176_s5 + $0x118] sm:$0xff] %v2966_v62 }
 0x551   :  { %2681 = vmatpush.msra.mxu1 %v2450_v15  ;;  %v2726_v12 = vpop.f32.mrf.mxu3  ;;  %v2350_v2 = vmax.f32 %v6815_v36, %v2270_v20  ;;  %v2340_v15 = vmax.f32 %v6801_v37, %v6897_v61 }
 0x552   :  { %v2901_v18 = vmax.f32 %v6829_v55, %v2726_v12  ;;  %v2345_v55 = vmax.f32 %v6809_v0, %v2267_v9  ;;  %v7830_v12 = vmax.f32 %v7829_v16, 0.0 }
 0x553   :  { %2682 = vmatpush.msra.mxu1 %v2445_v49  ;;  %v2430_v36 = vadd.f32 %v2350_v2, %v7766_v41  ;;  %v7822_v41 = vmax.f32 %v6546_v19, 0.0  ;;  %v7828_v19 = vld [vmem:[#allocation19_spill] sm:$0xff] }
 0x554   :  { %v2936_v24 = vadd.f32 %v2901_v18, %v5238_v35  ;;  %v2425_v0 = vadd.f32 %v2345_v55, %v7767_v8  ;;  %v7823_v8 = vld [vmem:[#allocation49_spill] sm:$0xff]  ;;  %v7831_v18 = vld [vmem:[#allocation7_spill] sm:$0xff] }
 0x555   :  { %2683 = vmatpush.msra.mxu1 %v2440_v34  ;;  %v2510_v32 = vmax.f32 %v2430_v36, 0.0  ;;  %v7832_v6 = vmax.f32 %v7831_v18, 0.0 }
 0x556   :  { %3480 = vmatmul.msk.f32.vlgmr.msra.gmra.mxu1 %vm1141_vm2, %v6567_v11  ;;  %v2971_v38 = vmax.f32 %v2936_v24, 0.0 }
 0x557   :  { %2786 = vmatpush.msrb.mxu1 %v2513_v48  ;;  %v7833_v48 = vld [vmem:[#allocation39_spill] sm:$0xff] }
 0x558   :  { %v2273_v51 = vpop.f32.mrf.mxu2  ;;  %3527 = vst [vmem:[%s7176_s5 + $0x140] sm:$0xff] %v2971_v38  ;;  %v7834_v24 = vmax.f32 %v7833_v48, 0.0  ;;  %v7836_v38 = vld [vmem:[#allocation50_spill] sm:$0xff] }
 0x559   :  { %v2355_v25 = vmax.f32 %v6821_v40, %v2273_v51  ;;  %2787 = vmatpush.msrb.mxu1 %v2508_v13  ;;  %v2729_v31 = vpop.f32.mrf.mxu3  ;;  %v2420_v40 = vadd.f32 %v2340_v15, %v7768_v45  ;;  %v7826_v45 = vld [vmem:[#allocation41_spill] sm:$0xff]  ;;  %v7837_v51 = vmax.f32 %v7836_v38, 0.0  ;;  %v7845_v15 = vld [vmem:[#allocation76_spill] sm:$0xff] }
 0x55a   :  { %v2906_v20 = vmax.f32 %v6835_v47, %v2729_v31  ;;  %v7824_v47 = vmax.f32 %v7823_v8, 0.0  ;;  %v7827_v23 = vmax.f32 %v7826_v45, 0.0  ;;  %v7835_v13 = vld [vmem:[#allocation81_spill] sm:$0xff] }
 0x55b   :  { %v2435_v62 = vadd.f32 %v2355_v25, %v7764_v1  ;;  %2788 = vmatpush.msrb.mxu1 %v2503_v59  ;;  %v2505_v1 = vmax.f32 %v2425_v0, 0.0  ;;  %v2500_v22 = vmax.f32 %v2420_v40, 0.0  ;;  %v7839_v59 = vld [vmem:[#allocation79_spill] sm:$0xff]  ;;  %v3642_v25 = vld [vmem:[#allocation2 + $0x18] sm:$0xff] }
 0x55c   :  { %v2941_v44 = vadd.f32 %v2906_v20, %v7746_v63  ;;  %v7840_v55 = vmax.f32 %v7839_v59, 0.0  ;;  %v3645_v20 = vld [vmem:[#allocation2 + $0x30] sm:$0x3] }
 0x55d   :  { %v2515_v9 = vmax.f32 %v2435_v62, 0.0  ;;  %2789 = vmatpush.msrb.mxu1 %v2498_v10  ;;  %v3644_v10 = vld [vmem:[#allocation2 + $0x28] sm:$0xff] }
 0x55e   :  { %3481 = vmatmul.msk.f32.gmra.mxu1 %vm1141_vm2, %v6611_v30  ;;  %v2976_v37 = vmax.f32 %v2941_v44, 0.0  ;;  %v7846_v44 = vld [vmem:[#allocation75_spill] sm:$0xff] }
 0x55f   :  { %2790 = vmatpush.msrb.mxu1 %v7822_v41  ;;  %2862 = vmatpush.msrb.mxu0 %v2515_v9 }
 0x560   :  { %3532 = vst [vmem:[%s7176_s5 + $0x168] sm:$0xff] %v2976_v37 }
 0x561   :  { %2791 = vmatpush.msrb.mxu1 %v7824_v47  ;;  %2863 = vmatpush.msrb.mxu0 %v2510_v32  ;;  %v2732_v61 = vpop.f32.mrf.mxu3 }
 0x562   :  { %v2911_v49 = vmax.f32 %v7825_v29, %v2732_v61 }
 0x563   :  { %2792 = vmatpush.msrb.mxu1 %v7827_v23  ;;  %2864 = vmatpush.msrb.mxu0 %v2505_v1  ;;  %v7847_v1 = vld [vmem:[#allocation46_spill] sm:$0xff]  ;;  %v7849_v23 = vld [vmem:[#allocation73_spill] sm:$0xff] }
 0x564   :  { %v2946_v43 = vadd.f32 %v2911_v49, %v7828_v19 }
 0x565   :  { %2793 = vmatpush.msrb.mxu1 %v7830_v12  ;;  %2865 = vmatpush.msrb.mxu0 %v2500_v22  ;;  %v7848_v22 = vld [vmem:[#allocation31_spill] sm:$0xff] }
 0x566   :  { %3482 = vmatmul.msk.f32.gmra.mxu1 %vm1141_vm2, %v6996_v46  ;;  %v2981_v34 = vmax.f32 %v2946_v43, 0.0 }
 0x567   :  { %2794 = vmatpush.msrb.mxu1 %v7832_v6  ;;  %2866 = vmatpush.msrb.mxu0 %v2495_v57 }
 0x568   :  { %3537 = vst [vmem:[%s7176_s5 + $0x190] sm:$0xff] %v2981_v34  ;;  %v7850_v34 = vld [vmem:[#allocation25_spill] sm:$0xff] }
 0x569   :  { %2795 = vmatpush.msrb.mxu1 %v7834_v24  ;;  %2867 = vmatpush.msrb.mxu0 %v2490_v28  ;;  %v2735_v27 = vpop.f32.mrf.mxu3  ;;  %v7841_v28 = vld [vmem:[#allocation78_spill] sm:$0xff] }
 0x56a   :  { %v2916_v2 = vmax.f32 %v7835_v13, %v2735_v27  ;;  %v7851_v27 = vld [vmem:[#allocation6_spill] sm:$0xff] }
 0x56b   :  { %2796 = vmatpush.msrb.mxu1 %v7837_v51  ;;  %2868 = vmatpush.msrb.mxu0 %v2485_v21 }
 0x56c   :  { %v2951_v57 = vadd.f32 %v2916_v2, %v7838_v33 }
 0x56d   :  { %2797 = vmatpush.msrb.mxu1 %v7840_v55  ;;  %2869 = vmatpush.msrb.mxu0 %v2480_v5 }
 0x56e   :  { %3483 = vmatmul.msk.f32.gmra.mxu1 %vm1141_vm2, %v3642_v25  ;;  %v2986_v3 = vmax.f32 %v2951_v57, 0.0 }
 0x56f   :  { %2870 = vmatpush.msrb.mxu0 %v2475_v39 }
 0x570   :  { %3542 = vst [vmem:[%s7176_s5 + $0x1b8] sm:$0xff] %v2986_v3 }
 0x571   :  { %2871 = vmatpush.msrb.mxu0 %v2470_v60  ;;  %v2738_v50 = vpop.f32.mrf.mxu3  ;;  %v7843_v60 = vld [vmem:[#allocation69_spill] sm:$0xff] }
 0x572   :  { %v2921_v21 = vmax.f32 %v7841_v28, %v2738_v50 }
 0x573   :  { %2872 = vmatpush.msrb.mxu0 %v2465_v14  ;;  %v7844_v14 = vld [vmem:[#allocation42_spill] sm:$0xff] }
 0x574   :  { %v2956_v5 = vadd.f32 %v2921_v21, %v7842_v58 }
 0x575   :  { %2873 = vmatpush.msrb.mxu0 %v2460_v53 }
 0x576   :  { %3484 = vmatmul.msk.f32.gmra.mxu1 %vm1141_vm2, %v3643_v26  ;;  %3515 = vmatmul.msk.f32.vlgmr.msrb.gmra.mxu0 %vm1141_vm2, %v6567_v11  ;;  %v2991_v39 = vmax.f32 %v2956_v5, 0.0 }
 0x578   :  { %3547 = vst [vmem:[%s7176_s5 + $0x1e0] sm:$0xff] %v2991_v39 }
 0x579   :  { %v2741_v7 = vpop.f32.mrf.mxu3 }
 0x57a   :  { %v2926_v17 = vmax.f32 %v7843_v60, %v2741_v7 }
 0x57c   :  { %v2961_v31 = vadd.f32 %v2926_v17, %v7844_v14 }
 0x57e   :  { %3485 = vmatmul.msk.f32.gmra.mxu1 %vm1141_vm2, %v3644_v10  ;;  %3516 = vmatmul.msk.f32.gmra.mxu0 %vm1141_vm2, %v6611_v30  ;;  %v2996_v4 = vmax.f32 %v2961_v31, 0.0 }
 0x580   :  { %3552 = vst [vmem:[%s7176_s5 + $0x208] sm:$0x3] %v2996_v4 }
 0x581   :  { %v2837_v53 = vpop.f32.mrf.mxu3 }
 0x582   :  { %v2899_v36 = vmax.f32 %v7845_v15, %v2837_v53 }
 0x584   :  { %v2934_v62 = vadd.f32 %v2899_v36, %v5220_v42 }
 0x586   :  { %3486 = vmatmul.msk.f32.gmra.mxu1 %vm1141_vm2, %v3645_v20  ;;  %3517 = vmatmul.msk.f32.gmra.mxu0 %vm1141_vm2, %v6996_v46  ;;  %v2969_v0 = vmax.f32 %v2934_v62, 0.0  ;;  %v7852_v62 = vld [vmem:[#allocation82_spill] sm:$0xff] }
 0x588   :  { %3525 = vst [vmem:[%s7176_s5 + $0x130] sm:$0xff] %v2969_v0 }
 0x589   :  { %v2840_v9 = vpop.f32.mrf.mxu3 }
 0x58a   :  { %v2904_v40 = vmax.f32 %v7846_v44, %v2840_v9 }
 0x58c   :  { %v2939_v32 = vadd.f32 %v2904_v40, %v5238_v35 }
 0x58e   :  { %3501 = vmatmul.msk.f32.vlgmr.msrb.gmra.mxu1 %vm1141_vm2, %v6567_v11  ;;  %3518 = vmatmul.msk.f32.gmra.mxu0 %vm1141_vm2, %v3642_v25  ;;  %v2974_v37 = vmax.f32 %v2939_v32, 0.0 }
 0x590   :  { %3530 = vst [vmem:[%s7176_s5 + $0x158] sm:$0xff] %v2974_v37 }
 0x591   :  { %v2843_v41 = vpop.f32.mrf.mxu3 }
 0x592   :  { %v2909_v8 = vmax.f32 %v7847_v1, %v2843_v41  ;;  %v7853_v1 = vld [vmem:[#allocation85_spill] sm:$0xff] }
 0x594   :  { %v2944_v47 = vadd.f32 %v2909_v8, %v7746_v63 }
 0x596   :  { %3502 = vmatmul.msk.f32.gmra.mxu1 %vm1141_vm2, %v6611_v30  ;;  %3519 = vmatmul.msk.f32.gmra.mxu0 %vm1141_vm2, %v3643_v26  ;;  %v2979_v61 = vmax.f32 %v2944_v47, 0.0 }
 0x598   :  { %3535 = vst [vmem:[%s7176_s5 + $0x180] sm:$0xff] %v2979_v61 }
 0x599   :  { %v2846_v11 = vpop.f32.mrf.mxu3 }
 0x59a   :  { %v2914_v29 = vmax.f32 %v7848_v22, %v2846_v11 }
 0x59c   :  { %v2949_v49 = vadd.f32 %v2914_v29, %v7828_v19 }
 0x59e   :  { %3503 = vmatmul.msk.f32.gmra.mxu1 %vm1141_vm2, %v6996_v46  ;;  %3520 = vmatmul.msk.f32.gmra.mxu0 %vm1141_vm2, %v3644_v10  ;;  %v2984_v45 = vmax.f32 %v2949_v49, 0.0 }
 0x5a0   :  { %3540 = vst [vmem:[%s7176_s5 + $0x1a8] sm:$0xff] %v2984_v45  ;;  %v7854_v45 = vld [vmem:[#allocation84_spill] sm:$0xff] }
 0x5a1   :  { %v2849_v30 = vpop.f32.mrf.mxu3 }
 0x5a2   :  { %v2919_v43 = vmax.f32 %v7849_v23, %v2849_v30 }
 0x5a4   :  { %v2954_v16 = vadd.f32 %v2919_v43, %v7838_v33 }
 0x5a6   :  { %3504 = vmatmul.msk.f32.gmra.mxu1 %vm1141_vm2, %v3642_v25  ;;  %3521 = vmatmul.msk.f32.gmra.mxu0 %vm1141_vm2, %v3645_v20  ;;  %v2989_v12 = vmax.f32 %v2954_v16, 0.0 }
 0x5a8   :  { %3545 = vst [vmem:[%s7176_s5 + $0x1d0] sm:$0xff] %v2989_v12 }
 0x5a9   :  { %v2852_v46 = vpop.f32.mrf.mxu3 }
 0x5aa   :  { %v2924_v18 = vmax.f32 %v7850_v34, %v2852_v46 }
 0x5ac   :  { %v2959_v6 = vadd.f32 %v2924_v18, %v7842_v58  ;;  %v7855_v18 = vld [vmem:[#allocation87_spill] sm:$0xff] }
 0x5ae   :  { %3505 = vmatmul.msk.f32.gmra.mxu1 %vm1141_vm2, %v3643_v26  ;;  %v2994_v48 = vmax.f32 %v2959_v6, 0.0 }
 0x5b0   :  { %3550 = vst [vmem:[%s7176_s5 + $0x1f8] sm:$0xff] %v2994_v48 }
 0x5b1   :  { %v2855_v24 = vpop.f32.mrf.mxu3 }
 0x5b2   :  { %v2929_v13 = vmax.f32 %v7851_v27, %v2855_v24 }
 0x5b4   :  { %v2964_v2 = vadd.f32 %v2929_v13, %v7844_v14 }
 0x5b6   :  { %3506 = vmatmul.msk.f32.gmra.mxu1 %vm1141_vm2, %v3644_v10  ;;  %v2999_v38 = vmax.f32 %v2964_v2, 0.0 }
 0x5b8   :  { %3555 = vst [vmem:[%s7176_s5 + $0x220] sm:$0x3] %v2999_v38 }
 0x5be   :  { %3507 = vmatmul.msk.f32.gmra.mxu1 %vm1141_vm2, %v3645_v20 }
 0x5d3   :  { %v2685_v51 = vpop.f32.mrf.mxu1 }
 0x5db   :  { %v2688_v57 = vpop.f32.mrf.mxu1 }
 0x5e3   :  { %v2691_v59 = vpop.f32.mrf.mxu1 }
 0x5eb   :  { %v2694_v55 = vpop.f32.mrf.mxu1 }
 0x5f3   :  { %v2697_v25 = vpop.f32.mrf.mxu1  ;;  %v2875_v3 = vpop.f32.mrf.mxu0 }
 0x5f4   :  { %v2900_v50 = vmax.f32 %v2685_v51, %v2875_v3 }
 0x5f6   :  { %v2935_v28 = vadd.f32 %v2900_v50, %v5220_v42 }
 0x5f8   :  { %v2970_v21 = vmax.f32 %v2935_v28, 0.0 }
 0x5fa   :  { %3526 = vst.msk [vmem:[%s7176_s5 + $0x138] sm:$0xff] %vm1652_vm3, %v2970_v21 }
 0x5fb   :  { %v2700_v5 = vpop.f32.mrf.mxu1  ;;  %v2878_v26 = vpop.f32.mrf.mxu0 }
 0x5fc   :  { %v2905_v39 = vmax.f32 %v2688_v57, %v2878_v26 }
 0x5fe   :  { %v2940_v7 = vadd.f32 %v2905_v39, %v5238_v35 }
 0x600   :  { %v2975_v60 = vmax.f32 %v2940_v7, 0.0 }
 0x602   :  { %3531 = vst.msk [vmem:[%s7176_s5 + $0x160] sm:$0xff] %vm1652_vm3, %v2975_v60 }
 0x603   :  { %v2703_v17 = vpop.f32.mrf.mxu1  ;;  %v2881_v31 = vpop.f32.mrf.mxu0 }
 0x604   :  { %v2910_v10 = vmax.f32 %v2691_v59, %v2881_v31 }
 0x606   :  { %v2945_v4 = vadd.f32 %v2910_v10, %v7746_v63 }
 0x608   :  { %v2980_v53 = vmax.f32 %v2945_v4, 0.0 }
 0x60a   :  { %3536 = vst.msk [vmem:[%s7176_s5 + $0x188] sm:$0xff] %vm1652_vm3, %v2980_v53 }
 0x60b   :  { %v2799_v15 = vpop.f32.mrf.mxu1  ;;  %v2884_v36 = vpop.f32.mrf.mxu0 }
 0x60c   :  { %v2898_v20 = vmax.f32 %v7852_v62, %v2799_v15  ;;  %v2915_v0 = vmax.f32 %v2694_v55, %v2884_v36 }
 0x60e   :  { %v2933_v9 = vadd.f32 %v2898_v20, %v5220_v42  ;;  %v2950_v44 = vadd.f32 %v2915_v0, %v7828_v19 }
 0x610   :  { %v2968_v40 = vmax.f32 %v2933_v9, 0.0  ;;  %v2985_v32 = vmax.f32 %v2950_v44, 0.0 }
 0x612   :  { %3524 = vst [vmem:[%s7176_s5 + $0x128] sm:$0xff] %v2968_v40 }
 0x613   :  { %3541 = vst.msk [vmem:[%s7176_s5 + $0x1b0] sm:$0xff] %vm1652_vm3, %v2985_v32  ;;  %v2802_v37 = vpop.f32.mrf.mxu1  ;;  %v2887_v41 = vpop.f32.mrf.mxu0 }
 0x614   :  { %v2903_v8 = vmax.f32 %v7853_v1, %v2802_v37  ;;  %v2920_v47 = vmax.f32 %v2697_v25, %v2887_v41 }
 0x616   :  { %v2938_v42 = vadd.f32 %v2903_v8, %v5238_v35  ;;  %v2955_v61 = vadd.f32 %v2920_v47, %v7838_v33 }
 0x618   :  { %v2973_v11 = vmax.f32 %v2938_v42, 0.0  ;;  %v2990_v22 = vmax.f32 %v2955_v61, 0.0 }
 0x61a   :  { %3529 = vst [vmem:[%s7176_s5 + $0x150] sm:$0xff] %v2973_v11 }
 0x61b   :  { %3546 = vst.msk [vmem:[%s7176_s5 + $0x1d8] sm:$0xff] %vm1652_vm3, %v2990_v22  ;;  %v2805_v29 = vpop.f32.mrf.mxu1  ;;  %v2890_v49 = vpop.f32.mrf.mxu0 }
 0x61c   :  { %v2908_v30 = vmax.f32 %v7854_v45, %v2805_v29  ;;  %v2925_v23 = vmax.f32 %v2700_v5, %v2890_v49 }
 0x61e   :  { %v2943_v35 = vadd.f32 %v2908_v30, %v7746_v63  ;;  %v2960_v43 = vadd.f32 %v2925_v23, %v7842_v58 }
 0x620   :  { %v2978_v16 = vmax.f32 %v2943_v35, 0.0  ;;  %v2995_v12 = vmax.f32 %v2960_v43, 0.0 }
 0x622   :  { %3534 = vst [vmem:[%s7176_s5 + $0x178] sm:$0xff] %v2978_v16 }
 0x623   :  { %3551 = vst.msk [vmem:[%s7176_s5 + $0x200] sm:$0xff] %vm1652_vm3, %v2995_v12  ;;  %v2808_v46 = vpop.f32.mrf.mxu1  ;;  %v2893_v34 = vpop.f32.mrf.mxu0 }
 0x624   :  { %v2913_v6 = vmax.f32 %v7855_v18, %v2808_v46  ;;  %v2930_v48 = vmax.f32 %v2703_v17, %v2893_v34 }
 0x626   :  { %v2948_v63 = vadd.f32 %v2913_v6, %v7828_v19  ;;  %v2965_v24 = vadd.f32 %v2930_v48, %v7844_v14 }
 0x628   :  { %v2983_v27 = vmax.f32 %v2948_v63, 0.0  ;;  %v3000_v13 = vmax.f32 %v2965_v24, 0.0 }
 0x62a   :  { %3539 = vst [vmem:[%s7176_s5 + $0x1a0] sm:$0xff] %v2983_v27 }
 0x62b   :  { %3556 = vst.msk [vmem:[%s7176_s5 + $0x228] sm:$0x3] %vm1683_vm4, %v3000_v13  ;;  %v2811_v2 = vpop.f32.mrf.mxu1 }
 0x62c   :  { %v2918_v38 = vmax.f32 %v6873_v52, %v2811_v2 }
 0x62e   :  { %v2953_v51 = vadd.f32 %v2918_v38, %v7838_v33 }
 0x630   :  { %v2988_v57 = vmax.f32 %v2953_v51, 0.0 }
 0x632   :  { %3544 = vst [vmem:[%s7176_s5 + $0x1c8] sm:$0xff] %v2988_v57 }
 0x633   :  { %v2814_v19 = vpop.f32.mrf.mxu1 }
 0x634   :  { %v2923_v59 = vmax.f32 %v6876_v56, %v2814_v19 }
 0x636   :  { %v2958_v55 = vadd.f32 %v2923_v59, %v7842_v58 }
 0x638   :  { %v2993_v25 = vmax.f32 %v2958_v55, 0.0 }
 0x63a   :  { %3549 = vst [vmem:[%s7176_s5 + $0x1f0] sm:$0xff] %v2993_v25 }
 0x63b   :  { %v2817_v3 = vpop.f32.mrf.mxu1 }
 0x63c   :  { %v2928_v52 = vmax.f32 %v6906_v54, %v2817_v3 }
 0x63e   :  { %v2963_v33 = vadd.f32 %v2928_v52, %v7844_v14 }
 0x640   :  { %v2998_v50 = vmax.f32 %v2963_v33, 0.0 }
 0x642   :  { %3554 = vst [vmem:[%s7176_s5 + $0x218] sm:$0x3] %v2998_v50 }
 0x643   :  { %3041 = vsyncpa [#allocation3], 1 }

// kernel: forward.3
= control target key start
LH: loop header
LB: loop body
LE: loop exit
PB: predicated region body
PF: predicated region fallthrough
CT: control target
= control target key end

     0   :  { %12 = vsyncpa [#allocation4], 0  ;;  %s2983_s24 = smov 0   ;;  %s2985_s25 = smov 0   ;;  %s4139_s0 = inlined_call_operand.vmem [shape: f32[2,30720], index: 0, kind: input, shape index: {}]   ;;  %s4140_s1 = inlined_call_operand.vmem [shape: f32[30720,120], index: 1, kind: input, shape index: {}]   ;;  %s4141_s2 = inlined_call_operand.vmem [shape: f32[1,120], index: 2, kind: input, shape index: {}]   ;;  %s4142_s3 = inlined_call_operand.vmem [shape: f32[120,84], index: 3, kind: input, shape index: {}]   ;;  %s4143_s4 = inlined_call_operand.vmem [shape: f32[1,84], index: 4, kind: input, shape index: {}]   ;;  %s4144_s5 = inlined_call_operand.vmem [shape: f32[84,6], index: 5, kind: input, shape index: {}]   ;;  %s4145_s6 = inlined_call_operand.vmem [shape: f32[1,6], index: 6, kind: input, shape index: {}]   ;;  %s4146_s7 = inlined_call_operand.hbm [shape: f32[2,6], index: 7, kind: output, shape index: {}]  }
   0x1   :  { %s2987_s26 = smov 0  }
   0x2 LB: > { %s2835_s27 = sadd.s32 4294967295, %s2939_s26   ;;  %s27_s28 = sadd.s32 1, %s2935_s25  ;;  %s2939_s26 = sphi %s2987_s26, %s18_s26   ;;  %s2935_s25 = sphi %s2985_s25, %s4148_s25   ;;  %s2931_s24 = sphi %s2983_s24, %s4147_s24  }
   0x3   : > { %p28_p0 = scmp.ge.s32.totalorder %s27_s28, 4  ;;  %p2838_p1 = scmp.ge.s32.totalorder %s2939_s26, 1 }
   0x4   : > { %p268_p2 = scmp.lt.s32.totalorder %s2939_s26, 5 }
   0x5   : > { %s4150_s28 = smov (%p28_p0, %s27_s28), 0 }
   0x6   : > { %p269_p3 = pnand %p2838_p1, %p268_p2 }
   0x7   : > { %s304_s29 = smul.u32 (!%p269_p3), 60, %s2931_s24  ;;  %p2841_p6 = scmp.ne.s32.totalorder (!%p269_p3), %s2931_s24, 0 }
   0x8   : > { %272 = sbr.rel (%p269_p3) target bundleno = 966 (0x3c6), region = 48 }
   0x9   : > { %s314_s30 = smul.u32 (!%p269_p3), 960, %s2931_s24  ;;  %p307_p4 = scmp.lt.s32.totalorder (!%p269_p3), %s304_s29, 239 }
   0xb   : > { %p315_p5 = scmp.lt.s32.totalorder (!%p269_p3), %s314_s30, 3839 }
   0xd   : > { %s4152_s29 = smov (!%p307_p4, %s304_s29), 239  ;;  %s4154_s30 = smov (!%p315_p5, %s314_s30), 3839 }
   0xe   : > { %s2839_s8 = sshll.u32 %s4152_s29, 1  ;;  %s2840_s12 = sshll.u32 %s4154_s30, 3 }
   0xf   : > { %s3009_s11 = scalar_lea.vmem %s4139_s0, %s2839_s8  ;;  %s3014_s15 = scalar_lea.vmem %s4140_s1, %s2840_s12 }
  0x10   : > { %323 = sbr.rel (%p2841_p6) target bundleno = 23 (0x17), region = 52 }
  0x15   : > { %vm324_vm0 = vcmask 975872   ;;  %v2941_v0 = vmov 0.0  }
  0x16   : > { %325 = vst.msk [vmem:[#allocation2] sm:$0x3] %vm324_vm0, %v2941_v0 }
  0x17 PF: > { %v357_v1 = vld [vmem:[%s3014_s15 + $0x78] sm:$0xff]  ;;  %v356_v3 = vld [vmem:[%s3014_s15 + $0x70] sm:$0xff]  ;;  %v355_v7 = vld [vmem:[%s3014_s15 + $0x68] sm:$0xff]  ;;  %vm2654_vm1 = vcmask 975872   ;;  %p2842_p7 = scmp.ne.s32.totalorder %s2931_s24, 3 }
  0x18   : > { %v389_v2 = vld [vmem:[%s3014_s15 + $0x178] sm:$0xff]  ;;  %1453 = vmatpush.msra.mxu0 %v357_v1  ;;  %v388_v5 = vld [vmem:[%s3014_s15 + $0x170] sm:$0xff]  ;;  %v387_v9 = vld [vmem:[%s3014_s15 + $0x168] sm:$0xff] }
  0x19   : > { %1493 = vmatpush.msra.mxu2 %v389_v2  ;;  %v373_v4 = vld [vmem:[%s3014_s15 + $0xf8] sm:$0xff]  ;;  %v372_v8 = vld [vmem:[%s3014_s15 + $0xf0] sm:$0xff]  ;;  %v371_v11 = vld [vmem:[%s3014_s15 + $0xe8] sm:$0xff] }
  0x1a   : > { %v405_v6 = vld [vmem:[%s3014_s15 + $0x1f8] sm:$0xff]  ;;  %1473 = vmatpush.msra.mxu1 %v373_v4  ;;  %1454 = vmatpush.msra.mxu0 %v356_v3  ;;  %v404_v10 = vld [vmem:[%s3014_s15 + $0x1f0] sm:$0xff]  ;;  %v354_v12 = vld [vmem:[%s3014_s15 + $0x60] sm:$0xff] }
  0x1b   : > { %1513 = vmatpush.msra.mxu3 %v405_v6  ;;  %1494 = vmatpush.msra.mxu2 %v388_v5  ;;  %v386_v13 = vld [vmem:[%s3014_s15 + $0x160] sm:$0xff]  ;;  %v403_v14 = vld [vmem:[%s3014_s15 + $0x1e8] sm:$0xff]  ;;  %v353_v17 = vld [vmem:[%s3014_s15 + $0x58] sm:$0xff] }
  0x1c   : > { %1474 = vmatpush.msra.mxu1 %v372_v8  ;;  %1455 = vmatpush.msra.mxu0 %v355_v7  ;;  %v370_v15 = vld [vmem:[%s3014_s15 + $0xe0] sm:$0xff]  ;;  %v385_v18 = vld [vmem:[%s3014_s15 + $0x158] sm:$0xff]  ;;  %v352_v21 = vld [vmem:[%s3014_s15 + $0x50] sm:$0xff] }
  0x1d   : > { %1514 = vmatpush.msra.mxu3 %v404_v10  ;;  %1495 = vmatpush.msra.mxu2 %v387_v9  ;;  %v402_v16 = vld [vmem:[%s3014_s15 + $0x1e0] sm:$0xff]  ;;  %v369_v19 = vld [vmem:[%s3014_s15 + $0xd8] sm:$0xff]  ;;  %v384_v22 = vld [vmem:[%s3014_s15 + $0x150] sm:$0xff] }
  0x1e   : > { %1475 = vmatpush.msra.mxu1 %v371_v11  ;;  %1456 = vmatpush.msra.mxu0 %v354_v12  ;;  %v401_v20 = vld [vmem:[%s3014_s15 + $0x1d8] sm:$0xff]  ;;  %v368_v23 = vld [vmem:[%s3014_s15 + $0xd0] sm:$0xff]  ;;  %v351_v25 = vld [vmem:[%s3014_s15 + $0x48] sm:$0xff] }
  0x1f   : > { %1515 = vmatpush.msra.mxu3 %v403_v14  ;;  %1496 = vmatpush.msra.mxu2 %v386_v13  ;;  %v400_v24 = vld [vmem:[%s3014_s15 + $0x1d0] sm:$0xff]  ;;  %v383_v26 = vld [vmem:[%s3014_s15 + $0x148] sm:$0xff]  ;;  %v350_v29 = vld [vmem:[%s3014_s15 + $0x40] sm:$0xff] }
  0x20   : > { %1476 = vmatpush.msra.mxu1 %v370_v15  ;;  %1457 = vmatpush.msra.mxu0 %v353_v17  ;;  %v367_v27 = vld [vmem:[%s3014_s15 + $0xc8] sm:$0xff]  ;;  %v382_v30 = vld [vmem:[%s3014_s15 + $0x140] sm:$0xff]  ;;  %v349_v33 = vld [vmem:[%s3014_s15 + $0x38] sm:$0xff] }
  0x21   : > { %1516 = vmatpush.msra.mxu3 %v402_v16  ;;  %1497 = vmatpush.msra.mxu2 %v385_v18  ;;  %v399_v28 = vld [vmem:[%s3014_s15 + $0x1c8] sm:$0xff]  ;;  %v366_v31 = vld [vmem:[%s3014_s15 + $0xc0] sm:$0xff]  ;;  %v381_v34 = vld [vmem:[%s3014_s15 + $0x138] sm:$0xff] }
  0x22   : > { %1477 = vmatpush.msra.mxu1 %v369_v19  ;;  %1458 = vmatpush.msra.mxu0 %v352_v21  ;;  %v398_v32 = vld [vmem:[%s3014_s15 + $0x1c0] sm:$0xff]  ;;  %v365_v35 = vld [vmem:[%s3014_s15 + $0xb8] sm:$0xff]  ;;  %v348_v37 = vld [vmem:[%s3014_s15 + $0x30] sm:$0xff] }
  0x23   : > { %1517 = vmatpush.msra.mxu3 %v401_v20  ;;  %1498 = vmatpush.msra.mxu2 %v384_v22  ;;  %v397_v36 = vld [vmem:[%s3014_s15 + $0x1b8] sm:$0xff]  ;;  %v380_v38 = vld [vmem:[%s3014_s15 + $0x130] sm:$0xff]  ;;  %v347_v41 = vld [vmem:[%s3014_s15 + $0x28] sm:$0xff] }
  0x24   : > { %1478 = vmatpush.msra.mxu1 %v368_v23  ;;  %1459 = vmatpush.msra.mxu0 %v351_v25  ;;  %v364_v39 = vld [vmem:[%s3014_s15 + $0xb0] sm:$0xff]  ;;  %v379_v42 = vld [vmem:[%s3014_s15 + $0x128] sm:$0xff]  ;;  %v346_v45 = vld [vmem:[%s3014_s15 + $0x20] sm:$0xff] }
  0x25   : > { %1518 = vmatpush.msra.mxu3 %v400_v24  ;;  %1499 = vmatpush.msra.mxu2 %v383_v26  ;;  %v396_v40 = vld [vmem:[%s3014_s15 + $0x1b0] sm:$0xff]  ;;  %v363_v43 = vld [vmem:[%s3014_s15 + $0xa8] sm:$0xff]  ;;  %v378_v46 = vld [vmem:[%s3014_s15 + $0x120] sm:$0xff] }
  0x26   : > { %1479 = vmatpush.msra.mxu1 %v367_v27  ;;  %1460 = vmatpush.msra.mxu0 %v350_v29  ;;  %v395_v44 = vld [vmem:[%s3014_s15 + $0x1a8] sm:$0xff]  ;;  %v362_v47 = vld [vmem:[%s3014_s15 + $0xa0] sm:$0xff]  ;;  %v345_v49 = vld [vmem:[%s3014_s15 + $0x18] sm:$0xff] }
  0x27   : > { %1519 = vmatpush.msra.mxu3 %v399_v28  ;;  %1500 = vmatpush.msra.mxu2 %v382_v30  ;;  %v394_v48 = vld [vmem:[%s3014_s15 + $0x1a0] sm:$0xff]  ;;  %v377_v50 = vld [vmem:[%s3014_s15 + $0x118] sm:$0xff]  ;;  %v344_v53 = vld [vmem:[%s3014_s15 + $0x10] sm:$0xff] }
  0x28   : > { %1480 = vmatpush.msra.mxu1 %v366_v31  ;;  %1461 = vmatpush.msra.mxu0 %v349_v33  ;;  %v361_v51 = vld [vmem:[%s3014_s15 + $0x98] sm:$0xff]  ;;  %v376_v54 = vld [vmem:[%s3014_s15 + $0x110] sm:$0xff]  ;;  %v343_v57 = vld [vmem:[%s3014_s15 + $0x8] sm:$0xff] }
  0x29   : > { %1520 = vmatpush.msra.mxu3 %v398_v32  ;;  %1501 = vmatpush.msra.mxu2 %v381_v34  ;;  %v393_v52 = vld [vmem:[%s3014_s15 + $0x198] sm:$0xff]  ;;  %v360_v55 = vld [vmem:[%s3014_s15 + $0x90] sm:$0xff]  ;;  %v375_v58 = vld [vmem:[%s3014_s15 + $0x108] sm:$0xff] }
  0x2a   : > { %1481 = vmatpush.msra.mxu1 %v365_v35  ;;  %1462 = vmatpush.msra.mxu0 %v348_v37  ;;  %v392_v56 = vld [vmem:[%s3014_s15 + $0x190] sm:$0xff]  ;;  %v359_v59 = vld [vmem:[%s3014_s15 + $0x88] sm:$0xff]  ;;  %v342_v61 = vld [vmem:[%s3014_s15] sm:$0xff] }
  0x2b   : > { %1521 = vmatpush.msra.mxu3 %v397_v36  ;;  %1502 = vmatpush.msra.mxu2 %v380_v38  ;;  %v391_v60 = vld [vmem:[%s3014_s15 + $0x188] sm:$0xff]  ;;  %v374_v62 = vld [vmem:[%s3014_s15 + $0x100] sm:$0xff]  ;;  %v421_v63 = vld [vmem:[%s3014_s15 + $0x278] sm:$0xff] }
  0x2c   : > { %1482 = vmatpush.msra.mxu1 %v364_v39  ;;  %1463 = vmatpush.msra.mxu0 %v347_v41  ;;  %v453_v0 = vld [vmem:[%s3014_s15 + $0x378] sm:$0xff]  ;;  %v358_v1 = vld [vmem:[%s3014_s15 + $0x80] sm:$0xff]  ;;  %v420_v3 = vld [vmem:[%s3014_s15 + $0x270] sm:$0xff] }
  0x2d   : > { %1522 = vmatpush.msra.mxu3 %v396_v40  ;;  %1503 = vmatpush.msra.mxu2 %v379_v42  ;;  %v390_v2 = vld [vmem:[%s3014_s15 + $0x180] sm:$0xff]  ;;  %v437_v4 = vld [vmem:[%s3014_s15 + $0x2f8] sm:$0xff]  ;;  %v452_v5 = vld [vmem:[%s3014_s15 + $0x370] sm:$0xff] }
  0x2e   : > { %1483 = vmatpush.msra.mxu1 %v363_v43  ;;  %1464 = vmatpush.msra.mxu0 %v346_v45  ;;  %v469_v6 = vld [vmem:[%s3014_s15 + $0x3f8] sm:$0xff]  ;;  %v419_v7 = vld [vmem:[%s3014_s15 + $0x268] sm:$0xff]  ;;  %v436_v8 = vld [vmem:[%s3014_s15 + $0x2f0] sm:$0xff] }
  0x2f   : > { %1523 = vmatpush.msra.mxu3 %v395_v44  ;;  %1504 = vmatpush.msra.mxu2 %v378_v46  ;;  %v451_v9 = vld [vmem:[%s3014_s15 + $0x368] sm:$0xff]  ;;  %v468_v10 = vld [vmem:[%s3014_s15 + $0x3f0] sm:$0xff]  ;;  %v418_v11 = vld [vmem:[%s3014_s15 + $0x260] sm:$0xff] }
  0x30   : > { %1484 = vmatpush.msra.mxu1 %v362_v47  ;;  %1465 = vmatpush.msra.mxu0 %v345_v49  ;;  %v435_v12 = vld [vmem:[%s3014_s15 + $0x2e8] sm:$0xff]  ;;  %v450_v13 = vld [vmem:[%s3014_s15 + $0x360] sm:$0xff]  ;;  %v417_v15 = vld [vmem:[%s3014_s15 + $0x258] sm:$0xff] }
  0x31   : > { %1524 = vmatpush.msra.mxu3 %v394_v48  ;;  %1505 = vmatpush.msra.mxu2 %v377_v50  ;;  %v467_v14 = vld [vmem:[%s3014_s15 + $0x3e8] sm:$0xff]  ;;  %v434_v16 = vld [vmem:[%s3014_s15 + $0x2e0] sm:$0xff]  ;;  %v449_v17 = vld [vmem:[%s3014_s15 + $0x358] sm:$0xff] }
  0x32   : > { %1485 = vmatpush.msra.mxu1 %v361_v51  ;;  %1466 = vmatpush.msra.mxu0 %v344_v53  ;;  %v466_v18 = vld [vmem:[%s3014_s15 + $0x3e0] sm:$0xff]  ;;  %v416_v19 = vld [vmem:[%s3014_s15 + $0x250] sm:$0xff]  ;;  %v433_v20 = vld [vmem:[%s3014_s15 + $0x2d8] sm:$0xff] }
  0x33   : > { %1525 = vmatpush.msra.mxu3 %v393_v52  ;;  %1506 = vmatpush.msra.mxu2 %v376_v54  ;;  %v448_v21 = vld [vmem:[%s3014_s15 + $0x350] sm:$0xff]  ;;  %v465_v22 = vld [vmem:[%s3014_s15 + $0x3d8] sm:$0xff]  ;;  %v327_v23 = vld [vmem:[%s3009_s11] sm:$0xff] }
  0x34   : > { %1486 = vmatpush.msra.mxu1 %v360_v55  ;;  %1467 = vmatpush.msra.mxu0 %v343_v57  ;;  %v415_v24 = vld [vmem:[%s3014_s15 + $0x248] sm:$0xff]  ;;  %v432_v25 = vld [vmem:[%s3014_s15 + $0x2d0] sm:$0xff]  ;;  %1317 = vst [vmem:[#allocation1] ss:$4 sm:$0xff] %v327_v23  ;;  %v414_v28 = vld [vmem:[%s3014_s15 + $0x240] sm:$0xff] }
  0x35   : > { %1526 = vmatpush.msra.mxu3 %v392_v56  ;;  %1507 = vmatpush.msra.mxu2 %v375_v58  ;;  %v447_v26 = vld [vmem:[%s3014_s15 + $0x348] sm:$0xff]  ;;  %v464_v27 = vld [vmem:[%s3014_s15 + $0x3d0] sm:$0xff]  ;;  %v446_v30 = vld [vmem:[%s3014_s15 + $0x340] sm:$0xff] }
  0x36   : > { %1487 = vmatpush.msra.mxu1 %v359_v59  ;;  %1468 = vmatpush.msra.mxu0 %v342_v61  ;;  %v431_v29 = vld [vmem:[%s3014_s15 + $0x2c8] sm:$0xff]  ;;  %v413_v32 = vld [vmem:[%s3014_s15 + $0x238] sm:$0xff]  ;;  %v430_v33 = vld [vmem:[%s3014_s15 + $0x2c0] sm:$0xff] }
  0x37   : > { %1527 = vmatpush.msra.mxu3 %v391_v60  ;;  %1508 = vmatpush.msra.mxu2 %v374_v62  ;;  %v463_v31 = vld [vmem:[%s3014_s15 + $0x3c8] sm:$0xff]  ;;  %v445_v34 = vld [vmem:[%s3014_s15 + $0x338] sm:$0xff]  ;;  %v462_v35 = vld [vmem:[%s3014_s15 + $0x3c0] sm:$0xff] }
  0x38   : > { %1533 = vmatpush.msrb.mxu0 %v421_v63  ;;  %1488 = vmatpush.msra.mxu1 %v358_v1  ;;  %v412_v36 = vld [vmem:[%s3014_s15 + $0x230] sm:$0xff]  ;;  %v429_v37 = vld [vmem:[%s3014_s15 + $0x2b8] sm:$0xff]  ;;  %v328_v40 = vld [vmem:[%s3009_s11 + $0x8] sm:$0xff] }
  0x39   : > { %1573 = vmatpush.msrb.mxu2 %v453_v0  ;;  %1528 = vmatpush.msra.mxu3 %v390_v2  ;;  %v444_v38 = vld [vmem:[%s3014_s15 + $0x330] sm:$0xff]  ;;  %v461_v39 = vld [vmem:[%s3014_s15 + $0x3b8] sm:$0xff]  ;;  %v411_v41 = vld [vmem:[%s3014_s15 + $0x228] sm:$0xff]  ;;  %1319 = vst [vmem:[#allocation1 + $0x20] ss:$4 sm:$0xff] %v328_v40 }
  0x3a   : > { %1534 = vmatpush.msrb.mxu0 %v420_v3  ;;  %1553 = vmatpush.msrb.mxu1 %v437_v4  ;;  %v428_v42 = vld [vmem:[%s3014_s15 + $0x2b0] sm:$0xff]  ;;  %v443_v44 = vld [vmem:[%s3014_s15 + $0x328] sm:$0xff]  ;;  %v410_v50 = vld [vmem:[%s3014_s15 + $0x220] sm:$0xff] }
  0x3b   : > { %1574 = vmatpush.msrb.mxu2 %v452_v5  ;;  %1593 = vmatpush.msrb.mxu3 %v469_v6  ;;  %v329_v43 = vld [vmem:[%s3009_s11 + $0x10] sm:$0xff]  ;;  %v1322_v45 = vld.sshfl [vmem:[#allocation1 + $0x10] sm:$0xff pattern:$0x73625140]  ;;  %v427_v51 = vld [vmem:[%s3014_s15 + $0x2a8] sm:$0xff] }
  0x3c   : > { %1535 = vmatpush.msrb.mxu0 %v419_v7  ;;  %1554 = vmatpush.msrb.mxu1 %v436_v8  ;;  %v3125_v46 = vld.sshfl [vmem:[#allocation1] sm:$0xff pattern:$0x73625140]  ;;  %v3127_v47 = vld.sshfl [vmem:[#allocation1 + $0x18] sm:$0xff pattern:$0x73625140] }
  0x3d   : > { %1575 = vmatpush.msrb.mxu2 %v451_v9  ;;  %1594 = vmatpush.msrb.mxu3 %v468_v10  ;;  %v3129_v48 = vld.sshfl [vmem:[#allocation1 + $0x8] sm:$0xff pattern:$0x73625140]  ;;  %v460_v49 = vld [vmem:[%s3014_s15 + $0x3b0] sm:$0xff]  ;;  %v442_v52 = vld [vmem:[%s3014_s15 + $0x320] sm:$0xff] }
  0x3e   : > { %1536 = vmatpush.msrb.mxu0 %v418_v11  ;;  %1555 = vmatpush.msrb.mxu1 %v435_v12  ;;  %1328 = vst [vmem:[#allocation1] ss:$4 sm:$0xff] %v329_v43  ;;  %v459_v53 = vld [vmem:[%s3014_s15 + $0x3a8] sm:$0xff]  ;;  %v409_v54 = vld [vmem:[%s3014_s15 + $0x218] sm:$0xff]  ;;  %v426_v55 = vld [vmem:[%s3014_s15 + $0x2a0] sm:$0xff] }
  0x3f   : > { %1576 = vmatpush.msrb.mxu2 %v450_v13  ;;  %1595 = vmatpush.msrb.mxu3 %v467_v14  ;;  %v441_v56 = vld [vmem:[%s3014_s15 + $0x318] sm:$0xff]  ;;  %v458_v57 = vld [vmem:[%s3014_s15 + $0x3a0] sm:$0xff]  ;;  %v408_v58 = vld [vmem:[%s3014_s15 + $0x210] sm:$0xff] }
  0x40   : > { %1537 = vmatpush.msrb.mxu0 %v417_v15  ;;  %1556 = vmatpush.msrb.mxu1 %v434_v16  ;;  %v425_v59 = vld [vmem:[%s3014_s15 + $0x298] sm:$0xff]  ;;  %v3143_v61 = vld.sshfl [vmem:[#allocation1 + $0x30] sm:$0xff pattern:$0x73625140]  ;;  %v440_v1 = vld [vmem:[%s3014_s15 + $0x310] sm:$0xff] }
  0x41   : > { %1577 = vmatpush.msrb.mxu2 %v449_v17  ;;  %1596 = vmatpush.msrb.mxu3 %v466_v18  ;;  %v330_v60 = vld [vmem:[%s3009_s11 + $0x18] sm:$0xff]  ;;  %v3145_v62 = vld.sshfl [vmem:[#allocation1 + $0x20] sm:$0xff pattern:$0x73625140]  ;;  %v407_v3 = vld [vmem:[%s3014_s15 + $0x208] sm:$0xff] }
  0x42   : > { %1538 = vmatpush.msrb.mxu0 %v416_v19  ;;  %1557 = vmatpush.msrb.mxu1 %v433_v20  ;;  %v3147_v63 = vld.sshfl [vmem:[#allocation1 + $0x38] sm:$0xff pattern:$0x73625140]  ;;  %v3149_v0 = vld.sshfl [vmem:[#allocation1 + $0x28] sm:$0xff pattern:$0x73625140] }
  0x43   : > { %1578 = vmatpush.msrb.mxu2 %v448_v21  ;;  %1597 = vmatpush.msrb.mxu3 %v465_v22  ;;  %v457_v2 = vld [vmem:[%s3014_s15 + $0x398] sm:$0xff]  ;;  %1329 = vst [vmem:[#allocation1 + $0x20] ss:$4 sm:$0xff] %v330_v60  ;;  %v424_v4 = vld [vmem:[%s3014_s15 + $0x290] sm:$0xff]  ;;  %v439_v5 = vld [vmem:[%s3014_s15 + $0x308] sm:$0xff] }
  0x44   : > { %1539 = vmatpush.msrb.mxu0 %v415_v24  ;;  %1558 = vmatpush.msrb.mxu1 %v432_v25  ;;  %v456_v6 = vld [vmem:[%s3014_s15 + $0x390] sm:$0xff]  ;;  %v406_v7 = vld [vmem:[%s3014_s15 + $0x200] sm:$0xff]  ;;  %v423_v8 = vld [vmem:[%s3014_s15 + $0x288] sm:$0xff] }
  0x45   : > { %1579 = vmatpush.msrb.mxu2 %v447_v26  ;;  %1598 = vmatpush.msrb.mxu3 %v464_v27  ;;  %v438_v9 = vld [vmem:[%s3014_s15 + $0x300] sm:$0xff]  ;;  %v455_v10 = vld [vmem:[%s3014_s15 + $0x388] sm:$0xff]  ;;  %v485_v11 = vld [vmem:[%s3014_s15 + $0x478] sm:$0xff] }
  0x46   : > { %1540 = vmatpush.msrb.mxu0 %v414_v28  ;;  %1559 = vmatpush.msrb.mxu1 %v431_v29  ;;  %v517_v12 = vld [vmem:[%s3014_s15 + $0x578] sm:$0xff]  ;;  %v422_v13 = vld [vmem:[%s3014_s15 + $0x280] sm:$0xff]  ;;  %v484_v15 = vld [vmem:[%s3014_s15 + $0x470] sm:$0xff] }
  0x47   : > { %1580 = vmatpush.msrb.mxu2 %v446_v30  ;;  %1599 = vmatpush.msrb.mxu3 %v463_v31  ;;  %v454_v14 = vld [vmem:[%s3014_s15 + $0x380] sm:$0xff]  ;;  %v501_v16 = vld [vmem:[%s3014_s15 + $0x4f8] sm:$0xff]  ;;  %v516_v17 = vld [vmem:[%s3014_s15 + $0x570] sm:$0xff] }
  0x48   : > { %1541 = vmatpush.msrb.mxu0 %v413_v32  ;;  %1560 = vmatpush.msrb.mxu1 %v430_v33  ;;  %v533_v18 = vld [vmem:[%s3014_s15 + $0x5f8] sm:$0xff]  ;;  %v483_v19 = vld [vmem:[%s3014_s15 + $0x468] sm:$0xff]  ;;  %v500_v20 = vld [vmem:[%s3014_s15 + $0x4f0] sm:$0xff] }
  0x49   : > { %1581 = vmatpush.msrb.mxu2 %v445_v34  ;;  %1600 = vmatpush.msrb.mxu3 %v462_v35  ;;  %v515_v21 = vld [vmem:[%s3014_s15 + $0x568] sm:$0xff]  ;;  %v532_v22 = vld [vmem:[%s3014_s15 + $0x5f0] sm:$0xff]  ;;  %v482_v23 = vld [vmem:[%s3014_s15 + $0x460] sm:$0xff] }
  0x4a   : > { %1542 = vmatpush.msrb.mxu0 %v412_v36  ;;  %1561 = vmatpush.msrb.mxu1 %v429_v37  ;;  %v499_v24 = vld [vmem:[%s3014_s15 + $0x4e8] sm:$0xff]  ;;  %v514_v25 = vld [vmem:[%s3014_s15 + $0x560] sm:$0xff]  ;;  %v3179_v26 = vld.sshfl [vmem:[#allocation1] sm:$0xff pattern:$0x73625140] }
  0x4b   : > { %1582 = vmatpush.msrb.mxu2 %v444_v38  ;;  %1601 = vmatpush.msrb.mxu3 %v461_v39  ;;  %v3181_v27 = vld.sshfl [vmem:[#allocation1 + $0x10] sm:$0xff pattern:$0x73625140]  ;;  %v3183_v28 = vld.sshfl [vmem:[#allocation1 + $0x8] sm:$0xff pattern:$0x73625140] }
  0x4c   : > { %1543 = vmatpush.msrb.mxu0 %v411_v41  ;;  %1562 = vmatpush.msrb.mxu1 %v428_v42  ;;  %v531_v29 = vld [vmem:[%s3014_s15 + $0x5e8] sm:$0xff]  ;;  %v331_v30 = vld [vmem:[%s3009_s11 + $0x20] sm:$0xff]  ;;  %v481_v32 = vld [vmem:[%s3014_s15 + $0x458] sm:$0xff] }
  0x4d   : > { %1583 = vmatpush.msrb.mxu2 %v443_v44  ;;  %1602 = vmatpush.msrb.mxu3 %v460_v49  ;;  %v3187_v31 = vld.sshfl [vmem:[#allocation1 + $0x18] sm:$0xff pattern:$0x73625140]  ;;  %v498_v33 = vld [vmem:[%s3014_s15 + $0x4e0] sm:$0xff]  ;;  %v513_v34 = vld [vmem:[%s3014_s15 + $0x558] sm:$0xff] }
  0x4e   : > { %1544 = vmatpush.msrb.mxu0 %v410_v50  ;;  %1563 = vmatpush.msrb.mxu1 %v427_v51  ;;  %1338 = vst [vmem:[#allocation1] ss:$4 sm:$0xff] %v331_v30  ;;  %v530_v35 = vld [vmem:[%s3014_s15 + $0x5e0] sm:$0xff]  ;;  %v480_v36 = vld [vmem:[%s3014_s15 + $0x450] sm:$0xff]  ;;  %v497_v37 = vld [vmem:[%s3014_s15 + $0x4d8] sm:$0xff] }
  0x4f   : > { %1584 = vmatpush.msrb.mxu2 %v442_v52  ;;  %1603 = vmatpush.msrb.mxu3 %v459_v53  ;;  %v512_v38 = vld [vmem:[%s3014_s15 + $0x550] sm:$0xff]  ;;  %v529_v39 = vld [vmem:[%s3014_s15 + $0x5d8] sm:$0xff]  ;;  %v479_v40 = vld [vmem:[%s3014_s15 + $0x448] sm:$0xff] }
  0x50   : > { %1545 = vmatpush.msrb.mxu0 %v409_v54  ;;  %1564 = vmatpush.msrb.mxu1 %v426_v55  ;;  %v496_v41 = vld [vmem:[%s3014_s15 + $0x4d0] sm:$0xff]  ;;  %v511_v42 = vld [vmem:[%s3014_s15 + $0x548] sm:$0xff]  ;;  %v478_v44 = vld [vmem:[%s3014_s15 + $0x440] sm:$0xff] }
  0x51   : > { %1585 = vmatpush.msrb.mxu2 %v441_v56  ;;  %1604 = vmatpush.msrb.mxu3 %v458_v57  ;;  %v528_v43 = vld [vmem:[%s3014_s15 + $0x5d0] sm:$0xff]  ;;  %v494_v49 = vld [vmem:[%s3014_s15 + $0x4c0] sm:$0xff]  ;;  %v509_v50 = vld [vmem:[%s3014_s15 + $0x538] sm:$0xff] }
  0x52   : > { %1546 = vmatpush.msrb.mxu0 %v408_v58  ;;  %1565 = vmatpush.msrb.mxu1 %v425_v59  ;;  %v526_v51 = vld [vmem:[%s3014_s15 + $0x5c0] sm:$0xff]  ;;  %v476_v52 = vld [vmem:[%s3014_s15 + $0x430] sm:$0xff]  ;;  %v493_v53 = vld [vmem:[%s3014_s15 + $0x4b8] sm:$0xff] }
  0x53   : > { %1586 = vmatpush.msrb.mxu2 %v440_v1  ;;  %1605 = vmatpush.msrb.mxu3 %v457_v2  ;;  %v508_v54 = vld [vmem:[%s3014_s15 + $0x530] sm:$0xff]  ;;  %v525_v55 = vld [vmem:[%s3014_s15 + $0x5b8] sm:$0xff]  ;;  %v475_v56 = vld [vmem:[%s3014_s15 + $0x428] sm:$0xff] }
  0x54   : > { %1547 = vmatpush.msrb.mxu0 %v407_v3  ;;  %1566 = vmatpush.msrb.mxu1 %v424_v4  ;;  %v492_v57 = vld [vmem:[%s3014_s15 + $0x4b0] sm:$0xff]  ;;  %v507_v58 = vld [vmem:[%s3014_s15 + $0x528] sm:$0xff]  ;;  %v474_v60 = vld [vmem:[%s3014_s15 + $0x420] sm:$0xff] }
  0x55   : > { %1587 = vmatpush.msrb.mxu2 %v439_v5  ;;  %1606 = vmatpush.msrb.mxu3 %v456_v6  ;;  %v524_v59 = vld [vmem:[%s3014_s15 + $0x5b0] sm:$0xff]  ;;  %v490_v1 = vld [vmem:[%s3014_s15 + $0x4a0] sm:$0xff]  ;;  %v505_v2 = vld [vmem:[%s3014_s15 + $0x518] sm:$0xff] }
  0x56   : > { %1509 = vmatmul.f32.vlgmr.msra.gmra.mxu2 %v1322_v45  ;;  %1548 = vmatpush.msrb.mxu0 %v406_v7  ;;  %v495_v45 = vld [vmem:[%s3014_s15 + $0x4c8] sm:$0xff]  ;;  %v522_v3 = vld [vmem:[%s3014_s15 + $0x5a0] sm:$0xff]  ;;  %v472_v4 = vld [vmem:[%s3014_s15 + $0x410] sm:$0xff] }
  0x57   : > { %1567 = vmatpush.msrb.mxu1 %v423_v8  ;;  %1588 = vmatpush.msrb.mxu2 %v438_v9  ;;  %v489_v5 = vld [vmem:[%s3014_s15 + $0x498] sm:$0xff]  ;;  %v504_v6 = vld [vmem:[%s3014_s15 + $0x510] sm:$0xff]  ;;  %v471_v8 = vld [vmem:[%s3014_s15 + $0x408] sm:$0xff] }
  0x58   : > { %1607 = vmatpush.msrb.mxu3 %v455_v10  ;;  %1469 = vmatmul.f32.vlgmr.msra.gmra.mxu0 %v3125_v46  ;;  %v510_v46 = vld [vmem:[%s3014_s15 + $0x540] sm:$0xff]  ;;  %v521_v7 = vld [vmem:[%s3014_s15 + $0x598] sm:$0xff]  ;;  %v488_v9 = vld [vmem:[%s3014_s15 + $0x490] sm:$0xff] }
  0x59   : > { %1529 = vmatmul.f32.vlgmr.msra.gmra.mxu3 %v3127_v47  ;;  %1613 = vmatpush.msra.mxu0 %v485_v11  ;;  %v527_v47 = vld [vmem:[%s3014_s15 + $0x5c8] sm:$0xff]  ;;  %v520_v11 = vld [vmem:[%s3014_s15 + $0x590] sm:$0xff] }
  0x5a   : > { %1653 = vmatpush.msra.mxu2 %v517_v12  ;;  %1568 = vmatpush.msrb.mxu1 %v422_v13  ;;  %v503_v10 = vld [vmem:[%s3014_s15 + $0x508] sm:$0xff]  ;;  %v470_v12 = vld [vmem:[%s3014_s15 + $0x400] sm:$0xff]  ;;  %v3258_v30 = vld.sshfl [vmem:[#allocation1 + $0x20] sm:$0xff pattern:$0x73625140] }
  0x5b   : > { %1608 = vmatpush.msrb.mxu3 %v454_v14  ;;  %1489 = vmatmul.f32.vlgmr.msra.gmra.mxu1 %v3129_v48  ;;  %v477_v48 = vld [vmem:[%s3014_s15 + $0x438] sm:$0xff]  ;;  %v487_v13 = vld [vmem:[%s3014_s15 + $0x488] sm:$0xff]  ;;  %v502_v14 = vld [vmem:[%s3014_s15 + $0x500] sm:$0xff] }
  0x5c   : > { %1614 = vmatpush.msra.mxu0 %v484_v15  ;;  %1633 = vmatpush.msra.mxu1 %v501_v16  ;;  %v519_v15 = vld [vmem:[%s3014_s15 + $0x588] sm:$0xff]  ;;  %v549_v16 = vld [vmem:[%s3014_s15 + $0x678] sm:$0xff] }
  0x5d   : > { %1654 = vmatpush.msra.mxu2 %v516_v17  ;;  %1673 = vmatpush.msra.mxu3 %v533_v18  ;;  %v581_v17 = vld [vmem:[%s3014_s15 + $0x778] sm:$0xff]  ;;  %v486_v18 = vld [vmem:[%s3014_s15 + $0x480] sm:$0xff] }
  0x5e   : > { %1615 = vmatpush.msra.mxu0 %v483_v19  ;;  %1634 = vmatpush.msra.mxu1 %v500_v20  ;;  %v518_v19 = vld [vmem:[%s3014_s15 + $0x580] sm:$0xff]  ;;  %v548_v20 = vld [vmem:[%s3014_s15 + $0x670] sm:$0xff] }
  0x5f   : > { %1655 = vmatpush.msra.mxu2 %v515_v21  ;;  %1674 = vmatpush.msra.mxu3 %v532_v22  ;;  %v565_v21 = vld [vmem:[%s3014_s15 + $0x6f8] sm:$0xff]  ;;  %v580_v22 = vld [vmem:[%s3014_s15 + $0x770] sm:$0xff] }
  0x60   : > { %1589 = vmatmul.f32.vlgmr.msrb.gmra.mxu2 %v3143_v61  ;;  %1616 = vmatpush.msra.mxu0 %v482_v23  ;;  %v491_v61 = vld [vmem:[%s3014_s15 + $0x4a8] sm:$0xff]  ;;  %v597_v23 = vld [vmem:[%s3014_s15 + $0x7f8] sm:$0xff] }
  0x61   : > { %1635 = vmatpush.msra.mxu1 %v499_v24  ;;  %1656 = vmatpush.msra.mxu2 %v514_v25  ;;  %v547_v24 = vld [vmem:[%s3014_s15 + $0x668] sm:$0xff]  ;;  %v564_v25 = vld [vmem:[%s3014_s15 + $0x6f0] sm:$0xff] }
  0x62   : > { %1675 = vmatpush.msra.mxu3 %v531_v29  ;;  %1549 = vmatmul.f32.vlgmr.msrb.gmra.mxu0 %v3145_v62  ;;  %v506_v62 = vld [vmem:[%s3014_s15 + $0x520] sm:$0xff]  ;;  %v579_v29 = vld [vmem:[%s3014_s15 + $0x768] sm:$0xff] }
  0x63   : > { %1609 = vmatmul.f32.vlgmr.msrb.gmra.mxu3 %v3147_v63  ;;  %1617 = vmatpush.msra.mxu0 %v481_v32  ;;  %v523_v63 = vld [vmem:[%s3014_s15 + $0x5a8] sm:$0xff]  ;;  %v3260_v32 = vld.sshfl [vmem:[#allocation1 + $0x30] sm:$0xff pattern:$0x73625140] }
  0x64   : > { %1636 = vmatpush.msra.mxu1 %v498_v33  ;;  %1657 = vmatpush.msra.mxu2 %v513_v34  ;;  %v3262_v33 = vld.sshfl [vmem:[#allocation1 + $0x28] sm:$0xff pattern:$0x73625140]  ;;  %v332_v34 = vld [vmem:[%s3009_s11 + $0x28] sm:$0xff] }
  0x65   : > { %1676 = vmatpush.msra.mxu3 %v530_v35  ;;  %1569 = vmatmul.f32.vlgmr.msrb.gmra.mxu1 %v3149_v0  ;;  %v473_v0 = vld [vmem:[%s3014_s15 + $0x418] sm:$0xff]  ;;  %v578_v35 = vld [vmem:[%s3014_s15 + $0x760] sm:$0xff] }
  0x66   : > { %1618 = vmatpush.msra.mxu0 %v480_v36  ;;  %1637 = vmatpush.msra.mxu1 %v497_v37  ;;  %v595_v36 = vld [vmem:[%s3014_s15 + $0x7e8] sm:$0xff]  ;;  %v545_v37 = vld [vmem:[%s3014_s15 + $0x658] sm:$0xff] }
  0x67   : > { %1658 = vmatpush.msra.mxu2 %v512_v38  ;;  %1677 = vmatpush.msra.mxu3 %v529_v39  ;;  %v562_v38 = vld [vmem:[%s3014_s15 + $0x6e0] sm:$0xff]  ;;  %v577_v39 = vld [vmem:[%s3014_s15 + $0x758] sm:$0xff] }
  0x68   : > { %1619 = vmatpush.msra.mxu0 %v479_v40  ;;  %1638 = vmatpush.msra.mxu1 %v496_v41  ;;  %v594_v40 = vld [vmem:[%s3014_s15 + $0x7e0] sm:$0xff]  ;;  %v544_v41 = vld [vmem:[%s3014_s15 + $0x650] sm:$0xff] }
  0x69   : > { %1659 = vmatpush.msra.mxu2 %v511_v42  ;;  %1678 = vmatpush.msra.mxu3 %v528_v43  ;;  %v561_v42 = vld [vmem:[%s3014_s15 + $0x6d8] sm:$0xff]  ;;  %v576_v43 = vld [vmem:[%s3014_s15 + $0x750] sm:$0xff] }
  0x6a   : > { %1620 = vmatpush.msra.mxu0 %v478_v44  ;;  %1639 = vmatpush.msra.mxu1 %v495_v45  ;;  %v593_v44 = vld [vmem:[%s3014_s15 + $0x7d8] sm:$0xff]  ;;  %v543_v45 = vld [vmem:[%s3014_s15 + $0x648] sm:$0xff] }
  0x6b   : > { %1660 = vmatpush.msra.mxu2 %v510_v46  ;;  %1679 = vmatpush.msra.mxu3 %v527_v47  ;;  %v560_v46 = vld [vmem:[%s3014_s15 + $0x6d0] sm:$0xff]  ;;  %v575_v47 = vld [vmem:[%s3014_s15 + $0x748] sm:$0xff] }
  0x6c   : > { %1621 = vmatpush.msra.mxu0 %v477_v48  ;;  %1640 = vmatpush.msra.mxu1 %v494_v49  ;;  %v592_v48 = vld [vmem:[%s3014_s15 + $0x7d0] sm:$0xff]  ;;  %v542_v49 = vld [vmem:[%s3014_s15 + $0x640] sm:$0xff] }
  0x6d   : > { %1661 = vmatpush.msra.mxu2 %v509_v50  ;;  %1680 = vmatpush.msra.mxu3 %v526_v51  ;;  %v559_v50 = vld [vmem:[%s3014_s15 + $0x6c8] sm:$0xff]  ;;  %v574_v51 = vld [vmem:[%s3014_s15 + $0x740] sm:$0xff] }
  0x6e   : > { %1622 = vmatpush.msra.mxu0 %v476_v52  ;;  %1641 = vmatpush.msra.mxu1 %v493_v53  ;;  %v591_v52 = vld [vmem:[%s3014_s15 + $0x7c8] sm:$0xff]  ;;  %v541_v53 = vld [vmem:[%s3014_s15 + $0x638] sm:$0xff] }
  0x6f   : > { %1662 = vmatpush.msra.mxu2 %v508_v54  ;;  %1681 = vmatpush.msra.mxu3 %v525_v55  ;;  %v558_v54 = vld [vmem:[%s3014_s15 + $0x6c0] sm:$0xff]  ;;  %v573_v55 = vld [vmem:[%s3014_s15 + $0x738] sm:$0xff] }
  0x70   : > { %1623 = vmatpush.msra.mxu0 %v475_v56  ;;  %1642 = vmatpush.msra.mxu1 %v492_v57  ;;  %v590_v56 = vld [vmem:[%s3014_s15 + $0x7c0] sm:$0xff]  ;;  %v540_v57 = vld [vmem:[%s3014_s15 + $0x630] sm:$0xff] }
  0x71   : > { %1663 = vmatpush.msra.mxu2 %v507_v58  ;;  %1682 = vmatpush.msra.mxu3 %v524_v59  ;;  %v557_v58 = vld [vmem:[%s3014_s15 + $0x6b8] sm:$0xff]  ;;  %v572_v59 = vld [vmem:[%s3014_s15 + $0x730] sm:$0xff] }
  0x72   : > { %1624 = vmatpush.msra.mxu0 %v474_v60  ;;  %1643 = vmatpush.msra.mxu1 %v491_v61  ;;  %v589_v60 = vld [vmem:[%s3014_s15 + $0x7b8] sm:$0xff]  ;;  %v539_v61 = vld [vmem:[%s3014_s15 + $0x628] sm:$0xff] }
  0x73   : > { %1664 = vmatpush.msra.mxu2 %v506_v62  ;;  %1683 = vmatpush.msra.mxu3 %v523_v63  ;;  %v556_v62 = vld [vmem:[%s3014_s15 + $0x6b0] sm:$0xff]  ;;  %v571_v63 = vld [vmem:[%s3014_s15 + $0x728] sm:$0xff] }
  0x74   : > { %1625 = vmatpush.msra.mxu0 %v473_v0  ;;  %1644 = vmatpush.msra.mxu1 %v490_v1  ;;  %v588_v0 = vld [vmem:[%s3014_s15 + $0x7b0] sm:$0xff]  ;;  %v538_v1 = vld [vmem:[%s3014_s15 + $0x620] sm:$0xff] }
  0x75   : > { %1665 = vmatpush.msra.mxu2 %v505_v2  ;;  %1684 = vmatpush.msra.mxu3 %v522_v3  ;;  %v555_v2 = vld [vmem:[%s3014_s15 + $0x6a8] sm:$0xff]  ;;  %v570_v3 = vld [vmem:[%s3014_s15 + $0x720] sm:$0xff] }
  0x76   : > { %1626 = vmatpush.msra.mxu0 %v472_v4  ;;  %1645 = vmatpush.msra.mxu1 %v489_v5  ;;  %v587_v4 = vld [vmem:[%s3014_s15 + $0x7a8] sm:$0xff]  ;;  %v537_v5 = vld [vmem:[%s3014_s15 + $0x618] sm:$0xff] }
  0x77   : > { %1666 = vmatpush.msra.mxu2 %v504_v6  ;;  %1685 = vmatpush.msra.mxu3 %v521_v7  ;;  %v554_v6 = vld [vmem:[%s3014_s15 + $0x6a0] sm:$0xff]  ;;  %v569_v7 = vld [vmem:[%s3014_s15 + $0x718] sm:$0xff] }
  0x78   : > { %1627 = vmatpush.msra.mxu0 %v471_v8  ;;  %1646 = vmatpush.msra.mxu1 %v488_v9  ;;  %v586_v8 = vld [vmem:[%s3014_s15 + $0x7a0] sm:$0xff]  ;;  %v536_v9 = vld [vmem:[%s3014_s15 + $0x610] sm:$0xff] }
  0x79   : > { %1667 = vmatpush.msra.mxu2 %v503_v10  ;;  %1686 = vmatpush.msra.mxu3 %v520_v11  ;;  %v553_v10 = vld [vmem:[%s3014_s15 + $0x698] sm:$0xff]  ;;  %v568_v11 = vld [vmem:[%s3014_s15 + $0x710] sm:$0xff] }
  0x7a   : > { %1628 = vmatpush.msra.mxu0 %v470_v12  ;;  %1647 = vmatpush.msra.mxu1 %v487_v13  ;;  %v585_v12 = vld [vmem:[%s3014_s15 + $0x798] sm:$0xff]  ;;  %v535_v13 = vld [vmem:[%s3014_s15 + $0x608] sm:$0xff] }
  0x7b   : > { %1668 = vmatpush.msra.mxu2 %v502_v14  ;;  %1687 = vmatpush.msra.mxu3 %v519_v15  ;;  %v552_v14 = vld [vmem:[%s3014_s15 + $0x690] sm:$0xff]  ;;  %v567_v15 = vld [vmem:[%s3014_s15 + $0x708] sm:$0xff] }
  0x7c   : > { %1629 = vmatmul.f32.vlgmr.msra.gmra.mxu0 %v3179_v26  ;;  %1669 = vmatmul.f32.vlgmr.msra.gmra.mxu2 %v3181_v27  ;;  %v596_v26 = vld [vmem:[%s3014_s15 + $0x7f0] sm:$0xff]  ;;  %v546_v27 = vld [vmem:[%s3014_s15 + $0x660] sm:$0xff] }
  0x7d   : > { %1693 = vmatpush.msrb.mxu0 %v549_v16  ;;  %1733 = vmatpush.msrb.mxu2 %v581_v17  ;;  %v584_v16 = vld [vmem:[%s3014_s15 + $0x790] sm:$0xff]  ;;  %v534_v17 = vld [vmem:[%s3014_s15 + $0x600] sm:$0xff] }
  0x7e   : > { %1648 = vmatpush.msra.mxu1 %v486_v18  ;;  %1688 = vmatpush.msra.mxu3 %v518_v19  ;;  %v551_v18 = vld [vmem:[%s3014_s15 + $0x688] sm:$0xff]  ;;  %v566_v19 = vld [vmem:[%s3014_s15 + $0x700] sm:$0xff] }
  0x7f   : > { %1649 = vmatmul.f32.vlgmr.msra.gmra.mxu1 %v3183_v28  ;;  %1689 = vmatmul.f32.vlgmr.msra.gmra.mxu3 %v3187_v31  ;;  %v563_v28 = vld [vmem:[%s3014_s15 + $0x6e8] sm:$0xff] }
  0x80   : > { %1694 = vmatpush.msrb.mxu0 %v548_v20  ;;  %1713 = vmatpush.msrb.mxu1 %v565_v21  ;;  %v3266_v31 = vld.sshfl [vmem:[#allocation1 + $0x38] sm:$0xff pattern:$0x73625140]  ;;  %v613_v21 = vld [vmem:[%s3014_s15 + $0x878] sm:$0xff] }
  0x81   : > { %1734 = vmatpush.msrb.mxu2 %v580_v22  ;;  %1753 = vmatpush.msrb.mxu3 %v597_v23  ;;  %1339 = vst [vmem:[#allocation1 + $0x20] ss:$4 sm:$0xff] %v332_v34  ;;  %v583_v20 = vld [vmem:[%s3014_s15 + $0x788] sm:$0xff]  ;;  %v645_v22 = vld [vmem:[%s3014_s15 + $0x978] sm:$0xff]  ;;  %v550_v23 = vld [vmem:[%s3014_s15 + $0x680] sm:$0xff] }
  0x82   : > { %1695 = vmatpush.msrb.mxu0 %v547_v24  ;;  %1714 = vmatpush.msrb.mxu1 %v564_v25  ;;  %v582_v24 = vld [vmem:[%s3014_s15 + $0x780] sm:$0xff]  ;;  %v612_v25 = vld [vmem:[%s3014_s15 + $0x870] sm:$0xff] }
  0x83   : > { %1735 = vmatpush.msrb.mxu2 %v579_v29  ;;  %1754 = vmatpush.msrb.mxu3 %v596_v26  ;;  %v629_v29 = vld [vmem:[%s3014_s15 + $0x8f8] sm:$0xff]  ;;  %v644_v26 = vld [vmem:[%s3014_s15 + $0x970] sm:$0xff] }
  0x84   : > { %1696 = vmatpush.msrb.mxu0 %v546_v27  ;;  %1715 = vmatpush.msrb.mxu1 %v563_v28  ;;  %v661_v27 = vld [vmem:[%s3014_s15 + $0x9f8] sm:$0xff]  ;;  %v643_v28 = vld [vmem:[%s3014_s15 + $0x968] sm:$0xff]  ;;  %v660_v34 = vld [vmem:[%s3014_s15 + $0x9f0] sm:$0xff] }
  0x85   : > { %1736 = vmatpush.msrb.mxu2 %v578_v35  ;;  %1755 = vmatpush.msrb.mxu3 %v595_v36  ;;  %v610_v35 = vld [vmem:[%s3014_s15 + $0x860] sm:$0xff]  ;;  %v627_v36 = vld [vmem:[%s3014_s15 + $0x8e8] sm:$0xff] }
  0x86   : > { %1697 = vmatpush.msrb.mxu0 %v545_v37  ;;  %1716 = vmatpush.msrb.mxu1 %v562_v38  ;;  %v609_v37 = vld [vmem:[%s3014_s15 + $0x858] sm:$0xff]  ;;  %v626_v38 = vld [vmem:[%s3014_s15 + $0x8e0] sm:$0xff] }
  0x87   : > { %1737 = vmatpush.msrb.mxu2 %v577_v39  ;;  %1756 = vmatpush.msrb.mxu3 %v594_v40  ;;  %v641_v39 = vld [vmem:[%s3014_s15 + $0x958] sm:$0xff]  ;;  %v658_v40 = vld [vmem:[%s3014_s15 + $0x9e0] sm:$0xff] }
  0x88   : > { %1698 = vmatpush.msrb.mxu0 %v544_v41  ;;  %1717 = vmatpush.msrb.mxu1 %v561_v42  ;;  %v608_v41 = vld [vmem:[%s3014_s15 + $0x850] sm:$0xff]  ;;  %v625_v42 = vld [vmem:[%s3014_s15 + $0x8d8] sm:$0xff] }
  0x89   : > { %1738 = vmatpush.msrb.mxu2 %v576_v43  ;;  %1757 = vmatpush.msrb.mxu3 %v593_v44  ;;  %v640_v43 = vld [vmem:[%s3014_s15 + $0x950] sm:$0xff]  ;;  %v657_v44 = vld [vmem:[%s3014_s15 + $0x9d8] sm:$0xff] }
  0x8a   : > { %1699 = vmatpush.msrb.mxu0 %v543_v45  ;;  %1718 = vmatpush.msrb.mxu1 %v560_v46  ;;  %v607_v45 = vld [vmem:[%s3014_s15 + $0x848] sm:$0xff]  ;;  %v624_v46 = vld [vmem:[%s3014_s15 + $0x8d0] sm:$0xff] }
  0x8b   : > { %1739 = vmatpush.msrb.mxu2 %v575_v47  ;;  %1758 = vmatpush.msrb.mxu3 %v592_v48  ;;  %v639_v47 = vld [vmem:[%s3014_s15 + $0x948] sm:$0xff]  ;;  %v656_v48 = vld [vmem:[%s3014_s15 + $0x9d0] sm:$0xff] }
  0x8c   : > { %1700 = vmatpush.msrb.mxu0 %v542_v49  ;;  %1719 = vmatpush.msrb.mxu1 %v559_v50  ;;  %v606_v49 = vld [vmem:[%s3014_s15 + $0x840] sm:$0xff]  ;;  %v623_v50 = vld [vmem:[%s3014_s15 + $0x8c8] sm:$0xff] }
  0x8d   : > { %1740 = vmatpush.msrb.mxu2 %v574_v51  ;;  %1759 = vmatpush.msrb.mxu3 %v591_v52  ;;  %v638_v51 = vld [vmem:[%s3014_s15 + $0x940] sm:$0xff]  ;;  %v655_v52 = vld [vmem:[%s3014_s15 + $0x9c8] sm:$0xff] }
  0x8e   : > { %1701 = vmatpush.msrb.mxu0 %v541_v53  ;;  %1720 = vmatpush.msrb.mxu1 %v558_v54  ;;  %v605_v53 = vld [vmem:[%s3014_s15 + $0x838] sm:$0xff]  ;;  %v622_v54 = vld [vmem:[%s3014_s15 + $0x8c0] sm:$0xff] }
  0x8f   : > { %1741 = vmatpush.msrb.mxu2 %v573_v55  ;;  %1760 = vmatpush.msrb.mxu3 %v590_v56  ;;  %v637_v55 = vld [vmem:[%s3014_s15 + $0x938] sm:$0xff]  ;;  %v654_v56 = vld [vmem:[%s3014_s15 + $0x9c0] sm:$0xff] }
  0x90   : > { %1702 = vmatpush.msrb.mxu0 %v540_v57  ;;  %1721 = vmatpush.msrb.mxu1 %v557_v58  ;;  %v604_v57 = vld [vmem:[%s3014_s15 + $0x830] sm:$0xff]  ;;  %v621_v58 = vld [vmem:[%s3014_s15 + $0x8b8] sm:$0xff] }
  0x91   : > { %1742 = vmatpush.msrb.mxu2 %v572_v59  ;;  %1761 = vmatpush.msrb.mxu3 %v589_v60  ;;  %v636_v59 = vld [vmem:[%s3014_s15 + $0x930] sm:$0xff]  ;;  %v653_v60 = vld [vmem:[%s3014_s15 + $0x9b8] sm:$0xff] }
  0x92   : > { %1703 = vmatpush.msrb.mxu0 %v539_v61  ;;  %1722 = vmatpush.msrb.mxu1 %v556_v62  ;;  %v603_v61 = vld [vmem:[%s3014_s15 + $0x828] sm:$0xff]  ;;  %v620_v62 = vld [vmem:[%s3014_s15 + $0x8b0] sm:$0xff] }
  0x93   : > { %1743 = vmatpush.msrb.mxu2 %v571_v63  ;;  %1762 = vmatpush.msrb.mxu3 %v588_v0  ;;  %v635_v63 = vld [vmem:[%s3014_s15 + $0x928] sm:$0xff]  ;;  %v652_v0 = vld [vmem:[%s3014_s15 + $0x9b0] sm:$0xff] }
  0x94   : > { %1704 = vmatpush.msrb.mxu0 %v538_v1  ;;  %1723 = vmatpush.msrb.mxu1 %v555_v2  ;;  %v602_v1 = vld [vmem:[%s3014_s15 + $0x820] sm:$0xff]  ;;  %v619_v2 = vld [vmem:[%s3014_s15 + $0x8a8] sm:$0xff] }
  0x95   : > { %1744 = vmatpush.msrb.mxu2 %v570_v3  ;;  %1763 = vmatpush.msrb.mxu3 %v587_v4  ;;  %v634_v3 = vld [vmem:[%s3014_s15 + $0x920] sm:$0xff]  ;;  %v651_v4 = vld [vmem:[%s3014_s15 + $0x9a8] sm:$0xff] }
  0x96   : > { %1705 = vmatpush.msrb.mxu0 %v537_v5  ;;  %1724 = vmatpush.msrb.mxu1 %v554_v6  ;;  %v601_v5 = vld [vmem:[%s3014_s15 + $0x818] sm:$0xff]  ;;  %v618_v6 = vld [vmem:[%s3014_s15 + $0x8a0] sm:$0xff] }
  0x97   : > { %1745 = vmatpush.msrb.mxu2 %v569_v7  ;;  %1764 = vmatpush.msrb.mxu3 %v586_v8  ;;  %v633_v7 = vld [vmem:[%s3014_s15 + $0x918] sm:$0xff]  ;;  %v650_v8 = vld [vmem:[%s3014_s15 + $0x9a0] sm:$0xff] }
  0x98   : > { %1706 = vmatpush.msrb.mxu0 %v536_v9  ;;  %1725 = vmatpush.msrb.mxu1 %v553_v10  ;;  %v600_v9 = vld [vmem:[%s3014_s15 + $0x810] sm:$0xff]  ;;  %v617_v10 = vld [vmem:[%s3014_s15 + $0x898] sm:$0xff] }
  0x99   : > { %1746 = vmatpush.msrb.mxu2 %v568_v11  ;;  %1765 = vmatpush.msrb.mxu3 %v585_v12  ;;  %v632_v11 = vld [vmem:[%s3014_s15 + $0x910] sm:$0xff]  ;;  %v649_v12 = vld [vmem:[%s3014_s15 + $0x998] sm:$0xff] }
  0x9a   : > { %1707 = vmatpush.msrb.mxu0 %v535_v13  ;;  %1726 = vmatpush.msrb.mxu1 %v552_v14  ;;  %v599_v13 = vld [vmem:[%s3014_s15 + $0x808] sm:$0xff]  ;;  %v616_v14 = vld [vmem:[%s3014_s15 + $0x890] sm:$0xff] }
  0x9b   : > { %1747 = vmatpush.msrb.mxu2 %v567_v15  ;;  %1766 = vmatpush.msrb.mxu3 %v584_v16  ;;  %v631_v15 = vld [vmem:[%s3014_s15 + $0x908] sm:$0xff]  ;;  %v648_v16 = vld [vmem:[%s3014_s15 + $0x990] sm:$0xff] }
  0x9c   : > { %1708 = vmatpush.msrb.mxu0 %v534_v17  ;;  %1727 = vmatpush.msrb.mxu1 %v551_v18  ;;  %v598_v17 = vld [vmem:[%s3014_s15 + $0x800] sm:$0xff]  ;;  %v615_v18 = vld [vmem:[%s3014_s15 + $0x888] sm:$0xff] }
  0x9d   : > { %1748 = vmatpush.msrb.mxu2 %v566_v19  ;;  %1767 = vmatpush.msrb.mxu3 %v583_v20  ;;  %v630_v19 = vld [vmem:[%s3014_s15 + $0x900] sm:$0xff]  ;;  %v647_v20 = vld [vmem:[%s3014_s15 + $0x988] sm:$0xff] }
  0x9e   : > { %1709 = vmatmul.f32.vlgmr.msrb.gmra.mxu0 %v3258_v30  ;;  %1749 = vmatmul.f32.vlgmr.msrb.gmra.mxu2 %v3260_v32  ;;  %v611_v30 = vld [vmem:[%s3014_s15 + $0x868] sm:$0xff]  ;;  %v628_v32 = vld [vmem:[%s3014_s15 + $0x8f0] sm:$0xff] }
  0x9f   : > { %1773 = vmatpush.msra.mxu0 %v613_v21  ;;  %1813 = vmatpush.msra.mxu2 %v645_v22  ;;  %v1340_v21 = vld.sshfl [vmem:[#allocation1] sm:$0xff pattern:$0x73625140]  ;;  %v1342_v22 = vld.sshfl [vmem:[#allocation1 + $0x10] sm:$0xff pattern:$0x73625140] }
  0xa0   : > { %1728 = vmatpush.msrb.mxu1 %v550_v23  ;;  %1768 = vmatpush.msrb.mxu3 %v582_v24  ;;  %v677_v23 = vld [vmem:[%s3014_s15 + $0xa78] sm:$0xff] }
  0xa1   : > { %1729 = vmatmul.f32.vlgmr.msrb.gmra.mxu1 %v3262_v33  ;;  %1769 = vmatmul.f32.vlgmr.msrb.gmra.mxu3 %v3266_v31  ;;  %v642_v33 = vld [vmem:[%s3014_s15 + $0x960] sm:$0xff]  ;;  %v659_v31 = vld [vmem:[%s3014_s15 + $0x9e8] sm:$0xff]  ;;  %v709_v24 = vld [vmem:[%s3014_s15 + $0xb78] sm:$0xff] }
  0xa2   : > { %1774 = vmatpush.msra.mxu0 %v612_v25  ;;  %1793 = vmatpush.msra.mxu1 %v629_v29  ;;  %v614_v25 = vld [vmem:[%s3014_s15 + $0x880] sm:$0xff] }
  0xa3   : > { %1814 = vmatpush.msra.mxu2 %v644_v26  ;;  %1833 = vmatpush.msra.mxu3 %v661_v27  ;;  %v646_v29 = vld [vmem:[%s3014_s15 + $0x980] sm:$0xff]  ;;  %v1341_v26 = vld.sshfl [vmem:[#allocation1 + $0x8] sm:$0xff pattern:$0x73625140] }
  0xa4   : > { %1775 = vmatpush.msra.mxu0 %v611_v30  ;;  %1794 = vmatpush.msra.mxu1 %v628_v32  ;;  %v1343_v27 = vld.sshfl [vmem:[#allocation1 + $0x18] sm:$0xff pattern:$0x73625140]  ;;  %v676_v30 = vld [vmem:[%s3014_s15 + $0xa70] sm:$0xff]  ;;  %v693_v32 = vld [vmem:[%s3014_s15 + $0xaf8] sm:$0xff] }
  0xa5   : > { %1815 = vmatpush.msra.mxu2 %v643_v28  ;;  %1834 = vmatpush.msra.mxu3 %v660_v34  ;;  %v708_v28 = vld [vmem:[%s3014_s15 + $0xb70] sm:$0xff]  ;;  %v725_v34 = vld [vmem:[%s3014_s15 + $0xbf8] sm:$0xff] }
  0xa6   : > { %1776 = vmatpush.msra.mxu0 %v610_v35  ;;  %1795 = vmatpush.msra.mxu1 %v627_v36  ;;  %v675_v35 = vld [vmem:[%s3014_s15 + $0xa68] sm:$0xff]  ;;  %v692_v36 = vld [vmem:[%s3014_s15 + $0xaf0] sm:$0xff] }
  0xa7   : > { %1816 = vmatpush.msra.mxu2 %v642_v33  ;;  %1835 = vmatpush.msra.mxu3 %v659_v31  ;;  %v707_v33 = vld [vmem:[%s3014_s15 + $0xb68] sm:$0xff]  ;;  %v724_v31 = vld [vmem:[%s3014_s15 + $0xbf0] sm:$0xff] }
  0xa8   : > { %1777 = vmatpush.msra.mxu0 %v609_v37  ;;  %1796 = vmatpush.msra.mxu1 %v626_v38  ;;  %v674_v37 = vld [vmem:[%s3014_s15 + $0xa60] sm:$0xff]  ;;  %v691_v38 = vld [vmem:[%s3014_s15 + $0xae8] sm:$0xff] }
  0xa9   : > { %1817 = vmatpush.msra.mxu2 %v641_v39  ;;  %1836 = vmatpush.msra.mxu3 %v658_v40  ;;  %v706_v39 = vld [vmem:[%s3014_s15 + $0xb60] sm:$0xff]  ;;  %v723_v40 = vld [vmem:[%s3014_s15 + $0xbe8] sm:$0xff] }
  0xaa   : > { %1778 = vmatpush.msra.mxu0 %v608_v41  ;;  %1797 = vmatpush.msra.mxu1 %v625_v42  ;;  %v673_v41 = vld [vmem:[%s3014_s15 + $0xa58] sm:$0xff]  ;;  %v690_v42 = vld [vmem:[%s3014_s15 + $0xae0] sm:$0xff] }
  0xab   : > { %1818 = vmatpush.msra.mxu2 %v640_v43  ;;  %1837 = vmatpush.msra.mxu3 %v657_v44  ;;  %v705_v43 = vld [vmem:[%s3014_s15 + $0xb58] sm:$0xff]  ;;  %v722_v44 = vld [vmem:[%s3014_s15 + $0xbe0] sm:$0xff] }
  0xac   : > { %1779 = vmatpush.msra.mxu0 %v607_v45  ;;  %1798 = vmatpush.msra.mxu1 %v624_v46  ;;  %v672_v45 = vld [vmem:[%s3014_s15 + $0xa50] sm:$0xff]  ;;  %v689_v46 = vld [vmem:[%s3014_s15 + $0xad8] sm:$0xff] }
  0xad   : > { %1819 = vmatpush.msra.mxu2 %v639_v47  ;;  %1838 = vmatpush.msra.mxu3 %v656_v48  ;;  %v704_v47 = vld [vmem:[%s3014_s15 + $0xb50] sm:$0xff]  ;;  %v721_v48 = vld [vmem:[%s3014_s15 + $0xbd8] sm:$0xff] }
  0xae   : > { %1780 = vmatpush.msra.mxu0 %v606_v49  ;;  %1799 = vmatpush.msra.mxu1 %v623_v50  ;;  %v671_v49 = vld [vmem:[%s3014_s15 + $0xa48] sm:$0xff]  ;;  %v688_v50 = vld [vmem:[%s3014_s15 + $0xad0] sm:$0xff] }
  0xaf   : > { %1820 = vmatpush.msra.mxu2 %v638_v51  ;;  %1839 = vmatpush.msra.mxu3 %v655_v52  ;;  %v703_v51 = vld [vmem:[%s3014_s15 + $0xb48] sm:$0xff]  ;;  %v720_v52 = vld [vmem:[%s3014_s15 + $0xbd0] sm:$0xff] }
  0xb0   : > { %1781 = vmatpush.msra.mxu0 %v605_v53  ;;  %1800 = vmatpush.msra.mxu1 %v622_v54  ;;  %v670_v53 = vld [vmem:[%s3014_s15 + $0xa40] sm:$0xff]  ;;  %v687_v54 = vld [vmem:[%s3014_s15 + $0xac8] sm:$0xff] }
  0xb1   : > { %1821 = vmatpush.msra.mxu2 %v637_v55  ;;  %1840 = vmatpush.msra.mxu3 %v654_v56  ;;  %v702_v55 = vld [vmem:[%s3014_s15 + $0xb40] sm:$0xff]  ;;  %v719_v56 = vld [vmem:[%s3014_s15 + $0xbc8] sm:$0xff] }
  0xb2   : > { %1782 = vmatpush.msra.mxu0 %v604_v57  ;;  %1801 = vmatpush.msra.mxu1 %v621_v58  ;;  %v669_v57 = vld [vmem:[%s3014_s15 + $0xa38] sm:$0xff]  ;;  %v686_v58 = vld [vmem:[%s3014_s15 + $0xac0] sm:$0xff] }
  0xb3   : > { %1822 = vmatpush.msra.mxu2 %v636_v59  ;;  %1841 = vmatpush.msra.mxu3 %v653_v60  ;;  %v701_v59 = vld [vmem:[%s3014_s15 + $0xb38] sm:$0xff]  ;;  %v718_v60 = vld [vmem:[%s3014_s15 + $0xbc0] sm:$0xff] }
  0xb4   : > { %1783 = vmatpush.msra.mxu0 %v603_v61  ;;  %1802 = vmatpush.msra.mxu1 %v620_v62  ;;  %v668_v61 = vld [vmem:[%s3014_s15 + $0xa30] sm:$0xff]  ;;  %v685_v62 = vld [vmem:[%s3014_s15 + $0xab8] sm:$0xff] }
  0xb5   : > { %1823 = vmatpush.msra.mxu2 %v635_v63  ;;  %1842 = vmatpush.msra.mxu3 %v652_v0  ;;  %v700_v63 = vld [vmem:[%s3014_s15 + $0xb30] sm:$0xff]  ;;  %v717_v0 = vld [vmem:[%s3014_s15 + $0xbb8] sm:$0xff] }
  0xb6   : > { %1784 = vmatpush.msra.mxu0 %v602_v1  ;;  %1803 = vmatpush.msra.mxu1 %v619_v2  ;;  %v667_v1 = vld [vmem:[%s3014_s15 + $0xa28] sm:$0xff]  ;;  %v684_v2 = vld [vmem:[%s3014_s15 + $0xab0] sm:$0xff] }
  0xb7   : > { %1824 = vmatpush.msra.mxu2 %v634_v3  ;;  %1843 = vmatpush.msra.mxu3 %v651_v4  ;;  %v699_v3 = vld [vmem:[%s3014_s15 + $0xb28] sm:$0xff]  ;;  %v716_v4 = vld [vmem:[%s3014_s15 + $0xbb0] sm:$0xff] }
  0xb8   : > { %1785 = vmatpush.msra.mxu0 %v601_v5  ;;  %1804 = vmatpush.msra.mxu1 %v618_v6  ;;  %v666_v5 = vld [vmem:[%s3014_s15 + $0xa20] sm:$0xff]  ;;  %v683_v6 = vld [vmem:[%s3014_s15 + $0xaa8] sm:$0xff] }
  0xb9   : > { %1825 = vmatpush.msra.mxu2 %v633_v7  ;;  %1844 = vmatpush.msra.mxu3 %v650_v8  ;;  %v698_v7 = vld [vmem:[%s3014_s15 + $0xb20] sm:$0xff]  ;;  %v715_v8 = vld [vmem:[%s3014_s15 + $0xba8] sm:$0xff] }
  0xba   : > { %1786 = vmatpush.msra.mxu0 %v600_v9  ;;  %1805 = vmatpush.msra.mxu1 %v617_v10  ;;  %v665_v9 = vld [vmem:[%s3014_s15 + $0xa18] sm:$0xff]  ;;  %v682_v10 = vld [vmem:[%s3014_s15 + $0xaa0] sm:$0xff] }
  0xbb   : > { %1826 = vmatpush.msra.mxu2 %v632_v11  ;;  %1845 = vmatpush.msra.mxu3 %v649_v12  ;;  %v697_v11 = vld [vmem:[%s3014_s15 + $0xb18] sm:$0xff]  ;;  %v714_v12 = vld [vmem:[%s3014_s15 + $0xba0] sm:$0xff] }
  0xbc   : > { %1787 = vmatpush.msra.mxu0 %v599_v13  ;;  %1806 = vmatpush.msra.mxu1 %v616_v14  ;;  %v664_v13 = vld [vmem:[%s3014_s15 + $0xa10] sm:$0xff]  ;;  %v681_v14 = vld [vmem:[%s3014_s15 + $0xa98] sm:$0xff] }
  0xbd   : > { %1827 = vmatpush.msra.mxu2 %v631_v15  ;;  %1846 = vmatpush.msra.mxu3 %v648_v16  ;;  %v696_v15 = vld [vmem:[%s3014_s15 + $0xb10] sm:$0xff]  ;;  %v713_v16 = vld [vmem:[%s3014_s15 + $0xb98] sm:$0xff] }
  0xbe   : > { %1788 = vmatpush.msra.mxu0 %v598_v17  ;;  %1807 = vmatpush.msra.mxu1 %v615_v18  ;;  %v663_v17 = vld [vmem:[%s3014_s15 + $0xa08] sm:$0xff]  ;;  %v680_v18 = vld [vmem:[%s3014_s15 + $0xa90] sm:$0xff] }
  0xbf   : > { %1828 = vmatpush.msra.mxu2 %v630_v19  ;;  %1847 = vmatpush.msra.mxu3 %v647_v20  ;;  %v333_v19 = vld [vmem:[%s3009_s11 + $0x30] sm:$0xff]  ;;  %v695_v20 = vld [vmem:[%s3014_s15 + $0xb08] sm:$0xff] }
  0xc0   : > { %1789 = vmatmul.f32.vlgmr.msra.gmra.mxu0 %v1340_v21  ;;  %1829 = vmatmul.f32.vlgmr.msra.gmra.mxu2 %v1342_v22  ;;  %v712_v21 = vld [vmem:[%s3014_s15 + $0xb90] sm:$0xff]  ;;  %1348 = vst [vmem:[#allocation1] ss:$4 sm:$0xff] %v333_v19  ;;  %v662_v22 = vld [vmem:[%s3014_s15 + $0xa00] sm:$0xff]  ;;  %v745_v19 = vld [vmem:[%s3014_s15 + $0xc98] sm:$0xff] }
  0xc1   : > { %1853 = vmatpush.msrb.mxu0 %v677_v23  ;;  %1893 = vmatpush.msrb.mxu2 %v709_v24  ;;  %v679_v23 = vld [vmem:[%s3014_s15 + $0xa88] sm:$0xff]  ;;  %v694_v24 = vld [vmem:[%s3014_s15 + $0xb00] sm:$0xff] }
  0xc2   : > { %1808 = vmatpush.msra.mxu1 %v614_v25  ;;  %1848 = vmatpush.msra.mxu3 %v646_v29  ;;  %v711_v25 = vld [vmem:[%s3014_s15 + $0xb88] sm:$0xff]  ;;  %v1344_v29 = vld.sshfl [vmem:[#allocation1 + $0x20] sm:$0xff pattern:$0x73625140] }
  0xc3   : > { %1809 = vmatmul.f32.vlgmr.msra.gmra.mxu1 %v1341_v26  ;;  %1849 = vmatmul.f32.vlgmr.msra.gmra.mxu3 %v1343_v27  ;;  %v1346_v26 = vld.sshfl [vmem:[#allocation1 + $0x30] sm:$0xff pattern:$0x73625140]  ;;  %v741_v27 = vld [vmem:[%s3014_s15 + $0xc78] sm:$0xff] }
  0xc4   : > { %1854 = vmatpush.msrb.mxu0 %v676_v30  ;;  %1873 = vmatpush.msrb.mxu1 %v693_v32  ;;  %v773_v30 = vld [vmem:[%s3014_s15 + $0xd78] sm:$0xff]  ;;  %v678_v32 = vld [vmem:[%s3014_s15 + $0xa80] sm:$0xff] }
  0xc5   : > { %1894 = vmatpush.msrb.mxu2 %v708_v28  ;;  %1913 = vmatpush.msrb.mxu3 %v725_v34  ;;  %v710_v28 = vld [vmem:[%s3014_s15 + $0xb80] sm:$0xff]  ;;  %v1345_v34 = vld.sshfl [vmem:[#allocation1 + $0x28] sm:$0xff pattern:$0x73625140] }
  0xc6   : > { %1855 = vmatpush.msrb.mxu0 %v675_v35  ;;  %1874 = vmatpush.msrb.mxu1 %v692_v36  ;;  %v1347_v35 = vld.sshfl [vmem:[#allocation1 + $0x38] sm:$0xff pattern:$0x73625140]  ;;  %v740_v36 = vld [vmem:[%s3014_s15 + $0xc70] sm:$0xff] }
  0xc7   : > { %1895 = vmatpush.msrb.mxu2 %v707_v33  ;;  %1914 = vmatpush.msrb.mxu3 %v724_v31  ;;  %v757_v33 = vld [vmem:[%s3014_s15 + $0xcf8] sm:$0xff]  ;;  %v772_v31 = vld [vmem:[%s3014_s15 + $0xd70] sm:$0xff] }
  0xc8   : > { %1856 = vmatpush.msrb.mxu0 %v674_v37  ;;  %1875 = vmatpush.msrb.mxu1 %v691_v38  ;;  %v789_v37 = vld [vmem:[%s3014_s15 + $0xdf8] sm:$0xff]  ;;  %v739_v38 = vld [vmem:[%s3014_s15 + $0xc68] sm:$0xff] }
  0xc9   : > { %1896 = vmatpush.msrb.mxu2 %v706_v39  ;;  %1915 = vmatpush.msrb.mxu3 %v723_v40  ;;  %v756_v39 = vld [vmem:[%s3014_s15 + $0xcf0] sm:$0xff]  ;;  %v771_v40 = vld [vmem:[%s3014_s15 + $0xd68] sm:$0xff] }
  0xca   : > { %1857 = vmatpush.msrb.mxu0 %v673_v41  ;;  %1876 = vmatpush.msrb.mxu1 %v690_v42  ;;  %v788_v41 = vld [vmem:[%s3014_s15 + $0xdf0] sm:$0xff]  ;;  %v738_v42 = vld [vmem:[%s3014_s15 + $0xc60] sm:$0xff] }
  0xcb   : > { %1897 = vmatpush.msrb.mxu2 %v705_v43  ;;  %1916 = vmatpush.msrb.mxu3 %v722_v44  ;;  %v755_v43 = vld [vmem:[%s3014_s15 + $0xce8] sm:$0xff]  ;;  %v770_v44 = vld [vmem:[%s3014_s15 + $0xd60] sm:$0xff] }
  0xcc   : > { %1858 = vmatpush.msrb.mxu0 %v672_v45  ;;  %1877 = vmatpush.msrb.mxu1 %v689_v46  ;;  %v787_v45 = vld [vmem:[%s3014_s15 + $0xde8] sm:$0xff]  ;;  %v737_v46 = vld [vmem:[%s3014_s15 + $0xc58] sm:$0xff] }
  0xcd   : > { %1898 = vmatpush.msrb.mxu2 %v704_v47  ;;  %1917 = vmatpush.msrb.mxu3 %v721_v48  ;;  %v754_v47 = vld [vmem:[%s3014_s15 + $0xce0] sm:$0xff]  ;;  %v769_v48 = vld [vmem:[%s3014_s15 + $0xd58] sm:$0xff] }
  0xce   : > { %1859 = vmatpush.msrb.mxu0 %v671_v49  ;;  %1878 = vmatpush.msrb.mxu1 %v688_v50  ;;  %v786_v49 = vld [vmem:[%s3014_s15 + $0xde0] sm:$0xff]  ;;  %v736_v50 = vld [vmem:[%s3014_s15 + $0xc50] sm:$0xff] }
  0xcf   : > { %1899 = vmatpush.msrb.mxu2 %v703_v51  ;;  %1918 = vmatpush.msrb.mxu3 %v720_v52  ;;  %v753_v51 = vld [vmem:[%s3014_s15 + $0xcd8] sm:$0xff]  ;;  %v768_v52 = vld [vmem:[%s3014_s15 + $0xd50] sm:$0xff] }
  0xd0   : > { %1860 = vmatpush.msrb.mxu0 %v670_v53  ;;  %1879 = vmatpush.msrb.mxu1 %v687_v54  ;;  %v785_v53 = vld [vmem:[%s3014_s15 + $0xdd8] sm:$0xff]  ;;  %v735_v54 = vld [vmem:[%s3014_s15 + $0xc48] sm:$0xff] }
  0xd1   : > { %1900 = vmatpush.msrb.mxu2 %v702_v55  ;;  %1919 = vmatpush.msrb.mxu3 %v719_v56  ;;  %v752_v55 = vld [vmem:[%s3014_s15 + $0xcd0] sm:$0xff]  ;;  %v767_v56 = vld [vmem:[%s3014_s15 + $0xd48] sm:$0xff] }
  0xd2   : > { %1861 = vmatpush.msrb.mxu0 %v669_v57  ;;  %1880 = vmatpush.msrb.mxu1 %v686_v58  ;;  %v784_v57 = vld [vmem:[%s3014_s15 + $0xdd0] sm:$0xff]  ;;  %v734_v58 = vld [vmem:[%s3014_s15 + $0xc40] sm:$0xff] }
  0xd3   : > { %1901 = vmatpush.msrb.mxu2 %v701_v59  ;;  %1920 = vmatpush.msrb.mxu3 %v718_v60  ;;  %v751_v59 = vld [vmem:[%s3014_s15 + $0xcc8] sm:$0xff]  ;;  %v766_v60 = vld [vmem:[%s3014_s15 + $0xd40] sm:$0xff] }
  0xd4   : > { %1862 = vmatpush.msrb.mxu0 %v668_v61  ;;  %1881 = vmatpush.msrb.mxu1 %v685_v62  ;;  %v783_v61 = vld [vmem:[%s3014_s15 + $0xdc8] sm:$0xff]  ;;  %v733_v62 = vld [vmem:[%s3014_s15 + $0xc38] sm:$0xff] }
  0xd5   : > { %1902 = vmatpush.msrb.mxu2 %v700_v63  ;;  %1921 = vmatpush.msrb.mxu3 %v717_v0  ;;  %v750_v63 = vld [vmem:[%s3014_s15 + $0xcc0] sm:$0xff]  ;;  %v765_v0 = vld [vmem:[%s3014_s15 + $0xd38] sm:$0xff] }
  0xd6   : > { %1863 = vmatpush.msrb.mxu0 %v667_v1  ;;  %1882 = vmatpush.msrb.mxu1 %v684_v2  ;;  %v782_v1 = vld [vmem:[%s3014_s15 + $0xdc0] sm:$0xff]  ;;  %v732_v2 = vld [vmem:[%s3014_s15 + $0xc30] sm:$0xff] }
  0xd7   : > { %1903 = vmatpush.msrb.mxu2 %v699_v3  ;;  %1922 = vmatpush.msrb.mxu3 %v716_v4  ;;  %v749_v3 = vld [vmem:[%s3014_s15 + $0xcb8] sm:$0xff]  ;;  %v764_v4 = vld [vmem:[%s3014_s15 + $0xd30] sm:$0xff] }
  0xd8   : > { %1864 = vmatpush.msrb.mxu0 %v666_v5  ;;  %1883 = vmatpush.msrb.mxu1 %v683_v6  ;;  %v781_v5 = vld [vmem:[%s3014_s15 + $0xdb8] sm:$0xff]  ;;  %v731_v6 = vld [vmem:[%s3014_s15 + $0xc28] sm:$0xff] }
  0xd9   : > { %1904 = vmatpush.msrb.mxu2 %v698_v7  ;;  %1923 = vmatpush.msrb.mxu3 %v715_v8  ;;  %v748_v7 = vld [vmem:[%s3014_s15 + $0xcb0] sm:$0xff]  ;;  %v763_v8 = vld [vmem:[%s3014_s15 + $0xd28] sm:$0xff] }
  0xda   : > { %1865 = vmatpush.msrb.mxu0 %v665_v9  ;;  %1884 = vmatpush.msrb.mxu1 %v682_v10  ;;  %v780_v9 = vld [vmem:[%s3014_s15 + $0xdb0] sm:$0xff]  ;;  %v730_v10 = vld [vmem:[%s3014_s15 + $0xc20] sm:$0xff] }
  0xdb   : > { %1905 = vmatpush.msrb.mxu2 %v697_v11  ;;  %1924 = vmatpush.msrb.mxu3 %v714_v12  ;;  %v747_v11 = vld [vmem:[%s3014_s15 + $0xca8] sm:$0xff]  ;;  %v762_v12 = vld [vmem:[%s3014_s15 + $0xd20] sm:$0xff] }
  0xdc   : > { %1866 = vmatpush.msrb.mxu0 %v664_v13  ;;  %1885 = vmatpush.msrb.mxu1 %v681_v14  ;;  %v779_v13 = vld [vmem:[%s3014_s15 + $0xda8] sm:$0xff]  ;;  %v729_v14 = vld [vmem:[%s3014_s15 + $0xc18] sm:$0xff] }
  0xdd   : > { %1906 = vmatpush.msrb.mxu2 %v696_v15  ;;  %1925 = vmatpush.msrb.mxu3 %v713_v16  ;;  %v746_v15 = vld [vmem:[%s3014_s15 + $0xca0] sm:$0xff]  ;;  %v761_v16 = vld [vmem:[%s3014_s15 + $0xd18] sm:$0xff] }
  0xde   : > { %1867 = vmatpush.msrb.mxu0 %v663_v17  ;;  %1886 = vmatpush.msrb.mxu1 %v680_v18  ;;  %v778_v17 = vld [vmem:[%s3014_s15 + $0xda0] sm:$0xff]  ;;  %v728_v18 = vld [vmem:[%s3014_s15 + $0xc10] sm:$0xff] }
  0xdf   : > { %1907 = vmatpush.msrb.mxu2 %v695_v20  ;;  %1926 = vmatpush.msrb.mxu3 %v712_v21  ;;  %v760_v20 = vld [vmem:[%s3014_s15 + $0xd10] sm:$0xff]  ;;  %v777_v21 = vld [vmem:[%s3014_s15 + $0xd98] sm:$0xff] }
  0xe0   : > { %1868 = vmatpush.msrb.mxu0 %v662_v22  ;;  %1887 = vmatpush.msrb.mxu1 %v679_v23  ;;  %v727_v22 = vld [vmem:[%s3014_s15 + $0xc08] sm:$0xff]  ;;  %v744_v23 = vld [vmem:[%s3014_s15 + $0xc90] sm:$0xff] }
  0xe1   : > { %1908 = vmatpush.msrb.mxu2 %v694_v24  ;;  %1927 = vmatpush.msrb.mxu3 %v711_v25  ;;  %v334_v24 = vld [vmem:[%s3009_s11 + $0x38] sm:$0xff]  ;;  %v759_v25 = vld [vmem:[%s3014_s15 + $0xd08] sm:$0xff] }
  0xe2   : > { %1869 = vmatmul.f32.vlgmr.msrb.gmra.mxu0 %v1344_v29  ;;  %1909 = vmatmul.f32.vlgmr.msrb.gmra.mxu2 %v1346_v26  ;;  %v776_v29 = vld [vmem:[%s3014_s15 + $0xd90] sm:$0xff]  ;;  %1349 = vst [vmem:[#allocation1 + $0x20] ss:$4 sm:$0xff] %v334_v24  ;;  %v726_v26 = vld [vmem:[%s3014_s15 + $0xc00] sm:$0xff]  ;;  %v809_v24 = vld [vmem:[%s3014_s15 + $0xe98] sm:$0xff] }
  0xe3   : > { %1933 = vmatpush.msra.mxu0 %v741_v27  ;;  %1973 = vmatpush.msra.mxu2 %v773_v30  ;;  %v743_v27 = vld [vmem:[%s3014_s15 + $0xc88] sm:$0xff]  ;;  %v758_v30 = vld [vmem:[%s3014_s15 + $0xd00] sm:$0xff] }
  0xe4   : > { %1888 = vmatpush.msrb.mxu1 %v678_v32  ;;  %1928 = vmatpush.msrb.mxu3 %v710_v28  ;;  %v775_v32 = vld [vmem:[%s3014_s15 + $0xd88] sm:$0xff]  ;;  %v1350_v28 = vld.sshfl [vmem:[#allocation1] sm:$0xff pattern:$0x73625140] }
  0xe5   : > { %1889 = vmatmul.f32.vlgmr.msrb.gmra.mxu1 %v1345_v34  ;;  %1929 = vmatmul.f32.vlgmr.msrb.gmra.mxu3 %v1347_v35  ;;  %v1352_v34 = vld.sshfl [vmem:[#allocation1 + $0x10] sm:$0xff pattern:$0x73625140]  ;;  %v805_v35 = vld [vmem:[%s3014_s15 + $0xe78] sm:$0xff] }
  0xe6   : > { %1934 = vmatpush.msra.mxu0 %v740_v36  ;;  %1953 = vmatpush.msra.mxu1 %v757_v33  ;;  %v837_v36 = vld [vmem:[%s3014_s15 + $0xf78] sm:$0xff]  ;;  %v742_v33 = vld [vmem:[%s3014_s15 + $0xc80] sm:$0xff] }
  0xe7   : > { %1974 = vmatpush.msra.mxu2 %v772_v31  ;;  %1993 = vmatpush.msra.mxu3 %v789_v37  ;;  %v774_v31 = vld [vmem:[%s3014_s15 + $0xd80] sm:$0xff]  ;;  %v1351_v37 = vld.sshfl [vmem:[#allocation1 + $0x8] sm:$0xff pattern:$0x73625140] }
  0xe8   : > { %1935 = vmatpush.msra.mxu0 %v739_v38  ;;  %1954 = vmatpush.msra.mxu1 %v756_v39  ;;  %v1353_v38 = vld.sshfl [vmem:[#allocation1 + $0x18] sm:$0xff pattern:$0x73625140]  ;;  %v804_v39 = vld [vmem:[%s3014_s15 + $0xe70] sm:$0xff] }
  0xe9   : > { %1975 = vmatpush.msra.mxu2 %v771_v40  ;;  %1994 = vmatpush.msra.mxu3 %v788_v41  ;;  %v821_v40 = vld [vmem:[%s3014_s15 + $0xef8] sm:$0xff]  ;;  %v836_v41 = vld [vmem:[%s3014_s15 + $0xf70] sm:$0xff] }
  0xea   : > { %1936 = vmatpush.msra.mxu0 %v738_v42  ;;  %1955 = vmatpush.msra.mxu1 %v755_v43  ;;  %v853_v42 = vld [vmem:[%s3014_s15 + $0xff8] sm:$0xff]  ;;  %v803_v43 = vld [vmem:[%s3014_s15 + $0xe68] sm:$0xff] }
  0xeb   : > { %1976 = vmatpush.msra.mxu2 %v770_v44  ;;  %1995 = vmatpush.msra.mxu3 %v787_v45  ;;  %v820_v44 = vld [vmem:[%s3014_s15 + $0xef0] sm:$0xff]  ;;  %v835_v45 = vld [vmem:[%s3014_s15 + $0xf68] sm:$0xff] }
  0xec   : > { %1937 = vmatpush.msra.mxu0 %v737_v46  ;;  %1956 = vmatpush.msra.mxu1 %v754_v47  ;;  %v852_v46 = vld [vmem:[%s3014_s15 + $0xff0] sm:$0xff]  ;;  %v802_v47 = vld [vmem:[%s3014_s15 + $0xe60] sm:$0xff] }
  0xed   : > { %1977 = vmatpush.msra.mxu2 %v769_v48  ;;  %1996 = vmatpush.msra.mxu3 %v786_v49  ;;  %v819_v48 = vld [vmem:[%s3014_s15 + $0xee8] sm:$0xff]  ;;  %v834_v49 = vld [vmem:[%s3014_s15 + $0xf60] sm:$0xff] }
  0xee   : > { %1938 = vmatpush.msra.mxu0 %v736_v50  ;;  %1957 = vmatpush.msra.mxu1 %v753_v51  ;;  %v851_v50 = vld [vmem:[%s3014_s15 + $0xfe8] sm:$0xff]  ;;  %v801_v51 = vld [vmem:[%s3014_s15 + $0xe58] sm:$0xff] }
  0xef   : > { %1978 = vmatpush.msra.mxu2 %v768_v52  ;;  %1997 = vmatpush.msra.mxu3 %v785_v53  ;;  %v818_v52 = vld [vmem:[%s3014_s15 + $0xee0] sm:$0xff]  ;;  %v833_v53 = vld [vmem:[%s3014_s15 + $0xf58] sm:$0xff] }
  0xf0   : > { %1939 = vmatpush.msra.mxu0 %v735_v54  ;;  %1958 = vmatpush.msra.mxu1 %v752_v55  ;;  %v850_v54 = vld [vmem:[%s3014_s15 + $0xfe0] sm:$0xff]  ;;  %v800_v55 = vld [vmem:[%s3014_s15 + $0xe50] sm:$0xff] }
  0xf1   : > { %1979 = vmatpush.msra.mxu2 %v767_v56  ;;  %1998 = vmatpush.msra.mxu3 %v784_v57  ;;  %v817_v56 = vld [vmem:[%s3014_s15 + $0xed8] sm:$0xff]  ;;  %v832_v57 = vld [vmem:[%s3014_s15 + $0xf50] sm:$0xff] }
  0xf2   : > { %1940 = vmatpush.msra.mxu0 %v734_v58  ;;  %1959 = vmatpush.msra.mxu1 %v751_v59  ;;  %v849_v58 = vld [vmem:[%s3014_s15 + $0xfd8] sm:$0xff]  ;;  %v799_v59 = vld [vmem:[%s3014_s15 + $0xe48] sm:$0xff] }
  0xf3   : > { %1980 = vmatpush.msra.mxu2 %v766_v60  ;;  %1999 = vmatpush.msra.mxu3 %v783_v61  ;;  %v816_v60 = vld [vmem:[%s3014_s15 + $0xed0] sm:$0xff]  ;;  %v831_v61 = vld [vmem:[%s3014_s15 + $0xf48] sm:$0xff] }
  0xf4   : > { %1941 = vmatpush.msra.mxu0 %v733_v62  ;;  %1960 = vmatpush.msra.mxu1 %v750_v63  ;;  %v848_v62 = vld [vmem:[%s3014_s15 + $0xfd0] sm:$0xff]  ;;  %v798_v63 = vld [vmem:[%s3014_s15 + $0xe40] sm:$0xff] }
  0xf5   : > { %1981 = vmatpush.msra.mxu2 %v765_v0  ;;  %2000 = vmatpush.msra.mxu3 %v782_v1  ;;  %v815_v0 = vld [vmem:[%s3014_s15 + $0xec8] sm:$0xff]  ;;  %v830_v1 = vld [vmem:[%s3014_s15 + $0xf40] sm:$0xff] }
  0xf6   : > { %1942 = vmatpush.msra.mxu0 %v732_v2  ;;  %1961 = vmatpush.msra.mxu1 %v749_v3  ;;  %v847_v2 = vld [vmem:[%s3014_s15 + $0xfc8] sm:$0xff]  ;;  %v797_v3 = vld [vmem:[%s3014_s15 + $0xe38] sm:$0xff] }
  0xf7   : > { %1982 = vmatpush.msra.mxu2 %v764_v4  ;;  %2001 = vmatpush.msra.mxu3 %v781_v5  ;;  %v814_v4 = vld [vmem:[%s3014_s15 + $0xec0] sm:$0xff]  ;;  %v829_v5 = vld [vmem:[%s3014_s15 + $0xf38] sm:$0xff] }
  0xf8   : > { %1943 = vmatpush.msra.mxu0 %v731_v6  ;;  %1962 = vmatpush.msra.mxu1 %v748_v7  ;;  %v846_v6 = vld [vmem:[%s3014_s15 + $0xfc0] sm:$0xff]  ;;  %v796_v7 = vld [vmem:[%s3014_s15 + $0xe30] sm:$0xff] }
  0xf9   : > { %1983 = vmatpush.msra.mxu2 %v763_v8  ;;  %2002 = vmatpush.msra.mxu3 %v780_v9  ;;  %v813_v8 = vld [vmem:[%s3014_s15 + $0xeb8] sm:$0xff]  ;;  %v828_v9 = vld [vmem:[%s3014_s15 + $0xf30] sm:$0xff] }
  0xfa   : > { %1944 = vmatpush.msra.mxu0 %v730_v10  ;;  %1963 = vmatpush.msra.mxu1 %v747_v11  ;;  %v845_v10 = vld [vmem:[%s3014_s15 + $0xfb8] sm:$0xff]  ;;  %v795_v11 = vld [vmem:[%s3014_s15 + $0xe28] sm:$0xff] }
  0xfb   : > { %1984 = vmatpush.msra.mxu2 %v762_v12  ;;  %2003 = vmatpush.msra.mxu3 %v779_v13  ;;  %v812_v12 = vld [vmem:[%s3014_s15 + $0xeb0] sm:$0xff]  ;;  %v827_v13 = vld [vmem:[%s3014_s15 + $0xf28] sm:$0xff] }
  0xfc   : > { %1945 = vmatpush.msra.mxu0 %v729_v14  ;;  %1964 = vmatpush.msra.mxu1 %v746_v15  ;;  %v844_v14 = vld [vmem:[%s3014_s15 + $0xfb0] sm:$0xff]  ;;  %v794_v15 = vld [vmem:[%s3014_s15 + $0xe20] sm:$0xff] }
  0xfd   : > { %1985 = vmatpush.msra.mxu2 %v761_v16  ;;  %2004 = vmatpush.msra.mxu3 %v778_v17  ;;  %v811_v16 = vld [vmem:[%s3014_s15 + $0xea8] sm:$0xff]  ;;  %v826_v17 = vld [vmem:[%s3014_s15 + $0xf20] sm:$0xff] }
  0xfe   : > { %1946 = vmatpush.msra.mxu0 %v728_v18  ;;  %1965 = vmatpush.msra.mxu1 %v745_v19  ;;  %v843_v18 = vld [vmem:[%s3014_s15 + $0xfa8] sm:$0xff]  ;;  %v793_v19 = vld [vmem:[%s3014_s15 + $0xe18] sm:$0xff] }
  0xff   : > { %1986 = vmatpush.msra.mxu2 %v760_v20  ;;  %2005 = vmatpush.msra.mxu3 %v777_v21  ;;  %v810_v20 = vld [vmem:[%s3014_s15 + $0xea0] sm:$0xff]  ;;  %v825_v21 = vld [vmem:[%s3014_s15 + $0xf18] sm:$0xff] }
 0x100   : > { %1947 = vmatpush.msra.mxu0 %v727_v22  ;;  %1966 = vmatpush.msra.mxu1 %v744_v23  ;;  %v842_v22 = vld [vmem:[%s3014_s15 + $0xfa0] sm:$0xff]  ;;  %v792_v23 = vld [vmem:[%s3014_s15 + $0xe10] sm:$0xff] }
 0x101   : > { %1987 = vmatpush.msra.mxu2 %v759_v25  ;;  %2006 = vmatpush.msra.mxu3 %v776_v29  ;;  %v824_v25 = vld [vmem:[%s3014_s15 + $0xf10] sm:$0xff]  ;;  %v841_v29 = vld [vmem:[%s3014_s15 + $0xf98] sm:$0xff] }
 0x102   : > { %1948 = vmatpush.msra.mxu0 %v726_v26  ;;  %1967 = vmatpush.msra.mxu1 %v743_v27  ;;  %v791_v26 = vld [vmem:[%s3014_s15 + $0xe08] sm:$0xff]  ;;  %v808_v27 = vld [vmem:[%s3014_s15 + $0xe90] sm:$0xff] }
 0x103   : > { %1988 = vmatpush.msra.mxu2 %v758_v30  ;;  %2007 = vmatpush.msra.mxu3 %v775_v32  ;;  %v335_v30 = vld [vmem:[%s3009_s11 + $0x40] sm:$0xff]  ;;  %v823_v32 = vld [vmem:[%s3014_s15 + $0xf08] sm:$0xff] }
 0x104   : > { %1949 = vmatmul.f32.vlgmr.msra.gmra.mxu0 %v1350_v28  ;;  %1989 = vmatmul.f32.vlgmr.msra.gmra.mxu2 %v1352_v34  ;;  %v840_v28 = vld [vmem:[%s3014_s15 + $0xf90] sm:$0xff]  ;;  %1358 = vst [vmem:[#allocation1] ss:$4 sm:$0xff] %v335_v30  ;;  %v790_v34 = vld [vmem:[%s3014_s15 + $0xe00] sm:$0xff]  ;;  %v873_v30 = vld [vmem:[%s3014_s15 + $0x1098] sm:$0xff] }
 0x105   : > { %2013 = vmatpush.msrb.mxu0 %v805_v35  ;;  %2053 = vmatpush.msrb.mxu2 %v837_v36  ;;  %v807_v35 = vld [vmem:[%s3014_s15 + $0xe88] sm:$0xff]  ;;  %v822_v36 = vld [vmem:[%s3014_s15 + $0xf00] sm:$0xff] }
 0x106   : > { %1968 = vmatpush.msra.mxu1 %v742_v33  ;;  %2008 = vmatpush.msra.mxu3 %v774_v31  ;;  %v839_v33 = vld [vmem:[%s3014_s15 + $0xf88] sm:$0xff]  ;;  %v1354_v31 = vld.sshfl [vmem:[#allocation1 + $0x20] sm:$0xff pattern:$0x73625140] }
 0x107   : > { %1969 = vmatmul.f32.vlgmr.msra.gmra.mxu1 %v1351_v37  ;;  %2009 = vmatmul.f32.vlgmr.msra.gmra.mxu3 %v1353_v38  ;;  %v1356_v37 = vld.sshfl [vmem:[#allocation1 + $0x30] sm:$0xff pattern:$0x73625140]  ;;  %v869_v38 = vld [vmem:[%s3014_s15 + $0x1078] sm:$0xff] }
 0x108   : > { %2014 = vmatpush.msrb.mxu0 %v804_v39  ;;  %2033 = vmatpush.msrb.mxu1 %v821_v40  ;;  %v901_v39 = vld [vmem:[%s3014_s15 + $0x1178] sm:$0xff]  ;;  %v806_v40 = vld [vmem:[%s3014_s15 + $0xe80] sm:$0xff] }
 0x109   : > { %2054 = vmatpush.msrb.mxu2 %v836_v41  ;;  %2073 = vmatpush.msrb.mxu3 %v853_v42  ;;  %v838_v41 = vld [vmem:[%s3014_s15 + $0xf80] sm:$0xff]  ;;  %v1355_v42 = vld.sshfl [vmem:[#allocation1 + $0x28] sm:$0xff pattern:$0x73625140] }
 0x10a   : > { %2015 = vmatpush.msrb.mxu0 %v803_v43  ;;  %2034 = vmatpush.msrb.mxu1 %v820_v44  ;;  %v1357_v43 = vld.sshfl [vmem:[#allocation1 + $0x38] sm:$0xff pattern:$0x73625140]  ;;  %v868_v44 = vld [vmem:[%s3014_s15 + $0x1070] sm:$0xff] }
 0x10b   : > { %2055 = vmatpush.msrb.mxu2 %v835_v45  ;;  %2074 = vmatpush.msrb.mxu3 %v852_v46  ;;  %v885_v45 = vld [vmem:[%s3014_s15 + $0x10f8] sm:$0xff]  ;;  %v900_v46 = vld [vmem:[%s3014_s15 + $0x1170] sm:$0xff] }
 0x10c   : > { %2016 = vmatpush.msrb.mxu0 %v802_v47  ;;  %2035 = vmatpush.msrb.mxu1 %v819_v48  ;;  %v917_v47 = vld [vmem:[%s3014_s15 + $0x11f8] sm:$0xff]  ;;  %v867_v48 = vld [vmem:[%s3014_s15 + $0x1068] sm:$0xff] }
 0x10d   : > { %2056 = vmatpush.msrb.mxu2 %v834_v49  ;;  %2075 = vmatpush.msrb.mxu3 %v851_v50  ;;  %v884_v49 = vld [vmem:[%s3014_s15 + $0x10f0] sm:$0xff]  ;;  %v899_v50 = vld [vmem:[%s3014_s15 + $0x1168] sm:$0xff] }
 0x10e   : > { %2017 = vmatpush.msrb.mxu0 %v801_v51  ;;  %2036 = vmatpush.msrb.mxu1 %v818_v52  ;;  %v916_v51 = vld [vmem:[%s3014_s15 + $0x11f0] sm:$0xff]  ;;  %v866_v52 = vld [vmem:[%s3014_s15 + $0x1060] sm:$0xff] }
 0x10f   : > { %2057 = vmatpush.msrb.mxu2 %v833_v53  ;;  %2076 = vmatpush.msrb.mxu3 %v850_v54  ;;  %v883_v53 = vld [vmem:[%s3014_s15 + $0x10e8] sm:$0xff]  ;;  %v898_v54 = vld [vmem:[%s3014_s15 + $0x1160] sm:$0xff] }
 0x110   : > { %2018 = vmatpush.msrb.mxu0 %v800_v55  ;;  %2037 = vmatpush.msrb.mxu1 %v817_v56  ;;  %v915_v55 = vld [vmem:[%s3014_s15 + $0x11e8] sm:$0xff]  ;;  %v865_v56 = vld [vmem:[%s3014_s15 + $0x1058] sm:$0xff] }
 0x111   : > { %2058 = vmatpush.msrb.mxu2 %v832_v57  ;;  %2077 = vmatpush.msrb.mxu3 %v849_v58  ;;  %v882_v57 = vld [vmem:[%s3014_s15 + $0x10e0] sm:$0xff]  ;;  %v897_v58 = vld [vmem:[%s3014_s15 + $0x1158] sm:$0xff] }
 0x112   : > { %2019 = vmatpush.msrb.mxu0 %v799_v59  ;;  %2038 = vmatpush.msrb.mxu1 %v816_v60  ;;  %v914_v59 = vld [vmem:[%s3014_s15 + $0x11e0] sm:$0xff]  ;;  %v864_v60 = vld [vmem:[%s3014_s15 + $0x1050] sm:$0xff] }
 0x113   : > { %2059 = vmatpush.msrb.mxu2 %v831_v61  ;;  %2078 = vmatpush.msrb.mxu3 %v848_v62  ;;  %v881_v61 = vld [vmem:[%s3014_s15 + $0x10d8] sm:$0xff]  ;;  %v896_v62 = vld [vmem:[%s3014_s15 + $0x1150] sm:$0xff] }
 0x114   : > { %2020 = vmatpush.msrb.mxu0 %v798_v63  ;;  %2039 = vmatpush.msrb.mxu1 %v815_v0  ;;  %v913_v63 = vld [vmem:[%s3014_s15 + $0x11d8] sm:$0xff]  ;;  %v863_v0 = vld [vmem:[%s3014_s15 + $0x1048] sm:$0xff] }
 0x115   : > { %2060 = vmatpush.msrb.mxu2 %v830_v1  ;;  %2079 = vmatpush.msrb.mxu3 %v847_v2  ;;  %v880_v1 = vld [vmem:[%s3014_s15 + $0x10d0] sm:$0xff]  ;;  %v895_v2 = vld [vmem:[%s3014_s15 + $0x1148] sm:$0xff] }
 0x116   : > { %2021 = vmatpush.msrb.mxu0 %v797_v3  ;;  %2040 = vmatpush.msrb.mxu1 %v814_v4  ;;  %v912_v3 = vld [vmem:[%s3014_s15 + $0x11d0] sm:$0xff]  ;;  %v862_v4 = vld [vmem:[%s3014_s15 + $0x1040] sm:$0xff] }
 0x117   : > { %2061 = vmatpush.msrb.mxu2 %v829_v5  ;;  %2080 = vmatpush.msrb.mxu3 %v846_v6  ;;  %v879_v5 = vld [vmem:[%s3014_s15 + $0x10c8] sm:$0xff]  ;;  %v894_v6 = vld [vmem:[%s3014_s15 + $0x1140] sm:$0xff] }
 0x118   : > { %2022 = vmatpush.msrb.mxu0 %v796_v7  ;;  %2041 = vmatpush.msrb.mxu1 %v813_v8  ;;  %v911_v7 = vld [vmem:[%s3014_s15 + $0x11c8] sm:$0xff]  ;;  %v861_v8 = vld [vmem:[%s3014_s15 + $0x1038] sm:$0xff] }
 0x119   : > { %2062 = vmatpush.msrb.mxu2 %v828_v9  ;;  %2081 = vmatpush.msrb.mxu3 %v845_v10  ;;  %v878_v9 = vld [vmem:[%s3014_s15 + $0x10c0] sm:$0xff]  ;;  %v893_v10 = vld [vmem:[%s3014_s15 + $0x1138] sm:$0xff] }
 0x11a   : > { %2023 = vmatpush.msrb.mxu0 %v795_v11  ;;  %2042 = vmatpush.msrb.mxu1 %v812_v12  ;;  %v910_v11 = vld [vmem:[%s3014_s15 + $0x11c0] sm:$0xff]  ;;  %v860_v12 = vld [vmem:[%s3014_s15 + $0x1030] sm:$0xff] }
 0x11b   : > { %2063 = vmatpush.msrb.mxu2 %v827_v13  ;;  %2082 = vmatpush.msrb.mxu3 %v844_v14  ;;  %v877_v13 = vld [vmem:[%s3014_s15 + $0x10b8] sm:$0xff]  ;;  %v892_v14 = vld [vmem:[%s3014_s15 + $0x1130] sm:$0xff] }
 0x11c   : > { %2024 = vmatpush.msrb.mxu0 %v794_v15  ;;  %2043 = vmatpush.msrb.mxu1 %v811_v16  ;;  %v909_v15 = vld [vmem:[%s3014_s15 + $0x11b8] sm:$0xff]  ;;  %v859_v16 = vld [vmem:[%s3014_s15 + $0x1028] sm:$0xff] }
 0x11d   : > { %2064 = vmatpush.msrb.mxu2 %v826_v17  ;;  %2083 = vmatpush.msrb.mxu3 %v843_v18  ;;  %v876_v17 = vld [vmem:[%s3014_s15 + $0x10b0] sm:$0xff]  ;;  %v891_v18 = vld [vmem:[%s3014_s15 + $0x1128] sm:$0xff] }
 0x11e   : > { %2025 = vmatpush.msrb.mxu0 %v793_v19  ;;  %2044 = vmatpush.msrb.mxu1 %v810_v20  ;;  %v908_v19 = vld [vmem:[%s3014_s15 + $0x11b0] sm:$0xff]  ;;  %v858_v20 = vld [vmem:[%s3014_s15 + $0x1020] sm:$0xff] }
 0x11f   : > { %2065 = vmatpush.msrb.mxu2 %v825_v21  ;;  %2084 = vmatpush.msrb.mxu3 %v842_v22  ;;  %v875_v21 = vld [vmem:[%s3014_s15 + $0x10a8] sm:$0xff]  ;;  %v890_v22 = vld [vmem:[%s3014_s15 + $0x1120] sm:$0xff] }
 0x120   : > { %2026 = vmatpush.msrb.mxu0 %v792_v23  ;;  %2045 = vmatpush.msrb.mxu1 %v809_v24  ;;  %v907_v23 = vld [vmem:[%s3014_s15 + $0x11a8] sm:$0xff]  ;;  %v857_v24 = vld [vmem:[%s3014_s15 + $0x1018] sm:$0xff] }
 0x121   : > { %2066 = vmatpush.msrb.mxu2 %v824_v25  ;;  %2085 = vmatpush.msrb.mxu3 %v841_v29  ;;  %v874_v25 = vld [vmem:[%s3014_s15 + $0x10a0] sm:$0xff]  ;;  %v889_v29 = vld [vmem:[%s3014_s15 + $0x1118] sm:$0xff] }
 0x122   : > { %2027 = vmatpush.msrb.mxu0 %v791_v26  ;;  %2046 = vmatpush.msrb.mxu1 %v808_v27  ;;  %v906_v26 = vld [vmem:[%s3014_s15 + $0x11a0] sm:$0xff]  ;;  %v856_v27 = vld [vmem:[%s3014_s15 + $0x1010] sm:$0xff] }
 0x123   : > { %2067 = vmatpush.msrb.mxu2 %v823_v32  ;;  %2086 = vmatpush.msrb.mxu3 %v840_v28  ;;  %v888_v32 = vld [vmem:[%s3014_s15 + $0x1110] sm:$0xff]  ;;  %v905_v28 = vld [vmem:[%s3014_s15 + $0x1198] sm:$0xff] }
 0x124   : > { %2028 = vmatpush.msrb.mxu0 %v790_v34  ;;  %2047 = vmatpush.msrb.mxu1 %v807_v35  ;;  %v855_v34 = vld [vmem:[%s3014_s15 + $0x1008] sm:$0xff]  ;;  %v872_v35 = vld [vmem:[%s3014_s15 + $0x1090] sm:$0xff] }
 0x125   : > { %2068 = vmatpush.msrb.mxu2 %v822_v36  ;;  %2087 = vmatpush.msrb.mxu3 %v839_v33  ;;  %v336_v36 = vld [vmem:[%s3009_s11 + $0x48] sm:$0xff] }
 0x126   : > { %2029 = vmatmul.f32.vlgmr.msrb.gmra.mxu0 %v1354_v31  ;;  %2069 = vmatmul.f32.vlgmr.msrb.gmra.mxu2 %v1356_v37  ;;  %v887_v33 = vld [vmem:[%s3014_s15 + $0x1108] sm:$0xff]  ;;  %v904_v31 = vld [vmem:[%s3014_s15 + $0x1190] sm:$0xff]  ;;  %1359 = vst [vmem:[#allocation1 + $0x20] ss:$4 sm:$0xff] %v336_v36  ;;  %v854_v37 = vld [vmem:[%s3014_s15 + $0x1000] sm:$0xff] }
 0x127   : > { %2093 = vmatpush.msra.mxu0 %v869_v38  ;;  %2133 = vmatpush.msra.mxu2 %v901_v39  ;;  %v871_v38 = vld [vmem:[%s3014_s15 + $0x1088] sm:$0xff]  ;;  %v886_v39 = vld [vmem:[%s3014_s15 + $0x1100] sm:$0xff]  ;;  %v937_v36 = vld [vmem:[%s3014_s15 + $0x1298] sm:$0xff] }
 0x128   : > { %2048 = vmatpush.msrb.mxu1 %v806_v40  ;;  %2088 = vmatpush.msrb.mxu3 %v838_v41  ;;  %v903_v40 = vld [vmem:[%s3014_s15 + $0x1188] sm:$0xff]  ;;  %v1360_v41 = vld.sshfl [vmem:[#allocation1] sm:$0xff pattern:$0x73625140] }
 0x129   : > { %2049 = vmatmul.f32.vlgmr.msrb.gmra.mxu1 %v1355_v42  ;;  %2089 = vmatmul.f32.vlgmr.msrb.gmra.mxu3 %v1357_v43  ;;  %v1362_v42 = vld.sshfl [vmem:[#allocation1 + $0x10] sm:$0xff pattern:$0x73625140]  ;;  %v933_v43 = vld [vmem:[%s3014_s15 + $0x1278] sm:$0xff] }
 0x12a   : > { %2094 = vmatpush.msra.mxu0 %v868_v44  ;;  %2113 = vmatpush.msra.mxu1 %v885_v45  ;;  %v965_v44 = vld [vmem:[%s3014_s15 + $0x1378] sm:$0xff]  ;;  %v870_v45 = vld [vmem:[%s3014_s15 + $0x1080] sm:$0xff] }
 0x12b   : > { %2134 = vmatpush.msra.mxu2 %v900_v46  ;;  %2153 = vmatpush.msra.mxu3 %v917_v47  ;;  %v902_v46 = vld [vmem:[%s3014_s15 + $0x1180] sm:$0xff]  ;;  %v1361_v47 = vld.sshfl [vmem:[#allocation1 + $0x8] sm:$0xff pattern:$0x73625140] }
 0x12c   : > { %2095 = vmatpush.msra.mxu0 %v867_v48  ;;  %2114 = vmatpush.msra.mxu1 %v884_v49  ;;  %v1363_v48 = vld.sshfl [vmem:[#allocation1 + $0x18] sm:$0xff pattern:$0x73625140]  ;;  %v932_v49 = vld [vmem:[%s3014_s15 + $0x1270] sm:$0xff] }
 0x12d   : > { %2135 = vmatpush.msra.mxu2 %v899_v50  ;;  %2154 = vmatpush.msra.mxu3 %v916_v51  ;;  %v949_v50 = vld [vmem:[%s3014_s15 + $0x12f8] sm:$0xff]  ;;  %v964_v51 = vld [vmem:[%s3014_s15 + $0x1370] sm:$0xff] }
 0x12e   : > { %2096 = vmatpush.msra.mxu0 %v866_v52  ;;  %2115 = vmatpush.msra.mxu1 %v883_v53  ;;  %v981_v52 = vld [vmem:[%s3014_s15 + $0x13f8] sm:$0xff]  ;;  %v931_v53 = vld [vmem:[%s3014_s15 + $0x1268] sm:$0xff] }
 0x12f   : > { %2136 = vmatpush.msra.mxu2 %v898_v54  ;;  %2155 = vmatpush.msra.mxu3 %v915_v55  ;;  %v948_v54 = vld [vmem:[%s3014_s15 + $0x12f0] sm:$0xff]  ;;  %v963_v55 = vld [vmem:[%s3014_s15 + $0x1368] sm:$0xff] }
 0x130   : > { %2097 = vmatpush.msra.mxu0 %v865_v56  ;;  %2116 = vmatpush.msra.mxu1 %v882_v57  ;;  %v980_v56 = vld [vmem:[%s3014_s15 + $0x13f0] sm:$0xff]  ;;  %v930_v57 = vld [vmem:[%s3014_s15 + $0x1260] sm:$0xff] }
 0x131   : > { %2137 = vmatpush.msra.mxu2 %v897_v58  ;;  %2156 = vmatpush.msra.mxu3 %v914_v59  ;;  %v947_v58 = vld [vmem:[%s3014_s15 + $0x12e8] sm:$0xff]  ;;  %v962_v59 = vld [vmem:[%s3014_s15 + $0x1360] sm:$0xff] }
 0x132   : > { %2098 = vmatpush.msra.mxu0 %v864_v60  ;;  %2117 = vmatpush.msra.mxu1 %v881_v61  ;;  %v979_v60 = vld [vmem:[%s3014_s15 + $0x13e8] sm:$0xff]  ;;  %v929_v61 = vld [vmem:[%s3014_s15 + $0x1258] sm:$0xff] }
 0x133   : > { %2138 = vmatpush.msra.mxu2 %v896_v62  ;;  %2157 = vmatpush.msra.mxu3 %v913_v63  ;;  %v946_v62 = vld [vmem:[%s3014_s15 + $0x12e0] sm:$0xff]  ;;  %v961_v63 = vld [vmem:[%s3014_s15 + $0x1358] sm:$0xff] }
 0x134   : > { %2099 = vmatpush.msra.mxu0 %v863_v0  ;;  %2118 = vmatpush.msra.mxu1 %v880_v1  ;;  %v978_v0 = vld [vmem:[%s3014_s15 + $0x13e0] sm:$0xff]  ;;  %v928_v1 = vld [vmem:[%s3014_s15 + $0x1250] sm:$0xff] }
 0x135   : > { %2139 = vmatpush.msra.mxu2 %v895_v2  ;;  %2158 = vmatpush.msra.mxu3 %v912_v3  ;;  %v945_v2 = vld [vmem:[%s3014_s15 + $0x12d8] sm:$0xff]  ;;  %v960_v3 = vld [vmem:[%s3014_s15 + $0x1350] sm:$0xff] }
 0x136   : > { %2100 = vmatpush.msra.mxu0 %v862_v4  ;;  %2119 = vmatpush.msra.mxu1 %v879_v5  ;;  %v977_v4 = vld [vmem:[%s3014_s15 + $0x13d8] sm:$0xff]  ;;  %v927_v5 = vld [vmem:[%s3014_s15 + $0x1248] sm:$0xff] }
 0x137   : > { %2140 = vmatpush.msra.mxu2 %v894_v6  ;;  %2159 = vmatpush.msra.mxu3 %v911_v7  ;;  %v944_v6 = vld [vmem:[%s3014_s15 + $0x12d0] sm:$0xff]  ;;  %v959_v7 = vld [vmem:[%s3014_s15 + $0x1348] sm:$0xff] }
 0x138   : > { %2101 = vmatpush.msra.mxu0 %v861_v8  ;;  %2120 = vmatpush.msra.mxu1 %v878_v9  ;;  %v976_v8 = vld [vmem:[%s3014_s15 + $0x13d0] sm:$0xff]  ;;  %v926_v9 = vld [vmem:[%s3014_s15 + $0x1240] sm:$0xff] }
 0x139   : > { %2141 = vmatpush.msra.mxu2 %v893_v10  ;;  %2160 = vmatpush.msra.mxu3 %v910_v11  ;;  %v943_v10 = vld [vmem:[%s3014_s15 + $0x12c8] sm:$0xff]  ;;  %v958_v11 = vld [vmem:[%s3014_s15 + $0x1340] sm:$0xff] }
 0x13a   : > { %2102 = vmatpush.msra.mxu0 %v860_v12  ;;  %2121 = vmatpush.msra.mxu1 %v877_v13  ;;  %v975_v12 = vld [vmem:[%s3014_s15 + $0x13c8] sm:$0xff]  ;;  %v925_v13 = vld [vmem:[%s3014_s15 + $0x1238] sm:$0xff] }
 0x13b   : > { %2142 = vmatpush.msra.mxu2 %v892_v14  ;;  %2161 = vmatpush.msra.mxu3 %v909_v15  ;;  %v942_v14 = vld [vmem:[%s3014_s15 + $0x12c0] sm:$0xff]  ;;  %v957_v15 = vld [vmem:[%s3014_s15 + $0x1338] sm:$0xff] }
 0x13c   : > { %2103 = vmatpush.msra.mxu0 %v859_v16  ;;  %2122 = vmatpush.msra.mxu1 %v876_v17  ;;  %v974_v16 = vld [vmem:[%s3014_s15 + $0x13c0] sm:$0xff]  ;;  %v924_v17 = vld [vmem:[%s3014_s15 + $0x1230] sm:$0xff] }
 0x13d   : > { %2143 = vmatpush.msra.mxu2 %v891_v18  ;;  %2162 = vmatpush.msra.mxu3 %v908_v19  ;;  %v941_v18 = vld [vmem:[%s3014_s15 + $0x12b8] sm:$0xff]  ;;  %v956_v19 = vld [vmem:[%s3014_s15 + $0x1330] sm:$0xff] }
 0x13e   : > { %2104 = vmatpush.msra.mxu0 %v858_v20  ;;  %2123 = vmatpush.msra.mxu1 %v875_v21  ;;  %v973_v20 = vld [vmem:[%s3014_s15 + $0x13b8] sm:$0xff]  ;;  %v923_v21 = vld [vmem:[%s3014_s15 + $0x1228] sm:$0xff] }
 0x13f   : > { %2144 = vmatpush.msra.mxu2 %v890_v22  ;;  %2163 = vmatpush.msra.mxu3 %v907_v23  ;;  %v940_v22 = vld [vmem:[%s3014_s15 + $0x12b0] sm:$0xff]  ;;  %v955_v23 = vld [vmem:[%s3014_s15 + $0x1328] sm:$0xff] }
 0x140   : > { %2105 = vmatpush.msra.mxu0 %v857_v24  ;;  %2124 = vmatpush.msra.mxu1 %v874_v25  ;;  %v972_v24 = vld [vmem:[%s3014_s15 + $0x13b0] sm:$0xff]  ;;  %v922_v25 = vld [vmem:[%s3014_s15 + $0x1220] sm:$0xff] }
 0x141   : > { %2145 = vmatpush.msra.mxu2 %v889_v29  ;;  %2164 = vmatpush.msra.mxu3 %v906_v26  ;;  %v939_v29 = vld [vmem:[%s3014_s15 + $0x12a8] sm:$0xff]  ;;  %v954_v26 = vld [vmem:[%s3014_s15 + $0x1320] sm:$0xff] }
 0x142   : > { %2106 = vmatpush.msra.mxu0 %v856_v27  ;;  %2125 = vmatpush.msra.mxu1 %v873_v30  ;;  %v971_v27 = vld [vmem:[%s3014_s15 + $0x13a8] sm:$0xff]  ;;  %v921_v30 = vld [vmem:[%s3014_s15 + $0x1218] sm:$0xff] }
 0x143   : > { %2146 = vmatpush.msra.mxu2 %v888_v32  ;;  %2165 = vmatpush.msra.mxu3 %v905_v28  ;;  %v938_v32 = vld [vmem:[%s3014_s15 + $0x12a0] sm:$0xff]  ;;  %v953_v28 = vld [vmem:[%s3014_s15 + $0x1318] sm:$0xff] }
 0x144   : > { %2107 = vmatpush.msra.mxu0 %v855_v34  ;;  %2126 = vmatpush.msra.mxu1 %v872_v35  ;;  %v970_v34 = vld [vmem:[%s3014_s15 + $0x13a0] sm:$0xff]  ;;  %v920_v35 = vld [vmem:[%s3014_s15 + $0x1210] sm:$0xff] }
 0x145   : > { %2147 = vmatpush.msra.mxu2 %v887_v33  ;;  %2166 = vmatpush.msra.mxu3 %v904_v31  ;;  %v952_v33 = vld [vmem:[%s3014_s15 + $0x1310] sm:$0xff]  ;;  %v969_v31 = vld [vmem:[%s3014_s15 + $0x1398] sm:$0xff] }
 0x146   : > { %2108 = vmatpush.msra.mxu0 %v854_v37  ;;  %2127 = vmatpush.msra.mxu1 %v871_v38  ;;  %v919_v37 = vld [vmem:[%s3014_s15 + $0x1208] sm:$0xff]  ;;  %v936_v38 = vld [vmem:[%s3014_s15 + $0x1290] sm:$0xff] }
 0x147   : > { %2148 = vmatpush.msra.mxu2 %v886_v39  ;;  %2167 = vmatpush.msra.mxu3 %v903_v40  ;;  %v337_v39 = vld [vmem:[%s3009_s11 + $0x50] sm:$0xff]  ;;  %v951_v40 = vld [vmem:[%s3014_s15 + $0x1308] sm:$0xff] }
 0x148   : > { %2109 = vmatmul.f32.vlgmr.msra.gmra.mxu0 %v1360_v41  ;;  %2149 = vmatmul.f32.vlgmr.msra.gmra.mxu2 %v1362_v42  ;;  %v968_v41 = vld [vmem:[%s3014_s15 + $0x1390] sm:$0xff]  ;;  %1368 = vst [vmem:[#allocation1] ss:$4 sm:$0xff] %v337_v39  ;;  %v918_v42 = vld [vmem:[%s3014_s15 + $0x1200] sm:$0xff]  ;;  %v1001_v39 = vld [vmem:[%s3014_s15 + $0x1498] sm:$0xff] }
 0x149   : > { %2173 = vmatpush.msrb.mxu0 %v933_v43  ;;  %2213 = vmatpush.msrb.mxu2 %v965_v44  ;;  %v935_v43 = vld [vmem:[%s3014_s15 + $0x1288] sm:$0xff]  ;;  %v950_v44 = vld [vmem:[%s3014_s15 + $0x1300] sm:$0xff] }
 0x14a   : > { %2128 = vmatpush.msra.mxu1 %v870_v45  ;;  %2168 = vmatpush.msra.mxu3 %v902_v46  ;;  %v967_v45 = vld [vmem:[%s3014_s15 + $0x1388] sm:$0xff]  ;;  %v1364_v46 = vld.sshfl [vmem:[#allocation1 + $0x20] sm:$0xff pattern:$0x73625140] }
 0x14b   : > { %2129 = vmatmul.f32.vlgmr.msra.gmra.mxu1 %v1361_v47  ;;  %2169 = vmatmul.f32.vlgmr.msra.gmra.mxu3 %v1363_v48  ;;  %v1366_v47 = vld.sshfl [vmem:[#allocation1 + $0x30] sm:$0xff pattern:$0x73625140]  ;;  %v997_v48 = vld [vmem:[%s3014_s15 + $0x1478] sm:$0xff] }
 0x14c   : > { %2174 = vmatpush.msrb.mxu0 %v932_v49  ;;  %2193 = vmatpush.msrb.mxu1 %v949_v50  ;;  %v1029_v49 = vld [vmem:[%s3014_s15 + $0x1578] sm:$0xff]  ;;  %v934_v50 = vld [vmem:[%s3014_s15 + $0x1280] sm:$0xff] }
 0x14d   : > { %2214 = vmatpush.msrb.mxu2 %v964_v51  ;;  %2233 = vmatpush.msrb.mxu3 %v981_v52  ;;  %v966_v51 = vld [vmem:[%s3014_s15 + $0x1380] sm:$0xff]  ;;  %v1365_v52 = vld.sshfl [vmem:[#allocation1 + $0x28] sm:$0xff pattern:$0x73625140] }
 0x14e   : > { %2175 = vmatpush.msrb.mxu0 %v931_v53  ;;  %2194 = vmatpush.msrb.mxu1 %v948_v54  ;;  %v1367_v53 = vld.sshfl [vmem:[#allocation1 + $0x38] sm:$0xff pattern:$0x73625140]  ;;  %v996_v54 = vld [vmem:[%s3014_s15 + $0x1470] sm:$0xff] }
 0x14f   : > { %2215 = vmatpush.msrb.mxu2 %v963_v55  ;;  %2234 = vmatpush.msrb.mxu3 %v980_v56  ;;  %v1013_v55 = vld [vmem:[%s3014_s15 + $0x14f8] sm:$0xff]  ;;  %v1028_v56 = vld [vmem:[%s3014_s15 + $0x1570] sm:$0xff] }
 0x150   : > { %2176 = vmatpush.msrb.mxu0 %v930_v57  ;;  %2195 = vmatpush.msrb.mxu1 %v947_v58  ;;  %v1045_v57 = vld [vmem:[%s3014_s15 + $0x15f8] sm:$0xff]  ;;  %v995_v58 = vld [vmem:[%s3014_s15 + $0x1468] sm:$0xff] }
 0x151   : > { %2216 = vmatpush.msrb.mxu2 %v962_v59  ;;  %2235 = vmatpush.msrb.mxu3 %v979_v60  ;;  %v1012_v59 = vld [vmem:[%s3014_s15 + $0x14f0] sm:$0xff]  ;;  %v1027_v60 = vld [vmem:[%s3014_s15 + $0x1568] sm:$0xff] }
 0x152   : > { %2177 = vmatpush.msrb.mxu0 %v929_v61  ;;  %2196 = vmatpush.msrb.mxu1 %v946_v62  ;;  %v1044_v61 = vld [vmem:[%s3014_s15 + $0x15f0] sm:$0xff]  ;;  %v994_v62 = vld [vmem:[%s3014_s15 + $0x1460] sm:$0xff] }
 0x153   : > { %2217 = vmatpush.msrb.mxu2 %v961_v63  ;;  %2236 = vmatpush.msrb.mxu3 %v978_v0  ;;  %v1011_v63 = vld [vmem:[%s3014_s15 + $0x14e8] sm:$0xff]  ;;  %v1026_v0 = vld [vmem:[%s3014_s15 + $0x1560] sm:$0xff] }
 0x154   : > { %2178 = vmatpush.msrb.mxu0 %v928_v1  ;;  %2197 = vmatpush.msrb.mxu1 %v945_v2  ;;  %v1043_v1 = vld [vmem:[%s3014_s15 + $0x15e8] sm:$0xff]  ;;  %v993_v2 = vld [vmem:[%s3014_s15 + $0x1458] sm:$0xff] }
 0x155   : > { %2218 = vmatpush.msrb.mxu2 %v960_v3  ;;  %2237 = vmatpush.msrb.mxu3 %v977_v4  ;;  %v1010_v3 = vld [vmem:[%s3014_s15 + $0x14e0] sm:$0xff]  ;;  %v1025_v4 = vld [vmem:[%s3014_s15 + $0x1558] sm:$0xff] }
 0x156   : > { %2179 = vmatpush.msrb.mxu0 %v927_v5  ;;  %2198 = vmatpush.msrb.mxu1 %v944_v6  ;;  %v1042_v5 = vld [vmem:[%s3014_s15 + $0x15e0] sm:$0xff]  ;;  %v992_v6 = vld [vmem:[%s3014_s15 + $0x1450] sm:$0xff] }
 0x157   : > { %2219 = vmatpush.msrb.mxu2 %v959_v7  ;;  %2238 = vmatpush.msrb.mxu3 %v976_v8  ;;  %v1009_v7 = vld [vmem:[%s3014_s15 + $0x14d8] sm:$0xff]  ;;  %v1024_v8 = vld [vmem:[%s3014_s15 + $0x1550] sm:$0xff] }
 0x158   : > { %2180 = vmatpush.msrb.mxu0 %v926_v9  ;;  %2199 = vmatpush.msrb.mxu1 %v943_v10  ;;  %v1041_v9 = vld [vmem:[%s3014_s15 + $0x15d8] sm:$0xff]  ;;  %v991_v10 = vld [vmem:[%s3014_s15 + $0x1448] sm:$0xff] }
 0x159   : > { %2220 = vmatpush.msrb.mxu2 %v958_v11  ;;  %2239 = vmatpush.msrb.mxu3 %v975_v12  ;;  %v1008_v11 = vld [vmem:[%s3014_s15 + $0x14d0] sm:$0xff]  ;;  %v1023_v12 = vld [vmem:[%s3014_s15 + $0x1548] sm:$0xff] }
 0x15a   : > { %2181 = vmatpush.msrb.mxu0 %v925_v13  ;;  %2200 = vmatpush.msrb.mxu1 %v942_v14  ;;  %v1040_v13 = vld [vmem:[%s3014_s15 + $0x15d0] sm:$0xff]  ;;  %v990_v14 = vld [vmem:[%s3014_s15 + $0x1440] sm:$0xff] }
 0x15b   : > { %2221 = vmatpush.msrb.mxu2 %v957_v15  ;;  %2240 = vmatpush.msrb.mxu3 %v974_v16  ;;  %v1007_v15 = vld [vmem:[%s3014_s15 + $0x14c8] sm:$0xff]  ;;  %v1022_v16 = vld [vmem:[%s3014_s15 + $0x1540] sm:$0xff] }
 0x15c   : > { %2182 = vmatpush.msrb.mxu0 %v924_v17  ;;  %2201 = vmatpush.msrb.mxu1 %v941_v18  ;;  %v1039_v17 = vld [vmem:[%s3014_s15 + $0x15c8] sm:$0xff]  ;;  %v989_v18 = vld [vmem:[%s3014_s15 + $0x1438] sm:$0xff] }
 0x15d   : > { %2222 = vmatpush.msrb.mxu2 %v956_v19  ;;  %2241 = vmatpush.msrb.mxu3 %v973_v20  ;;  %v1006_v19 = vld [vmem:[%s3014_s15 + $0x14c0] sm:$0xff]  ;;  %v1021_v20 = vld [vmem:[%s3014_s15 + $0x1538] sm:$0xff] }
 0x15e   : > { %2183 = vmatpush.msrb.mxu0 %v923_v21  ;;  %2202 = vmatpush.msrb.mxu1 %v940_v22  ;;  %v1038_v21 = vld [vmem:[%s3014_s15 + $0x15c0] sm:$0xff]  ;;  %v988_v22 = vld [vmem:[%s3014_s15 + $0x1430] sm:$0xff] }
 0x15f   : > { %2223 = vmatpush.msrb.mxu2 %v955_v23  ;;  %2242 = vmatpush.msrb.mxu3 %v972_v24  ;;  %v1005_v23 = vld [vmem:[%s3014_s15 + $0x14b8] sm:$0xff]  ;;  %v1020_v24 = vld [vmem:[%s3014_s15 + $0x1530] sm:$0xff] }
 0x160   : > { %2184 = vmatpush.msrb.mxu0 %v922_v25  ;;  %2203 = vmatpush.msrb.mxu1 %v939_v29  ;;  %v1037_v25 = vld [vmem:[%s3014_s15 + $0x15b8] sm:$0xff]  ;;  %v987_v29 = vld [vmem:[%s3014_s15 + $0x1428] sm:$0xff] }
 0x161   : > { %2224 = vmatpush.msrb.mxu2 %v954_v26  ;;  %2243 = vmatpush.msrb.mxu3 %v971_v27  ;;  %v1004_v26 = vld [vmem:[%s3014_s15 + $0x14b0] sm:$0xff]  ;;  %v1019_v27 = vld [vmem:[%s3014_s15 + $0x1528] sm:$0xff] }
 0x162   : > { %2185 = vmatpush.msrb.mxu0 %v921_v30  ;;  %2204 = vmatpush.msrb.mxu1 %v938_v32  ;;  %v1036_v30 = vld [vmem:[%s3014_s15 + $0x15b0] sm:$0xff]  ;;  %v986_v32 = vld [vmem:[%s3014_s15 + $0x1420] sm:$0xff] }
 0x163   : > { %2225 = vmatpush.msrb.mxu2 %v953_v28  ;;  %2244 = vmatpush.msrb.mxu3 %v970_v34  ;;  %v1003_v28 = vld [vmem:[%s3014_s15 + $0x14a8] sm:$0xff]  ;;  %v1018_v34 = vld [vmem:[%s3014_s15 + $0x1520] sm:$0xff] }
 0x164   : > { %2186 = vmatpush.msrb.mxu0 %v920_v35  ;;  %2205 = vmatpush.msrb.mxu1 %v937_v36  ;;  %v1035_v35 = vld [vmem:[%s3014_s15 + $0x15a8] sm:$0xff]  ;;  %v985_v36 = vld [vmem:[%s3014_s15 + $0x1418] sm:$0xff] }
 0x165   : > { %2226 = vmatpush.msrb.mxu2 %v952_v33  ;;  %2245 = vmatpush.msrb.mxu3 %v969_v31  ;;  %v1002_v33 = vld [vmem:[%s3014_s15 + $0x14a0] sm:$0xff]  ;;  %v1017_v31 = vld [vmem:[%s3014_s15 + $0x1518] sm:$0xff] }
 0x166   : > { %2187 = vmatpush.msrb.mxu0 %v919_v37  ;;  %2206 = vmatpush.msrb.mxu1 %v936_v38  ;;  %v1034_v37 = vld [vmem:[%s3014_s15 + $0x15a0] sm:$0xff]  ;;  %v984_v38 = vld [vmem:[%s3014_s15 + $0x1410] sm:$0xff] }
 0x167   : > { %2227 = vmatpush.msrb.mxu2 %v951_v40  ;;  %2246 = vmatpush.msrb.mxu3 %v968_v41  ;;  %v1016_v40 = vld [vmem:[%s3014_s15 + $0x1510] sm:$0xff]  ;;  %v1033_v41 = vld [vmem:[%s3014_s15 + $0x1598] sm:$0xff] }
 0x168   : > { %2188 = vmatpush.msrb.mxu0 %v918_v42  ;;  %2207 = vmatpush.msrb.mxu1 %v935_v43  ;;  %v983_v42 = vld [vmem:[%s3014_s15 + $0x1408] sm:$0xff]  ;;  %v1000_v43 = vld [vmem:[%s3014_s15 + $0x1490] sm:$0xff] }
 0x169   : > { %2228 = vmatpush.msrb.mxu2 %v950_v44  ;;  %2247 = vmatpush.msrb.mxu3 %v967_v45  ;;  %v338_v44 = vld [vmem:[%s3009_s11 + $0x58] sm:$0xff]  ;;  %v1015_v45 = vld [vmem:[%s3014_s15 + $0x1508] sm:$0xff] }
 0x16a   : > { %2189 = vmatmul.f32.vlgmr.msrb.gmra.mxu0 %v1364_v46  ;;  %2229 = vmatmul.f32.vlgmr.msrb.gmra.mxu2 %v1366_v47  ;;  %v1032_v46 = vld [vmem:[%s3014_s15 + $0x1590] sm:$0xff]  ;;  %1369 = vst [vmem:[#allocation1 + $0x20] ss:$4 sm:$0xff] %v338_v44  ;;  %v982_v47 = vld [vmem:[%s3014_s15 + $0x1400] sm:$0xff]  ;;  %v1065_v44 = vld [vmem:[%s3014_s15 + $0x1698] sm:$0xff] }
 0x16b   : > { %2253 = vmatpush.msra.mxu0 %v997_v48  ;;  %2293 = vmatpush.msra.mxu2 %v1029_v49  ;;  %v999_v48 = vld [vmem:[%s3014_s15 + $0x1488] sm:$0xff]  ;;  %v1014_v49 = vld [vmem:[%s3014_s15 + $0x1500] sm:$0xff] }
 0x16c   : > { %2208 = vmatpush.msrb.mxu1 %v934_v50  ;;  %2248 = vmatpush.msrb.mxu3 %v966_v51  ;;  %v1031_v50 = vld [vmem:[%s3014_s15 + $0x1588] sm:$0xff]  ;;  %v1370_v51 = vld.sshfl [vmem:[#allocation1] sm:$0xff pattern:$0x73625140] }
 0x16d   : > { %2209 = vmatmul.f32.vlgmr.msrb.gmra.mxu1 %v1365_v52  ;;  %2249 = vmatmul.f32.vlgmr.msrb.gmra.mxu3 %v1367_v53  ;;  %v1372_v52 = vld.sshfl [vmem:[#allocation1 + $0x10] sm:$0xff pattern:$0x73625140]  ;;  %v1061_v53 = vld [vmem:[%s3014_s15 + $0x1678] sm:$0xff] }
 0x16e   : > { %2254 = vmatpush.msra.mxu0 %v996_v54  ;;  %2273 = vmatpush.msra.mxu1 %v1013_v55  ;;  %v1093_v54 = vld [vmem:[%s3014_s15 + $0x1778] sm:$0xff]  ;;  %v998_v55 = vld [vmem:[%s3014_s15 + $0x1480] sm:$0xff] }
 0x16f   : > { %2294 = vmatpush.msra.mxu2 %v1028_v56  ;;  %2313 = vmatpush.msra.mxu3 %v1045_v57  ;;  %v1030_v56 = vld [vmem:[%s3014_s15 + $0x1580] sm:$0xff]  ;;  %v1371_v57 = vld.sshfl [vmem:[#allocation1 + $0x8] sm:$0xff pattern:$0x73625140] }
 0x170   : > { %2255 = vmatpush.msra.mxu0 %v995_v58  ;;  %2274 = vmatpush.msra.mxu1 %v1012_v59  ;;  %v1373_v58 = vld.sshfl [vmem:[#allocation1 + $0x18] sm:$0xff pattern:$0x73625140]  ;;  %v1060_v59 = vld [vmem:[%s3014_s15 + $0x1670] sm:$0xff] }
 0x171   : > { %2295 = vmatpush.msra.mxu2 %v1027_v60  ;;  %2314 = vmatpush.msra.mxu3 %v1044_v61  ;;  %v1077_v60 = vld [vmem:[%s3014_s15 + $0x16f8] sm:$0xff]  ;;  %v1092_v61 = vld [vmem:[%s3014_s15 + $0x1770] sm:$0xff] }
 0x172   : > { %2256 = vmatpush.msra.mxu0 %v994_v62  ;;  %2275 = vmatpush.msra.mxu1 %v1011_v63  ;;  %v1109_v62 = vld [vmem:[%s3014_s15 + $0x17f8] sm:$0xff]  ;;  %v1059_v63 = vld [vmem:[%s3014_s15 + $0x1668] sm:$0xff] }
 0x173   : > { %2296 = vmatpush.msra.mxu2 %v1026_v0  ;;  %2315 = vmatpush.msra.mxu3 %v1043_v1  ;;  %v1076_v0 = vld [vmem:[%s3014_s15 + $0x16f0] sm:$0xff]  ;;  %v1091_v1 = vld [vmem:[%s3014_s15 + $0x1768] sm:$0xff] }
 0x174   : > { %2257 = vmatpush.msra.mxu0 %v993_v2  ;;  %2276 = vmatpush.msra.mxu1 %v1010_v3  ;;  %v1108_v2 = vld [vmem:[%s3014_s15 + $0x17f0] sm:$0xff]  ;;  %v1058_v3 = vld [vmem:[%s3014_s15 + $0x1660] sm:$0xff] }
 0x175   : > { %2297 = vmatpush.msra.mxu2 %v1025_v4  ;;  %2316 = vmatpush.msra.mxu3 %v1042_v5  ;;  %v1075_v4 = vld [vmem:[%s3014_s15 + $0x16e8] sm:$0xff]  ;;  %v1090_v5 = vld [vmem:[%s3014_s15 + $0x1760] sm:$0xff] }
 0x176   : > { %2258 = vmatpush.msra.mxu0 %v992_v6  ;;  %2277 = vmatpush.msra.mxu1 %v1009_v7  ;;  %v1107_v6 = vld [vmem:[%s3014_s15 + $0x17e8] sm:$0xff]  ;;  %v1057_v7 = vld [vmem:[%s3014_s15 + $0x1658] sm:$0xff] }
 0x177   : > { %2298 = vmatpush.msra.mxu2 %v1024_v8  ;;  %2317 = vmatpush.msra.mxu3 %v1041_v9  ;;  %v1074_v8 = vld [vmem:[%s3014_s15 + $0x16e0] sm:$0xff]  ;;  %v1089_v9 = vld [vmem:[%s3014_s15 + $0x1758] sm:$0xff] }
 0x178   : > { %2259 = vmatpush.msra.mxu0 %v991_v10  ;;  %2278 = vmatpush.msra.mxu1 %v1008_v11  ;;  %v1106_v10 = vld [vmem:[%s3014_s15 + $0x17e0] sm:$0xff]  ;;  %v1056_v11 = vld [vmem:[%s3014_s15 + $0x1650] sm:$0xff] }
 0x179   : > { %2299 = vmatpush.msra.mxu2 %v1023_v12  ;;  %2318 = vmatpush.msra.mxu3 %v1040_v13  ;;  %v1073_v12 = vld [vmem:[%s3014_s15 + $0x16d8] sm:$0xff]  ;;  %v1088_v13 = vld [vmem:[%s3014_s15 + $0x1750] sm:$0xff] }
 0x17a   : > { %2260 = vmatpush.msra.mxu0 %v990_v14  ;;  %2279 = vmatpush.msra.mxu1 %v1007_v15  ;;  %v1105_v14 = vld [vmem:[%s3014_s15 + $0x17d8] sm:$0xff]  ;;  %v1055_v15 = vld [vmem:[%s3014_s15 + $0x1648] sm:$0xff] }
 0x17b   : > { %2300 = vmatpush.msra.mxu2 %v1022_v16  ;;  %2319 = vmatpush.msra.mxu3 %v1039_v17  ;;  %v1072_v16 = vld [vmem:[%s3014_s15 + $0x16d0] sm:$0xff]  ;;  %v1087_v17 = vld [vmem:[%s3014_s15 + $0x1748] sm:$0xff] }
 0x17c   : > { %2261 = vmatpush.msra.mxu0 %v989_v18  ;;  %2280 = vmatpush.msra.mxu1 %v1006_v19  ;;  %v1104_v18 = vld [vmem:[%s3014_s15 + $0x17d0] sm:$0xff]  ;;  %v1054_v19 = vld [vmem:[%s3014_s15 + $0x1640] sm:$0xff] }
 0x17d   : > { %2301 = vmatpush.msra.mxu2 %v1021_v20  ;;  %2320 = vmatpush.msra.mxu3 %v1038_v21  ;;  %v1071_v20 = vld [vmem:[%s3014_s15 + $0x16c8] sm:$0xff]  ;;  %v1086_v21 = vld [vmem:[%s3014_s15 + $0x1740] sm:$0xff] }
 0x17e   : > { %2262 = vmatpush.msra.mxu0 %v988_v22  ;;  %2281 = vmatpush.msra.mxu1 %v1005_v23  ;;  %v1103_v22 = vld [vmem:[%s3014_s15 + $0x17c8] sm:$0xff]  ;;  %v1053_v23 = vld [vmem:[%s3014_s15 + $0x1638] sm:$0xff] }
 0x17f   : > { %2302 = vmatpush.msra.mxu2 %v1020_v24  ;;  %2321 = vmatpush.msra.mxu3 %v1037_v25  ;;  %v1070_v24 = vld [vmem:[%s3014_s15 + $0x16c0] sm:$0xff]  ;;  %v1085_v25 = vld [vmem:[%s3014_s15 + $0x1738] sm:$0xff] }
 0x180   : > { %2263 = vmatpush.msra.mxu0 %v987_v29  ;;  %2282 = vmatpush.msra.mxu1 %v1004_v26  ;;  %v1102_v29 = vld [vmem:[%s3014_s15 + $0x17c0] sm:$0xff]  ;;  %v1052_v26 = vld [vmem:[%s3014_s15 + $0x1630] sm:$0xff] }
 0x181   : > { %2303 = vmatpush.msra.mxu2 %v1019_v27  ;;  %2322 = vmatpush.msra.mxu3 %v1036_v30  ;;  %v1069_v27 = vld [vmem:[%s3014_s15 + $0x16b8] sm:$0xff]  ;;  %v1084_v30 = vld [vmem:[%s3014_s15 + $0x1730] sm:$0xff] }
 0x182   : > { %2264 = vmatpush.msra.mxu0 %v986_v32  ;;  %2283 = vmatpush.msra.mxu1 %v1003_v28  ;;  %v1101_v32 = vld [vmem:[%s3014_s15 + $0x17b8] sm:$0xff]  ;;  %v1051_v28 = vld [vmem:[%s3014_s15 + $0x1628] sm:$0xff] }
 0x183   : > { %2304 = vmatpush.msra.mxu2 %v1018_v34  ;;  %2323 = vmatpush.msra.mxu3 %v1035_v35  ;;  %v1068_v34 = vld [vmem:[%s3014_s15 + $0x16b0] sm:$0xff]  ;;  %v1083_v35 = vld [vmem:[%s3014_s15 + $0x1728] sm:$0xff] }
 0x184   : > { %2265 = vmatpush.msra.mxu0 %v985_v36  ;;  %2284 = vmatpush.msra.mxu1 %v1002_v33  ;;  %v1100_v36 = vld [vmem:[%s3014_s15 + $0x17b0] sm:$0xff]  ;;  %v1050_v33 = vld [vmem:[%s3014_s15 + $0x1620] sm:$0xff] }
 0x185   : > { %2305 = vmatpush.msra.mxu2 %v1017_v31  ;;  %2324 = vmatpush.msra.mxu3 %v1034_v37  ;;  %v1067_v31 = vld [vmem:[%s3014_s15 + $0x16a8] sm:$0xff]  ;;  %v1082_v37 = vld [vmem:[%s3014_s15 + $0x1720] sm:$0xff] }
 0x186   : > { %2266 = vmatpush.msra.mxu0 %v984_v38  ;;  %2285 = vmatpush.msra.mxu1 %v1001_v39  ;;  %v1099_v38 = vld [vmem:[%s3014_s15 + $0x17a8] sm:$0xff]  ;;  %v1049_v39 = vld [vmem:[%s3014_s15 + $0x1618] sm:$0xff] }
 0x187   : > { %2306 = vmatpush.msra.mxu2 %v1016_v40  ;;  %2325 = vmatpush.msra.mxu3 %v1033_v41  ;;  %v1066_v40 = vld [vmem:[%s3014_s15 + $0x16a0] sm:$0xff]  ;;  %v1081_v41 = vld [vmem:[%s3014_s15 + $0x1718] sm:$0xff] }
 0x188   : > { %2267 = vmatpush.msra.mxu0 %v983_v42  ;;  %2286 = vmatpush.msra.mxu1 %v1000_v43  ;;  %v1098_v42 = vld [vmem:[%s3014_s15 + $0x17a0] sm:$0xff]  ;;  %v1048_v43 = vld [vmem:[%s3014_s15 + $0x1610] sm:$0xff] }
 0x189   : > { %2307 = vmatpush.msra.mxu2 %v1015_v45  ;;  %2326 = vmatpush.msra.mxu3 %v1032_v46  ;;  %v1080_v45 = vld [vmem:[%s3014_s15 + $0x1710] sm:$0xff]  ;;  %v1097_v46 = vld [vmem:[%s3014_s15 + $0x1798] sm:$0xff] }
 0x18a   : > { %2268 = vmatpush.msra.mxu0 %v982_v47  ;;  %2287 = vmatpush.msra.mxu1 %v999_v48  ;;  %v1047_v47 = vld [vmem:[%s3014_s15 + $0x1608] sm:$0xff]  ;;  %v1064_v48 = vld [vmem:[%s3014_s15 + $0x1690] sm:$0xff] }
 0x18b   : > { %2308 = vmatpush.msra.mxu2 %v1014_v49  ;;  %2327 = vmatpush.msra.mxu3 %v1031_v50  ;;  %v339_v49 = vld [vmem:[%s3009_s11 + $0x60] sm:$0xff]  ;;  %v1079_v50 = vld [vmem:[%s3014_s15 + $0x1708] sm:$0xff] }
 0x18c   : > { %2269 = vmatmul.f32.vlgmr.msra.gmra.mxu0 %v1370_v51  ;;  %2309 = vmatmul.f32.vlgmr.msra.gmra.mxu2 %v1372_v52  ;;  %v1096_v51 = vld [vmem:[%s3014_s15 + $0x1790] sm:$0xff]  ;;  %1378 = vst [vmem:[#allocation1] ss:$4 sm:$0xff] %v339_v49  ;;  %v1046_v52 = vld [vmem:[%s3014_s15 + $0x1600] sm:$0xff]  ;;  %v1129_v49 = vld [vmem:[%s3014_s15 + $0x1898] sm:$0xff] }
 0x18d   : > { %2333 = vmatpush.msrb.mxu0 %v1061_v53  ;;  %2373 = vmatpush.msrb.mxu2 %v1093_v54  ;;  %v1063_v53 = vld [vmem:[%s3014_s15 + $0x1688] sm:$0xff]  ;;  %v1078_v54 = vld [vmem:[%s3014_s15 + $0x1700] sm:$0xff] }
 0x18e   : > { %2288 = vmatpush.msra.mxu1 %v998_v55  ;;  %2328 = vmatpush.msra.mxu3 %v1030_v56  ;;  %v1095_v55 = vld [vmem:[%s3014_s15 + $0x1788] sm:$0xff]  ;;  %v1374_v56 = vld.sshfl [vmem:[#allocation1 + $0x20] sm:$0xff pattern:$0x73625140] }
 0x18f   : > { %2289 = vmatmul.f32.vlgmr.msra.gmra.mxu1 %v1371_v57  ;;  %2329 = vmatmul.f32.vlgmr.msra.gmra.mxu3 %v1373_v58  ;;  %v1376_v57 = vld.sshfl [vmem:[#allocation1 + $0x30] sm:$0xff pattern:$0x73625140]  ;;  %v1125_v58 = vld [vmem:[%s3014_s15 + $0x1878] sm:$0xff] }
 0x190   : > { %2334 = vmatpush.msrb.mxu0 %v1060_v59  ;;  %2353 = vmatpush.msrb.mxu1 %v1077_v60  ;;  %v1157_v59 = vld [vmem:[%s3014_s15 + $0x1978] sm:$0xff]  ;;  %v1062_v60 = vld [vmem:[%s3014_s15 + $0x1680] sm:$0xff] }
 0x191   : > { %2374 = vmatpush.msrb.mxu2 %v1092_v61  ;;  %2393 = vmatpush.msrb.mxu3 %v1109_v62  ;;  %v1094_v61 = vld [vmem:[%s3014_s15 + $0x1780] sm:$0xff]  ;;  %v1375_v62 = vld.sshfl [vmem:[#allocation1 + $0x28] sm:$0xff pattern:$0x73625140] }
 0x192   : > { %2335 = vmatpush.msrb.mxu0 %v1059_v63  ;;  %2354 = vmatpush.msrb.mxu1 %v1076_v0  ;;  %v1377_v63 = vld.sshfl [vmem:[#allocation1 + $0x38] sm:$0xff pattern:$0x73625140]  ;;  %v1124_v0 = vld [vmem:[%s3014_s15 + $0x1870] sm:$0xff] }
 0x193   : > { %2375 = vmatpush.msrb.mxu2 %v1091_v1  ;;  %2394 = vmatpush.msrb.mxu3 %v1108_v2  ;;  %v1141_v1 = vld [vmem:[%s3014_s15 + $0x18f8] sm:$0xff]  ;;  %v1156_v2 = vld [vmem:[%s3014_s15 + $0x1970] sm:$0xff] }
 0x194   : > { %2336 = vmatpush.msrb.mxu0 %v1058_v3  ;;  %2355 = vmatpush.msrb.mxu1 %v1075_v4  ;;  %v1173_v3 = vld [vmem:[%s3014_s15 + $0x19f8] sm:$0xff]  ;;  %v1123_v4 = vld [vmem:[%s3014_s15 + $0x1868] sm:$0xff] }
 0x195   : > { %2376 = vmatpush.msrb.mxu2 %v1090_v5  ;;  %2395 = vmatpush.msrb.mxu3 %v1107_v6  ;;  %v1140_v5 = vld [vmem:[%s3014_s15 + $0x18f0] sm:$0xff]  ;;  %v1155_v6 = vld [vmem:[%s3014_s15 + $0x1968] sm:$0xff] }
 0x196   : > { %2337 = vmatpush.msrb.mxu0 %v1057_v7  ;;  %2356 = vmatpush.msrb.mxu1 %v1074_v8  ;;  %v1172_v7 = vld [vmem:[%s3014_s15 + $0x19f0] sm:$0xff]  ;;  %v1122_v8 = vld [vmem:[%s3014_s15 + $0x1860] sm:$0xff] }
 0x197   : > { %2377 = vmatpush.msrb.mxu2 %v1089_v9  ;;  %2396 = vmatpush.msrb.mxu3 %v1106_v10  ;;  %v1139_v9 = vld [vmem:[%s3014_s15 + $0x18e8] sm:$0xff]  ;;  %v1154_v10 = vld [vmem:[%s3014_s15 + $0x1960] sm:$0xff] }
 0x198   : > { %2338 = vmatpush.msrb.mxu0 %v1056_v11  ;;  %2357 = vmatpush.msrb.mxu1 %v1073_v12  ;;  %v1171_v11 = vld [vmem:[%s3014_s15 + $0x19e8] sm:$0xff]  ;;  %v1121_v12 = vld [vmem:[%s3014_s15 + $0x1858] sm:$0xff] }
 0x199   : > { %2378 = vmatpush.msrb.mxu2 %v1088_v13  ;;  %2397 = vmatpush.msrb.mxu3 %v1105_v14  ;;  %v1138_v13 = vld [vmem:[%s3014_s15 + $0x18e0] sm:$0xff]  ;;  %v1153_v14 = vld [vmem:[%s3014_s15 + $0x1958] sm:$0xff] }
 0x19a   : > { %2339 = vmatpush.msrb.mxu0 %v1055_v15  ;;  %2358 = vmatpush.msrb.mxu1 %v1072_v16  ;;  %v1170_v15 = vld [vmem:[%s3014_s15 + $0x19e0] sm:$0xff]  ;;  %v1120_v16 = vld [vmem:[%s3014_s15 + $0x1850] sm:$0xff] }
 0x19b   : > { %2379 = vmatpush.msrb.mxu2 %v1087_v17  ;;  %2398 = vmatpush.msrb.mxu3 %v1104_v18  ;;  %v1137_v17 = vld [vmem:[%s3014_s15 + $0x18d8] sm:$0xff]  ;;  %v1152_v18 = vld [vmem:[%s3014_s15 + $0x1950] sm:$0xff] }
 0x19c   : > { %2340 = vmatpush.msrb.mxu0 %v1054_v19  ;;  %2359 = vmatpush.msrb.mxu1 %v1071_v20  ;;  %v1169_v19 = vld [vmem:[%s3014_s15 + $0x19d8] sm:$0xff]  ;;  %v1119_v20 = vld [vmem:[%s3014_s15 + $0x1848] sm:$0xff] }
 0x19d   : > { %2380 = vmatpush.msrb.mxu2 %v1086_v21  ;;  %2399 = vmatpush.msrb.mxu3 %v1103_v22  ;;  %v1136_v21 = vld [vmem:[%s3014_s15 + $0x18d0] sm:$0xff]  ;;  %v1151_v22 = vld [vmem:[%s3014_s15 + $0x1948] sm:$0xff] }
 0x19e   : > { %2341 = vmatpush.msrb.mxu0 %v1053_v23  ;;  %2360 = vmatpush.msrb.mxu1 %v1070_v24  ;;  %v1168_v23 = vld [vmem:[%s3014_s15 + $0x19d0] sm:$0xff]  ;;  %v1118_v24 = vld [vmem:[%s3014_s15 + $0x1840] sm:$0xff] }
 0x19f   : > { %2381 = vmatpush.msrb.mxu2 %v1085_v25  ;;  %2400 = vmatpush.msrb.mxu3 %v1102_v29  ;;  %v1135_v25 = vld [vmem:[%s3014_s15 + $0x18c8] sm:$0xff]  ;;  %v1150_v29 = vld [vmem:[%s3014_s15 + $0x1940] sm:$0xff] }
 0x1a0   : > { %2342 = vmatpush.msrb.mxu0 %v1052_v26  ;;  %2361 = vmatpush.msrb.mxu1 %v1069_v27  ;;  %v1167_v26 = vld [vmem:[%s3014_s15 + $0x19c8] sm:$0xff]  ;;  %v1117_v27 = vld [vmem:[%s3014_s15 + $0x1838] sm:$0xff] }
 0x1a1   : > { %2382 = vmatpush.msrb.mxu2 %v1084_v30  ;;  %2401 = vmatpush.msrb.mxu3 %v1101_v32  ;;  %v1134_v30 = vld [vmem:[%s3014_s15 + $0x18c0] sm:$0xff]  ;;  %v1149_v32 = vld [vmem:[%s3014_s15 + $0x1938] sm:$0xff] }
 0x1a2   : > { %2343 = vmatpush.msrb.mxu0 %v1051_v28  ;;  %2362 = vmatpush.msrb.mxu1 %v1068_v34  ;;  %v1166_v28 = vld [vmem:[%s3014_s15 + $0x19c0] sm:$0xff]  ;;  %v1116_v34 = vld [vmem:[%s3014_s15 + $0x1830] sm:$0xff] }
 0x1a3   : > { %2383 = vmatpush.msrb.mxu2 %v1083_v35  ;;  %2402 = vmatpush.msrb.mxu3 %v1100_v36  ;;  %v1133_v35 = vld [vmem:[%s3014_s15 + $0x18b8] sm:$0xff]  ;;  %v1148_v36 = vld [vmem:[%s3014_s15 + $0x1930] sm:$0xff] }
 0x1a4   : > { %2344 = vmatpush.msrb.mxu0 %v1050_v33  ;;  %2363 = vmatpush.msrb.mxu1 %v1067_v31  ;;  %v1165_v33 = vld [vmem:[%s3014_s15 + $0x19b8] sm:$0xff]  ;;  %v1115_v31 = vld [vmem:[%s3014_s15 + $0x1828] sm:$0xff] }
 0x1a5   : > { %2384 = vmatpush.msrb.mxu2 %v1082_v37  ;;  %2403 = vmatpush.msrb.mxu3 %v1099_v38  ;;  %v1132_v37 = vld [vmem:[%s3014_s15 + $0x18b0] sm:$0xff]  ;;  %v1147_v38 = vld [vmem:[%s3014_s15 + $0x1928] sm:$0xff] }
 0x1a6   : > { %2345 = vmatpush.msrb.mxu0 %v1049_v39  ;;  %2364 = vmatpush.msrb.mxu1 %v1066_v40  ;;  %v1164_v39 = vld [vmem:[%s3014_s15 + $0x19b0] sm:$0xff]  ;;  %v1114_v40 = vld [vmem:[%s3014_s15 + $0x1820] sm:$0xff] }
 0x1a7   : > { %2385 = vmatpush.msrb.mxu2 %v1081_v41  ;;  %2404 = vmatpush.msrb.mxu3 %v1098_v42  ;;  %v1131_v41 = vld [vmem:[%s3014_s15 + $0x18a8] sm:$0xff]  ;;  %v1146_v42 = vld [vmem:[%s3014_s15 + $0x1920] sm:$0xff] }
 0x1a8   : > { %2346 = vmatpush.msrb.mxu0 %v1048_v43  ;;  %2365 = vmatpush.msrb.mxu1 %v1065_v44  ;;  %v1163_v43 = vld [vmem:[%s3014_s15 + $0x19a8] sm:$0xff]  ;;  %v1113_v44 = vld [vmem:[%s3014_s15 + $0x1818] sm:$0xff] }
 0x1a9   : > { %2386 = vmatpush.msrb.mxu2 %v1080_v45  ;;  %2405 = vmatpush.msrb.mxu3 %v1097_v46  ;;  %v1130_v45 = vld [vmem:[%s3014_s15 + $0x18a0] sm:$0xff]  ;;  %v1145_v46 = vld [vmem:[%s3014_s15 + $0x1918] sm:$0xff] }
 0x1aa   : > { %2347 = vmatpush.msrb.mxu0 %v1047_v47  ;;  %2366 = vmatpush.msrb.mxu1 %v1064_v48  ;;  %v1162_v47 = vld [vmem:[%s3014_s15 + $0x19a0] sm:$0xff]  ;;  %v1112_v48 = vld [vmem:[%s3014_s15 + $0x1810] sm:$0xff] }
 0x1ab   : > { %2387 = vmatpush.msrb.mxu2 %v1079_v50  ;;  %2406 = vmatpush.msrb.mxu3 %v1096_v51  ;;  %v1144_v50 = vld [vmem:[%s3014_s15 + $0x1910] sm:$0xff]  ;;  %v1161_v51 = vld [vmem:[%s3014_s15 + $0x1998] sm:$0xff] }
 0x1ac   : > { %2348 = vmatpush.msrb.mxu0 %v1046_v52  ;;  %2367 = vmatpush.msrb.mxu1 %v1063_v53  ;;  %v1111_v52 = vld [vmem:[%s3014_s15 + $0x1808] sm:$0xff]  ;;  %v1128_v53 = vld [vmem:[%s3014_s15 + $0x1890] sm:$0xff] }
 0x1ad   : > { %2388 = vmatpush.msrb.mxu2 %v1078_v54  ;;  %2407 = vmatpush.msrb.mxu3 %v1095_v55  ;;  %v340_v54 = vld [vmem:[%s3009_s11 + $0x68] sm:$0xff] }
 0x1ae   : > { %2349 = vmatmul.f32.vlgmr.msrb.gmra.mxu0 %v1374_v56  ;;  %2389 = vmatmul.f32.vlgmr.msrb.gmra.mxu2 %v1376_v57  ;;  %v1143_v55 = vld [vmem:[%s3014_s15 + $0x1908] sm:$0xff]  ;;  %v1160_v56 = vld [vmem:[%s3014_s15 + $0x1990] sm:$0xff]  ;;  %1379 = vst [vmem:[#allocation1 + $0x20] ss:$4 sm:$0xff] %v340_v54  ;;  %v1110_v57 = vld [vmem:[%s3014_s15 + $0x1800] sm:$0xff] }
 0x1af   : > { %2413 = vmatpush.msra.mxu0 %v1125_v58  ;;  %2453 = vmatpush.msra.mxu2 %v1157_v59  ;;  %v1127_v58 = vld [vmem:[%s3014_s15 + $0x1888] sm:$0xff]  ;;  %v1142_v59 = vld [vmem:[%s3014_s15 + $0x1900] sm:$0xff]  ;;  %v1209_v54 = vld [vmem:[%s3014_s15 + $0x1b18] sm:$0xff] }
 0x1b0   : > { %2368 = vmatpush.msrb.mxu1 %v1062_v60  ;;  %2408 = vmatpush.msrb.mxu3 %v1094_v61  ;;  %v1159_v60 = vld [vmem:[%s3014_s15 + $0x1988] sm:$0xff]  ;;  %v1380_v61 = vld.sshfl [vmem:[#allocation1] sm:$0xff pattern:$0x73625140] }
 0x1b1   : > { %2369 = vmatmul.f32.vlgmr.msrb.gmra.mxu1 %v1375_v62  ;;  %2409 = vmatmul.f32.vlgmr.msrb.gmra.mxu3 %v1377_v63  ;;  %v1382_v62 = vld.sshfl [vmem:[#allocation1 + $0x10] sm:$0xff pattern:$0x73625140]  ;;  %v1189_v63 = vld [vmem:[%s3014_s15 + $0x1a78] sm:$0xff] }
 0x1b2   : > { %2414 = vmatpush.msra.mxu0 %v1124_v0  ;;  %2433 = vmatpush.msra.mxu1 %v1141_v1  ;;  %v1221_v0 = vld [vmem:[%s3014_s15 + $0x1b78] sm:$0xff]  ;;  %v1126_v1 = vld [vmem:[%s3014_s15 + $0x1880] sm:$0xff] }
 0x1b3   : > { %2454 = vmatpush.msra.mxu2 %v1156_v2  ;;  %2473 = vmatpush.msra.mxu3 %v1173_v3  ;;  %v1158_v2 = vld [vmem:[%s3014_s15 + $0x1980] sm:$0xff]  ;;  %v1381_v3 = vld.sshfl [vmem:[#allocation1 + $0x8] sm:$0xff pattern:$0x73625140] }
 0x1b4   : > { %2415 = vmatpush.msra.mxu0 %v1123_v4  ;;  %2434 = vmatpush.msra.mxu1 %v1140_v5  ;;  %v1383_v4 = vld.sshfl [vmem:[#allocation1 + $0x18] sm:$0xff pattern:$0x73625140]  ;;  %v1188_v5 = vld [vmem:[%s3014_s15 + $0x1a70] sm:$0xff] }
 0x1b5   : > { %2455 = vmatpush.msra.mxu2 %v1155_v6  ;;  %2474 = vmatpush.msra.mxu3 %v1172_v7  ;;  %v1205_v6 = vld [vmem:[%s3014_s15 + $0x1af8] sm:$0xff]  ;;  %v1220_v7 = vld [vmem:[%s3014_s15 + $0x1b70] sm:$0xff] }
 0x1b6   : > { %2416 = vmatpush.msra.mxu0 %v1122_v8  ;;  %2435 = vmatpush.msra.mxu1 %v1139_v9  ;;  %v1237_v8 = vld [vmem:[%s3014_s15 + $0x1bf8] sm:$0xff]  ;;  %v1187_v9 = vld [vmem:[%s3014_s15 + $0x1a68] sm:$0xff] }
 0x1b7   : > { %2456 = vmatpush.msra.mxu2 %v1154_v10  ;;  %2475 = vmatpush.msra.mxu3 %v1171_v11  ;;  %v1204_v10 = vld [vmem:[%s3014_s15 + $0x1af0] sm:$0xff]  ;;  %v1219_v11 = vld [vmem:[%s3014_s15 + $0x1b68] sm:$0xff] }
 0x1b8   : > { %2417 = vmatpush.msra.mxu0 %v1121_v12  ;;  %2436 = vmatpush.msra.mxu1 %v1138_v13  ;;  %v1236_v12 = vld [vmem:[%s3014_s15 + $0x1bf0] sm:$0xff]  ;;  %v1186_v13 = vld [vmem:[%s3014_s15 + $0x1a60] sm:$0xff] }
 0x1b9   : > { %2457 = vmatpush.msra.mxu2 %v1153_v14  ;;  %2476 = vmatpush.msra.mxu3 %v1170_v15  ;;  %v1203_v14 = vld [vmem:[%s3014_s15 + $0x1ae8] sm:$0xff]  ;;  %v1218_v15 = vld [vmem:[%s3014_s15 + $0x1b60] sm:$0xff] }
 0x1ba   : > { %2418 = vmatpush.msra.mxu0 %v1120_v16  ;;  %2437 = vmatpush.msra.mxu1 %v1137_v17  ;;  %v1235_v16 = vld [vmem:[%s3014_s15 + $0x1be8] sm:$0xff]  ;;  %v1185_v17 = vld [vmem:[%s3014_s15 + $0x1a58] sm:$0xff] }
 0x1bb   : > { %2458 = vmatpush.msra.mxu2 %v1152_v18  ;;  %2477 = vmatpush.msra.mxu3 %v1169_v19  ;;  %v1202_v18 = vld [vmem:[%s3014_s15 + $0x1ae0] sm:$0xff]  ;;  %v1217_v19 = vld [vmem:[%s3014_s15 + $0x1b58] sm:$0xff] }
 0x1bc   : > { %2419 = vmatpush.msra.mxu0 %v1119_v20  ;;  %2438 = vmatpush.msra.mxu1 %v1136_v21  ;;  %v1234_v20 = vld [vmem:[%s3014_s15 + $0x1be0] sm:$0xff]  ;;  %v1184_v21 = vld [vmem:[%s3014_s15 + $0x1a50] sm:$0xff] }
 0x1bd   : > { %2459 = vmatpush.msra.mxu2 %v1151_v22  ;;  %2478 = vmatpush.msra.mxu3 %v1168_v23  ;;  %v1201_v22 = vld [vmem:[%s3014_s15 + $0x1ad8] sm:$0xff]  ;;  %v1216_v23 = vld [vmem:[%s3014_s15 + $0x1b50] sm:$0xff] }
 0x1be   : > { %2420 = vmatpush.msra.mxu0 %v1118_v24  ;;  %2439 = vmatpush.msra.mxu1 %v1135_v25  ;;  %v1233_v24 = vld [vmem:[%s3014_s15 + $0x1bd8] sm:$0xff]  ;;  %v1183_v25 = vld [vmem:[%s3014_s15 + $0x1a48] sm:$0xff] }
 0x1bf   : > { %2460 = vmatpush.msra.mxu2 %v1150_v29  ;;  %2479 = vmatpush.msra.mxu3 %v1167_v26  ;;  %v1200_v29 = vld [vmem:[%s3014_s15 + $0x1ad0] sm:$0xff]  ;;  %v1215_v26 = vld [vmem:[%s3014_s15 + $0x1b48] sm:$0xff] }
 0x1c0   : > { %2421 = vmatpush.msra.mxu0 %v1117_v27  ;;  %2440 = vmatpush.msra.mxu1 %v1134_v30  ;;  %v1232_v27 = vld [vmem:[%s3014_s15 + $0x1bd0] sm:$0xff]  ;;  %v1182_v30 = vld [vmem:[%s3014_s15 + $0x1a40] sm:$0xff] }
 0x1c1   : > { %2461 = vmatpush.msra.mxu2 %v1149_v32  ;;  %2480 = vmatpush.msra.mxu3 %v1166_v28  ;;  %v1199_v32 = vld [vmem:[%s3014_s15 + $0x1ac8] sm:$0xff]  ;;  %v1214_v28 = vld [vmem:[%s3014_s15 + $0x1b40] sm:$0xff] }
 0x1c2   : > { %2422 = vmatpush.msra.mxu0 %v1116_v34  ;;  %2441 = vmatpush.msra.mxu1 %v1133_v35  ;;  %v1231_v34 = vld [vmem:[%s3014_s15 + $0x1bc8] sm:$0xff]  ;;  %v1181_v35 = vld [vmem:[%s3014_s15 + $0x1a38] sm:$0xff] }
 0x1c3   : > { %2462 = vmatpush.msra.mxu2 %v1148_v36  ;;  %2481 = vmatpush.msra.mxu3 %v1165_v33  ;;  %v1198_v36 = vld [vmem:[%s3014_s15 + $0x1ac0] sm:$0xff]  ;;  %v1213_v33 = vld [vmem:[%s3014_s15 + $0x1b38] sm:$0xff] }
 0x1c4   : > { %2423 = vmatpush.msra.mxu0 %v1115_v31  ;;  %2442 = vmatpush.msra.mxu1 %v1132_v37  ;;  %v1230_v31 = vld [vmem:[%s3014_s15 + $0x1bc0] sm:$0xff]  ;;  %v1180_v37 = vld [vmem:[%s3014_s15 + $0x1a30] sm:$0xff] }
 0x1c5   : > { %2463 = vmatpush.msra.mxu2 %v1147_v38  ;;  %2482 = vmatpush.msra.mxu3 %v1164_v39  ;;  %v1197_v38 = vld [vmem:[%s3014_s15 + $0x1ab8] sm:$0xff]  ;;  %v1212_v39 = vld [vmem:[%s3014_s15 + $0x1b30] sm:$0xff] }
 0x1c6   : > { %2424 = vmatpush.msra.mxu0 %v1114_v40  ;;  %2443 = vmatpush.msra.mxu1 %v1131_v41  ;;  %v1229_v40 = vld [vmem:[%s3014_s15 + $0x1bb8] sm:$0xff]  ;;  %v1179_v41 = vld [vmem:[%s3014_s15 + $0x1a28] sm:$0xff] }
 0x1c7   : > { %2464 = vmatpush.msra.mxu2 %v1146_v42  ;;  %2483 = vmatpush.msra.mxu3 %v1163_v43  ;;  %v1196_v42 = vld [vmem:[%s3014_s15 + $0x1ab0] sm:$0xff]  ;;  %v1211_v43 = vld [vmem:[%s3014_s15 + $0x1b28] sm:$0xff] }
 0x1c8   : > { %2425 = vmatpush.msra.mxu0 %v1113_v44  ;;  %2444 = vmatpush.msra.mxu1 %v1130_v45  ;;  %v1228_v44 = vld [vmem:[%s3014_s15 + $0x1bb0] sm:$0xff]  ;;  %v1490_v45 = vpop.f32.mrf.mxu1 }
 0x1c9   : > { %2465 = vmatpush.msra.mxu2 %v1145_v46  ;;  %2484 = vmatpush.msra.mxu3 %v1162_v47  ;;  %v1178_v46 = vld [vmem:[%s3014_s15 + $0x1a20] sm:$0xff]  ;;  %v1195_v47 = vld [vmem:[%s3014_s15 + $0x1aa8] sm:$0xff] }
 0x1ca   : > { %2426 = vmatpush.msra.mxu0 %v1112_v48  ;;  %2445 = vmatpush.msra.mxu1 %v1129_v49  ;;  %v1210_v48 = vld [vmem:[%s3014_s15 + $0x1b20] sm:$0xff]  ;;  %v1227_v49 = vld [vmem:[%s3014_s15 + $0x1ba8] sm:$0xff] }
 0x1cb   : > { %2466 = vmatpush.msra.mxu2 %v1144_v50  ;;  %2485 = vmatpush.msra.mxu3 %v1161_v51  ;;  %v1470_v50 = vpop.f32.mrf.mxu0  ;;  %v1177_v51 = vld [vmem:[%s3014_s15 + $0x1a18] sm:$0xff] }
 0x1cc   : > { %2427 = vmatpush.msra.mxu0 %v1111_v52  ;;  %2446 = vmatpush.msra.mxu1 %v1128_v53  ;;  %v1194_v52 = vld [vmem:[%s3014_s15 + $0x1aa0] sm:$0xff]  ;;  %v1491_v53 = vadd.f32 %v1490_v45, %v1470_v50  ;;  %v1264_v45 = vld [vmem:[%s3014_s15 + $0x1cd0] sm:$0xff]  ;;  %v1263_v50 = vld [vmem:[%s3014_s15 + $0x1cc8] sm:$0xff] }
 0x1cd   : > { %2467 = vmatpush.msra.mxu2 %v1143_v55  ;;  %2486 = vmatpush.msra.mxu3 %v1160_v56  ;;  %v1226_v55 = vld [vmem:[%s3014_s15 + $0x1ba0] sm:$0xff]  ;;  %v1510_v56 = vpop.f32.mrf.mxu2 }
 0x1ce   : > { %2428 = vmatpush.msra.mxu0 %v1110_v57  ;;  %2447 = vmatpush.msra.mxu1 %v1127_v58  ;;  %v1176_v57 = vld [vmem:[%s3014_s15 + $0x1a10] sm:$0xff]  ;;  %v1193_v58 = vld [vmem:[%s3014_s15 + $0x1a98] sm:$0xff] }
 0x1cf   : > { %2468 = vmatpush.msra.mxu2 %v1142_v59  ;;  %2487 = vmatpush.msra.mxu3 %v1159_v60  ;;  %v1208_v59 = vld [vmem:[%s3014_s15 + $0x1b10] sm:$0xff]  ;;  %v1225_v60 = vld [vmem:[%s3014_s15 + $0x1b98] sm:$0xff] }
 0x1d0   : > { %2429 = vmatmul.f32.vlgmr.msra.gmra.mxu0 %v1380_v61  ;;  %2469 = vmatmul.f32.vlgmr.msra.gmra.mxu2 %v1382_v62  ;;  %v1175_v61 = vld [vmem:[%s3014_s15 + $0x1a08] sm:$0xff]  ;;  %v1192_v62 = vld [vmem:[%s3014_s15 + $0x1a90] sm:$0xff] }
 0x1d1   : > { %2493 = vmatpush.msrb.mxu0 %v1189_v63  ;;  %2533 = vmatpush.msrb.mxu2 %v1221_v0  ;;  %v341_v63 = vld [vmem:[%s3009_s11 + $0x70] sm:$0xff]  ;;  %v1511_v0 = vadd.f32 %v1510_v56, %v1491_v53  ;;  %v1295_v53 = vld [vmem:[%s3014_s15 + $0x1dc8] sm:$0xff] }
 0x1d2   : > { %2448 = vmatpush.msra.mxu1 %v1126_v1  ;;  %2488 = vmatpush.msra.mxu3 %v1158_v2  ;;  %v1207_v1 = vld [vmem:[%s3014_s15 + $0x1b08] sm:$0xff]  ;;  %v1224_v2 = vld [vmem:[%s3014_s15 + $0x1b90] sm:$0xff]  ;;  %1388 = vst [vmem:[#allocation1] ss:$4 sm:$0xff] %v341_v63  ;;  %v1293_v63 = vld [vmem:[%s3014_s15 + $0x1db8] sm:$0xff] }
 0x1d3   : > { %2449 = vmatmul.f32.vlgmr.msra.gmra.mxu1 %v1381_v3  ;;  %2489 = vmatmul.f32.vlgmr.msra.gmra.mxu3 %v1383_v4  ;;  %v1530_v3 = vpop.f32.mrf.mxu3  ;;  %v1174_v4 = vld [vmem:[%s3014_s15 + $0x1a00] sm:$0xff] }
 0x1d4   : > { %2494 = vmatpush.msrb.mxu0 %v1188_v5  ;;  %2513 = vmatpush.msrb.mxu1 %v1205_v6  ;;  %v1191_v5 = vld [vmem:[%s3014_s15 + $0x1a88] sm:$0xff]  ;;  %v1206_v6 = vld [vmem:[%s3014_s15 + $0x1b00] sm:$0xff] }
 0x1d5   : > { %2534 = vmatpush.msrb.mxu2 %v1220_v7  ;;  %2553 = vmatpush.msrb.mxu3 %v1237_v8  ;;  %v1223_v7 = vld [vmem:[%s3014_s15 + $0x1b88] sm:$0xff]  ;;  %v1384_v8 = vld.sshfl [vmem:[#allocation1 + $0x20] sm:$0xff pattern:$0x73625140] }
 0x1d6   : > { %2495 = vmatpush.msrb.mxu0 %v1187_v9  ;;  %2514 = vmatpush.msrb.mxu1 %v1204_v10  ;;  %v1386_v9 = vld.sshfl [vmem:[#allocation1 + $0x30] sm:$0xff pattern:$0x73625140]  ;;  %v1531_v10 = vadd.f32 %v1530_v3, %v1511_v0 }
 0x1d7   : > { %2535 = vmatpush.msrb.mxu2 %v1219_v11  ;;  %2554 = vmatpush.msrb.mxu3 %v1236_v12  ;;  %v1253_v11 = vld [vmem:[%s3014_s15 + $0x1c78] sm:$0xff] }
 0x1d8   : > { %2496 = vmatpush.msrb.mxu0 %v1186_v13  ;;  %2515 = vmatpush.msrb.mxu1 %v1203_v14  ;;  %v1285_v12 = vld [vmem:[%s3014_s15 + $0x1d78] sm:$0xff]  ;;  %v1550_v13 = vpop.f32.mrf.mxu0  ;;  %v1190_v14 = vld [vmem:[%s3014_s15 + $0x1a80] sm:$0xff] }
 0x1d9   : > { %2536 = vmatpush.msrb.mxu2 %v1218_v15  ;;  %2555 = vmatpush.msrb.mxu3 %v1235_v16  ;;  %v1222_v15 = vld [vmem:[%s3014_s15 + $0x1b80] sm:$0xff]  ;;  %v1385_v16 = vld.sshfl [vmem:[#allocation1 + $0x28] sm:$0xff pattern:$0x73625140] }
 0x1da   : > { %2497 = vmatpush.msrb.mxu0 %v1185_v17  ;;  %2516 = vmatpush.msrb.mxu1 %v1202_v18  ;;  %v1387_v17 = vld.sshfl [vmem:[#allocation1 + $0x38] sm:$0xff pattern:$0x73625140]  ;;  %v1252_v18 = vld [vmem:[%s3014_s15 + $0x1c70] sm:$0xff] }
 0x1db   : > { %2537 = vmatpush.msrb.mxu2 %v1217_v19  ;;  %2556 = vmatpush.msrb.mxu3 %v1234_v20  ;;  %v1269_v19 = vld [vmem:[%s3014_s15 + $0x1cf8] sm:$0xff]  ;;  %v1551_v20 = vadd.f32 %v1550_v13, %v1531_v10  ;;  %v1291_v10 = vld [vmem:[%s3014_s15 + $0x1da8] sm:$0xff]  ;;  %v1258_v13 = vld [vmem:[%s3014_s15 + $0x1ca0] sm:$0xff] }
 0x1dc   : > { %2498 = vmatpush.msrb.mxu0 %v1184_v21  ;;  %2517 = vmatpush.msrb.mxu1 %v1201_v22  ;;  %v1284_v21 = vld [vmem:[%s3014_s15 + $0x1d70] sm:$0xff]  ;;  %v1301_v22 = vld [vmem:[%s3014_s15 + $0x1df8] sm:$0xff] }
 0x1dd   : > { %2538 = vmatpush.msrb.mxu2 %v1216_v23  ;;  %2557 = vmatpush.msrb.mxu3 %v1233_v24  ;;  %v1570_v23 = vpop.f32.mrf.mxu1  ;;  %v1251_v24 = vld [vmem:[%s3014_s15 + $0x1c68] sm:$0xff] }
 0x1de   : > { %2499 = vmatpush.msrb.mxu0 %v1183_v25  ;;  %2518 = vmatpush.msrb.mxu1 %v1200_v29  ;;  %v1268_v25 = vld [vmem:[%s3014_s15 + $0x1cf0] sm:$0xff]  ;;  %v1283_v29 = vld [vmem:[%s3014_s15 + $0x1d68] sm:$0xff] }
 0x1df   : > { %2539 = vmatpush.msrb.mxu2 %v1215_v26  ;;  %2558 = vmatpush.msrb.mxu3 %v1232_v27  ;;  %v1300_v26 = vld [vmem:[%s3014_s15 + $0x1df0] sm:$0xff]  ;;  %v1250_v27 = vld [vmem:[%s3014_s15 + $0x1c60] sm:$0xff] }
 0x1e0   : > { %2500 = vmatpush.msrb.mxu0 %v1182_v30  ;;  %2519 = vmatpush.msrb.mxu1 %v1199_v32  ;;  %v1267_v30 = vld [vmem:[%s3014_s15 + $0x1ce8] sm:$0xff]  ;;  %v1571_v32 = vadd.f32 %v1570_v23, %v1551_v20  ;;  %v1272_v20 = vld [vmem:[%s3014_s15 + $0x1d10] sm:$0xff] }
 0x1e1   : > { %2540 = vmatpush.msrb.mxu2 %v1214_v28  ;;  %2559 = vmatpush.msrb.mxu3 %v1231_v34  ;;  %v1282_v28 = vld [vmem:[%s3014_s15 + $0x1d60] sm:$0xff]  ;;  %v1299_v34 = vld [vmem:[%s3014_s15 + $0x1de8] sm:$0xff]  ;;  %v1256_v23 = vld [vmem:[%s3014_s15 + $0x1c90] sm:$0xff] }
 0x1e2   : > { %2501 = vmatpush.msrb.mxu0 %v1181_v35  ;;  %2520 = vmatpush.msrb.mxu1 %v1198_v36  ;;  %v1590_v35 = vpop.f32.mrf.mxu2  ;;  %v1249_v36 = vld [vmem:[%s3014_s15 + $0x1c58] sm:$0xff] }
 0x1e3   : > { %2541 = vmatpush.msrb.mxu2 %v1213_v33  ;;  %2560 = vmatpush.msrb.mxu3 %v1230_v31  ;;  %v1266_v33 = vld [vmem:[%s3014_s15 + $0x1ce0] sm:$0xff]  ;;  %v1281_v31 = vld [vmem:[%s3014_s15 + $0x1d58] sm:$0xff] }
 0x1e4   : > { %2502 = vmatpush.msrb.mxu0 %v1180_v37  ;;  %2521 = vmatpush.msrb.mxu1 %v1197_v38  ;;  %v1298_v37 = vld [vmem:[%s3014_s15 + $0x1de0] sm:$0xff]  ;;  %v1248_v38 = vld [vmem:[%s3014_s15 + $0x1c50] sm:$0xff] }
 0x1e5   : > { %2542 = vmatpush.msrb.mxu2 %v1212_v39  ;;  %2561 = vmatpush.msrb.mxu3 %v1229_v40  ;;  %v1265_v39 = vld [vmem:[%s3014_s15 + $0x1cd8] sm:$0xff]  ;;  %v1591_v40 = vadd.f32 %v1590_v35, %v1571_v32  ;;  %v1270_v32 = vld [vmem:[%s3014_s15 + $0x1d00] sm:$0xff]  ;;  %v1389_v35 = vld.sshfl [vmem:[#allocation1] sm:$0xff pattern:$0x73625140] }
 0x1e6   : > { %2503 = vmatpush.msrb.mxu0 %v1179_v41  ;;  %2522 = vmatpush.msrb.mxu1 %v1196_v42  ;;  %v1280_v41 = vld [vmem:[%s3014_s15 + $0x1d50] sm:$0xff]  ;;  %v1297_v42 = vld [vmem:[%s3014_s15 + $0x1dd8] sm:$0xff] }
 0x1e7   : > { %2543 = vmatpush.msrb.mxu2 %v1211_v43  ;;  %2562 = vmatpush.msrb.mxu3 %v1228_v44  ;;  %v1610_v43 = vpop.f32.mrf.mxu3  ;;  %v1247_v44 = vld [vmem:[%s3014_s15 + $0x1c48] sm:$0xff] }
 0x1e8   : > { %2504 = vmatpush.msrb.mxu0 %v1178_v46  ;;  %2523 = vmatpush.msrb.mxu1 %v1195_v47  ;;  %v1279_v46 = vld [vmem:[%s3014_s15 + $0x1d48] sm:$0xff]  ;;  %v1296_v47 = vld [vmem:[%s3014_s15 + $0x1dd0] sm:$0xff] }
 0x1e9   : > { %2544 = vmatpush.msrb.mxu2 %v1210_v48  ;;  %2563 = vmatpush.msrb.mxu3 %v1227_v49  ;;  %v1630_v48 = vpop.f32.mrf.mxu0  ;;  %v1246_v49 = vld [vmem:[%s3014_s15 + $0x1c40] sm:$0xff] }
 0x1ea   : > { %2505 = vmatpush.msrb.mxu0 %v1177_v51  ;;  %2524 = vmatpush.msrb.mxu1 %v1194_v52  ;;  %v1611_v51 = vadd.f32 %v1610_v43, %v1591_v40  ;;  %v1278_v52 = vld [vmem:[%s3014_s15 + $0x1d40] sm:$0xff]  ;;  %v1670_v0 = vpop.f32.mrf.mxu2 }
 0x1eb   : > { %2545 = vmatpush.msrb.mxu2 %v1209_v54  ;;  %2564 = vmatpush.msrb.mxu3 %v1226_v55  ;;  %v1245_v54 = vld [vmem:[%s3014_s15 + $0x1c38] sm:$0xff]  ;;  %v1262_v55 = vld [vmem:[%s3014_s15 + $0x1cc0] sm:$0xff] }
 0x1ec   : > { %2506 = vmatpush.msrb.mxu0 %v1176_v57  ;;  %2525 = vmatpush.msrb.mxu1 %v1193_v58  ;;  %v1631_v56 = vadd.f32 %v1630_v48, %v1611_v51  ;;  %v1277_v57 = vld [vmem:[%s3014_s15 + $0x1d38] sm:$0xff]  ;;  %v1294_v58 = vld [vmem:[%s3014_s15 + $0x1dc0] sm:$0xff] }
 0x1ed   : > { %2546 = vmatpush.msrb.mxu2 %v1208_v59  ;;  %2565 = vmatpush.msrb.mxu3 %v1225_v60  ;;  %v1650_v59 = vpop.f32.mrf.mxu1  ;;  %v1244_v60 = vld [vmem:[%s3014_s15 + $0x1c30] sm:$0xff] }
 0x1ee   : > { %2507 = vmatpush.msrb.mxu0 %v1175_v61  ;;  %2526 = vmatpush.msrb.mxu1 %v1192_v62  ;;  %v1261_v61 = vld [vmem:[%s3014_s15 + $0x1cb8] sm:$0xff]  ;;  %v1276_v62 = vld [vmem:[%s3014_s15 + $0x1d30] sm:$0xff]  ;;  %v1651_v3 = vadd.f32 %v1650_v59, %v1631_v56 }
 0x1ef   : > { %2547 = vmatpush.msrb.mxu2 %v1207_v1  ;;  %2566 = vmatpush.msrb.mxu3 %v1224_v2  ;;  %v1243_v1 = vld [vmem:[%s3014_s15 + $0x1c28] sm:$0xff]  ;;  %v1260_v2 = vld [vmem:[%s3014_s15 + $0x1cb0] sm:$0xff] }
 0x1f0   : > { %2508 = vmatpush.msrb.mxu0 %v1174_v4  ;;  %2527 = vmatpush.msrb.mxu1 %v1191_v5  ;;  %v1275_v4 = vld [vmem:[%s3014_s15 + $0x1d28] sm:$0xff]  ;;  %v1292_v5 = vld [vmem:[%s3014_s15 + $0x1db0] sm:$0xff] }
 0x1f1   : > { %2548 = vmatpush.msrb.mxu2 %v1206_v6  ;;  %2567 = vmatpush.msrb.mxu3 %v1223_v7  ;;  %v1242_v6 = vld [vmem:[%s3014_s15 + $0x1c20] sm:$0xff]  ;;  %v1259_v7 = vld [vmem:[%s3014_s15 + $0x1ca8] sm:$0xff] }
 0x1f2   : > { %2509 = vmatmul.f32.vlgmr.msrb.gmra.mxu0 %v1384_v8  ;;  %2549 = vmatmul.f32.vlgmr.msrb.gmra.mxu2 %v1386_v9  ;;  %v1671_v8 = vadd.f32 %v1670_v0, %v1651_v3  ;;  %v1274_v9 = vld [vmem:[%s3014_s15 + $0x1d20] sm:$0xff] }
 0x1f3   : > { %2573 = vmatpush.msra.mxu0 %v1253_v11  ;;  %2613 = vmatpush.msra.mxu2 %v1285_v12  ;;  %v1690_v11 = vpop.f32.mrf.mxu3  ;;  %v1241_v12 = vld [vmem:[%s3014_s15 + $0x1c18] sm:$0xff] }
 0x1f4   : > { %2528 = vmatpush.msrb.mxu1 %v1190_v14  ;;  %2568 = vmatpush.msrb.mxu3 %v1222_v15  ;;  %v1273_v14 = vld [vmem:[%s3014_s15 + $0x1d18] sm:$0xff]  ;;  %v1290_v15 = vld [vmem:[%s3014_s15 + $0x1da0] sm:$0xff] }
 0x1f5   : > { %2529 = vmatmul.f32.vlgmr.msrb.gmra.mxu1 %v1385_v16  ;;  %2569 = vmatmul.f32.vlgmr.msrb.gmra.mxu3 %v1387_v17  ;;  %v1710_v16 = vpop.f32.mrf.mxu0  ;;  %v1240_v17 = vld [vmem:[%s3014_s15 + $0x1c10] sm:$0xff] }
 0x1f6   : > { %2574 = vmatpush.msra.mxu0 %v1252_v18  ;;  %2593 = vmatpush.msra.mxu1 %v1269_v19  ;;  %v1257_v18 = vld [vmem:[%s3014_s15 + $0x1c98] sm:$0xff]  ;;  %v1691_v19 = vadd.f32 %v1690_v11, %v1671_v8 }
 0x1f7   : > { %2614 = vmatpush.msra.mxu2 %v1284_v21  ;;  %2633 = vmatpush.msra.mxu3 %v1301_v22  ;;  %v1289_v21 = vld [vmem:[%s3014_s15 + $0x1d98] sm:$0xff]  ;;  %v1239_v22 = vld [vmem:[%s3014_s15 + $0x1c08] sm:$0xff] }
 0x1f8   : > { %2575 = vmatpush.msra.mxu0 %v1251_v24  ;;  %2594 = vmatpush.msra.mxu1 %v1268_v25  ;;  %v1711_v24 = vadd.f32 %v1710_v16, %v1691_v19  ;;  %v1271_v25 = vld [vmem:[%s3014_s15 + $0x1d08] sm:$0xff] }
 0x1f9   : > { %2615 = vmatpush.msra.mxu2 %v1283_v29  ;;  %2634 = vmatpush.msra.mxu3 %v1300_v26  ;;  %v1288_v29 = vld [vmem:[%s3014_s15 + $0x1d90] sm:$0xff]  ;;  %v1730_v26 = vpop.f32.mrf.mxu1 }
 0x1fa   : > { %2576 = vmatpush.msra.mxu0 %v1250_v27  ;;  %2595 = vmatpush.msra.mxu1 %v1267_v30  ;;  %v1238_v27 = vld [vmem:[%s3014_s15 + $0x1c00] sm:$0xff]  ;;  %v1255_v30 = vld [vmem:[%s3014_s15 + $0x1c88] sm:$0xff] }
 0x1fb   : > { %2616 = vmatpush.msra.mxu2 %v1282_v28  ;;  %2635 = vmatpush.msra.mxu3 %v1299_v34  ;;  %v1287_v28 = vld [vmem:[%s3014_s15 + $0x1d88] sm:$0xff]  ;;  %v1750_v34 = vpop.f32.mrf.mxu2 }
 0x1fc   : > { %2577 = vmatpush.msra.mxu0 %v1249_v36  ;;  %2596 = vmatpush.msra.mxu1 %v1266_v33  ;;  %v1391_v36 = vld.sshfl [vmem:[#allocation1 + $0x10] sm:$0xff pattern:$0x73625140]  ;;  %v1731_v33 = vadd.f32 %v1730_v26, %v1711_v24 }
 0x1fd   : > { %2617 = vmatpush.msra.mxu2 %v1281_v31  ;;  %2636 = vmatpush.msra.mxu3 %v1298_v37  ;;  %v1254_v31 = vld [vmem:[%s3014_s15 + $0x1c80] sm:$0xff] }
 0x1fe   : > { %2578 = vmatpush.msra.mxu0 %v1248_v38  ;;  %2597 = vmatpush.msra.mxu1 %v1265_v39  ;;  %v1286_v37 = vld [vmem:[%s3014_s15 + $0x1d80] sm:$0xff]  ;;  %v1390_v38 = vld.sshfl [vmem:[#allocation1 + $0x8] sm:$0xff pattern:$0x73625140]  ;;  %v1751_v40 = vadd.f32 %v1750_v34, %v1731_v33 }
 0x1ff   : > { %2618 = vmatpush.msra.mxu2 %v1280_v41  ;;  %2637 = vmatpush.msra.mxu3 %v1297_v42  ;;  %v1392_v39 = vld.sshfl [vmem:[#allocation1 + $0x18] sm:$0xff pattern:$0x73625140]  ;;  %v1770_v41 = vpop.f32.mrf.mxu3  ;;  %v1790_v42 = vpop.f32.mrf.mxu0 }
 0x200   : > { %2579 = vmatpush.msra.mxu0 %v1247_v44  ;;  %2598 = vmatpush.msra.mxu1 %v1264_v45  ;;  %v1771_v43 = vadd.f32 %v1770_v41, %v1751_v40 }
 0x201   : > { %2619 = vmatpush.msra.mxu2 %v1279_v46  ;;  %2638 = vmatpush.msra.mxu3 %v1296_v47  ;;  %v1810_v45 = vpop.f32.mrf.mxu1 }
 0x202   : > { %2580 = vmatpush.msra.mxu0 %v1246_v49  ;;  %2599 = vmatpush.msra.mxu1 %v1263_v50  ;;  %v1791_v44 = vadd.f32 %v1790_v42, %v1771_v43 }
 0x203   : > { %2620 = vmatpush.msra.mxu2 %v1278_v52  ;;  %2639 = vmatpush.msra.mxu3 %v1295_v53  ;;  %v1830_v46 = vpop.f32.mrf.mxu2 }
 0x204   : > { %2581 = vmatpush.msra.mxu0 %v1245_v54  ;;  %2600 = vmatpush.msra.mxu1 %v1262_v55  ;;  %v1811_v47 = vadd.f32 %v1810_v45, %v1791_v44 }
 0x205   : > { %2621 = vmatpush.msra.mxu2 %v1277_v57  ;;  %2640 = vmatpush.msra.mxu3 %v1294_v58 }
 0x206   : > { %2582 = vmatpush.msra.mxu0 %v1244_v60  ;;  %2601 = vmatpush.msra.mxu1 %v1261_v61  ;;  %v1831_v48 = vadd.f32 %v1830_v46, %v1811_v47 }
 0x207   : > { %2622 = vmatpush.msra.mxu2 %v1276_v62  ;;  %2641 = vmatpush.msra.mxu3 %v1293_v63  ;;  %v1850_v49 = vpop.f32.mrf.mxu3  ;;  %v1870_v50 = vpop.f32.mrf.mxu0 }
 0x208   : > { %2583 = vmatpush.msra.mxu0 %v1243_v1  ;;  %2602 = vmatpush.msra.mxu1 %v1260_v2  ;;  %v1851_v51 = vadd.f32 %v1850_v49, %v1831_v48 }
 0x209   : > { %2623 = vmatpush.msra.mxu2 %v1275_v4  ;;  %2642 = vmatpush.msra.mxu3 %v1292_v5  ;;  %v1890_v53 = vpop.f32.mrf.mxu1 }
 0x20a   : > { %2584 = vmatpush.msra.mxu0 %v1242_v6  ;;  %2603 = vmatpush.msra.mxu1 %v1259_v7  ;;  %v1871_v52 = vadd.f32 %v1870_v50, %v1851_v51 }
 0x20b   : > { %2624 = vmatpush.msra.mxu2 %v1274_v9  ;;  %2643 = vmatpush.msra.mxu3 %v1291_v10  ;;  %v1910_v54 = vpop.f32.mrf.mxu2 }
 0x20c   : > { %2585 = vmatpush.msra.mxu0 %v1241_v12  ;;  %2604 = vmatpush.msra.mxu1 %v1258_v13  ;;  %v1891_v55 = vadd.f32 %v1890_v53, %v1871_v52 }
 0x20d   : > { %2625 = vmatpush.msra.mxu2 %v1273_v14  ;;  %2644 = vmatpush.msra.mxu3 %v1290_v15 }
 0x20e   : > { %2586 = vmatpush.msra.mxu0 %v1240_v17  ;;  %2605 = vmatpush.msra.mxu1 %v1257_v18  ;;  %v1911_v56 = vadd.f32 %v1910_v54, %v1891_v55 }
 0x20f   : > { %2626 = vmatpush.msra.mxu2 %v1272_v20  ;;  %2645 = vmatpush.msra.mxu3 %v1289_v21  ;;  %v1930_v57 = vpop.f32.mrf.mxu3  ;;  %v1950_v58 = vpop.f32.mrf.mxu0 }
 0x210   : > { %2587 = vmatpush.msra.mxu0 %v1239_v22  ;;  %2606 = vmatpush.msra.mxu1 %v1256_v23  ;;  %v1931_v59 = vadd.f32 %v1930_v57, %v1911_v56 }
 0x211   : > { %2627 = vmatpush.msra.mxu2 %v1271_v25  ;;  %2646 = vmatpush.msra.mxu3 %v1288_v29  ;;  %v1970_v61 = vpop.f32.mrf.mxu1 }
 0x212   : > { %2588 = vmatpush.msra.mxu0 %v1238_v27  ;;  %2607 = vmatpush.msra.mxu1 %v1255_v30  ;;  %v1951_v60 = vadd.f32 %v1950_v58, %v1931_v59 }
 0x213   : > { %2628 = vmatpush.msra.mxu2 %v1270_v32  ;;  %2647 = vmatpush.msra.mxu3 %v1287_v28  ;;  %v1990_v62 = vpop.f32.mrf.mxu2 }
 0x214   : > { %2589 = vmatmul.f32.vlgmr.msra.gmra.mxu0 %v1389_v35  ;;  %2629 = vmatmul.f32.vlgmr.msra.gmra.mxu2 %v1391_v36  ;;  %v1971_v63 = vadd.f32 %v1970_v61, %v1951_v60 }
 0x215   : > { %2608 = vmatpush.msra.mxu1 %v1254_v31  ;;  %2648 = vmatpush.msra.mxu3 %v1286_v37 }
 0x216   : > { %2609 = vmatmul.f32.vlgmr.msra.gmra.mxu1 %v1390_v38  ;;  %2649 = vmatmul.f32.vlgmr.msra.gmra.mxu3 %v1392_v39  ;;  %v1991_v0 = vadd.f32 %v1990_v62, %v1971_v63 }
 0x217   : > { %v2010_v1 = vpop.f32.mrf.mxu3  ;;  %v2030_v2 = vpop.f32.mrf.mxu0 }
 0x218   : > { %v2011_v3 = vadd.f32 %v2010_v1, %v1991_v0  ;;  %v326_v1 = vld [vmem:[#allocation2] sm:$0x3] }
 0x219   : > { %v2050_v5 = vpop.f32.mrf.mxu1 }
 0x21a   : > { %v2031_v4 = vadd.f32 %v2030_v2, %v2011_v3 }
 0x21b   : > { %v2070_v6 = vpop.f32.mrf.mxu2 }
 0x21c   : > { %v2051_v7 = vadd.f32 %v2050_v5, %v2031_v4 }
 0x21e   : > { %v2071_v8 = vadd.f32 %v2070_v6, %v2051_v7 }
 0x21f   : > { %v2090_v9 = vpop.f32.mrf.mxu3  ;;  %v2110_v10 = vpop.f32.mrf.mxu0 }
 0x220   : > { %v2091_v11 = vadd.f32 %v2090_v9, %v2071_v8 }
 0x221   : > { %v2130_v13 = vpop.f32.mrf.mxu1 }
 0x222   : > { %v2111_v12 = vadd.f32 %v2110_v10, %v2091_v11 }
 0x223   : > { %v2150_v14 = vpop.f32.mrf.mxu2 }
 0x224   : > { %v2131_v15 = vadd.f32 %v2130_v13, %v2111_v12 }
 0x226   : > { %v2151_v16 = vadd.f32 %v2150_v14, %v2131_v15 }
 0x227   : > { %v2170_v17 = vpop.f32.mrf.mxu3  ;;  %v2190_v18 = vpop.f32.mrf.mxu0 }
 0x228   : > { %v2171_v19 = vadd.f32 %v2170_v17, %v2151_v16 }
 0x229   : > { %v2210_v21 = vpop.f32.mrf.mxu1 }
 0x22a   : > { %v2191_v20 = vadd.f32 %v2190_v18, %v2171_v19 }
 0x22b   : > { %v2230_v22 = vpop.f32.mrf.mxu2 }
 0x22c   : > { %v2211_v23 = vadd.f32 %v2210_v21, %v2191_v20 }
 0x22e   : > { %v2231_v24 = vadd.f32 %v2230_v22, %v2211_v23 }
 0x22f   : > { %v2250_v25 = vpop.f32.mrf.mxu3  ;;  %v2270_v29 = vpop.f32.mrf.mxu0 }
 0x230   : > { %v2251_v26 = vadd.f32 %v2250_v25, %v2231_v24 }
 0x231   : > { %v2290_v30 = vpop.f32.mrf.mxu1 }
 0x232   : > { %v2271_v27 = vadd.f32 %v2270_v29, %v2251_v26 }
 0x233   : > { %v2310_v32 = vpop.f32.mrf.mxu2 }
 0x234   : > { %v2291_v28 = vadd.f32 %v2290_v30, %v2271_v27 }
 0x236   : > { %v2311_v34 = vadd.f32 %v2310_v32, %v2291_v28 }
 0x237   : > { %v2330_v35 = vpop.f32.mrf.mxu3  ;;  %v2350_v36 = vpop.f32.mrf.mxu0 }
 0x238   : > { %v2331_v33 = vadd.f32 %v2330_v35, %v2311_v34 }
 0x239   : > { %v2370_v37 = vpop.f32.mrf.mxu1 }
 0x23a   : > { %v2351_v31 = vadd.f32 %v2350_v36, %v2331_v33 }
 0x23b   : > { %v2390_v38 = vpop.f32.mrf.mxu2 }
 0x23c   : > { %v2371_v39 = vadd.f32 %v2370_v37, %v2351_v31 }
 0x23e   : > { %v2391_v40 = vadd.f32 %v2390_v38, %v2371_v39 }
 0x23f   : > { %v2410_v41 = vpop.f32.mrf.mxu3 }
 0x240   : > { %v2411_v43 = vadd.f32 %v2410_v41, %v2391_v40 }
 0x24d   : > { %v2430_v42 = vpop.f32.mrf.mxu0 }
 0x24e   : > { %v2431_v44 = vadd.f32 %v2430_v42, %v2411_v43 }
 0x250   : > { %v2450_v45 = vpop.f32.mrf.mxu1 }
 0x251   : > { %v2451_v47 = vadd.f32 %v2450_v45, %v2431_v44 }
 0x253   : > { %v2470_v46 = vpop.f32.mrf.mxu2 }
 0x254   : > { %v2471_v48 = vadd.f32 %v2470_v46, %v2451_v47 }
 0x256   : > { %v2490_v49 = vpop.f32.mrf.mxu3 }
 0x257   : > { %v2491_v51 = vadd.f32 %v2490_v49, %v2471_v48 }
 0x26f   : > { %v2510_v50 = vpop.f32.mrf.mxu0 }
 0x270   : > { %v2511_v52 = vadd.f32 %v2510_v50, %v2491_v51 }
 0x272   : > { %v2530_v53 = vpop.f32.mrf.mxu1 }
 0x273   : > { %v2531_v55 = vadd.f32 %v2530_v53, %v2511_v52 }
 0x275   : > { %v2550_v54 = vpop.f32.mrf.mxu2 }
 0x276   : > { %v2551_v56 = vadd.f32 %v2550_v54, %v2531_v55 }
 0x278   : > { %v2570_v57 = vpop.f32.mrf.mxu3 }
 0x279   : > { %v2571_v58 = vadd.f32 %v2570_v57, %v2551_v56 }
 0x291   : > { %v2590_v59 = vpop.f32.mrf.mxu0 }
 0x292   : > { %v2591_v60 = vadd.f32 %v2590_v59, %v2571_v58 }
 0x293   : > { %v2610_v61 = vpop.f32.mrf.mxu1 }
 0x294   : > { %v2611_v62 = vadd.f32 %v2610_v61, %v2591_v60 }
 0x297   : > { %v2630_v63 = vpop.f32.mrf.mxu2 }
 0x298   : > { %v2631_v0 = vadd.f32 %v2630_v63, %v2611_v62 }
 0x299   : > { %v2650_v2 = vpop.f32.mrf.mxu3 }
 0x29a   : > { %v2651_v3 = vadd.f32 %v2650_v2, %v2631_v0  ;;  %2659 = sbr.rel (%p2842_p7) target bundleno = 960 (0x3c0), region = 56 }
 0x29c   : > { %v2653_v4 = vadd.f32 %v2651_v3, %v326_v1 }
 0x29e   : > { %2655 = vst.msk [vmem:[#allocation2] sm:$0x3] %vm2654_vm1, %v2653_v4 }
 0x29f   : > { %v2681_v5 = vld [vmem:[%s4142_s3 + $0x70] sm:$0xff]  ;;  %v2680_v6 = vld [vmem:[%s4142_s3 + $0x68] sm:$0xff]  ;;  %v2679_v7 = vld [vmem:[%s4142_s3 + $0x60] sm:$0xff]  ;;  %vm2730_vm2 = vcmask 1043456   ;;  %vm2686_vm3 = vcmask 982016   ;;  %vm2726_vm4 = vcmask 687104  }
 0x2a0   : > { %2691 = vmatpush.msra.mxu0 %v2681_v5  ;;  %v2678_v8 = vld [vmem:[%s4142_s3 + $0x58] sm:$0xff]  ;;  %v2677_v9 = vld [vmem:[%s4142_s3 + $0x50] sm:$0xff]  ;;  %v2720_v11 = vld [vmem:[%s4144_s5 + $0x48] sm:$0xff]  ;;  %vm2754_vm5 = vcmask 41984  }
 0x2a1   : > { %v2721_v10 = vld [vmem:[%s4144_s5 + $0x50] sm:$0xf]  ;;  %v2676_v12 = vld [vmem:[%s4142_s3 + $0x48] sm:$0xff]  ;;  %v2719_v13 = vld [vmem:[%s4144_s5 + $0x40] sm:$0xff] }
 0x2a2   : > { %2692 = vmatpush.msra.mxu0 %v2680_v6  ;;  %2844 = vmatpush.msk.msra.mxu1 %vm2730_vm2, %v2721_v10  ;;  %v2675_v14 = vld [vmem:[%s4142_s3 + $0x40] sm:$0xff]  ;;  %v2718_v15 = vld [vmem:[%s4144_s5 + $0x38] sm:$0xff]  ;;  %v2717_v17 = vld [vmem:[%s4144_s5 + $0x30] sm:$0xff] }
 0x2a3   : > { %v2674_v16 = vld [vmem:[%s4142_s3 + $0x38] sm:$0xff]  ;;  %v2673_v18 = vld [vmem:[%s4142_s3 + $0x30] sm:$0xff]  ;;  %v2716_v19 = vld [vmem:[%s4144_s5 + $0x28] sm:$0xff] }
 0x2a4   : > { %2693 = vmatpush.msra.mxu0 %v2679_v7  ;;  %2740 = vmatpush.msra.mxu1 %v2720_v11  ;;  %v2672_v20 = vld [vmem:[%s4142_s3 + $0x28] sm:$0xff]  ;;  %v2715_v21 = vld [vmem:[%s4144_s5 + $0x20] sm:$0xff]  ;;  %v2714_v24 = vld [vmem:[%s4144_s5 + $0x18] sm:$0xff] }
 0x2a5   : > { %v2671_v22 = vld [vmem:[%s4142_s3 + $0x20] sm:$0xff]  ;;  %v2660_v25 = vld [vmem:[#allocation2] sm:$0x3]  ;;  %v2669_v26 = vld [vmem:[%s4142_s3 + $0x10] sm:$0xff] }
 0x2a6   : > { %2694 = vmatpush.msra.mxu0 %v2678_v8  ;;  %2741 = vmatpush.msra.mxu1 %v2719_v13  ;;  %v2882_v23 = vld [vmem:[%s4141_s2] ss:$0 sm:$0xff]  ;;  %v2670_v29 = vld [vmem:[%s4142_s3 + $0x18] sm:$0xff]  ;;  %v2668_v30 = vld [vmem:[%s4142_s3 + $0x8] sm:$0xff] }
 0x2a7   : > { %v2665_v27 = vadd.f32 %v2882_v23, %v2660_v25  ;;  %v2667_v32 = vld [vmem:[%s4142_s3] sm:$0xff]  ;;  %v2713_v34 = vld [vmem:[%s4144_s5 + $0x10] sm:$0xff]  ;;  %v2712_v35 = vld [vmem:[%s4144_s5 + $0x8] sm:$0xff] }
 0x2a8   : > { %2695 = vmatpush.msra.mxu0 %v2677_v9  ;;  %2742 = vmatpush.msra.mxu1 %v2718_v15  ;;  %v2711_v36 = vld [vmem:[%s4144_s5] sm:$0xff] }
 0x2a9   : > { %v2666_v28 = vmax.f32 %v2665_v27, 0.0  ;;  %v2883_v33 = vld [vmem:[%s4143_s4] ss:$0 sm:$0xff] }
 0x2aa   : > { %2696 = vmatpush.msra.mxu0 %v2676_v12  ;;  %2743 = vmatpush.msra.mxu1 %v2717_v17  ;;  %v2884_v39 = vld [vmem:[%s4145_s6] ss:$0 sm:$0xff] }
 0x2ac   : > { %2697 = vmatpush.msra.mxu0 %v2675_v14  ;;  %2744 = vmatpush.msra.mxu1 %v2716_v19 }
 0x2ae   : > { %2698 = vmatpush.msra.mxu0 %v2674_v16  ;;  %2745 = vmatpush.msra.mxu1 %v2715_v21 }
 0x2b0   : > { %2699 = vmatpush.msra.mxu0 %v2673_v18  ;;  %2746 = vmatpush.msra.mxu1 %v2714_v24 }
 0x2b2   : > { %2700 = vmatpush.msra.mxu0 %v2672_v20  ;;  %2747 = vmatpush.msra.mxu1 %v2713_v34 }
 0x2b4   : > { %2701 = vmatpush.msra.mxu0 %v2671_v22  ;;  %2748 = vmatpush.msra.mxu1 %v2712_v35 }
 0x2b6   : > { %2702 = vmatpush.msra.mxu0 %v2670_v29  ;;  %2749 = vmatpush.msra.mxu1 %v2711_v36 }
 0x2b8   : > { %2703 = vmatpush.msra.mxu0 %v2669_v26 }
 0x2ba   : > { %2704 = vmatpush.msra.mxu0 %v2668_v30 }
 0x2bc   : > { %2705 = vmatpush.msra.mxu0 %v2667_v32 }
 0x2bd   : > { %2843 = vmatmul.msk.f32.vlgmr.msra.gmra.mxu0 %vm2686_vm3, %v2666_v28 }
 0x33a   : > { %v2707_v31 = vpop.f32.mrf.mxu0 }
 0x33b   : > { %v2708_v37 = vadd.f32 %v2883_v33, %v2707_v31 }
 0x33d   : > { %v2710_v38 = vmax.f32 %v2708_v37, 0.0 }
 0x33f   : > { %2845 = vmatmul.msk.f32.vlgmr.msra.gmra.mxu1 %vm2726_vm4, %v2710_v38 }
 0x3bc   : > { %v2751_v40 = vpop.f32.mrf.mxu1 }
 0x3bd   : > { %v2752_v41 = vadd.f32 %v2884_v39, %v2751_v40 }
 0x3bf   : > { %2755 = vst.msk [vmem:[#allocation3] sm:$0x3] %vm2754_vm5, %v2752_v41 }
 0x3c0 PF: > { %p2854_p8 = scmp.eq.s32.totalorder %s2835_s27, 3  ;;  %s2766_s19 = sshll.u32 %s4146_s7, 4  ;;  %s2767_s19 = int_to_ptr.hbm [resolvable:$true] %s2766_s19 }
 0x3c1   : > { %s2942_s20 = smov [#allocation3]  }
 0x3c2   : > { %s2764_s21 = sshll.u32 %s2942_s20, 4  ;;  %s2765_s21 = int_to_ptr.vmem [resolvable:$true] %s2764_s21 }
 0x3c3   : > { %2851 = dma.vmem_to_hbm [thread:$0]  (%p2854_p8), %s2765_s21, 32, %s2767_s19, [#allocation4]  }
 0x3c4   : > { %2926 = dma.done.wait (%p2854_p8), [#allocation4], 32  }
 0x3c5   : > { %2928 = vsyncadd (%p2854_p8), [#allocation4], 4294967264 }
 0x3c6 PF: > { %s18_s26 = sadd.s32 1, %s2939_s26   ;;  %s4147_s24 = smov %s2935_s25 }
 0x3c7   : > { %p15_p9 = scmp.ge.s32.totalorder %s18_s26, 6   ;;  %s4148_s25 = smov %s4150_s28 }
 0x3c9   :  { %17 = sbr.rel (!%p15_p9) target bundleno = 2 (0x2), region = 88 }
 0x3ce   :  { %2780 = vsyncpa [#allocation4], 1 }
 0x3cf   :  { %2782 = vsyncpa [#allocation4 + $0x1], 1 }

</bundles_post_ra>
